<compile_context>
chip_gen: v7x
topology: tpu7x:2x2x1
jax: 0.10.0
libtpu: 0.0.40
codegen_flags: <defaults>
</compile_context>

<pallas_src>
import functools

import jax
import jax.numpy as jnp
from jax.experimental import pallas as pl
from jax.experimental.pallas import tpu as pltpu

_VMEM_LIMIT = 48 * 1024 * 1024  # fits v5e/v6e (128 MiB) and v7x (64 MiB) VMEM


def _round_up(x, m):
    return (x + m - 1) // m * m


# ----------------------------------------------------------------------------
# Pallas kernels
# ----------------------------------------------------------------------------
def conv3x3_bn_relu_kernel(xm_ref, xh_ref, w_ref, s_ref, b_ref, o_ref, *, th, W, Wp):
    """Conv2d(3x3, s=1, p=1) + BatchNorm(inference) + ReLU on one row band.

    xm_ref: (th, Wp, Cin)  zero-padded input rows [h*th, h*th+th)       (bf16)
    xh_ref: (3,  Wp, Cin)  halo rows [h*th+th, h*th+th+3)               (bf16)
    w_ref : (9, Cin, Cout) tap-major weights, tap = ky*3 + kx           (bf16)
    s_ref : (1, Cout)      folded BN scale                              (f32)
    b_ref : (1, Cout)      folded BN bias (includes the conv bias)      (f32)
    o_ref : (th, W, Cout)  output band                                  (bf16)
    """
    cin = xm_ref.shape[-1]
    cout = o_ref.shape[-1]
    M = th * Wp  # rows computed per band (includes the padding columns)
    # Flatten (row, col) -> flat rows; Wp is a multiple of 16 so the merge of the
    # leading dim into the sublane dim stays tile-aligned for bf16.
    band = jnp.concatenate([xm_ref[...], xh_ref[...]], axis=0)  # (th+3, Wp, cin)
    band = band.reshape((th + 3) * Wp, cin)
    acc = jnp.zeros((M, cout), jnp.float32)
    for ky in range(3):
        for kx in range(3):
            shift = ky * Wp + kx
            a = band[shift:shift + M, :]                        # (M, cin) bf16
            acc = acc + jnp.dot(a, w_ref[ky * 3 + kx],
                                preferred_element_type=jnp.float32)
    y = acc * s_ref[0] + b_ref[0]
    y = jnp.maximum(y, 0.0)
    y = y.reshape(th, Wp, cout)[:, :W, :]                       # drop pad columns
    o_ref[...] = y.astype(o_ref.dtype)


def maxpool2x2_kernel(x_ref, o_ref):
    """MaxPool2d(2, 2).  x_ref: (2*tph, Wo, 2*C) (adjacent W pair packed into the
    channel axis by a free wrapper reshape); o_ref: (tph, Wo, C)."""
    tph, wo, c = o_ref.shape
    v = x_ref[...]                                    # (2*tph, wo, 2c)
    m = jnp.maximum(v[:, :, :c], v[:, :, c:])         # max over the W pair
    m = m.reshape(tph, 2, wo, c)                      # split row pairs (leading dim)
    o_ref[...] = jnp.maximum(m[:, 0], m[:, 1])        # max over the H pair


def fc_kernel(a_ref, w_ref, b_ref, o_ref, *, relu):
    """o = relu_opt(a @ w + b); K is the only grid axis, o_ref is the f32 acc."""
    k = pl.program_id(0)

    @pl.when(k == 0)
    def _():
        o_ref[...] = jnp.zeros_like(o_ref)

    o_ref[...] += jnp.dot(a_ref[...], w_ref[...],
                          preferred_element_type=jnp.float32)

    @pl.when(k == pl.num_programs(0) - 1)
    def _():
        y = o_ref[...] + b_ref[...]
        if relu:
            y = jnp.maximum(y, 0.0)
        o_ref[...] = y


# ----------------------------------------------------------------------------
# Wrappers
# ----------------------------------------------------------------------------
def conv3x3_bn_relu(x, w, b, gamma, beta, mean, var, eps=1e-5):
    """x: (N, H, W, Cin) NHWC.  w: (Cout, Cin, 3, 3) PyTorch layout."""
    x = x.astype(jnp.bfloat16)
    N, H, W, Cin = x.shape
    Cout = w.shape[0]
    th = min(H, 28)                       # divides every H in this network
    Hb = H // th
    Wp = _round_up(W + 2, 16)             # conv pad + right zero-pad for alignment
    # Zero padding: 1 top / 2 bottom rows, 1 left col, (Wp-W-1) right cols.  The
    # extra zeros only ever feed padding columns that are sliced away in-kernel.
    xpad = jnp.pad(x, ((0, 0), (1, 2), (1, Wp - W - 1), (0, 0)))   # (N, H+3, Wp, Cin)
    xhalo = jnp.stack([xpad[:, (h + 1) * th:(h + 1) * th + 3]
                       for h in range(Hb)], axis=1)                # (N, Hb, 3, Wp, Cin)

    wmat = jnp.transpose(w, (2, 3, 1, 0)).reshape(9, Cin, Cout).astype(jnp.bfloat16)
    inv = gamma * jax.lax.rsqrt(var + eps)
    scale = inv.reshape(1, Cout).astype(jnp.float32)
    bias = ((b - mean) * inv + beta).reshape(1, Cout).astype(jnp.float32)

    kernel = functools.partial(conv3x3_bn_relu_kernel, th=th, W=W, Wp=Wp)
    return pl.pallas_call(
        kernel,
        out_shape=jax.ShapeDtypeStruct((N, H, W, Cout), jnp.bfloat16),
        grid=(N, Hb),
        in_specs=[
            pl.BlockSpec((None, th, Wp, Cin), lambda n, h: (n, h, 0, 0)),
            pl.BlockSpec((None, None, 3, Wp, Cin), lambda n, h: (n, h, 0, 0, 0)),
            pl.BlockSpec((9, Cin, Cout), lambda n, h: (0, 0, 0)),
            pl.BlockSpec((1, Cout), lambda n, h: (0, 0)),
            pl.BlockSpec((1, Cout), lambda n, h: (0, 0)),
        ],
        out_specs=pl.BlockSpec((None, th, W, Cout), lambda n, h: (n, h, 0, 0)),
        compiler_params=pltpu.CompilerParams(
            dimension_semantics=("parallel", "parallel"),
            vmem_limit_bytes=_VMEM_LIMIT),
    )(xpad, xhalo, wmat, scale, bias)


def maxpool2x2(x):
    """MaxPool2d(2, 2) on NHWC; x is read exactly once (no pre-gathered views)."""
    N, H, W, C = x.shape
    Ho, Wo = H // 2, W // 2
    tph = min(Ho, 56)                     # divides every pooled height here
    xr = x.reshape(N, H, Wo, 2 * C)       # free reshape: pack W pairs into channels
    return pl.pallas_call(
        maxpool2x2_kernel,
        out_shape=jax.ShapeDtypeStruct((N, Ho, Wo, C), x.dtype),
        grid=(N, Ho // tph),
        in_specs=[pl.BlockSpec((None, 2 * tph, Wo, 2 * C), lambda n, h: (n, h, 0, 0))],
        out_specs=pl.BlockSpec((None, tph, Wo, C), lambda n, h: (n, h, 0, 0)),
        compiler_params=pltpu.CompilerParams(
            dimension_semantics=("parallel", "parallel"),
            vmem_limit_bytes=_VMEM_LIMIT),
    )(xr)


def fc_layer(x, w, b, *, relu, tk=None):
    """relu_opt(x @ w.T + b).  x: (M, K); w: (Nout, K) PyTorch layout."""
    M, K = x.shape
    Nout = w.shape[0]
    if tk is None or K % tk != 0:
        tk = K
    a = x.astype(jnp.bfloat16)
    wt = jnp.transpose(w).astype(jnp.bfloat16)      # (K, Nout)
    bias = b.reshape(1, Nout).astype(jnp.float32)
    return pl.pallas_call(
        functools.partial(fc_kernel, relu=relu),
        out_shape=jax.ShapeDtypeStruct((M, Nout), jnp.float32),
        grid=(K // tk,),
        in_specs=[
            pl.BlockSpec((M, tk), lambda k: (0, k)),
            pl.BlockSpec((tk, Nout), lambda k: (k, 0)),
            pl.BlockSpec((1, Nout), lambda k: (0, 0)),
        ],
        out_specs=pl.BlockSpec((M, Nout), lambda k: (0, 0)),
        compiler_params=pltpu.CompilerParams(
            dimension_semantics=("arbitrary",),
            vmem_limit_bytes=_VMEM_LIMIT),
    )(a, wt, bias)


# ----------------------------------------------------------------------------
# Deterministic parameter construction (synthetic, matches the module's shapes)
# ----------------------------------------------------------------------------
_CONV_CFG = [
    [(3, 64), (64, 64)],
    [(64, 128), (128, 128)],
    [(128, 256), (256, 256), (256, 256)],
    [(256, 512), (512, 512), (512, 512)],
    [(512, 512), (512, 512), (512, 512)],
]
_FC_CFG = [(25088, 128), (128, 128), (128, 4)]


def init_params(key):
    conv_params = []
    for block in _CONV_CFG:
        bp = []
        for cin, cout in block:
            key, k1, k2, k3, k4, k5, k6 = jax.random.split(key, 7)
            w = jax.random.normal(k1, (cout, cin, 3, 3), jnp.float32) / jnp.sqrt(9.0 * cin)
            b = 0.01 * jax.random.normal(k2, (cout,), jnp.float32)
            gamma = 1.0 + 0.1 * jax.random.normal(k3, (cout,), jnp.float32)
            beta = 0.01 * jax.random.normal(k4, (cout,), jnp.float32)
            mean = 0.01 * jax.random.normal(k5, (cout,), jnp.float32)
            var = jnp.abs(1.0 + 0.1 * jax.random.normal(k6, (cout,), jnp.float32))
            bp.append((w, b, gamma, beta, mean, var))
        conv_params.append(bp)
    fc_params = []
    for fin, fout in _FC_CFG:
        key, k1, k2 = jax.random.split(key, 3)
        w = jax.random.normal(k1, (fout, fin), jnp.float32) / jnp.sqrt(float(fin))
        b = 0.01 * jax.random.normal(k2, (fout,), jnp.float32)
        fc_params.append((w, b))
    return conv_params, fc_params


# ----------------------------------------------------------------------------
# Full forward pass (mirrors CNN.forward)
# ----------------------------------------------------------------------------
def cnn_forward(x_nchw, conv_params, fc_params):
    x = jnp.transpose(x_nchw, (0, 2, 3, 1)).astype(jnp.bfloat16)  # NCHW -> NHWC
    for block in conv_params:
        for (w, b, g, be, mu, var) in block:
            # TODO(synk): BatchNorm uses inference-mode running stats; PyTorch's
            # default train() mode would use batch statistics.
            x = conv3x3_bn_relu(x, w, b, g, be, mu, var)
        x = maxpool2x2(x)
    n = x.shape[0]
    # x.view(-1, 7*7*512) in PyTorch flattens NCHW order -> transpose back first.
    x = jnp.transpose(x, (0, 3, 1, 2)).reshape(n, -1)
    (w1, b1), (w2, b2), (w3, b3) = fc_params
    x = fc_layer(x, w1, b1, relu=True, tk=6272)   # K=25088 in 4 steps
    # TODO(synk): Dropout(0.4) is identity in eval mode; train-mode masking not implemented.
    x = fc_layer(x, w2, b2, relu=True)
    x = fc_layer(x, w3, b3, relu=False)
    return x


# ----------------------------------------------------------------------------
# Small self-checks of the three kernels against plain-JAX references
# ----------------------------------------------------------------------------
def _conv_bn_relu_reference(x, w, b, gamma, beta, mean, var, eps=1e-5):
    xf = x.astype(jnp.float32)
    N, H, W, _ = x.shape
    xp = jnp.pad(xf, ((0, 0), (1, 1), (1, 1), (0, 0)))
    acc = jnp.zeros((N, H, W, w.shape[0]), jnp.float32)
    for ky in range(3):
        for kx in range(3):
            acc = acc + jnp.einsum('nhwc,oc->nhwo',
                                   xp[:, ky:ky + H, kx:kx + W, :],
                                   w[:, :, ky, kx].astype(jnp.float32))
    inv = gamma / jnp.sqrt(var + eps)
    return jnp.maximum(acc * inv + (b - mean) * inv + beta, 0.0)


def _self_check():
    key = jax.random.PRNGKey(1)
    kx, kw, kb, kg = jax.random.split(key, 4)
    # conv + BN + ReLU (exercises the halo path: 56 rows -> 2 bands of 28)
    cin, cout, hh = 8, 16, 56
    xs = jax.random.normal(kx, (1, hh, hh, cin), jnp.float32)
    ws = jax.random.normal(kw, (cout, cin, 3, 3), jnp.float32) / jnp.sqrt(9.0 * cin)
    bs = 0.1 * jax.random.normal(kb, (cout,), jnp.float32)
    gs = 1.0 + 0.1 * jax.random.normal(kg, (cout,), jnp.float32)
    be = 0.05 * jnp.ones((cout,), jnp.float32)
    mu = jnp.zeros((cout,), jnp.float32)
    vr = jnp.ones((cout,), jnp.float32)
    xbf = xs.astype(jnp.bfloat16)
    wbf = ws.astype(jnp.bfloat16).astype(jnp.float32)
    out = conv3x3_bn_relu(xbf, ws, bs, gs, be, mu, vr)
    ref = _conv_bn_relu_reference(xbf.astype(jnp.float32), wbf, bs, gs, be, mu, vr)
    assert float(jnp.max(jnp.abs(out.astype(jnp.float32) - ref))) < 0.05
    # maxpool
    pin = jax.random.normal(kx, (1, 8, 8, 16), jnp.float32).astype(jnp.bfloat16)
    pout = maxpool2x2(pin)
    pref = jnp.maximum(jnp.maximum(pin[:, 0::2, 0::2], pin[:, 0::2, 1::2]),
                       jnp.maximum(pin[:, 1::2, 0::2], pin[:, 1::2, 1::2]))
    assert bool(jnp.all(pout == pref))
    # fc (exercises K accumulation across 2 grid steps)
    a = jax.random.normal(kx, (2, 256), jnp.float32)
    wf = jax.random.normal(kw, (32, 256), jnp.float32) / 16.0
    bf = 0.1 * jax.random.normal(kb, (32,), jnp.float32)
    fout = fc_layer(a, wf, bf, relu=True, tk=128)
    fref = jnp.maximum(a.astype(jnp.bfloat16).astype(jnp.float32)
                       @ wf.astype(jnp.bfloat16).astype(jnp.float32).T + bf, 0.0)
    assert float(jnp.max(jnp.abs(fout - fref))) < 0.05


if __name__ == "__main__":
    _self_check()

    key = jax.random.PRNGKey(0)
    key, kx, kp = jax.random.split(key, 3)
    # 224x224 input is what the module's view(-1, 7*7*512) implies after five
    # 2x2 pools; batch is kept at 1 to keep the example small.
    x = jax.random.normal(kx, (1, 3, 224, 224), jnp.float32)
    conv_params, fc_params = init_params(kp)

    fwd = jax.jit(cnn_forward)
    out = jax.block_until_ready(fwd(x, conv_params, fc_params))

    assert out.shape == (1, 4), out.shape
    assert bool(jnp.all(jnp.isfinite(out)))
    print("KERNEL_OK")
</pallas_src>

<mosaic_0001>
module attributes {stable_mosaic.version = 11 : i64} {
  func.func @conv3x3_bn_relu_kernel(%arg0: i32, %arg1: i32, %arg2: memref<1x28x64x8xbf16, #tpu.memory_space<vmem>>, %arg3: memref<1x1x3x64x8xbf16, #tpu.memory_space<vmem>>, %arg4: memref<9x8x16xbf16, #tpu.memory_space<vmem>>, %arg5: memref<1x16xf32, #tpu.memory_space<vmem>>, %arg6: memref<1x16xf32, #tpu.memory_space<vmem>>, %arg7: memref<1x28x56x16xbf16, #tpu.memory_space<vmem>>) attributes {dimension_semantics = [#tpu.dimension_semantics<parallel>, #tpu.dimension_semantics<parallel>], iteration_bounds = array<i64: 1, 2>, scalar_prefetch = 0 : i64, scratch_operands = 0 : i64, tpu.core_type = #tpu.core_type<tc>, window_params = [{transform_indices = @transform_0, window_bounds = array<i64: 1, 28, 64, 8>}, {transform_indices = @transform_1, window_bounds = array<i64: 1, 1, 3, 64, 8>}, {pipeline_mode = #tpu.pipeline_mode<synchronous>, transform_indices = @transform_2, window_bounds = array<i64: 9, 8, 16>}, {pipeline_mode = #tpu.pipeline_mode<synchronous>, transform_indices = @transform_3, window_bounds = array<i64: 1, 16>}, {pipeline_mode = #tpu.pipeline_mode<synchronous>, transform_indices = @transform_4, window_bounds = array<i64: 1, 16>}, {transform_indices = @transform_5, window_bounds = array<i64: 1, 28, 56, 16>}]} {
    %c0 = arith.constant 0 : index
    %c0_0 = arith.constant 0 : index
    %c0_1 = arith.constant 0 : index
    %c0_2 = arith.constant 0 : index
    %0 = vector.load %arg2[%c0, %c0_0, %c0_1, %c0_2] : memref<1x28x64x8xbf16, #tpu.memory_space<vmem>>, vector<1x28x64x8xbf16>
    %1 = vector.shape_cast %0 : vector<1x28x64x8xbf16> to vector<28x64x8xbf16>
    %c0_3 = arith.constant 0 : index
    %c0_4 = arith.constant 0 : index
    %c0_5 = arith.constant 0 : index
    %c0_6 = arith.constant 0 : index
    %c0_7 = arith.constant 0 : index
    %2 = vector.load %arg3[%c0_3, %c0_4, %c0_5, %c0_6, %c0_7] : memref<1x1x3x64x8xbf16, #tpu.memory_space<vmem>>, vector<1x1x3x64x8xbf16>
    %3 = vector.shape_cast %2 : vector<1x1x3x64x8xbf16> to vector<3x64x8xbf16>
    %4 = tpu.concatenate %1, %3 in 0 : vector<28x64x8xbf16>, vector<3x64x8xbf16> -> vector<31x64x8xbf16>
    %5 = vector.shape_cast %4 : vector<31x64x8xbf16> to vector<1984x8xbf16>
    %cst = arith.constant 0.000000e+00 : f32
    %6 = vector.broadcast %cst : f32 to vector<1792x16xf32>
    %7 = vector.extract_strided_slice %5 {offsets = [0, 0], sizes = [1792, 8], strides = [1, 1]} : vector<1984x8xbf16> to vector<1792x8xbf16>
    %c0_8 = arith.constant 0 : index
    %c0_9 = arith.constant 0 : index
    %c0_10 = arith.constant 0 : index
    %8 = vector.load %arg4[%c0_8, %c0_9, %c0_10] : memref<9x8x16xbf16, #tpu.memory_space<vmem>>, vector<1x8x16xbf16>
    %9 = vector.shape_cast %8 : vector<1x8x16xbf16> to vector<8x16xbf16>
    %cst_11 = arith.constant dense<0.000000e+00> : vector<1792x16xf32>
    %10 = tpu.matmul %7, %9, %cst_11 {dimension_numbers = #tpu.dot_dimension_numbers<[1], [0], [0], [1], [0, 0, 1, 1], [], []>} : vector<1792x8xbf16>, vector<8x16xbf16>, vector<1792x16xf32> -> vector<1792x16xf32>
    %11 = arith.addf %6, %10 : vector<1792x16xf32>
    %12 = vector.extract_strided_slice %5 {offsets = [1, 0], sizes = [1792, 8], strides = [1, 1]} : vector<1984x8xbf16> to vector<1792x8xbf16>
    %c1 = arith.constant 1 : index
    %c0_12 = arith.constant 0 : index
    %c0_13 = arith.constant 0 : index
    %13 = vector.load %arg4[%c1, %c0_12, %c0_13] : memref<9x8x16xbf16, #tpu.memory_space<vmem>>, vector<1x8x16xbf16>
    %14 = vector.shape_cast %13 : vector<1x8x16xbf16> to vector<8x16xbf16>
    %cst_14 = arith.constant dense<0.000000e+00> : vector<1792x16xf32>
    %15 = tpu.matmul %12, %14, %cst_14 {dimension_numbers = #tpu.dot_dimension_numbers<[1], [0], [0], [1], [0, 0, 1, 1], [], []>} : vector<1792x8xbf16>, vector<8x16xbf16>, vector<1792x16xf32> -> vector<1792x16xf32>
    %16 = arith.addf %11, %15 : vector<1792x16xf32>
    %17 = vector.extract_strided_slice %5 {offsets = [2, 0], sizes = [1792, 8], strides = [1, 1]} : vector<1984x8xbf16> to vector<1792x8xbf16>
    %c2 = arith.constant 2 : index
    %c0_15 = arith.constant 0 : index
    %c0_16 = arith.constant 0 : index
    %18 = vector.load %arg4[%c2, %c0_15, %c0_16] : memref<9x8x16xbf16, #tpu.memory_space<vmem>>, vector<1x8x16xbf16>
    %19 = vector.shape_cast %18 : vector<1x8x16xbf16> to vector<8x16xbf16>
    %cst_17 = arith.constant dense<0.000000e+00> : vector<1792x16xf32>
    %20 = tpu.matmul %17, %19, %cst_17 {dimension_numbers = #tpu.dot_dimension_numbers<[1], [0], [0], [1], [0, 0, 1, 1], [], []>} : vector<1792x8xbf16>, vector<8x16xbf16>, vector<1792x16xf32> -> vector<1792x16xf32>
    %21 = arith.addf %16, %20 : vector<1792x16xf32>
    %22 = vector.extract_strided_slice %5 {offsets = [64, 0], sizes = [1792, 8], strides = [1, 1]} : vector<1984x8xbf16> to vector<1792x8xbf16>
    %c3 = arith.constant 3 : index
    %c0_18 = arith.constant 0 : index
    %c0_19 = arith.constant 0 : index
    %23 = vector.load %arg4[%c3, %c0_18, %c0_19] : memref<9x8x16xbf16, #tpu.memory_space<vmem>>, vector<1x8x16xbf16>
    %24 = vector.shape_cast %23 : vector<1x8x16xbf16> to vector<8x16xbf16>
    %cst_20 = arith.constant dense<0.000000e+00> : vector<1792x16xf32>
    %25 = tpu.matmul %22, %24, %cst_20 {dimension_numbers = #tpu.dot_dimension_numbers<[1], [0], [0], [1], [0, 0, 1, 1], [], []>} : vector<1792x8xbf16>, vector<8x16xbf16>, vector<1792x16xf32> -> vector<1792x16xf32>
    %26 = arith.addf %21, %25 : vector<1792x16xf32>
    %27 = vector.extract_strided_slice %5 {offsets = [65, 0], sizes = [1792, 8], strides = [1, 1]} : vector<1984x8xbf16> to vector<1792x8xbf16>
    %c4 = arith.constant 4 : index
    %c0_21 = arith.constant 0 : index
    %c0_22 = arith.constant 0 : index
    %28 = vector.load %arg4[%c4, %c0_21, %c0_22] : memref<9x8x16xbf16, #tpu.memory_space<vmem>>, vector<1x8x16xbf16>
    %29 = vector.shape_cast %28 : vector<1x8x16xbf16> to vector<8x16xbf16>
    %cst_23 = arith.constant dense<0.000000e+00> : vector<1792x16xf32>
    %30 = tpu.matmul %27, %29, %cst_23 {dimension_numbers = #tpu.dot_dimension_numbers<[1], [0], [0], [1], [0, 0, 1, 1], [], []>} : vector<1792x8xbf16>, vector<8x16xbf16>, vector<1792x16xf32> -> vector<1792x16xf32>
    %31 = arith.addf %26, %30 : vector<1792x16xf32>
    %32 = vector.extract_strided_slice %5 {offsets = [66, 0], sizes = [1792, 8], strides = [1, 1]} : vector<1984x8xbf16> to vector<1792x8xbf16>
    %c5 = arith.constant 5 : index
    %c0_24 = arith.constant 0 : index
    %c0_25 = arith.constant 0 : index
    %33 = vector.load %arg4[%c5, %c0_24, %c0_25] : memref<9x8x16xbf16, #tpu.memory_space<vmem>>, vector<1x8x16xbf16>
    %34 = vector.shape_cast %33 : vector<1x8x16xbf16> to vector<8x16xbf16>
    %cst_26 = arith.constant dense<0.000000e+00> : vector<1792x16xf32>
    %35 = tpu.matmul %32, %34, %cst_26 {dimension_numbers = #tpu.dot_dimension_numbers<[1], [0], [0], [1], [0, 0, 1, 1], [], []>} : vector<1792x8xbf16>, vector<8x16xbf16>, vector<1792x16xf32> -> vector<1792x16xf32>
    %36 = arith.addf %31, %35 : vector<1792x16xf32>
    %37 = vector.extract_strided_slice %5 {offsets = [128, 0], sizes = [1792, 8], strides = [1, 1]} : vector<1984x8xbf16> to vector<1792x8xbf16>
    %c6 = arith.constant 6 : index
    %c0_27 = arith.constant 0 : index
    %c0_28 = arith.constant 0 : index
    %38 = vector.load %arg4[%c6, %c0_27, %c0_28] : memref<9x8x16xbf16, #tpu.memory_space<vmem>>, vector<1x8x16xbf16>
    %39 = vector.shape_cast %38 : vector<1x8x16xbf16> to vector<8x16xbf16>
    %cst_29 = arith.constant dense<0.000000e+00> : vector<1792x16xf32>
    %40 = tpu.matmul %37, %39, %cst_29 {dimension_numbers = #tpu.dot_dimension_numbers<[1], [0], [0], [1], [0, 0, 1, 1], [], []>} : vector<1792x8xbf16>, vector<8x16xbf16>, vector<1792x16xf32> -> vector<1792x16xf32>
    %41 = arith.addf %36, %40 : vector<1792x16xf32>
    %42 = vector.extract_strided_slice %5 {offsets = [129, 0], sizes = [1792, 8], strides = [1, 1]} : vector<1984x8xbf16> to vector<1792x8xbf16>
    %c7 = arith.constant 7 : index
    %c0_30 = arith.constant 0 : index
    %c0_31 = arith.constant 0 : index
    %43 = vector.load %arg4[%c7, %c0_30, %c0_31] : memref<9x8x16xbf16, #tpu.memory_space<vmem>>, vector<1x8x16xbf16>
    %44 = vector.shape_cast %43 : vector<1x8x16xbf16> to vector<8x16xbf16>
    %cst_32 = arith.constant dense<0.000000e+00> : vector<1792x16xf32>
    %45 = tpu.matmul %42, %44, %cst_32 {dimension_numbers = #tpu.dot_dimension_numbers<[1], [0], [0], [1], [0, 0, 1, 1], [], []>} : vector<1792x8xbf16>, vector<8x16xbf16>, vector<1792x16xf32> -> vector<1792x16xf32>
    %46 = arith.addf %41, %45 : vector<1792x16xf32>
    %47 = vector.extract_strided_slice %5 {offsets = [130, 0], sizes = [1792, 8], strides = [1, 1]} : vector<1984x8xbf16> to vector<1792x8xbf16>
    %c8 = arith.constant 8 : index
    %c0_33 = arith.constant 0 : index
    %c0_34 = arith.constant 0 : index
    %48 = vector.load %arg4[%c8, %c0_33, %c0_34] : memref<9x8x16xbf16, #tpu.memory_space<vmem>>, vector<1x8x16xbf16>
    %49 = vector.shape_cast %48 : vector<1x8x16xbf16> to vector<8x16xbf16>
    %cst_35 = arith.constant dense<0.000000e+00> : vector<1792x16xf32>
    %50 = tpu.matmul %47, %49, %cst_35 {dimension_numbers = #tpu.dot_dimension_numbers<[1], [0], [0], [1], [0, 0, 1, 1], [], []>} : vector<1792x8xbf16>, vector<8x16xbf16>, vector<1792x16xf32> -> vector<1792x16xf32>
    %51 = arith.addf %46, %50 : vector<1792x16xf32>
    %c0_36 = arith.constant 0 : index
    %c0_37 = arith.constant 0 : index
    %52 = vector.load %arg5[%c0_36, %c0_37] : memref<1x16xf32, #tpu.memory_space<vmem>>, vector<1x16xf32>
    %53 = vector.shape_cast %52 : vector<1x16xf32> to vector<16xf32>
    %54 = vector.shape_cast %53 : vector<16xf32> to vector<1x16xf32>
    %55 = vector.broadcast %54 : vector<1x16xf32> to vector<1792x16xf32>
    %56 = arith.mulf %51, %55 : vector<1792x16xf32>
    %c0_38 = arith.constant 0 : index
    %c0_39 = arith.constant 0 : index
    %57 = vector.load %arg6[%c0_38, %c0_39] : memref<1x16xf32, #tpu.memory_space<vmem>>, vector<1x16xf32>
    %58 = vector.shape_cast %57 : vector<1x16xf32> to vector<16xf32>
    %59 = vector.shape_cast %58 : vector<16xf32> to vector<1x16xf32>
    %60 = vector.broadcast %59 : vector<1x16xf32> to vector<1792x16xf32>
    %61 = arith.addf %56, %60 : vector<1792x16xf32>
    %cst_40 = arith.constant 0.000000e+00 : f32
    %62 = vector.broadcast %cst_40 : f32 to vector<1792x16xf32>
    %63 = arith.maximumf %61, %62 : vector<1792x16xf32>
    %64 = vector.shape_cast %63 : vector<1792x16xf32> to vector<28x64x16xf32>
    %65 = vector.extract_strided_slice %64 {offsets = [0, 0, 0], sizes = [28, 56, 16], strides = [1, 1, 1]} : vector<28x64x16xf32> to vector<28x56x16xf32>
    %66 = arith.truncf %65 : vector<28x56x16xf32> to vector<28x56x16xbf16>
    %c0_41 = arith.constant 0 : index
    %c0_42 = arith.constant 0 : index
    %c0_43 = arith.constant 0 : index
    %c0_44 = arith.constant 0 : index
    %67 = vector.load %arg7[%c0_41, %c0_42, %c0_43, %c0_44] : memref<1x28x56x16xbf16, #tpu.memory_space<vmem>>, vector<1x28x56x16xbf16>
    %68 = vector.shape_cast %67 : vector<1x28x56x16xbf16> to vector<28x56x16xbf16>
    %69 = vector.shape_cast %66 : vector<28x56x16xbf16> to vector<1x28x56x16xbf16>
    tpu.vector_store %arg7[%c0_41, %c0_42, %c0_43, %c0_44], %69 {strides = array<i32>} : memref<1x28x56x16xbf16, #tpu.memory_space<vmem>>, vector<1x28x56x16xbf16>,
    return
  }
  func.func @transform_0(%arg0: i32, %arg1: i32) -> (i32, i32, i32, i32) {
    %c0_i32 = arith.constant 0 : i32
    %c0_i32_0 = arith.constant 0 : i32
    %c0_i32_1 = arith.constant 0 : i32
    return %arg0, %arg1, %c0_i32, %c0_i32_0 : i32, i32, i32, i32
  }
  func.func @transform_1(%arg0: i32, %arg1: i32) -> (i32, i32, i32, i32, i32) {
    %c0_i32 = arith.constant 0 : i32
    %c0_i32_0 = arith.constant 0 : i32
    %c0_i32_1 = arith.constant 0 : i32
    %c0_i32_2 = arith.constant 0 : i32
    return %arg0, %arg1, %c0_i32, %c0_i32_0, %c0_i32_1 : i32, i32, i32, i32, i32
  }
  func.func @transform_2(%arg0: i32, %arg1: i32) -> (i32, i32, i32) {
    %c0_i32 = arith.constant 0 : i32
    %c0_i32_0 = arith.constant 0 : i32
    %c0_i32_1 = arith.constant 0 : i32
    %c0_i32_2 = arith.constant 0 : i32
    return %c0_i32, %c0_i32_0, %c0_i32_1 : i32, i32, i32
  }
  func.func @transform_3(%arg0: i32, %arg1: i32) -> (i32, i32) {
    %c0_i32 = arith.constant 0 : i32
    %c0_i32_0 = arith.constant 0 : i32
    %c0_i32_1 = arith.constant 0 : i32
    return %c0_i32, %c0_i32_0 : i32, i32
  }
  func.func @transform_4(%arg0: i32, %arg1: i32) -> (i32, i32) {
    %c0_i32 = arith.constant 0 : i32
    %c0_i32_0 = arith.constant 0 : i32
    %c0_i32_1 = arith.constant 0 : i32
    return %c0_i32, %c0_i32_0 : i32, i32
  }
  func.func @transform_5(%arg0: i32, %arg1: i32) -> (i32, i32, i32, i32) {
    %c0_i32 = arith.constant 0 : i32
    %c0_i32_0 = arith.constant 0 : i32
    %c0_i32_1 = arith.constant 0 : i32
    return %arg0, %arg1, %c0_i32, %c0_i32_0 : i32, i32, i32, i32
  }
}

</mosaic_0001>

<bundles_post_ra>
// kernel: tpu_custom_call.1
= control target key start
LH: loop header
LB: loop body
LE: loop exit
PB: predicated region body
PF: predicated region fallthrough
CT: control target
= control target key end

     0   :  { %s21432_s18 = smov 0   ;;  %s21434_s19 = smov 0   ;;  %s26211_s0 = inlined_call_operand.vmem [shape: bf16[1,59,64,8], index: 0, kind: input, shape index: {}]   ;;  %s26212_s1 = inlined_call_operand.vmem [shape: bf16[1,2,3,64,8], index: 1, kind: input, shape index: {}]   ;;  %s26213_s2 = inlined_call_operand.vmem [shape: bf16[9,8,16], index: 2, kind: input, shape index: {}]   ;;  %s26214_s3 = inlined_call_operand.vmem [shape: f32[1,16], index: 3, kind: input, shape index: {}]   ;;  %s26215_s4 = inlined_call_operand.vmem [shape: f32[1,16], index: 4, kind: input, shape index: {}]   ;;  %s26216_s5 = inlined_call_operand.vmem [shape: bf16[1,56,56,16], index: 5, kind: output, shape index: {}]  }
   0x1   :  { %s21436_s20 = smov 0  }
   0x2 LB: > { %s24_s21 = sadd.s32 1, %s21396_s19  ;;  %p14627_p0 = scmp.ge.s32.totalorder %s21400_s20, 1  ;;  %s21400_s20 = sphi %s21436_s20, %s15_s20   ;;  %s21396_s19 = sphi %s21434_s19, %s27554_s19   ;;  %s21392_s18 = sphi %s21432_s18, %s27553_s18  }
   0x3   : > { %p25_p1 = scmp.ge.s32.totalorder %s24_s21, 2  ;;  %p235_p2 = scmp.lt.s32.totalorder %s21400_s20, 3 }
   0x5   : > { %s27556_s21 = smov (%p25_p1, %s24_s21), 0  ;;  %p236_p3 = pnand %p14627_p0, %p235_p2 }
   0x7   : > { %239 = sbr.rel (%p236_p3) target bundleno = 2267 (0x8db), region = 40 }
   0xe   : > { %v14632_v0 = vld [vmem:[%s26213_s2 + $0x4] sm:$0xf]  ;;  %vm2374_vm0 = vcmask 1043456   ;;  %v15200_v1 = vld [vmem:[%s26213_s2 + $0x10] sm:$0xf]  ;;  %s21459_s26 = smul.u32 28, %s21392_s18 }
   0xf   : > { %20985 = vmatprep.subr.msk.bf16.mxu1 %vm2374_vm0, %v14632_v0  ;;  %20989 = vmatprep.subr.msk.bf16.mxu0 %vm2374_vm0, %v15200_v1  ;;  %v2376_v2 = vsel %vm2374_vm0, %v14632_v0, 0  ;;  %v21465_v3 = vsel %vm2374_vm0, %v15200_v1, 0  ;;  %v570_v4 = vld [vmem:[%s26213_s2] sm:$0xf]  ;;  %v15314_v5 = vld [vmem:[%s26213_s2 + $0x14] sm:$0xf] }
  0x10   : > { %26720 = vst [vmem:[#allocation2_spill] sm:$0xff] %v21465_v3  ;;  %17186 = vmatpush3.bf16.msra.mxu1 %v2376_v2  ;;  %18090 = vmatpush3.bf16.msra.mxu0 %v21465_v3  ;;  %p295_p4 = scmp.lt.s32.totalorder %s21459_s26, 58  ;;  %vm1136_vm1 = vsmask.f32 7424  ;;  %vm2037_vm2 = vcmask 64512   ;;  %v3504_v14 = vsel %vm2374_vm0, %v570_v4, 0 }
  0x11   : > { %20986 = vmatprep.subr.msk.bf16.mxu1 %vm2374_vm0, %v570_v4  ;;  %20991 = vmatprep.subr.msk.bf16.mxu0 %vm2374_vm0, %v15314_v5  ;;  %v8384_v15 = vsel %vm2374_vm0, %v15314_v5, 0  ;;  %vm4409_vm3 = vcmask 1046528   ;;  %p310_p5 = scmp.lt.s32.totalorder %s21392_s18, 1  ;;  %p320_p6 = scmp.lt.s32.totalorder %s21459_s26, 55  ;;  %vm14309_vm4 = vcmask 125952  }
  0x12   : > { %s296_s6 = scalar_select %p295_p4, %s21459_s26, 58 }
  0x13   : > { %s27558_s18 = smov (!%p310_p5, %s21392_s18), 1  ;;  %s27560_s26 = smov (!%p320_p6, %s21459_s26), 55 }
  0x14   : > { %s15971_s7 = sshll.u32 %s296_s6, 5  ;;  %s20995_s13 = smul.u32 96, %s27558_s18 }
  0x15   : > { %s21481_s10 = scalar_lea.vmem %s26211_s0, %s15971_s7 }
  0x16   : > { %v21021_v6 = vld [vmem:[%s21481_s10] sm:$0xff]   ;;  %v21022_v7 = vld [vmem:[%s21481_s10 + $0x8] sm:$0xff]   ;;  %v21025_v18 = vld [vmem:[%s21481_s10 + $0x10] sm:$0xff]   ;;  %s22281_s16 = scalar_lea.vmem %s26212_s1, %s20995_s13 }
  0x17   : > { %v1138_v8 = vshrl.u32 %v21021_v6, 16  ;;  %v1140_v9 = vshll.u32 %v21021_v6, 16  ;;  %v1145_v10 = vshll.u32 %v21022_v7, 16  ;;  %v1149_v11 = vshrl.u32 %v21022_v7, 16  ;;  %v21023_v12 = vld [vmem:[%s21481_s10 + $0x20] sm:$0xff]   ;;  %v21024_v13 = vld [vmem:[%s21481_s10 + $0x28] sm:$0xff]  }
  0x18   : > { %v21026_v19 = vld [vmem:[%s21481_s10 + $0x30] sm:$0xff]   ;;  %v1169_v20 = vshll.u32 %v21023_v12, 16  ;;  %v1173_v21 = vshrl.u32 %v21023_v12, 16  ;;  %v1177_v22 = vshll.u32 %v21024_v13, 16  ;;  %v1181_v23 = vshrl.u32 %v21024_v13, 16  ;;  %v21027_v30 = vld [vmem:[%s21481_s10 + $0x18] sm:$0xff]  }
  0x19   : > { %v1142_v16 = vrot.slane %v1140_v9, 1  ;;  %v1147_v17 = vrot.slane %v1145_v10, 1  ;;  %v1153_v26 = vshll.u32 %v21025_v18, 16  ;;  %v1185_v27 = vshll.u32 %v21026_v19, 16  ;;  %v21028_v38 = vld [vmem:[%s21481_s10 + $0x38] sm:$0xff]   ;;  %v21029_v40 = vld [vmem:[%s21481_s10 + $0x40] sm:$0xff]  }
  0x1a   : > { %v1171_v28 = vrot.slane %v1169_v20, 1  ;;  %v1179_v29 = vrot.slane %v1177_v22, 1  ;;  %v1157_v31 = vshrl.u32 %v21025_v18, 16  ;;  %v1161_v37 = vshll.u32 %v21027_v30, 16  ;;  %v21030_v44 = vld [vmem:[%s21481_s10 + $0x48] sm:$0xff]   ;;  %v21031_v56 = vld [vmem:[%s21481_s10 + $0x50] sm:$0xff]  }
  0x1b   : > { %v1143_v24 = vor.u32 %v1142_v16, %v1138_v8  ;;  %v1151_v25 = vor.u32 %v1149_v11, %v1147_v17  ;;  %v1155_v33 = vrot.slane %v1153_v26, 1  ;;  %v1187_v34 = vrot.slane %v1185_v27, 1  ;;  %v21032_v60 = vld [vmem:[%s21481_s10 + $0x58] sm:$0xff]   ;;  %v21033_v9 = vld [vmem:[%s21481_s10 + $0x60] sm:$0xff]   ;;  %v21034_v13 = vld [vmem:[%s21481_s10 + $0x68] sm:$0xff]  }
  0x1c   : > { %v1175_v35 = vor.u32 %v1173_v21, %v1171_v28  ;;  %v1183_v36 = vor.u32 %v1181_v23, %v1179_v29  ;;  %v1189_v39 = vshrl.u32 %v21026_v19, 16  ;;  %v1165_v43 = vshrl.u32 %v21027_v30, 16  ;;  %v21035_v21 = vld [vmem:[%s21481_s10 + $0x70] sm:$0xff]  }
  0x1d   : > { %v1148_v32 = vsel %vm1136_vm1, %v1143_v24, %v1147_v17  ;;  %v1156_v41 = vsel %vm1136_vm1, %v1151_v25, %v1155_v33  ;;  %v1159_v42 = vor.u32 %v1157_v31, %v1155_v33  ;;  %v1163_v47 = vrot.slane %v1161_v37, 1  ;;  %v21036_v25 = vld [vmem:[%s21481_s10 + $0x78] sm:$0xff]   ;;  %v21037_v33 = vld [vmem:[%s21481_s10 + $0x80] sm:$0xff]   ;;  %v21038_v37 = vld [vmem:[%s21481_s10 + $0x88] sm:$0xff]  }
  0x1e   : > { %17187 = vmatprep.mubr.msk.bf16.mxu1 %vm2037_vm2, %v1148_v32  ;;  %v1180_v45 = vsel %vm1136_vm1, %v1175_v35, %v1179_v29  ;;  %v1188_v46 = vsel %vm1136_vm1, %v1183_v36, %v1187_v34  ;;  %v1191_v48 = vor.u32 %v1189_v39, %v1187_v34  ;;  %v1193_v49 = vshll.u32 %v21028_v38, 16 }
  0x1f   : > { %17188 = vmatmul.mubr.msk.bf16.vlgmr.msra.gmra.mrb[0].mxu1 %vm2037_vm2, %v1156_v41  ;;  %18091 = vmatprep.mubr.msk.bf16.mxu0 %vm2037_vm2, %v1180_v45  ;;  %v1197_v50 = vshrl.u32 %v21028_v38, 16  ;;  %v1201_v51 = vshll.u32 %v21029_v40, 16  ;;  %v1205_v52 = vshrl.u32 %v21029_v40, 16  ;;  %v1164_v53 = vsel %vm1136_vm1, %v1159_v42, %v1163_v47 }
  0x20   : > { %17412 = vmatpush3.bf16.msra.mxu1 %v3504_v14  ;;  %18092 = vmatmul.mubr.msk.bf16.vlgmr.msra.gmra.mrb[0].mxu0 %vm2037_vm2, %v1188_v46  ;;  %v1167_v54 = vor.u32 %v1165_v43, %v1163_v47  ;;  %v1209_v55 = vshll.u32 %v21030_v44, 16  ;;  %v1195_v57 = vrot.slane %v1193_v49, 1  ;;  %v1217_v1 = vshll.u32 %v21031_v56, 16  ;;  %v21040_v49 = vld [vmem:[%s21481_s10 + $0x98] sm:$0xff]  }
  0x21   : > { %18316 = vmatpush3.bf16.msra.mxu0 %v8384_v15  ;;  %17191 = vmatprep.mubr.msk.bf16.mxu1 %vm2037_vm2, %v1164_v53  ;;  %v1203_v58 = vrot.slane %v1201_v51, 1  ;;  %v1213_v4 = vshrl.u32 %v21030_v44, 16  ;;  %v1221_v6 = vshrl.u32 %v21031_v56, 16  ;;  %v1225_v7 = vshll.u32 %v21032_v60, 16 }
  0x22   : > { %v1211_v59 = vrot.slane %v1209_v55, 1  ;;  %v1196_v61 = vsel %vm1136_vm1, %v1191_v48, %v1195_v57  ;;  %v1172_v62 = vsel %vm1136_vm1, %v1167_v54, %v1171_v28  ;;  %v1199_v63 = vor.u32 %v1197_v50, %v1195_v57  ;;  %v21041_v57 = vld [vmem:[%s21481_s10 + $0xa0] sm:$0xff]  }
  0x23   : > { %v1207_v0 = vor.u32 %v1205_v52, %v1203_v58  ;;  %18095 = vmatprep.mubr.msk.bf16.mxu0 %vm2037_vm2, %v1196_v61  ;;  %v1219_v8 = vrot.slane %v1217_v1, 1  ;;  %v1227_v12 = vrot.slane %v1225_v7, 1  ;;  %v1233_v14 = vshll.u32 %v21033_v9, 16  ;;  %v21043_v7 = vld [vmem:[%s21481_s10 + $0xb0] sm:$0xff]  }
  0x24   : > { %v1204_v2 = vsel %vm1136_vm1, %v1199_v63, %v1203_v58  ;;  %v1215_v10 = vor.u32 %v1213_v4, %v1211_v59  ;;  %v1229_v16 = vshrl.u32 %v21032_v60, 16  ;;  %v1237_v18 = vshrl.u32 %v21033_v9, 16 }
  0x25   : > { %v21513_v5 = vsel %vm1136_vm1, %v1207_v0, %v1211_v59  ;;  %v1223_v11 = vor.u32 %v1221_v6, %v1219_v8  ;;  %v1241_v19 = vshll.u32 %v21034_v13, 16  ;;  %v1235_v20 = vrot.slane %v1233_v14, 1 }
  0x26   : > { %26721 = vst [vmem:[#allocation3_spill] sm:$0xff] %v21513_v5  ;;  %v21522_v15 = vsel %vm1136_vm1, %v1215_v10, %v1219_v8  ;;  %v1231_v22 = vor.u32 %v1229_v16, %v1227_v12  ;;  %v1249_v26 = vshll.u32 %v21035_v21, 16  ;;  %v1245_v28 = vshrl.u32 %v21034_v13, 16 }
  0x27   : > { %17192 = vmatmul.mubr.msk.bf16.gmra.mrb[4].mxu1 %vm2037_vm2, %v1172_v62  ;;  %26722 = vst [vmem:[#allocation4_spill] sm:$0xff] %v21522_v15  ;;  %v21526_v17 = vsel %vm1136_vm1, %v1223_v11, %v1227_v12  ;;  %v1239_v23 = vor.u32 %v1237_v18, %v1235_v20  ;;  %v1243_v24 = vrot.slane %v1241_v19, 1  ;;  %v1253_v30 = vshrl.u32 %v21035_v21, 16  ;;  %v21044_v11 = vld [vmem:[%s21481_s10 + $0xb8] sm:$0xff]   ;;  %v21045_v21 = vld [vmem:[%s21481_s10 + $0xc0] sm:$0xff]  }
  0x28   : > { %17195 = vmatprep.mubr.msk.bf16.mxu1 %vm2037_vm2, %v1180_v45  ;;  %18096 = vmatmul.mubr.msk.bf16.gmra.mrb[4].mxu0 %vm2037_vm2, %v1204_v2  ;;  %26723 = vst [vmem:[#allocation5_spill] sm:$0xff] %v21526_v17  ;;  %v21536_v27 = vsel %vm1136_vm1, %v1231_v22, %v1235_v20  ;;  %v1257_v31 = vshll.u32 %v21036_v25, 16  ;;  %v1251_v32 = vrot.slane %v1249_v26, 1  ;;  %v1265_v38 = vshll.u32 %v21037_v33, 16  ;;  %v21039_v45 = vld [vmem:[%s21481_s10 + $0x90] sm:$0xff]  }
  0x29   : > { %18099 = vmatprep.mubr.msk.bf16.mxu0 %vm2037_vm2, %v21513_v5  ;;  %26724 = vst [vmem:[#allocation6_spill] sm:$0xff] %v21536_v27  ;;  %v21540_v29 = vsel %vm1136_vm1, %v1239_v23, %v1243_v24  ;;  %v1247_v34 = vor.u32 %v1245_v28, %v1243_v24  ;;  %v1261_v40 = vshrl.u32 %v21036_v25, 16  ;;  %v1269_v42 = vshrl.u32 %v21037_v33, 16  ;;  %v21046_v23 = vld [vmem:[%s21481_s10 + $0xc8] sm:$0xff]  }
  0x2a   : > { %26725 = vst [vmem:[#allocation7_spill] sm:$0xff] %v21540_v29  ;;  %v1255_v35 = vor.u32 %v1253_v30, %v1251_v32  ;;  %v1259_v36 = vrot.slane %v1257_v31, 1  ;;  %v1273_v43 = vshll.u32 %v21038_v37, 16  ;;  %v1267_v44 = vrot.slane %v1265_v38, 1  ;;  %v21048_v38 = vld [vmem:[%s21481_s10 + $0xd8] sm:$0xff]  }
  0x2b   : > { %v21551_v39 = vsel %vm1136_vm1, %v1247_v34, %v1251_v32  ;;  %v1281_v50 = vshll.u32 %v21039_v45, 16  ;;  %v1277_v52 = vshrl.u32 %v21038_v37, 16  ;;  %v1285_v54 = vshrl.u32 %v21039_v45, 16  ;;  %v21047_v34 = vld [vmem:[%s21481_s10 + $0xd0] sm:$0xff]  }
  0x2c   : > { %26726 = vst [vmem:[#allocation8_spill] sm:$0xff] %v21551_v39  ;;  %v21556_v41 = vsel %vm1136_vm1, %v1255_v35, %v1259_v36  ;;  %v1271_v47 = vor.u32 %v1269_v42, %v1267_v44  ;;  %v1275_v48 = vrot.slane %v1273_v43, 1  ;;  %v1289_v55 = vshll.u32 %v21040_v49, 16 }
  0x2d   : > { %26727 = vst [vmem:[#allocation9_spill] sm:$0xff] %v21556_v41  ;;  %v1283_v56 = vrot.slane %v1281_v50, 1  ;;  %v1297_v62 = vshll.u32 %v21041_v57, 16  ;;  %v1293_v0 = vshrl.u32 %v21040_v49, 16  ;;  %v1313_v12 = vshll.u32 %v21043_v7, 16 }
  0x2e   : > { %v21572_v53 = vsel %vm1136_vm1, %v1271_v47, %v1275_v48  ;;  %v1279_v58 = vor.u32 %v1277_v52, %v1275_v48  ;;  %v1291_v60 = vrot.slane %v1289_v55, 1  ;;  %v1317_v18 = vshrl.u32 %v21043_v7, 16  ;;  %v21049_v48 = vld [vmem:[%s21481_s10 + $0xe0] sm:$0xff]  }
  0x2f   : > { %17196 = vmatmul.mubr.msk.bf16.gmra.mrb[8].mxu1 %vm2037_vm2, %v1188_v46  ;;  %v1263_v46 = vor.u32 %v1261_v40, %v1259_v36  ;;  %26729 = vst [vmem:[#allocation11_spill] sm:$0xff] %v21572_v53  ;;  %v1287_v59 = vor.u32 %v1285_v54, %v1283_v56  ;;  %v1299_v6 = vrot.slane %v1297_v62, 1  ;;  %v1321_v19 = vshll.u32 %v21044_v11, 16  ;;  %v21050_v54 = vld [vmem:[%s21481_s10 + $0xe8] sm:$0xff]  }
  0x30   : > { %17199 = vmatprep.mubr.msk.bf16.mxu1 %vm2037_vm2, %v1196_v61  ;;  %18100 = vmatmul.mubr.msk.bf16.gmra.mrb[8].mxu0 %vm2037_vm2, %v21522_v15  ;;  %v21042_v61 = vld [vmem:[%s21481_s10 + $0xa8] sm:$0xff]   ;;  %v21583_v63 = vsel %vm1136_vm1, %v1279_v58, %v1283_v56  ;;  %v1295_v8 = vor.u32 %v1293_v0, %v1291_v60  ;;  %v1315_v20 = vrot.slane %v1313_v12, 1  ;;  %v1329_v26 = vshll.u32 %v21045_v21, 16  ;;  %v21052_v0 = vld [vmem:[%s21481_s10 + $0xf8] sm:$0xff]  }
  0x31   : > { %18103 = vmatprep.mubr.msk.bf16.mxu0 %vm2037_vm2, %v21526_v17  ;;  %v21567_v51 = vsel %vm1136_vm1, %v1263_v46, %v1267_v44  ;;  %26730 = vst [vmem:[#allocation12_spill] sm:$0xff] %v21583_v63  ;;  %v21588_v1 = vsel %vm1136_vm1, %v1287_v59, %v1291_v60  ;;  %v1305_v4 = vshll.u32 %v21042_v61, 16  ;;  %v1309_v14 = vshrl.u32 %v21042_v61, 16  ;;  %v21051_v61 = vld [vmem:[%s21481_s10 + $0xf0] sm:$0xff]  }
  0x32   : > { %26728 = vst [vmem:[#allocation10_spill] sm:$0xff] %v21567_v51  ;;  %26731 = vst [vmem:[#allocation13_spill] sm:$0xff] %v21588_v1  ;;  %v21599_v13 = vsel %vm1136_vm1, %v1295_v8, %v1299_v6  ;;  %v1319_v24 = vor.u32 %v1317_v18, %v1315_v20  ;;  %v1323_v25 = vrot.slane %v1321_v19, 1  ;;  %v1325_v30 = vshrl.u32 %v21044_v11, 16  ;;  %v21053_v11 = vld [vmem:[%s21481_s10 + $0x100] sm:$0xff]  }
  0x33   : > { %v1307_v10 = vrot.slane %v1305_v4, 1  ;;  %26732 = vst [vmem:[#allocation14_spill] sm:$0xff] %v21599_v13  ;;  %v1337_v31 = vshll.u32 %v21046_v23, 16  ;;  %v1333_v33 = vshrl.u32 %v21045_v21, 16  ;;  %v1331_v35 = vrot.slane %v1329_v26, 1 }
  0x34   : > { %v21620_v32 = vsel %vm1136_vm1, %v1319_v24, %v1323_v25  ;;  %v1327_v36 = vor.u32 %v1325_v30, %v1323_v25  ;;  %v1341_v42 = vshrl.u32 %v21046_v23, 16  ;;  %v1345_v43 = vshll.u32 %v21047_v34, 16  ;;  %v21054_v23 = vld [vmem:[%s21481_s10 + $0x108] sm:$0xff]   ;;  %v21681_v25 = vld [vmem:[%s26213_s2 + $0x18] sm:$0xf]  ;;  %v21055_v30 = vld [vmem:[%s21481_s10 + $0x110] sm:$0xff]  }
  0x35   : > { %v1311_v22 = vor.u32 %v1309_v14, %v1307_v10  ;;  %26735 = vst [vmem:[#allocation17_spill] sm:$0xff] %v21620_v32  ;;  %v1339_v37 = vrot.slane %v1337_v31, 1  ;;  %v1335_v40 = vor.u32 %v1333_v33, %v1331_v35  ;;  %v1349_v45 = vshrl.u32 %v21047_v34, 16  ;;  %20992 = vmatprep.subr.msk.bf16.mxu0 %vm2374_vm0, %v21681_v25 }
  0x36   : > { %v21631_v44 = vsel %vm1136_vm1, %v1327_v36, %v1331_v35  ;;  %v1353_v46 = vshll.u32 %v21048_v38, 16  ;;  %v1347_v49 = vrot.slane %v1345_v43, 1  ;;  %v1357_v56 = vshrl.u32 %v21048_v38, 16  ;;  %v21056_v36 = vld [vmem:[%s21481_s10 + $0x118] sm:$0xff]  }
  0x37   : > { %17200 = vmatmul.mubr.msk.bf16.gmra.mrb[12].mxu1 %vm2037_vm2, %v1204_v2  ;;  %v1301_v2 = vshrl.u32 %v21041_v57, 16  ;;  %v21615_v28 = vsel %vm1136_vm1, %v1311_v22, %v1315_v20  ;;  %26736 = vst [vmem:[#allocation18_spill] sm:$0xff] %v21631_v44  ;;  %v21636_v47 = vsel %vm1136_vm1, %v1335_v40, %v1339_v37  ;;  %v1343_v50 = vor.u32 %v1341_v42, %v1339_v37 }
  0x38   : > { %17203 = vmatprep.mubr.msk.bf16.mxu1 %vm2037_vm2, %v21513_v5  ;;  %18104 = vmatmul.mubr.msk.bf16.gmra.mrb[12].mxu0 %vm2037_vm2, %v21536_v27  ;;  %26734 = vst [vmem:[#allocation16_spill] sm:$0xff] %v21615_v28  ;;  %26737 = vst [vmem:[#allocation19_spill] sm:$0xff] %v21636_v47  ;;  %v1355_v52 = vrot.slane %v1353_v46, 1  ;;  %v1351_v55 = vor.u32 %v1349_v45, %v1347_v49  ;;  %v1361_v57 = vshll.u32 %v21049_v48, 16  ;;  %v1365_v58 = vshrl.u32 %v21049_v48, 16 }
  0x39   : > { %18107 = vmatprep.mubr.msk.bf16.mxu0 %vm2037_vm2, %v21540_v29  ;;  %v1303_v9 = vor.u32 %v1301_v2, %v1299_v6  ;;  %v21647_v59 = vsel %vm1136_vm1, %v1343_v50, %v1347_v49  ;;  %v1369_v60 = vshll.u32 %v21050_v54, 16  ;;  %v1377_v7 = vshll.u32 %v21051_v61, 16 }
  0x3a   : > { %26738 = vst [vmem:[#allocation20_spill] sm:$0xff] %v21647_v59  ;;  %v21653_v62 = vsel %vm1136_vm1, %v1351_v55, %v1355_v52  ;;  %v1363_v2 = vrot.slane %v1361_v57, 1  ;;  %v1359_v4 = vor.u32 %v1357_v56, %v1355_v52  ;;  %v1381_v18 = vshrl.u32 %v21051_v61, 16  ;;  %v21058_v57 = vld [vmem:[%s21481_s10 + $0x128] sm:$0xff]  }
  0x3b   : > { %v21604_v16 = vsel %vm1136_vm1, %v1303_v9, %v1307_v10  ;;  %26739 = vst [vmem:[#allocation21_spill] sm:$0xff] %v21653_v62  ;;  %v1371_v6 = vrot.slane %v1369_v60, 1  ;;  %v1373_v9 = vshrl.u32 %v21050_v54, 16  ;;  %v1385_v10 = vshll.u32 %v21052_v0, 16  ;;  %v21057_v54 = vld [vmem:[%s21481_s10 + $0x120] sm:$0xff]  }
  0x3c   : > { %26733 = vst [vmem:[#allocation15_spill] sm:$0xff] %v21604_v16  ;;  %v1367_v8 = vor.u32 %v1365_v58, %v1363_v2  ;;  %v21664_v12 = vsel %vm1136_vm1, %v1359_v4, %v1363_v2  ;;  %v1379_v14 = vrot.slane %v1377_v7, 1  ;;  %v1389_v21 = vshrl.u32 %v21052_v0, 16 }
  0x3d   : > { %26740 = vst [vmem:[#allocation22_spill] sm:$0xff] %v21664_v12  ;;  %v1387_v20 = vrot.slane %v1385_v10, 1  ;;  %v1393_v22 = vshll.u32 %v21053_v11, 16  ;;  %v1375_v24 = vor.u32 %v1373_v9, %v1371_v6  ;;  %v1397_v33 = vshrl.u32 %v21053_v11, 16 }
  0x3e   : > { %v21669_v19 = vsel %vm1136_vm1, %v1367_v8, %v1371_v6  ;;  %v1383_v26 = vor.u32 %v1381_v18, %v1379_v14  ;;  %v1401_v34 = vshll.u32 %v21054_v23, 16  ;;  %v1405_v38 = vshrl.u32 %v21054_v23, 16  ;;  %v21059_v8 = vld [vmem:[%s21481_s10 + $0x130] sm:$0xff]  }
  0x3f   : > { %17204 = vmatmul.mubr.msk.bf16.gmra.mrb[16].mxu1 %vm2037_vm2, %v21522_v15  ;;  %26741 = vst [vmem:[#allocation23_spill] sm:$0xff] %v21669_v19  ;;  %v21687_v31 = vsel %vm1136_vm1, %v1375_v24, %v1379_v14  ;;  %v1395_v37 = vrot.slane %v1393_v22, 1  ;;  %v1391_v40 = vor.u32 %v1389_v21, %v1387_v20  ;;  %v1409_v43 = vshll.u32 %v21055_v30, 16  ;;  %v21060_v14 = vld [vmem:[%s21481_s10 + $0x138] sm:$0xff]  }
  0x40   : > { %17207 = vmatprep.mubr.msk.bf16.mxu1 %vm2037_vm2, %v21526_v17  ;;  %18108 = vmatmul.mubr.msk.bf16.gmra.mrb[16].mxu0 %vm2037_vm2, %v21551_v39  ;;  %26742 = vst [vmem:[#allocation24_spill] sm:$0xff] %v21687_v31  ;;  %v21692_v35 = vsel %vm1136_vm1, %v1383_v26, %v1387_v20  ;;  %v1403_v42 = vrot.slane %v1401_v34, 1  ;;  %v1413_v48 = vshrl.u32 %v21055_v30, 16  ;;  %v1417_v49 = vshll.u32 %v21056_v36, 16  ;;  %v21061_v30 = vld [vmem:[%s21481_s10 + $0x140] sm:$0xff]  }
  0x41   : > { %18111 = vmatprep.mubr.msk.bf16.mxu0 %vm2037_vm2, %v21556_v41  ;;  %26743 = vst [vmem:[#allocation25_spill] sm:$0xff] %v21692_v35  ;;  %v1399_v45 = vor.u32 %v1397_v33, %v1395_v37  ;;  %v21702_v46 = vsel %vm1136_vm1, %v1391_v40, %v1395_v37  ;;  %v1411_v52 = vrot.slane %v1409_v43, 1  ;;  %v1425_v60 = vshll.u32 %v21057_v54, 16  ;;  %v21062_v37 = vld [vmem:[%s21481_s10 + $0x148] sm:$0xff]  }
  0x42   : > { %26744 = vst [vmem:[#allocation26_spill] sm:$0xff] %v21702_v46  ;;  %v1407_v55 = vor.u32 %v1405_v38, %v1403_v42  ;;  %v1419_v56 = vrot.slane %v1417_v49, 1  ;;  %v1421_v0 = vshrl.u32 %v21056_v36, 16  ;;  %v1429_v4 = vshrl.u32 %v21057_v54, 16 }
  0x43   : > { %v21707_v50 = vsel %vm1136_vm1, %v1399_v45, %v1403_v42  ;;  %v1415_v58 = vor.u32 %v1413_v48, %v1411_v52  ;;  %v1433_v6 = vshll.u32 %v21058_v57, 16  ;;  %v1427_v7 = vrot.slane %v1425_v60, 1 }
  0x44   : > { %26745 = vst [vmem:[#allocation27_spill] sm:$0xff] %v21707_v50  ;;  %v21718_v61 = vsel %vm1136_vm1, %v1407_v55, %v1411_v52  ;;  %v1423_v9 = vor.u32 %v1421_v0, %v1419_v56  ;;  %v1441_v18 = vshll.u32 %v21059_v8, 16  ;;  %v1437_v21 = vshrl.u32 %v21058_v57, 16  ;;  %v21063_v52 = vld [vmem:[%s21481_s10 + $0x150] sm:$0xff]   ;;  %v21064_v57 = vld [vmem:[%s21481_s10 + $0x158] sm:$0xff]  }
  0x45   : > { %26746 = vst [vmem:[#allocation28_spill] sm:$0xff] %v21718_v61  ;;  %v21723_v2 = vsel %vm1136_vm1, %v1415_v58, %v1419_v56  ;;  %v1431_v10 = vor.u32 %v1429_v4, %v1427_v7  ;;  %v1435_v11 = vrot.slane %v1433_v6, 1  ;;  %v1445_v23 = vshrl.u32 %v21059_v8, 16 }
  0x46   : > { %26747 = vst [vmem:[#allocation29_spill] sm:$0xff] %v21723_v2  ;;  %v21734_v20 = vsel %vm1136_vm1, %v1423_v9, %v1427_v7  ;;  %v1449_v24 = vshll.u32 %v21060_v14, 16  ;;  %v1443_v26 = vrot.slane %v1441_v18, 1  ;;  %v1457_v38 = vshll.u32 %v21061_v30, 16  ;;  %v21065_v9 = vld [vmem:[%s21481_s10 + $0x160] sm:$0xff]   ;;  %v21066_v18 = vld [vmem:[%s21481_s10 + $0x168] sm:$0xff]  }
  0x47   : > { %17208 = vmatmul.mubr.msk.bf16.gmra.mrb[20].mxu1 %vm2037_vm2, %v21536_v27  ;;  %26748 = vst [vmem:[#allocation30_spill] sm:$0xff] %v21734_v20  ;;  %v21739_v22 = vsel %vm1136_vm1, %v1431_v10, %v1435_v11  ;;  %v1439_v33 = vor.u32 %v1437_v21, %v1435_v11  ;;  %v1453_v42 = vshrl.u32 %v21060_v14, 16  ;;  %v1461_v45 = vshrl.u32 %v21061_v30, 16 }
  0x48   : > { %17211 = vmatprep.mubr.msk.bf16.mxu1 %vm2037_vm2, %v21540_v29  ;;  %18112 = vmatmul.mubr.msk.bf16.gmra.mrb[20].mxu0 %vm2037_vm2, %v21567_v51  ;;  %26749 = vst [vmem:[#allocation31_spill] sm:$0xff] %v21739_v22  ;;  %v1447_v34 = vor.u32 %v1445_v23, %v1443_v26  ;;  %v1451_v36 = vrot.slane %v1449_v24, 1  ;;  %v1465_v48 = vshll.u32 %v21062_v37, 16  ;;  %v1459_v49 = vrot.slane %v1457_v38, 1 }
  0x49   : > { %18115 = vmatprep.mubr.msk.bf16.mxu0 %vm2037_vm2, %v21572_v53  ;;  %v21750_v40 = vsel %vm1136_vm1, %v1439_v33, %v1443_v26  ;;  %v1473_v58 = vshll.u32 %v21063_v52, 16  ;;  %v1469_v0 = vshrl.u32 %v21062_v37, 16  ;;  %v1477_v6 = vshrl.u32 %v21063_v52, 16 }
  0x4a   : > { %26750 = vst [vmem:[#allocation32_spill] sm:$0xff] %v21750_v40  ;;  %v21755_v43 = vsel %vm1136_vm1, %v1447_v34, %v1451_v36  ;;  %v1455_v54 = vor.u32 %v1453_v42, %v1451_v36  ;;  %v1463_v55 = vor.u32 %v1461_v45, %v1459_v49  ;;  %v1467_v56 = vrot.slane %v1465_v48, 1  ;;  %v21067_v36 = vld [vmem:[%s21481_s10 + $0x170] sm:$0xff]   ;;  %v21068_v45 = vld [vmem:[%s21481_s10 + $0x178] sm:$0xff]  }
  0x4b   : > { %26751 = vst [vmem:[#allocation33_spill] sm:$0xff] %v21755_v43  ;;  %v1481_v7 = vshll.u32 %v21064_v57, 16  ;;  %v1475_v8 = vrot.slane %v1473_v58, 1  ;;  %v1489_v21 = vshll.u32 %v21065_v9, 16  ;;  %v1485_v24 = vshrl.u32 %v21064_v57, 16  ;;  %v21069_v58 = vld [vmem:[%s21481_s10 + $0x180] sm:$0xff]  }
  0x4c   : > { %v21766_v60 = vsel %vm1136_vm1, %v1455_v54, %v1459_v49  ;;  %v21771_v4 = vsel %vm1136_vm1, %v1463_v55, %v1467_v56  ;;  %v1471_v10 = vor.u32 %v1469_v0, %v1467_v56  ;;  %v1493_v30 = vshrl.u32 %v21065_v9, 16 }
  0x4d   : > { %26752 = vst [vmem:[#allocation34_spill] sm:$0xff] %v21766_v60  ;;  %26753 = vst [vmem:[#allocation35_spill] sm:$0xff] %v21771_v4  ;;  %v1479_v11 = vor.u32 %v1477_v6, %v1475_v8  ;;  %v1483_v14 = vrot.slane %v1481_v7, 1  ;;  %v1497_v33 = vshll.u32 %v21066_v18, 16  ;;  %v1491_v34 = vrot.slane %v1489_v21, 1 }
  0x4e   : > { %v21782_v23 = vsel %vm1136_vm1, %v1471_v10, %v1475_v8  ;;  %v1505_v48 = vshll.u32 %v21067_v36, 16  ;;  %v1501_v52 = vshrl.u32 %v21066_v18, 16  ;;  %v1509_v55 = vshrl.u32 %v21067_v36, 16  ;;  %v21070_v8 = vld [vmem:[%s21481_s10 + $0x188] sm:$0xff]  }
  0x4f   : > { %17212 = vmatmul.mubr.msk.bf16.gmra.mrb[24].mxu1 %vm2037_vm2, %v21551_v39  ;;  %26754 = vst [vmem:[#allocation36_spill] sm:$0xff] %v21782_v23  ;;  %v21787_v26 = vsel %vm1136_vm1, %v1479_v11, %v1483_v14  ;;  %v1487_v37 = vor.u32 %v1485_v24, %v1483_v14  ;;  %v1495_v38 = vor.u32 %v1493_v30, %v1491_v34  ;;  %v1499_v42 = vrot.slane %v1497_v33, 1  ;;  %v21071_v30 = vld [vmem:[%s21481_s10 + $0x190] sm:$0xff]   ;;  %v22276_v39 = vld [vmem:[%s21481_s10 + $0x298] sm:$0xff]  }
  0x50   : > { %17215 = vmatprep.mubr.msk.bf16.mxu1 %vm2037_vm2, %v21556_v41  ;;  %18116 = vmatmul.mubr.msk.bf16.gmra.mrb[24].mxu0 %vm2037_vm2, %v21583_v63  ;;  %26755 = vst [vmem:[#allocation37_spill] sm:$0xff] %v21787_v26  ;;  %v1513_v56 = vshll.u32 %v21068_v45, 16  ;;  %v1507_v57 = vrot.slane %v1505_v48, 1  ;;  %v1521_v9 = vshll.u32 %v21069_v58, 16  ;;  %v1517_v11 = vshrl.u32 %v21068_v45, 16  ;;  %v22266_v41 = vld [vmem:[%s21481_s10 + $0x290] sm:$0xff]  }
  0x51   : > { %18119 = vmatprep.mubr.msk.bf16.mxu0 %vm2037_vm2, %v21588_v1  ;;  %v21798_v49 = vsel %vm1136_vm1, %v1487_v37, %v1491_v34  ;;  %v21803_v54 = vsel %vm1136_vm1, %v1495_v38, %v1499_v42  ;;  %v1503_v0 = vor.u32 %v1501_v52, %v1499_v42  ;;  %v1525_v18 = vshrl.u32 %v21069_v58, 16  ;;  %v21072_v37 = vld [vmem:[%s21481_s10 + $0x198] sm:$0xff]  }
  0x52   : > { %26756 = vst [vmem:[#allocation38_spill] sm:$0xff] %v21798_v49  ;;  %26757 = vst [vmem:[#allocation39_spill] sm:$0xff] %v21803_v54  ;;  %v1511_v6 = vor.u32 %v1509_v55, %v1507_v57  ;;  %v1515_v7 = vrot.slane %v1513_v56, 1  ;;  %v1529_v21 = vshll.u32 %v21070_v8, 16  ;;  %v1523_v24 = vrot.slane %v1521_v9, 1 }
  0x53   : > { %v21814_v10 = vsel %vm1136_vm1, %v1503_v0, %v1507_v57  ;;  %v1537_v38 = vshll.u32 %v21071_v30, 16  ;;  %v1533_v45 = vshrl.u32 %v21070_v8, 16  ;;  %v1541_v52 = vshrl.u32 %v21071_v30, 16  ;;  %v21073_v57 = vld [vmem:[%s21481_s10 + $0x1a0] sm:$0xff]  }
  0x54   : > { %26758 = vst [vmem:[#allocation40_spill] sm:$0xff] %v21814_v10  ;;  %v21819_v14 = vsel %vm1136_vm1, %v1511_v6, %v1515_v7  ;;  %v1519_v33 = vor.u32 %v1517_v11, %v1515_v7  ;;  %v1527_v34 = vor.u32 %v1525_v18, %v1523_v24  ;;  %v1531_v36 = vrot.slane %v1529_v21, 1  ;;  %v21074_v7 = vld [vmem:[%s21481_s10 + $0x1a8] sm:$0xff]  }
  0x55   : > { %26759 = vst [vmem:[#allocation41_spill] sm:$0xff] %v21819_v14  ;;  %v1545_v55 = vshll.u32 %v21072_v37, 16  ;;  %v1539_v56 = vrot.slane %v1537_v38, 1  ;;  %v1553_v8 = vshll.u32 %v21073_v57, 16  ;;  %v1549_v11 = vshrl.u32 %v21072_v37, 16  ;;  %v21076_v38 = vld [vmem:[%s21481_s10 + $0x1b8] sm:$0xff]  }
  0x56   : > { %v21830_v42 = vsel %vm1136_vm1, %v1519_v33, %v1523_v24  ;;  %v21835_v48 = vsel %vm1136_vm1, %v1527_v34, %v1531_v36  ;;  %v1535_v58 = vor.u32 %v1533_v45, %v1531_v36  ;;  %v1557_v21 = vshrl.u32 %v21073_v57, 16  ;;  %v21075_v33 = vld [vmem:[%s21481_s10 + $0x1b0] sm:$0xff]  }
  0x57   : > { %17216 = vmatmul.mubr.msk.bf16.gmra.mrb[28].mxu1 %vm2037_vm2, %v21567_v51  ;;  %26760 = vst [vmem:[#allocation42_spill] sm:$0xff] %v21830_v42  ;;  %26761 = vst [vmem:[#allocation43_spill] sm:$0xff] %v21835_v48  ;;  %v1543_v0 = vor.u32 %v1541_v52, %v1539_v56  ;;  %v1547_v6 = vrot.slane %v1545_v55, 1  ;;  %v1561_v24 = vshll.u32 %v21074_v7, 16  ;;  %v1555_v30 = vrot.slane %v1553_v8, 1 }
  0x58   : > { %17219 = vmatprep.mubr.msk.bf16.mxu1 %vm2037_vm2, %v21572_v53  ;;  %18120 = vmatmul.mubr.msk.bf16.gmra.mrb[28].mxu0 %vm2037_vm2, %v21599_v13  ;;  %v21846_v9 = vsel %vm1136_vm1, %v1535_v58, %v1539_v56  ;;  %v1569_v45 = vshll.u32 %v21075_v33, 16  ;;  %v1565_v55 = vshrl.u32 %v21074_v7, 16  ;;  %v1573_v57 = vshrl.u32 %v21075_v33, 16 }
  0x59   : > { %18123 = vmatprep.mubr.msk.bf16.mxu0 %vm2037_vm2, %v21604_v16  ;;  %26762 = vst [vmem:[#allocation44_spill] sm:$0xff] %v21846_v9  ;;  %v21851_v18 = vsel %vm1136_vm1, %v1543_v0, %v1547_v6  ;;  %v1551_v34 = vor.u32 %v1549_v11, %v1547_v6  ;;  %v1559_v36 = vor.u32 %v1557_v21, %v1555_v30  ;;  %v1563_v37 = vrot.slane %v1561_v24, 1  ;;  %v21077_v6 = vld [vmem:[%s21481_s10 + $0x1c0] sm:$0xff]   ;;  %v21078_v21 = vld [vmem:[%s21481_s10 + $0x1c8] sm:$0xff]  }
  0x5a   : > { %26763 = vst [vmem:[#allocation45_spill] sm:$0xff] %v21851_v18  ;;  %v1577_v58 = vshll.u32 %v21076_v38, 16  ;;  %v1571_v0 = vrot.slane %v1569_v45, 1  ;;  %v1585_v24 = vshll.u32 %v21077_v6, 16  ;;  %v1581_v33 = vshrl.u32 %v21076_v38, 16 }
  0x5b   : > { %v21862_v52 = vsel %vm1136_vm1, %v1551_v34, %v1555_v30  ;;  %v21867_v56 = vsel %vm1136_vm1, %v1559_v36, %v1563_v37  ;;  %v1567_v7 = vor.u32 %v1565_v55, %v1563_v37  ;;  %v1589_v36 = vshrl.u32 %v21077_v6, 16  ;;  %v21079_v55 = vld [vmem:[%s21481_s10 + $0x1d0] sm:$0xff]  }
  0x5c   : > { %26764 = vst [vmem:[#allocation46_spill] sm:$0xff] %v21862_v52  ;;  %26765 = vst [vmem:[#allocation47_spill] sm:$0xff] %v21867_v56  ;;  %v1575_v8 = vor.u32 %v1573_v57, %v1571_v0  ;;  %v1579_v11 = vrot.slane %v1577_v58, 1  ;;  %v1593_v45 = vshll.u32 %v21078_v21, 16  ;;  %v1587_v37 = vrot.slane %v1585_v24, 1 }
  0x5d   : > { %v21878_v30 = vsel %vm1136_vm1, %v1567_v7, %v1571_v0  ;;  %v21080_v0 = vld [vmem:[%s21481_s10 + $0x1d8] sm:$0xff]   ;;  %v1601_v7 = vshll.u32 %v21079_v55, 16  ;;  %v1605_v24 = vshrl.u32 %v21079_v55, 16  ;;  %v1793_v29 = vshll.u32 %v22266_v41, 16 }
  0x5e   : > { %26766 = vst [vmem:[#allocation48_spill] sm:$0xff] %v21878_v30  ;;  %v21883_v34 = vsel %vm1136_vm1, %v1575_v8, %v1579_v11  ;;  %v1583_v38 = vor.u32 %v1581_v33, %v1579_v11  ;;  %v1591_v57 = vor.u32 %v1589_v36, %v1587_v37  ;;  %v1595_v58 = vrot.slane %v1593_v45, 1  ;;  %v21081_v33 = vld [vmem:[%s21481_s10 + $0x1e0] sm:$0xff]  }
  0x5f   : > { %17220 = vmatmul.mubr.msk.bf16.gmra.mrb[32].mxu1 %vm2037_vm2, %v21583_v63  ;;  %26767 = vst [vmem:[#allocation49_spill] sm:$0xff] %v21883_v34  ;;  %v1597_v8 = vshrl.u32 %v21078_v21, 16  ;;  %v1603_v11 = vrot.slane %v1601_v7, 1  ;;  %v1613_v55 = vshrl.u32 %v21080_v0, 16  ;;  %v1801_v27 = vshll.u32 %v22276_v39, 16 }
  0x60   : > { %17223 = vmatprep.mubr.msk.bf16.mxu1 %vm2037_vm2, %v21588_v1  ;;  %18124 = vmatmul.mubr.msk.bf16.gmra.mrb[32].mxu0 %vm2037_vm2, %v21615_v28  ;;  %v21894_v6 = vsel %vm1136_vm1, %v1583_v38, %v1587_v37  ;;  %v21899_v3 = vsel %vm1136_vm1, %v1591_v57, %v1595_v58  ;;  %v1617_v38 = vshll.u32 %v21081_v33, 16  ;;  %v22238_v1 = vld [vmem:[%s21481_s10 + $0x288] sm:$0xff]  }
  0x61   : > { %18127 = vmatprep.mubr.msk.bf16.mxu0 %vm2037_vm2, %v21620_v32  ;;  %26768 = vst [vmem:[#allocation50_spill] sm:$0xff] %v21894_v6  ;;  %26769 = vst [vmem:[#allocation51_spill] sm:$0xff] %v21899_v3  ;;  %v1599_v21 = vor.u32 %v1597_v8, %v1595_v58  ;;  %v1607_v36 = vor.u32 %v1605_v24, %v1603_v11  ;;  %v21145_v8 = vld [vmem:[%s21481_s10 + $0x28] sm:$0xff]   ;;  %v1785_v53 = vshll.u32 %v22238_v1, 16 }
  0x62   : > { %v1619_v58 = vrot.slane %v1617_v38, 1  ;;  %v4419_v24 = vrot.slane %v21145_v8, 1  ;;  %v21147_v38 = vld [vmem:[%s21481_s10 + $0x38] sm:$0xff]   ;;  %v1621_v8 = vshrl.u32 %v21081_v33, 16 }
  0x63   : > { %v21909_v37 = vsel %vm1136_vm1, %v1599_v21, %v1603_v11 }
  0x64   : > { %26770 = vst [vmem:[#allocation52_spill] sm:$0xff] %v21909_v37  ;;  %v1623_v33 = vor.u32 %v1621_v8, %v1619_v58  ;;  %v21085_v8 = vld [vmem:[%s21481_s10 + $0x200] sm:$0xff]  }
  0x67   : > { %17224 = vmatmul.mubr.msk.bf16.gmra.mrb[36].mxu1 %vm2037_vm2, %v21599_v13 }
  0x68   : > { %17227 = vmatprep.mubr.msk.bf16.mxu1 %vm2037_vm2, %v21604_v16  ;;  %18128 = vmatmul.mubr.msk.bf16.gmra.mrb[36].mxu0 %vm2037_vm2, %v21631_v44  ;;  %v22231_v16 = vld [vmem:[%s21481_s10 + $0x280] sm:$0xff]  }
  0x69   : > { %18131 = vmatprep.mubr.msk.bf16.mxu0 %vm2037_vm2, %v21636_v47  ;;  %v1781_v63 = vshrl.u32 %v22231_v16, 16 }
  0x6f   : > { %17228 = vmatmul.mubr.msk.bf16.gmra.mrb[40].mxu1 %vm2037_vm2, %v21615_v28 }
  0x70   : > { %17231 = vmatprep.mubr.msk.bf16.mxu1 %vm2037_vm2, %v21620_v32  ;;  %18132 = vmatmul.mubr.msk.bf16.gmra.mrb[40].mxu0 %vm2037_vm2, %v21647_v59 }
  0x71   : > { %18135 = vmatprep.mubr.msk.bf16.mxu0 %vm2037_vm2, %v21653_v62 }
  0x77   : > { %17232 = vmatmul.mubr.msk.bf16.gmra.mrb[44].mxu1 %vm2037_vm2, %v21631_v44 }
  0x78   : > { %17235 = vmatprep.mubr.msk.bf16.mxu1 %vm2037_vm2, %v21636_v47  ;;  %18136 = vmatmul.mubr.msk.bf16.gmra.mrb[44].mxu0 %vm2037_vm2, %v21664_v12 }
  0x79   : > { %18139 = vmatprep.mubr.msk.bf16.mxu0 %vm2037_vm2, %v21669_v19 }
  0x7f   : > { %17236 = vmatmul.mubr.msk.bf16.gmra.mrb[48].mxu1 %vm2037_vm2, %v21647_v59 }
  0x80   : > { %17239 = vmatprep.mubr.msk.bf16.mxu1 %vm2037_vm2, %v21653_v62  ;;  %18140 = vmatmul.mubr.msk.bf16.gmra.mrb[48].mxu0 %vm2037_vm2, %v21687_v31  ;;  %v22193_v62 = vld [vmem:[%s21481_s10 + $0x270] sm:$0xff]  }
  0x81   : > { %18143 = vmatprep.mubr.msk.bf16.mxu0 %vm2037_vm2, %v21692_v35  ;;  %v1765_v44 = vshrl.u32 %v22193_v62, 16 }
  0x87   : > { %17240 = vmatmul.mubr.msk.bf16.gmra.mrb[52].mxu1 %vm2037_vm2, %v21664_v12 }
  0x88   : > { %17243 = vmatprep.mubr.msk.bf16.mxu1 %vm2037_vm2, %v21669_v19  ;;  %18144 = vmatmul.mubr.msk.bf16.gmra.mrb[52].mxu0 %vm2037_vm2, %v21702_v46 }
  0x89   : > { %18147 = vmatprep.mubr.msk.bf16.mxu0 %vm2037_vm2, %v21707_v50 }
  0x8f   : > { %17244 = vmatmul.mubr.msk.bf16.gmra.mrb[56].mxu1 %vm2037_vm2, %v21687_v31 }
  0x90   : > { %17247 = vmatprep.mubr.msk.bf16.mxu1 %vm2037_vm2, %v21692_v35  ;;  %18148 = vmatmul.mubr.msk.bf16.gmra.mrb[56].mxu0 %vm2037_vm2, %v21718_v61 }
  0x91   : > { %18151 = vmatprep.mubr.msk.bf16.mxu0 %vm2037_vm2, %v21723_v2 }
  0x97   : > { %17248 = vmatmul.mubr.msk.bf16.gmra.mrb[60].mxu1 %vm2037_vm2, %v21702_v46 }
  0x98   : > { %17251 = vmatprep.mubr.msk.bf16.mxu1 %vm2037_vm2, %v21707_v50  ;;  %18152 = vmatmul.mubr.msk.bf16.gmra.mrb[60].mxu0 %vm2037_vm2, %v21734_v20  ;;  %v22155_v50 = vld [vmem:[%s21481_s10 + $0x260] sm:$0xff]  }
  0x99   : > { %18155 = vmatprep.mubr.msk.bf16.mxu0 %vm2037_vm2, %v21739_v22  ;;  %v1749_v31 = vshrl.u32 %v22155_v50, 16 }
  0x9f   : > { %17252 = vmatmul.mubr.msk.bf16.gmra.mrb[64].mxu1 %vm2037_vm2, %v21718_v61 }
  0xa0   : > { %17255 = vmatprep.mubr.msk.bf16.mxu1 %vm2037_vm2, %v21723_v2  ;;  %18156 = vmatmul.mubr.msk.bf16.gmra.mrb[64].mxu0 %vm2037_vm2, %v21750_v40 }
  0xa1   : > { %18159 = vmatprep.mubr.msk.bf16.mxu0 %vm2037_vm2, %v21755_v43 }
  0xa7   : > { %17256 = vmatmul.mubr.msk.bf16.gmra.mrb[68].mxu1 %vm2037_vm2, %v21734_v20 }
  0xa8   : > { %17259 = vmatprep.mubr.msk.bf16.mxu1 %vm2037_vm2, %v21739_v22  ;;  %18160 = vmatmul.mubr.msk.bf16.gmra.mrb[68].mxu0 %vm2037_vm2, %v21766_v60 }
  0xa9   : > { %18163 = vmatprep.mubr.msk.bf16.mxu0 %vm2037_vm2, %v21771_v4 }
  0xaf   : > { %17260 = vmatmul.mubr.msk.bf16.gmra.mrb[72].mxu1 %vm2037_vm2, %v21750_v40 }
  0xb0   : > { %17263 = vmatprep.mubr.msk.bf16.mxu1 %vm2037_vm2, %v21755_v43  ;;  %18164 = vmatmul.mubr.msk.bf16.gmra.mrb[72].mxu0 %vm2037_vm2, %v21782_v23 }
  0xb1   : > { %18167 = vmatprep.mubr.msk.bf16.mxu0 %vm2037_vm2, %v21787_v26 }
  0xb7   : > { %17264 = vmatmul.mubr.msk.bf16.gmra.mrb[76].mxu1 %vm2037_vm2, %v21766_v60 }
  0xb8   : > { %17267 = vmatprep.mubr.msk.bf16.mxu1 %vm2037_vm2, %v21771_v4  ;;  %18168 = vmatmul.mubr.msk.bf16.gmra.mrb[76].mxu0 %vm2037_vm2, %v21798_v49 }
  0xb9   : > { %18171 = vmatprep.mubr.msk.bf16.mxu0 %vm2037_vm2, %v21803_v54 }
  0xbf   : > { %17268 = vmatmul.mubr.msk.bf16.gmra.mrb[80].mxu1 %vm2037_vm2, %v21782_v23 }
  0xc0   : > { %17271 = vmatprep.mubr.msk.bf16.mxu1 %vm2037_vm2, %v21787_v26  ;;  %18172 = vmatmul.mubr.msk.bf16.gmra.mrb[80].mxu0 %vm2037_vm2, %v21814_v10 }
  0xc1   : > { %18175 = vmatprep.mubr.msk.bf16.mxu0 %vm2037_vm2, %v21819_v14 }
  0xc7   : > { %17272 = vmatmul.mubr.msk.bf16.gmra.mrb[84].mxu1 %vm2037_vm2, %v21798_v49 }
  0xc8   : > { %17275 = vmatprep.mubr.msk.bf16.mxu1 %vm2037_vm2, %v21803_v54  ;;  %18176 = vmatmul.mubr.msk.bf16.gmra.mrb[84].mxu0 %vm2037_vm2, %v21830_v42 }
  0xc9   : > { %18179 = vmatprep.mubr.msk.bf16.mxu0 %vm2037_vm2, %v21835_v48 }
  0xcf   : > { %17276 = vmatmul.mubr.msk.bf16.gmra.mrb[88].mxu1 %vm2037_vm2, %v21814_v10 }
  0xd0   : > { %17279 = vmatprep.mubr.msk.bf16.mxu1 %vm2037_vm2, %v21819_v14  ;;  %18180 = vmatmul.mubr.msk.bf16.gmra.mrb[88].mxu0 %vm2037_vm2, %v21846_v9 }
  0xd1   : > { %18183 = vmatprep.mubr.msk.bf16.mxu0 %vm2037_vm2, %v21851_v18 }
  0xd7   : > { %17280 = vmatmul.mubr.msk.bf16.gmra.mrb[92].mxu1 %vm2037_vm2, %v21830_v42 }
  0xd8   : > { %17283 = vmatprep.mubr.msk.bf16.mxu1 %vm2037_vm2, %v21835_v48  ;;  %18184 = vmatmul.mubr.msk.bf16.gmra.mrb[92].mxu0 %vm2037_vm2, %v21862_v52 }
  0xd9   : > { %18187 = vmatprep.mubr.msk.bf16.mxu0 %vm2037_vm2, %v21867_v56 }
  0xdf   : > { %17284 = vmatmul.mubr.msk.bf16.gmra.mrb[96].mxu1 %vm2037_vm2, %v21846_v9 }
  0xe0   : > { %17287 = vmatprep.mubr.msk.bf16.mxu1 %vm2037_vm2, %v21851_v18  ;;  %18188 = vmatmul.mubr.msk.bf16.gmra.mrb[96].mxu0 %vm2037_vm2, %v21878_v30  ;;  %v1609_v18 = vshll.u32 %v21080_v0, 16  ;;  %v21923_v0 = vld [vmem:[%s21481_s10 + $0x20] sm:$0xff]  }
  0xe1   : > { %18191 = vmatprep.mubr.msk.bf16.mxu0 %vm2037_vm2, %v21883_v34  ;;  %26772 = vst [vmem:[#allocation54_spill] sm:$0xff] %v21923_v0  ;;  %v26219_v7 = vrot.slane %v21923_v0, 1 }
  0xe2   : > { %v1611_v45 = vrot.slane %v1609_v18, 1 }
  0xe3   : > { %v21935_v21 = vsel %vm4409_vm3, %v26219_v7, %v4419_v24 }
  0xe4   : > { %v21914_v57 = vsel %vm1136_vm1, %v1607_v36, %v1611_v45  ;;  %v1615_v18 = vor.u32 %v1613_v55, %v1611_v45  ;;  %26774 = vst [vmem:[#allocation56_spill] sm:$0xff] %v21935_v21  ;;  %v21082_v36 = vld [vmem:[%s21481_s10 + $0x1e8] sm:$0xff]   ;;  %v21146_v45 = vld [vmem:[%s21481_s10 + $0x30] sm:$0xff]  }
  0xe5   : > { %26771 = vst [vmem:[#allocation53_spill] sm:$0xff] %v21914_v57  ;;  %v4421_v55 = vrot.slane %v21146_v45, 1  ;;  %v1625_v7 = vshll.u32 %v21082_v36, 16 }
  0xe6   : > { %v21928_v11 = vsel %vm1136_vm1, %v1615_v18, %v1619_v58  ;;  %v4423_v18 = vrot.slane %v21147_v38, 1  ;;  %v21148_v38 = vld [vmem:[%s21481_s10 + $0x40] sm:$0xff]  }
  0xe7   : > { %17288 = vmatmul.mubr.msk.bf16.gmra.mrb[100].mxu1 %vm2037_vm2, %v21862_v52  ;;  %26773 = vst [vmem:[#allocation55_spill] sm:$0xff] %v21928_v11  ;;  %v1627_v45 = vrot.slane %v1625_v7, 1  ;;  %v1629_v52 = vshrl.u32 %v21082_v36, 16 }
  0xe8   : > { %17291 = vmatprep.mubr.msk.bf16.mxu1 %vm2037_vm2, %v21867_v56  ;;  %18192 = vmatmul.mubr.msk.bf16.gmra.mrb[100].mxu0 %vm2037_vm2, %v21894_v6 }
  0xe9   : > { %18195 = vmatprep.mubr.msk.bf16.mxu0 %vm2037_vm2, %v21899_v3  ;;  %v1631_v36 = vor.u32 %v1629_v52, %v1627_v45 }
  0xef   : > { %17292 = vmatmul.mubr.msk.bf16.gmra.mrb[104].mxu1 %vm2037_vm2, %v21878_v30  ;;  %v21083_v30 = vld [vmem:[%s21481_s10 + $0x1f0] sm:$0xff]  }
  0xf0   : > { %17295 = vmatprep.mubr.msk.bf16.mxu1 %vm2037_vm2, %v21883_v34  ;;  %18196 = vmatmul.mubr.msk.bf16.gmra.mrb[104].mxu0 %vm2037_vm2, %v21909_v37  ;;  %v21954_v34 = vsel %vm4409_vm3, %v4421_v55, %v4423_v18  ;;  %v1633_v56 = vshll.u32 %v21083_v30, 16  ;;  %v1637_v9 = vshrl.u32 %v21083_v30, 16 }
  0xf1   : > { %18199 = vmatprep.mubr.msk.bf16.mxu0 %vm2037_vm2, %v21914_v57  ;;  %26776 = vst [vmem:[#allocation58_spill] sm:$0xff] %v21954_v34 }
  0xf7   : > { %17296 = vmatmul.mubr.msk.bf16.gmra.mrb[108].mxu1 %vm2037_vm2, %v21894_v6  ;;  %v21947_v6 = vsel %vm4409_vm3, %v4419_v24, %v4421_v55  ;;  %v21084_v24 = vld [vmem:[%s21481_s10 + $0x1f8] sm:$0xff]  }
  0xf8   : > { %17299 = vmatprep.mubr.msk.bf16.mxu1 %vm2037_vm2, %v21899_v3  ;;  %18200 = vmatmul.mubr.msk.bf16.gmra.mrb[108].mxu0 %vm2037_vm2, %v21928_v11  ;;  %26775 = vst [vmem:[#allocation57_spill] sm:$0xff] %v21947_v6  ;;  %v9516_v3 = vsel %vm2374_vm0, %v21681_v25, 0  ;;  %v4425_v25 = vrot.slane %v21148_v38, 1  ;;  %v1641_v58 = vshll.u32 %v21084_v24, 16  ;;  %v21086_v38 = vld [vmem:[%s21481_s10 + $0x208] sm:$0xff]   ;;  %v1645_v52 = vshrl.u32 %v21084_v24, 16 }
  0xf9   : > { %18317 = vmatprep.mubr.msk.bf16.mxu0 %vm2037_vm2, %v21935_v21 }
  0xfa   : > { %v21970_v7 = vsel %vm4409_vm3, %v4423_v18, %v4425_v25  ;;  %v21150_v18 = vld [vmem:[%s21481_s10 + $0x50] sm:$0xff]  }
  0xfb   : > { %26778 = vst [vmem:[#allocation60_spill] sm:$0xff] %v21970_v7 }
  0xff   : > { %17300 = vmatmul.mubr.msk.bf16.gmra.mrb[112].mxu1 %vm2037_vm2, %v21909_v37  ;;  %v21149_v37 = vld [vmem:[%s21481_s10 + $0x48] sm:$0xff]  }
 0x100   : > { %17303 = vmatprep.mubr.msk.bf16.mxu1 %vm2037_vm2, %v21914_v57  ;;  %18318 = vmatmul.mubr.msk.bf16.vlgmr.msra.gmra.mrb[0].mxu0 %vm2037_vm2, %v21947_v6  ;;  %v4427_v55 = vrot.slane %v21149_v37, 1  ;;  %v21967_v57 = vsel %vm1136_vm1, %v1623_v33, %v1627_v45  ;;  %v1635_v37 = vrot.slane %v1633_v56, 1  ;;  %v1643_v33 = vrot.slane %v1641_v58, 1 }
 0x101   : > { %18542 = vmatpush3.bf16.msra.mxu0 %v9516_v3  ;;  %18321 = vmatprep.mubr.msk.bf16.mxu0 %vm2037_vm2, %v21954_v34  ;;  %26777 = vst [vmem:[#allocation59_spill] sm:$0xff] %v21967_v57  ;;  %v1649_v56 = vshll.u32 %v21085_v8, 16  ;;  %v1657_v58 = vshll.u32 %v21086_v38, 16  ;;  %v22511_v34 = vld [vmem:[%s21481_s10 + $0x2f0] sm:$0xff]  }
 0x102   : > { %v21975_v3 = vsel %vm4409_vm3, %v4425_v25, %v4427_v55  ;;  %v1639_v30 = vor.u32 %v1637_v9, %v1635_v37  ;;  %v21151_v25 = vld [vmem:[%s21481_s10 + $0x58] sm:$0xff]   ;;  %v21988_v42 = vsel %vm1136_vm1, %v1631_v36, %v1635_v37  ;;  %v1653_v9 = vshrl.u32 %v21085_v8, 16  ;;  %v21087_v37 = vld [vmem:[%s21481_s10 + $0x210] sm:$0xff]  }
 0x103   : > { %26779 = vst [vmem:[#allocation61_spill] sm:$0xff] %v21975_v3  ;;  %v4431_v48 = vrot.slane %v21151_v25, 1  ;;  %26780 = vst [vmem:[#allocation62_spill] sm:$0xff] %v21988_v42  ;;  %v1651_v25 = vrot.slane %v1649_v56, 1  ;;  %v1647_v24 = vor.u32 %v1645_v52, %v1643_v33  ;;  %v1659_v36 = vrot.slane %v1657_v58, 1 }
 0x104   : > { %v21991_v45 = vsel %vm1136_vm1, %v1639_v30, %v1643_v33  ;;  %v21088_v30 = vld [vmem:[%s21481_s10 + $0x218] sm:$0xff]   ;;  %v1665_v56 = vshll.u32 %v21087_v37, 16  ;;  %v1661_v33 = vshrl.u32 %v21086_v38, 16 }
 0x105   : > { %26781 = vst [vmem:[#allocation63_spill] sm:$0xff] %v21991_v45  ;;  %v1655_v8 = vor.u32 %v1653_v9, %v1651_v25  ;;  %v22012_v10 = vsel %vm1136_vm1, %v1647_v24, %v1651_v25  ;;  %v1669_v9 = vshrl.u32 %v21087_v37, 16  ;;  %v1673_v58 = vshll.u32 %v21088_v30, 16  ;;  %v21089_v25 = vld [vmem:[%s21481_s10 + $0x220] sm:$0xff]  }
 0x106   : > { %26784 = vst [vmem:[#allocation66_spill] sm:$0xff] %v22012_v10  ;;  %v1663_v38 = vor.u32 %v1661_v33, %v1659_v36  ;;  %v1681_v54 = vshll.u32 %v21089_v25, 16 }
 0x107   : > { %17304 = vmatmul.mubr.msk.bf16.gmra.mrb[116].mxu1 %vm2037_vm2, %v21928_v11  ;;  %v4429_v11 = vrot.slane %v21150_v18, 1  ;;  %v22015_v52 = vsel %vm1136_vm1, %v1655_v8, %v1659_v36  ;;  %v1675_v24 = vrot.slane %v1673_v58, 1  ;;  %v22031_v8 = vld [vmem:[%s21481_s10 + $0x228] sm:$0xff]   ;;  %v1677_v36 = vshrl.u32 %v21088_v30, 16 }
 0x108   : > { %17307 = vmatprep.mubr.msk.bf16.mxu1 %vm2037_vm2, %v21967_v57  ;;  %18322 = vmatmul.mubr.msk.bf16.gmra.mrb[4].mxu0 %vm2037_vm2, %v21970_v7  ;;  %26785 = vst [vmem:[#allocation67_spill] sm:$0xff] %v22015_v52  ;;  %v1689_v58 = vshll.u32 %v22031_v8, 16 }
 0x109   : > { %18325 = vmatprep.mubr.msk.bf16.mxu0 %vm2037_vm2, %v21975_v3  ;;  %v21994_v57 = vsel %vm4409_vm3, %v4427_v55, %v4429_v11  ;;  %v21999_v18 = vsel %vm4409_vm3, %v4429_v11, %v4431_v48  ;;  %v21152_v55 = vld [vmem:[%s21481_s10 + $0x60] sm:$0xff]   ;;  %v21153_v11 = vld [vmem:[%s21481_s10 + $0x68] sm:$0xff]   ;;  %v1679_v30 = vor.u32 %v1677_v36, %v1675_v24  ;;  %v1693_v36 = vshrl.u32 %v22031_v8, 16 }
 0x10a   : > { %26782 = vst [vmem:[#allocation64_spill] sm:$0xff] %v21994_v57  ;;  %26783 = vst [vmem:[#allocation65_spill] sm:$0xff] %v21999_v18  ;;  %v4435_v14 = vrot.slane %v21153_v11, 1  ;;  %v1667_v11 = vrot.slane %v1665_v56, 1 }
 0x10c   : > { %v1671_v37 = vor.u32 %v1669_v9, %v1667_v11  ;;  %v1685_v9 = vshrl.u32 %v21089_v25, 16 }
 0x10e   : > { %v22041_v33 = vsel %vm1136_vm1, %v1671_v37, %v1675_v24  ;;  %v1691_v37 = vrot.slane %v1689_v58, 1 }
 0x10f   : > { %17308 = vmatmul.mubr.msk.bf16.gmra.mrb[120].mxu1 %vm2037_vm2, %v21988_v42  ;;  %v4433_v42 = vrot.slane %v21152_v55, 1  ;;  %26789 = vst [vmem:[#allocation71_spill] sm:$0xff] %v22041_v33 }
 0x110   : > { %17311 = vmatprep.mubr.msk.bf16.mxu1 %vm2037_vm2, %v21991_v45  ;;  %18326 = vmatmul.mubr.msk.bf16.gmra.mrb[8].mxu0 %vm2037_vm2, %v21994_v57 }
 0x111   : > { %18329 = vmatprep.mubr.msk.bf16.mxu0 %vm2037_vm2, %v21999_v18  ;;  %v22018_v45 = vsel %vm4409_vm3, %v4431_v48, %v4433_v42  ;;  %v22023_v55 = vsel %vm4409_vm3, %v4433_v42, %v4435_v14  ;;  %v21154_v48 = vld [vmem:[%s21481_s10 + $0x70] sm:$0xff]   ;;  %v22473_v18 = vld [vmem:[%s21481_s10 + $0x2e0] sm:$0xff]  }
 0x112   : > { %26786 = vst [vmem:[#allocation68_spill] sm:$0xff] %v22018_v45  ;;  %26787 = vst [vmem:[#allocation69_spill] sm:$0xff] %v22023_v55  ;;  %v4437_v42 = vrot.slane %v21154_v48, 1  ;;  %v21156_v48 = vld [vmem:[%s21481_s10 + $0x80] sm:$0xff]  }
 0x114   : > { %v22045_v49 = vsel %vm4409_vm3, %v4435_v14, %v4437_v42  ;;  %v22060_v14 = vld [vmem:[%s21481_s10 + $0x238] sm:$0xff]  }
 0x115   : > { %26790 = vst [vmem:[#allocation72_spill] sm:$0xff] %v22045_v49 }
 0x117   : > { %17312 = vmatmul.mubr.msk.bf16.gmra.mrb[124].mxu1 %vm2037_vm2, %v22012_v10  ;;  %v21155_v10 = vld [vmem:[%s21481_s10 + $0x78] sm:$0xff]  }
 0x118   : > { %17315 = vmatprep.mubr.msk.bf16.mxu1 %vm2037_vm2, %v22015_v52  ;;  %18330 = vmatmul.mubr.msk.bf16.gmra.mrb[12].mxu0 %vm2037_vm2, %v22018_v45  ;;  %v4439_v56 = vrot.slane %v21155_v10, 1  ;;  %v22038_v52 = vsel %vm1136_vm1, %v1663_v38, %v1667_v11  ;;  %v1683_v11 = vrot.slane %v1681_v54, 1  ;;  %v22053_v38 = vld [vmem:[%s21481_s10 + $0x230] sm:$0xff]   ;;  %v21157_v54 = vld [vmem:[%s21481_s10 + $0x88] sm:$0xff]  }
 0x119   : > { %18333 = vmatprep.mubr.msk.bf16.mxu0 %vm2037_vm2, %v22023_v55  ;;  %26788 = vst [vmem:[#allocation70_spill] sm:$0xff] %v22038_v52  ;;  %v1697_v26 = vshll.u32 %v22053_v38, 16  ;;  %v1701_v58 = vshrl.u32 %v22053_v38, 16 }
 0x11a   : > { %v22050_v10 = vsel %vm4409_vm3, %v4437_v42, %v4439_v56  ;;  %v1687_v25 = vor.u32 %v1685_v9, %v1683_v11  ;;  %v4441_v42 = vrot.slane %v21156_v48, 1  ;;  %v22068_v24 = vsel %vm1136_vm1, %v1679_v30, %v1683_v11 }
 0x11b   : > { %26791 = vst [vmem:[#allocation73_spill] sm:$0xff] %v22050_v10  ;;  %26792 = vst [vmem:[#allocation74_spill] sm:$0xff] %v22068_v24  ;;  %v1699_v30 = vrot.slane %v1697_v26, 1  ;;  %v21159_v26 = vld [vmem:[%s21481_s10 + $0x98] sm:$0xff]  }
 0x11c   : > { %v22072_v9 = vsel %vm1136_vm1, %v1687_v25, %v1691_v37  ;;  %v22077_v48 = vsel %vm4409_vm3, %v4439_v56, %v4441_v42  ;;  %v1695_v25 = vor.u32 %v1693_v36, %v1691_v37  ;;  %v22092_v56 = vld [vmem:[%s21481_s10 + $0x248] sm:$0xff]   ;;  %v4447_v60 = vrot.slane %v21159_v26, 1  ;;  %v22117_v26 = vld [vmem:[%s21481_s10 + $0x250] sm:$0xff]  }
 0x11d   : > { %26793 = vst [vmem:[#allocation75_spill] sm:$0xff] %v22072_v9  ;;  %26794 = vst [vmem:[#allocation76_spill] sm:$0xff] %v22077_v48  ;;  %v1703_v23 = vor.u32 %v1701_v58, %v1699_v30  ;;  %v1709_v36 = vshrl.u32 %v22060_v14, 16  ;;  %v1733_v20 = vshrl.u32 %v22117_v26, 16 }
 0x11e   : > { %v22100_v37 = vsel %vm1136_vm1, %v1695_v25, %v1699_v30 }
 0x11f   : > { %17316 = vmatmul.mubr.msk.bf16.gmra.mrb[128].mxu1 %vm2037_vm2, %v22038_v52  ;;  %v4443_v52 = vrot.slane %v21157_v54, 1  ;;  %v22085_v54 = vld [vmem:[%s21481_s10 + $0x240] sm:$0xff]   ;;  %26796 = vst [vmem:[#allocation78_spill] sm:$0xff] %v22100_v37 }
 0x120   : > { %17319 = vmatprep.mubr.msk.bf16.mxu1 %vm2037_vm2, %v22041_v33  ;;  %18334 = vmatmul.mubr.msk.bf16.gmra.mrb[16].mxu0 %vm2037_vm2, %v22045_v49  ;;  %v1705_v33 = vshll.u32 %v22060_v14, 16  ;;  %v1713_v43 = vshll.u32 %v22085_v54, 16  ;;  %v1717_v58 = vshrl.u32 %v22085_v54, 16 }
 0x121   : > { %18337 = vmatprep.mubr.msk.bf16.mxu0 %vm2037_vm2, %v22050_v10  ;;  %v22082_v11 = vsel %vm4409_vm3, %v4441_v42, %v4443_v52  ;;  %v21158_v42 = vld [vmem:[%s21481_s10 + $0x90] sm:$0xff]  }
 0x122   : > { %26795 = vst [vmem:[#allocation77_spill] sm:$0xff] %v22082_v11  ;;  %v1707_v4 = vrot.slane %v1705_v33, 1  ;;  %v1715_v25 = vrot.slane %v1713_v43, 1  ;;  %v22435_v10 = vld [vmem:[%s21481_s10 + $0x2d0] sm:$0xff]  }
 0x124   : > { %v22104_v33 = vsel %vm1136_vm1, %v1703_v23, %v1707_v4  ;;  %v1711_v23 = vor.u32 %v1709_v36, %v1707_v4  ;;  %v1719_v40 = vor.u32 %v1717_v58, %v1715_v25  ;;  %v1729_v4 = vshll.u32 %v22117_v26, 16 }
 0x125   : > { %26797 = vst [vmem:[#allocation79_spill] sm:$0xff] %v22104_v33 }
 0x126   : > { %v22138_v36 = vsel %vm1136_vm1, %v1711_v23, %v1715_v25  ;;  %v1731_v23 = vrot.slane %v1729_v4, 1 }
 0x127   : > { %17320 = vmatmul.mubr.msk.bf16.gmra.mrb[132].mxu1 %vm2037_vm2, %v22068_v24  ;;  %v4445_v24 = vrot.slane %v21158_v42, 1  ;;  %26800 = vst [vmem:[#allocation82_spill] sm:$0xff] %v22138_v36 }
 0x128   : > { %17323 = vmatprep.mubr.msk.bf16.mxu1 %vm2037_vm2, %v22072_v9  ;;  %18338 = vmatmul.mubr.msk.bf16.gmra.mrb[20].mxu0 %vm2037_vm2, %v22077_v48  ;;  %v1721_v9 = vshll.u32 %v22092_v56, 16  ;;  %v1735_v46 = vor.u32 %v1733_v20, %v1731_v23 }
 0x129   : > { %18341 = vmatprep.mubr.msk.bf16.mxu0 %vm2037_vm2, %v22082_v11  ;;  %v22109_v42 = vsel %vm4409_vm3, %v4443_v52, %v4445_v24  ;;  %v22114_v30 = vsel %vm4409_vm3, %v4445_v24, %v4447_v60  ;;  %v22124_v52 = vld [vmem:[%s21481_s10 + $0x258] sm:$0xff]   ;;  %v22129_v24 = vld [vmem:[%s21481_s10 + $0xa0] sm:$0xff]  }
 0x12a   : > { %26798 = vst [vmem:[#allocation80_spill] sm:$0xff] %v22109_v42  ;;  %26799 = vst [vmem:[#allocation81_spill] sm:$0xff] %v22114_v30  ;;  %v1723_v22 = vrot.slane %v1721_v9, 1  ;;  %v4449_v43 = vrot.slane %v22129_v24, 1  ;;  %v1725_v9 = vshrl.u32 %v22092_v56, 16  ;;  %v1737_v2 = vshll.u32 %v22124_v52, 16 }
 0x12c   : > { %v22142_v58 = vsel %vm1136_vm1, %v1719_v40, %v1723_v22  ;;  %v22147_v61 = vsel %vm4409_vm3, %v4447_v60, %v4449_v43  ;;  %v1727_v40 = vor.u32 %v1725_v9, %v1723_v22  ;;  %v1739_v35 = vrot.slane %v1737_v2, 1  ;;  %v22162_v60 = vld [vmem:[%s21481_s10 + $0x268] sm:$0xff]  }
 0x12d   : > { %26801 = vst [vmem:[#allocation83_spill] sm:$0xff] %v22142_v58  ;;  %26802 = vst [vmem:[#allocation84_spill] sm:$0xff] %v22147_v61  ;;  %v1745_v22 = vshll.u32 %v22155_v50, 16  ;;  %v1741_v2 = vshrl.u32 %v22124_v52, 16  ;;  %v1753_v19 = vshll.u32 %v22162_v60, 16 }
 0x12e   : > { %v22176_v20 = vsel %vm1136_vm1, %v1727_v40, %v1731_v23  ;;  %v22180_v9 = vsel %vm1136_vm1, %v1735_v46, %v1739_v35 }
 0x12f   : > { %17324 = vmatmul.mubr.msk.bf16.gmra.mrb[136].mxu1 %vm2037_vm2, %v22100_v37  ;;  %v22133_v37 = vld [vmem:[%s21481_s10 + $0xa8] sm:$0xff]   ;;  %26804 = vst [vmem:[#allocation86_spill] sm:$0xff] %v22176_v20  ;;  %26805 = vst [vmem:[#allocation87_spill] sm:$0xff] %v22180_v9  ;;  %v1747_v40 = vrot.slane %v1745_v22, 1  ;;  %v1743_v46 = vor.u32 %v1741_v2, %v1739_v35  ;;  %v1755_v47 = vrot.slane %v1753_v19, 1  ;;  %v1761_v35 = vshll.u32 %v22193_v62, 16 }
 0x130   : > { %17327 = vmatprep.mubr.msk.bf16.mxu1 %vm2037_vm2, %v22104_v33  ;;  %18342 = vmatmul.mubr.msk.bf16.gmra.mrb[24].mxu0 %vm2037_vm2, %v22109_v42  ;;  %v4451_v33 = vrot.slane %v22133_v37, 1  ;;  %v1757_v19 = vshrl.u32 %v22162_v60, 16 }
 0x131   : > { %18345 = vmatprep.mubr.msk.bf16.mxu0 %vm2037_vm2, %v22114_v30  ;;  %v1751_v59 = vor.u32 %v1749_v31, %v1747_v40  ;;  %v22214_v31 = vsel %vm1136_vm1, %v1743_v46, %v1747_v40  ;;  %v1763_v46 = vrot.slane %v1761_v35, 1  ;;  %v22397_v30 = vld [vmem:[%s21481_s10 + $0x2c0] sm:$0xff]  }
 0x132   : > { %v22152_v25 = vsel %vm4409_vm3, %v4449_v43, %v4451_v33  ;;  %v22167_v43 = vld [vmem:[%s21481_s10 + $0xb0] sm:$0xff]   ;;  %26808 = vst [vmem:[#allocation90_spill] sm:$0xff] %v22214_v31 }
 0x133   : > { %26803 = vst [vmem:[#allocation85_spill] sm:$0xff] %v22152_v25  ;;  %v4453_v4 = vrot.slane %v22167_v43, 1  ;;  %v22218_v2 = vsel %vm1136_vm1, %v1751_v59, %v1755_v47  ;;  %v1759_v59 = vor.u32 %v1757_v19, %v1755_v47  ;;  %v1767_v13 = vor.u32 %v1765_v44, %v1763_v46 }
 0x134   : > { %26809 = vst [vmem:[#allocation91_spill] sm:$0xff] %v22218_v2  ;;  %v1777_v19 = vshll.u32 %v22231_v16, 16 }
 0x135   : > { %v22185_v12 = vsel %vm4409_vm3, %v4451_v33, %v4453_v4  ;;  %v22200_v33 = vld [vmem:[%s21481_s10 + $0x278] sm:$0xff]  }
 0x136   : > { %26806 = vst [vmem:[#allocation88_spill] sm:$0xff] %v22185_v12  ;;  %v1769_v32 = vshll.u32 %v22200_v33, 16  ;;  %v1773_v44 = vshrl.u32 %v22200_v33, 16 }
 0x137   : > { %17328 = vmatmul.mubr.msk.bf16.gmra.mrb[140].mxu1 %vm2037_vm2, %v22138_v36  ;;  %v22171_v36 = vld [vmem:[%s21481_s10 + $0xb8] sm:$0xff]  }
 0x138   : > { %17331 = vmatprep.mubr.msk.bf16.mxu1 %vm2037_vm2, %v22142_v58  ;;  %18346 = vmatmul.mubr.msk.bf16.gmra.mrb[28].mxu0 %vm2037_vm2, %v22147_v61  ;;  %v4455_v58 = vrot.slane %v22171_v36, 1 }
 0x139   : > { %18349 = vmatprep.mubr.msk.bf16.mxu0 %vm2037_vm2, %v22152_v25 }
 0x13a   : > { %v22190_v23 = vsel %vm4409_vm3, %v4453_v4, %v4455_v58  ;;  %v22205_v4 = vld [vmem:[%s21481_s10 + $0xc0] sm:$0xff]  }
 0x13b   : > { %26807 = vst [vmem:[#allocation89_spill] sm:$0xff] %v22190_v23  ;;  %v4457_v22 = vrot.slane %v22205_v4, 1 }
 0x13d   : > { %v22223_v28 = vsel %vm4409_vm3, %v4455_v58, %v4457_v22  ;;  %v1771_v58 = vrot.slane %v1769_v32, 1  ;;  %v22253_v32 = vsel %vm1136_vm1, %v1759_v59, %v1763_v46 }
 0x13e   : > { %26810 = vst [vmem:[#allocation92_spill] sm:$0xff] %v22223_v28  ;;  %26812 = vst [vmem:[#allocation94_spill] sm:$0xff] %v22253_v32 }
 0x13f   : > { %17332 = vmatmul.mubr.msk.bf16.gmra.mrb[144].mxu1 %vm2037_vm2, %v22176_v20  ;;  %v22209_v20 = vld [vmem:[%s21481_s10 + $0xc8] sm:$0xff]   ;;  %v1775_v59 = vor.u32 %v1773_v44, %v1771_v58 }
 0x140   : > { %17335 = vmatprep.mubr.msk.bf16.mxu1 %vm2037_vm2, %v22180_v9  ;;  %18350 = vmatmul.mubr.msk.bf16.gmra.mrb[32].mxu0 %vm2037_vm2, %v22185_v12  ;;  %v4459_v9 = vrot.slane %v22209_v20, 1 }
 0x141   : > { %18353 = vmatprep.mubr.msk.bf16.mxu0 %vm2037_vm2, %v22190_v23  ;;  %v22359_v23 = vld [vmem:[%s21481_s10 + $0x2b0] sm:$0xff]  }
 0x142   : > { %v22228_v40 = vsel %vm4409_vm3, %v4457_v22, %v4459_v9  ;;  %v22243_v22 = vld [vmem:[%s21481_s10 + $0xd0] sm:$0xff]  }
 0x143   : > { %26811 = vst [vmem:[#allocation93_spill] sm:$0xff] %v22228_v40  ;;  %v4461_v35 = vrot.slane %v22243_v22, 1 }
 0x145   : > { %v22263_v51 = vsel %vm4409_vm3, %v4459_v9, %v4461_v35 }
 0x146   : > { %26814 = vst [vmem:[#allocation96_spill] sm:$0xff] %v22263_v51 }
 0x147   : > { %17336 = vmatmul.mubr.msk.bf16.gmra.mrb[148].mxu1 %vm2037_vm2, %v22214_v31  ;;  %v22248_v31 = vld [vmem:[%s21481_s10 + $0xd8] sm:$0xff]  }
 0x148   : > { %17339 = vmatprep.mubr.msk.bf16.mxu1 %vm2037_vm2, %v22218_v2  ;;  %18354 = vmatmul.mubr.msk.bf16.gmra.mrb[36].mxu0 %vm2037_vm2, %v22223_v28  ;;  %v4463_v47 = vrot.slane %v22248_v31, 1  ;;  %v22258_v2 = vsel %vm1136_vm1, %v1767_v13, %v1771_v58  ;;  %v1779_v13 = vrot.slane %v1777_v19, 1  ;;  %v22292_v19 = vld [vmem:[%s21481_s10 + $0xe8] sm:$0xff]  }
 0x149   : > { %18357 = vmatprep.mubr.msk.bf16.mxu0 %vm2037_vm2, %v22228_v40  ;;  %26813 = vst [vmem:[#allocation95_spill] sm:$0xff] %v22258_v2  ;;  %v4467_v44 = vrot.slane %v22292_v19, 1 }
 0x14a   : > { %v22271_v46 = vsel %vm4409_vm3, %v4461_v35, %v4463_v47  ;;  %v1783_v9 = vor.u32 %v1781_v63, %v1779_v13  ;;  %v22288_v35 = vld [vmem:[%s21481_s10 + $0xe0] sm:$0xff]   ;;  %v22298_v63 = vsel %vm1136_vm1, %v1775_v59, %v1779_v13  ;;  %v1795_v13 = vrot.slane %v1793_v29, 1  ;;  %v22331_v29 = vld [vmem:[%s21481_s10 + $0xf0] sm:$0xff]  }
 0x14b   : > { %26815 = vst [vmem:[#allocation97_spill] sm:$0xff] %v22271_v46  ;;  %v4465_v58 = vrot.slane %v22288_v35, 1  ;;  %26816 = vst [vmem:[#allocation98_spill] sm:$0xff] %v22298_v63  ;;  %v22314_v59 = vld [vmem:[%s21481_s10 + $0x2a0] sm:$0xff]  }
 0x14d   : > { %v22306_v15 = vsel %vm4409_vm3, %v4463_v47, %v4465_v58  ;;  %v22311_v5 = vsel %vm4409_vm3, %v4465_v58, %v4467_v44  ;;  %v1803_v47 = vrot.slane %v1801_v27, 1  ;;  %v1809_v58 = vshll.u32 %v22314_v59, 16 }
 0x14e   : > { %26818 = vst [vmem:[#allocation100_spill] sm:$0xff] %v22306_v15  ;;  %26819 = vst [vmem:[#allocation101_spill] sm:$0xff] %v22311_v5 }
 0x14f   : > { %17340 = vmatmul.mubr.msk.bf16.gmra.mrb[152].mxu1 %vm2037_vm2, %v22253_v32  ;;  %v1787_v32 = vrot.slane %v1785_v53, 1  ;;  %v1797_v53 = vshrl.u32 %v22266_v41, 16 }
 0x150   : > { %17343 = vmatprep.mubr.msk.bf16.mxu1 %vm2037_vm2, %v22258_v2  ;;  %18358 = vmatmul.mubr.msk.bf16.gmra.mrb[40].mxu0 %vm2037_vm2, %v22263_v51  ;;  %v1789_v2 = vshrl.u32 %v22238_v1, 16  ;;  %v22321_v51 = vld [vmem:[%s21481_s10 + $0x2a8] sm:$0xff]  }
 0x151   : > { %18361 = vmatprep.mubr.msk.bf16.mxu0 %vm2037_vm2, %v22271_v46  ;;  %v22303_v17 = vsel %vm1136_vm1, %v1783_v9, %v1787_v32  ;;  %v1799_v9 = vor.u32 %v1797_v53, %v1795_v13  ;;  %v1817_v40 = vshll.u32 %v22321_v51, 16 }
 0x152   : > { %26817 = vst [vmem:[#allocation99_spill] sm:$0xff] %v22303_v17  ;;  %v1791_v46 = vor.u32 %v1789_v2, %v1787_v32  ;;  %v4469_v2 = vrot.slane %v22331_v29, 1  ;;  %v22337_v32 = vld [vmem:[%s21481_s10 + $0xf8] sm:$0xff]  }
 0x153   : > { %v4471_v27 = vrot.slane %v22337_v32, 1  ;;  %v1819_v25 = vrot.slane %v1817_v40, 1  ;;  %v1821_v40 = vshrl.u32 %v22321_v51, 16 }
 0x154   : > { %v22342_v53 = vsel %vm1136_vm1, %v1791_v46, %v1795_v13  ;;  %v22351_v28 = vsel %vm4409_vm3, %v4467_v44, %v4469_v2  ;;  %v1811_v13 = vrot.slane %v1809_v58, 1  ;;  %v22366_v44 = vld [vmem:[%s21481_s10 + $0x2b8] sm:$0xff]  }
 0x155   : > { %26820 = vst [vmem:[#allocation102_spill] sm:$0xff] %v22342_v53  ;;  %26822 = vst [vmem:[#allocation104_spill] sm:$0xff] %v22351_v28  ;;  %v22356_v46 = vsel %vm4409_vm3, %v4469_v2, %v4471_v27  ;;  %v22371_v2 = vld [vmem:[%s21481_s10 + $0x100] sm:$0xff]  }
 0x156   : > { %26823 = vst [vmem:[#allocation105_spill] sm:$0xff] %v22356_v46  ;;  %v4473_v58 = vrot.slane %v22371_v2, 1 }
 0x157   : > { %17344 = vmatmul.mubr.msk.bf16.gmra.mrb[156].mxu1 %vm2037_vm2, %v22298_v63  ;;  %v22326_v63 = vld [vmem:[%s26213_s2 + $0x8] sm:$0xf] }
 0x158   : > { %17347 = vmatprep.mubr.msk.bf16.mxu1 %vm2037_vm2, %v22303_v17  ;;  %18362 = vmatmul.mubr.msk.bf16.gmra.mrb[44].mxu0 %vm2037_vm2, %v22306_v15  ;;  %v1805_v17 = vshrl.u32 %v22276_v39, 16  ;;  %v1813_v15 = vshrl.u32 %v22314_v59, 16  ;;  %v22389_v61 = vsel %vm4409_vm3, %v4471_v27, %v4473_v58  ;;  %v22404_v27 = vld [vmem:[%s21481_s10 + $0x2c8] sm:$0xff]  }
 0x159   : > { %18365 = vmatprep.mubr.msk.bf16.mxu0 %vm2037_vm2, %v22311_v5  ;;  %20987 = vmatprep.subr.msk.bf16.mxu1 %vm2374_vm0, %v22326_v63  ;;  %v22346_v5 = vsel %vm1136_vm1, %v1799_v9, %v1803_v47  ;;  %26826 = vst [vmem:[#allocation108_spill] sm:$0xff] %v22389_v61 }
 0x15a   : > { %26821 = vst [vmem:[#allocation103_spill] sm:$0xff] %v22346_v5  ;;  %v1807_v9 = vor.u32 %v1805_v17, %v1803_v47  ;;  %v1815_v12 = vor.u32 %v1813_v15, %v1811_v13  ;;  %v1825_v17 = vshll.u32 %v22359_v23, 16 }
 0x15c   : > { %v22380_v15 = vsel %vm1136_vm1, %v1807_v9, %v1811_v13  ;;  %v22384_v47 = vsel %vm1136_vm1, %v1815_v12, %v1819_v25  ;;  %v1827_v9 = vrot.slane %v1825_v17, 1  ;;  %v1823_v12 = vor.u32 %v1821_v40, %v1819_v25 }
 0x15d   : > { %26824 = vst [vmem:[#allocation106_spill] sm:$0xff] %v22380_v15  ;;  %26825 = vst [vmem:[#allocation107_spill] sm:$0xff] %v22384_v47  ;;  %v1841_v25 = vshll.u32 %v22397_v30, 16 }
 0x15f   : > { %17348 = vmatmul.mubr.msk.bf16.gmra.mrb[160].mxu1 %vm2037_vm2, %v22342_v53  ;;  %v22375_v53 = vld [vmem:[%s21481_s10 + $0x108] sm:$0xff]  }
 0x160   : > { %17351 = vmatprep.mubr.msk.bf16.mxu1 %vm2037_vm2, %v22346_v5  ;;  %18366 = vmatmul.mubr.msk.bf16.gmra.mrb[48].mxu0 %vm2037_vm2, %v22351_v28  ;;  %v4475_v5 = vrot.slane %v22375_v53, 1  ;;  %v1833_v28 = vshll.u32 %v22366_v44, 16 }
 0x161   : > { %18369 = vmatprep.mubr.msk.bf16.mxu0 %vm2037_vm2, %v22356_v46  ;;  %v1829_v46 = vshrl.u32 %v22359_v23, 16 }
 0x162   : > { %v22394_v13 = vsel %vm4409_vm3, %v4473_v58, %v4475_v5  ;;  %v1835_v11 = vrot.slane %v1833_v28, 1  ;;  %v22409_v58 = vld [vmem:[%s21481_s10 + $0x110] sm:$0xff]   ;;  %v1837_v28 = vshrl.u32 %v22366_v44, 16 }
 0x163   : > { %26827 = vst [vmem:[#allocation109_spill] sm:$0xff] %v22394_v13  ;;  %v1831_v42 = vor.u32 %v1829_v46, %v1827_v9  ;;  %v4477_v17 = vrot.slane %v22409_v58, 1  ;;  %v22418_v46 = vsel %vm1136_vm1, %v1823_v12, %v1827_v9  ;;  %v1843_v12 = vrot.slane %v1841_v25, 1 }
 0x164   : > { %26828 = vst [vmem:[#allocation110_spill] sm:$0xff] %v22418_v46 }
 0x165   : > { %v22422_v40 = vsel %vm1136_vm1, %v1831_v42, %v1835_v11  ;;  %v22427_v48 = vsel %vm4409_vm3, %v4475_v5, %v4477_v17  ;;  %v1839_v42 = vor.u32 %v1837_v28, %v1835_v11  ;;  %v22442_v5 = vld [vmem:[%s21481_s10 + $0x2d8] sm:$0xff]   ;;  %v1857_v11 = vshll.u32 %v22435_v10, 16 }
 0x166   : > { %26829 = vst [vmem:[#allocation111_spill] sm:$0xff] %v22422_v40  ;;  %26830 = vst [vmem:[#allocation112_spill] sm:$0xff] %v22427_v48 }
 0x167   : > { %17352 = vmatmul.mubr.msk.bf16.gmra.mrb[164].mxu1 %vm2037_vm2, %v22380_v15  ;;  %v22413_v15 = vld [vmem:[%s21481_s10 + $0x118] sm:$0xff]  }
 0x168   : > { %17355 = vmatprep.mubr.msk.bf16.mxu1 %vm2037_vm2, %v22384_v47  ;;  %18370 = vmatmul.mubr.msk.bf16.gmra.mrb[52].mxu0 %vm2037_vm2, %v22389_v61  ;;  %v4479_v47 = vrot.slane %v22413_v15, 1  ;;  %v1849_v61 = vshll.u32 %v22404_v27, 16 }
 0x169   : > { %18373 = vmatprep.mubr.msk.bf16.mxu0 %vm2037_vm2, %v22394_v13  ;;  %v1845_v13 = vshrl.u32 %v22397_v30, 16 }
 0x16a   : > { %v22432_v9 = vsel %vm4409_vm3, %v4477_v17, %v4479_v47  ;;  %v1851_v55 = vrot.slane %v1849_v61, 1  ;;  %v22447_v17 = vld [vmem:[%s21481_s10 + $0x120] sm:$0xff]   ;;  %v1853_v61 = vshrl.u32 %v22404_v27, 16 }
 0x16b   : > { %26831 = vst [vmem:[#allocation113_spill] sm:$0xff] %v22432_v9  ;;  %v1847_v49 = vor.u32 %v1845_v13, %v1843_v12  ;;  %26832 = vst [vmem:[#allocation114_spill] sm:$0xff] %v22447_v17  ;;  %v4481_v25 = vrot.slane %v22447_v17, 1  ;;  %v22456_v13 = vsel %vm1136_vm1, %v1839_v42, %v1843_v12  ;;  %v1859_v42 = vrot.slane %v1857_v11, 1 }
 0x16c   : > { %26834 = vst [vmem:[#allocation116_spill] sm:$0xff] %v22456_v13 }
 0x16d   : > { %v22460_v28 = vsel %vm1136_vm1, %v1847_v49, %v1851_v55  ;;  %v22465_v45 = vsel %vm4409_vm3, %v4479_v47, %v4481_v25  ;;  %v1855_v49 = vor.u32 %v1853_v61, %v1851_v55  ;;  %v22480_v47 = vld [vmem:[%s21481_s10 + $0x2e8] sm:$0xff]   ;;  %v1873_v55 = vshll.u32 %v22473_v18, 16 }
 0x16e   : > { %26835 = vst [vmem:[#allocation117_spill] sm:$0xff] %v22460_v28  ;;  %26836 = vst [vmem:[#allocation118_spill] sm:$0xff] %v22465_v45 }
 0x16f   : > { %17356 = vmatmul.mubr.msk.bf16.gmra.mrb[168].mxu1 %vm2037_vm2, %v22418_v46  ;;  %v22451_v46 = vld [vmem:[%s21481_s10 + $0x128] sm:$0xff]  }
 0x170   : > { %17359 = vmatprep.mubr.msk.bf16.mxu1 %vm2037_vm2, %v22422_v40  ;;  %18374 = vmatmul.mubr.msk.bf16.gmra.mrb[56].mxu0 %vm2037_vm2, %v22427_v48  ;;  %26833 = vst [vmem:[#allocation115_spill] sm:$0xff] %v22451_v46  ;;  %v4483_v40 = vrot.slane %v22451_v46, 1  ;;  %v1865_v48 = vshll.u32 %v22442_v5, 16 }
 0x171   : > { %18377 = vmatprep.mubr.msk.bf16.mxu0 %vm2037_vm2, %v22432_v9  ;;  %v1861_v9 = vshrl.u32 %v22435_v10, 16 }
 0x172   : > { %v22470_v12 = vsel %vm4409_vm3, %v4481_v25, %v4483_v40  ;;  %v1867_v3 = vrot.slane %v1865_v48, 1  ;;  %v22485_v25 = vld [vmem:[%s21481_s10 + $0x130] sm:$0xff]   ;;  %v1869_v48 = vshrl.u32 %v22442_v5, 16 }
 0x173   : > { %26837 = vst [vmem:[#allocation119_spill] sm:$0xff] %v22470_v12  ;;  %v1863_v57 = vor.u32 %v1861_v9, %v1859_v42  ;;  %26838 = vst [vmem:[#allocation120_spill] sm:$0xff] %v22485_v25  ;;  %v4485_v11 = vrot.slane %v22485_v25, 1  ;;  %v22494_v9 = vsel %vm1136_vm1, %v1855_v49, %v1859_v42  ;;  %v1875_v49 = vrot.slane %v1873_v55, 1 }
 0x174   : > { %26840 = vst [vmem:[#allocation122_spill] sm:$0xff] %v22494_v9 }
 0x175   : > { %v22498_v61 = vsel %vm1136_vm1, %v1863_v57, %v1867_v3  ;;  %v22503_v7 = vsel %vm4409_vm3, %v4483_v40, %v4485_v11  ;;  %v1871_v57 = vor.u32 %v1869_v48, %v1867_v3  ;;  %v22518_v40 = vld [vmem:[%s21481_s10 + $0x2f8] sm:$0xff]   ;;  %v1889_v3 = vshll.u32 %v22511_v34, 16 }
 0x176   : > { %26841 = vst [vmem:[#allocation123_spill] sm:$0xff] %v22498_v61  ;;  %26842 = vst [vmem:[#allocation124_spill] sm:$0xff] %v22503_v7 }
 0x177   : > { %17360 = vmatmul.mubr.msk.bf16.gmra.mrb[172].mxu1 %vm2037_vm2, %v22456_v13  ;;  %v22489_v13 = vld [vmem:[%s21481_s10 + $0x138] sm:$0xff]  }
 0x178   : > { %17363 = vmatprep.mubr.msk.bf16.mxu1 %vm2037_vm2, %v22460_v28  ;;  %18378 = vmatmul.mubr.msk.bf16.gmra.mrb[60].mxu0 %vm2037_vm2, %v22465_v45  ;;  %26839 = vst [vmem:[#allocation121_spill] sm:$0xff] %v22489_v13  ;;  %v4487_v28 = vrot.slane %v22489_v13, 1  ;;  %v1881_v45 = vshll.u32 %v22480_v47, 16 }
 0x179   : > { %18381 = vmatprep.mubr.msk.bf16.mxu0 %vm2037_vm2, %v22470_v12  ;;  %v1877_v12 = vshrl.u32 %v22473_v18, 16 }
 0x17a   : > { %v22508_v42 = vsel %vm4409_vm3, %v4485_v11, %v4487_v28  ;;  %v1883_v21 = vrot.slane %v1881_v45, 1  ;;  %v22523_v11 = vld [vmem:[%s21481_s10 + $0x140] sm:$0xff]   ;;  %v1885_v45 = vshrl.u32 %v22480_v47, 16 }
 0x17b   : > { %26843 = vst [vmem:[#allocation125_spill] sm:$0xff] %v22508_v42  ;;  %v1879_v6 = vor.u32 %v1877_v12, %v1875_v49  ;;  %26844 = vst [vmem:[#allocation126_spill] sm:$0xff] %v22523_v11  ;;  %v4489_v55 = vrot.slane %v22523_v11, 1  ;;  %v22532_v12 = vsel %vm1136_vm1, %v1871_v57, %v1875_v49  ;;  %v1891_v57 = vrot.slane %v1889_v3, 1 }
 0x17c   : > { %26846 = vst [vmem:[#allocation128_spill] sm:$0xff] %v22532_v12 }
 0x17d   : > { %v22536_v48 = vsel %vm1136_vm1, %v1879_v6, %v1883_v21  ;;  %v22541_v0 = vsel %vm4409_vm3, %v4487_v28, %v4489_v55  ;;  %v1887_v6 = vor.u32 %v1885_v45, %v1883_v21  ;;  %v22556_v28 = vld [vmem:[%s21481_s10 + $0x308] sm:$0xff]  }
 0x17e   : > { %26847 = vst [vmem:[#allocation129_spill] sm:$0xff] %v22536_v48  ;;  %26848 = vst [vmem:[#allocation130_spill] sm:$0xff] %v22541_v0 }
 0x17f   : > { %17364 = vmatmul.mubr.msk.bf16.gmra.mrb[176].mxu1 %vm2037_vm2, %v22494_v9  ;;  %v22527_v9 = vld [vmem:[%s21481_s10 + $0x148] sm:$0xff]  }
 0x180   : > { %17367 = vmatprep.mubr.msk.bf16.mxu1 %vm2037_vm2, %v22498_v61  ;;  %18382 = vmatmul.mubr.msk.bf16.gmra.mrb[64].mxu0 %vm2037_vm2, %v22503_v7  ;;  %26845 = vst [vmem:[#allocation127_spill] sm:$0xff] %v22527_v9  ;;  %v4491_v61 = vrot.slane %v22527_v9, 1  ;;  %v1897_v7 = vshll.u32 %v22518_v40, 16  ;;  %v22549_v9 = vld [vmem:[%s21481_s10 + $0x300] sm:$0xff]  }
 0x181   : > { %18385 = vmatprep.mubr.msk.bf16.mxu0 %vm2037_vm2, %v22508_v42  ;;  %v1893_v42 = vshrl.u32 %v22511_v34, 16  ;;  %v1905_v21 = vshll.u32 %v22549_v9, 16 }
 0x182   : > { %v22546_v49 = vsel %vm4409_vm3, %v4489_v55, %v4491_v61  ;;  %v1899_v13 = vrot.slane %v1897_v7, 1  ;;  %v22561_v55 = vld [vmem:[%s21481_s10 + $0x150] sm:$0xff]   ;;  %v1901_v7 = vshrl.u32 %v22518_v40, 16 }
 0x183   : > { %26849 = vst [vmem:[#allocation131_spill] sm:$0xff] %v22546_v49  ;;  %v1895_v11 = vor.u32 %v1893_v42, %v1891_v57  ;;  %26850 = vst [vmem:[#allocation132_spill] sm:$0xff] %v22561_v55  ;;  %v4493_v3 = vrot.slane %v22561_v55, 1  ;;  %v22570_v42 = vsel %vm1136_vm1, %v1887_v6, %v1891_v57  ;;  %v1907_v6 = vrot.slane %v1905_v21, 1 }
 0x184   : > { %26852 = vst [vmem:[#allocation134_spill] sm:$0xff] %v22570_v42 }
 0x185   : > { %v22574_v45 = vsel %vm1136_vm1, %v1895_v11, %v1899_v13  ;;  %v22579_v55 = vsel %vm4409_vm3, %v4491_v61, %v4493_v3  ;;  %v1903_v11 = vor.u32 %v1901_v7, %v1899_v13  ;;  %v22594_v61 = vld [vmem:[%s21481_s10 + $0x318] sm:$0xff]  }
 0x186   : > { %26853 = vst [vmem:[#allocation135_spill] sm:$0xff] %v22574_v45  ;;  %26854 = vst [vmem:[#allocation136_spill] sm:$0xff] %v22579_v55 }
 0x187   : > { %17368 = vmatmul.mubr.msk.bf16.gmra.mrb[180].mxu1 %vm2037_vm2, %v22532_v12  ;;  %v22565_v12 = vld [vmem:[%s21481_s10 + $0x158] sm:$0xff]   ;;  %26857 = vst [vmem:[#allocation139_spill] sm:$0xff] %v22594_v61 }
 0x188   : > { %17371 = vmatprep.mubr.msk.bf16.mxu1 %vm2037_vm2, %v22536_v48  ;;  %18386 = vmatmul.mubr.msk.bf16.gmra.mrb[68].mxu0 %vm2037_vm2, %v22541_v0  ;;  %26851 = vst [vmem:[#allocation133_spill] sm:$0xff] %v22565_v12  ;;  %v4495_v48 = vrot.slane %v22565_v12, 1  ;;  %v1913_v0 = vshll.u32 %v22556_v28, 16  ;;  %v22587_v12 = vld [vmem:[%s21481_s10 + $0x310] sm:$0xff]  }
 0x189   : > { %18389 = vmatprep.mubr.msk.bf16.mxu0 %vm2037_vm2, %v22546_v49  ;;  %v1909_v49 = vshrl.u32 %v22549_v9, 16  ;;  %26856 = vst [vmem:[#allocation138_spill] sm:$0xff] %v22587_v12  ;;  %v1921_v13 = vshll.u32 %v22587_v12, 16 }
 0x18a   : > { %v22584_v57 = vsel %vm4409_vm3, %v4493_v3, %v4495_v48  ;;  %v1915_v46 = vrot.slane %v1913_v0, 1  ;;  %v22599_v3 = vld [vmem:[%s21481_s10 + $0x160] sm:$0xff]   ;;  %v1917_v0 = vshrl.u32 %v22556_v28, 16 }
 0x18b   : > { %26855 = vst [vmem:[#allocation137_spill] sm:$0xff] %v22584_v57  ;;  %v1911_v25 = vor.u32 %v1909_v49, %v1907_v6  ;;  %26858 = vst [vmem:[#allocation140_spill] sm:$0xff] %v22599_v3  ;;  %v4497_v21 = vrot.slane %v22599_v3, 1  ;;  %v22608_v49 = vsel %vm1136_vm1, %v1903_v11, %v1907_v6  ;;  %v1923_v11 = vrot.slane %v1921_v13, 1 }
 0x18c   : > { %26860 = vst [vmem:[#allocation142_spill] sm:$0xff] %v22608_v49 }
 0x18d   : > { %v22612_v7 = vsel %vm1136_vm1, %v1911_v25, %v1915_v46  ;;  %v22617_v3 = vsel %vm4409_vm3, %v4495_v48, %v4497_v21  ;;  %v1919_v25 = vor.u32 %v1917_v0, %v1915_v46  ;;  %v22632_v48 = vld [vmem:[%s21481_s10 + $0x328] sm:$0xff]  }
 0x18e   : > { %26861 = vst [vmem:[#allocation143_spill] sm:$0xff] %v22612_v7  ;;  %26862 = vst [vmem:[#allocation144_spill] sm:$0xff] %v22617_v3 }
 0x18f   : > { %17372 = vmatmul.mubr.msk.bf16.gmra.mrb[184].mxu1 %vm2037_vm2, %v22570_v42  ;;  %v22603_v42 = vld [vmem:[%s21481_s10 + $0x168] sm:$0xff]   ;;  %26865 = vst [vmem:[#allocation147_spill] sm:$0xff] %v22632_v48 }
 0x190   : > { %17375 = vmatprep.mubr.msk.bf16.mxu1 %vm2037_vm2, %v22574_v45  ;;  %18390 = vmatmul.mubr.msk.bf16.gmra.mrb[72].mxu0 %vm2037_vm2, %v22579_v55  ;;  %26859 = vst [vmem:[#allocation141_spill] sm:$0xff] %v22603_v42  ;;  %v4499_v45 = vrot.slane %v22603_v42, 1  ;;  %v1929_v55 = vshll.u32 %v22594_v61, 16  ;;  %v22625_v42 = vld [vmem:[%s21481_s10 + $0x320] sm:$0xff]  }
 0x191   : > { %18393 = vmatprep.mubr.msk.bf16.mxu0 %vm2037_vm2, %v22584_v57  ;;  %v1925_v57 = vshrl.u32 %v22587_v12, 16  ;;  %26864 = vst [vmem:[#allocation146_spill] sm:$0xff] %v22625_v42  ;;  %v1937_v46 = vshll.u32 %v22625_v42, 16 }
 0x192   : > { %v22622_v6 = vsel %vm4409_vm3, %v4497_v21, %v4499_v45  ;;  %v1931_v17 = vrot.slane %v1929_v55, 1  ;;  %v22637_v21 = vld [vmem:[%s21481_s10 + $0x170] sm:$0xff]   ;;  %v1933_v55 = vshrl.u32 %v22594_v61, 16 }
 0x193   : > { %26863 = vst [vmem:[#allocation145_spill] sm:$0xff] %v22622_v6  ;;  %v1927_v12 = vor.u32 %v1925_v57, %v1923_v11  ;;  %26866 = vst [vmem:[#allocation148_spill] sm:$0xff] %v22637_v21  ;;  %v4501_v13 = vrot.slane %v22637_v21, 1  ;;  %v22646_v57 = vsel %vm1136_vm1, %v1919_v25, %v1923_v11  ;;  %v1939_v25 = vrot.slane %v1937_v46, 1 }
 0x194   : > { %26868 = vst [vmem:[#allocation150_spill] sm:$0xff] %v22646_v57 }
 0x195   : > { %v22650_v0 = vsel %vm1136_vm1, %v1927_v12, %v1931_v17  ;;  %v22655_v21 = vsel %vm4409_vm3, %v4499_v45, %v4501_v13  ;;  %v1935_v12 = vor.u32 %v1933_v55, %v1931_v17  ;;  %v22670_v45 = vld [vmem:[%s21481_s10 + $0x338] sm:$0xff]  }
 0x196   : > { %26869 = vst [vmem:[#allocation151_spill] sm:$0xff] %v22650_v0  ;;  %26870 = vst [vmem:[#allocation152_spill] sm:$0xff] %v22655_v21 }
 0x197   : > { %17376 = vmatmul.mubr.msk.bf16.gmra.mrb[188].mxu1 %vm2037_vm2, %v22608_v49  ;;  %v22641_v49 = vld [vmem:[%s21481_s10 + $0x178] sm:$0xff]   ;;  %26873 = vst [vmem:[#allocation155_spill] sm:$0xff] %v22670_v45 }
 0x198   : > { %17379 = vmatprep.mubr.msk.bf16.mxu1 %vm2037_vm2, %v22612_v7  ;;  %18394 = vmatmul.mubr.msk.bf16.gmra.mrb[76].mxu0 %vm2037_vm2, %v22617_v3  ;;  %26867 = vst [vmem:[#allocation149_spill] sm:$0xff] %v22641_v49  ;;  %v4503_v7 = vrot.slane %v22641_v49, 1  ;;  %v1945_v3 = vshll.u32 %v22632_v48, 16  ;;  %v22663_v49 = vld [vmem:[%s21481_s10 + $0x330] sm:$0xff]  }
 0x199   : > { %18397 = vmatprep.mubr.msk.bf16.mxu0 %vm2037_vm2, %v22622_v6  ;;  %v1941_v6 = vshrl.u32 %v22625_v42, 16  ;;  %26872 = vst [vmem:[#allocation154_spill] sm:$0xff] %v22663_v49  ;;  %v1953_v17 = vshll.u32 %v22663_v49, 16 }
 0x19a   : > { %v22660_v11 = vsel %vm4409_vm3, %v4501_v13, %v4503_v7  ;;  %v1947_v61 = vrot.slane %v1945_v3, 1  ;;  %v22675_v13 = vld [vmem:[%s21481_s10 + $0x180] sm:$0xff]   ;;  %v1949_v3 = vshrl.u32 %v22632_v48, 16 }
 0x19b   : > { %26871 = vst [vmem:[#allocation153_spill] sm:$0xff] %v22660_v11  ;;  %v1943_v42 = vor.u32 %v1941_v6, %v1939_v25  ;;  %26874 = vst [vmem:[#allocation156_spill] sm:$0xff] %v22675_v13  ;;  %v4505_v46 = vrot.slane %v22675_v13, 1  ;;  %v22684_v6 = vsel %vm1136_vm1, %v1935_v12, %v1939_v25  ;;  %v1955_v12 = vrot.slane %v1953_v17, 1 }
 0x19c   : > { %26876 = vst [vmem:[#allocation158_spill] sm:$0xff] %v22684_v6 }
 0x19d   : > { %v22688_v55 = vsel %vm1136_vm1, %v1943_v42, %v1947_v61  ;;  %v22693_v13 = vsel %vm4409_vm3, %v4503_v7, %v4505_v46  ;;  %v1951_v42 = vor.u32 %v1949_v3, %v1947_v61  ;;  %v22708_v7 = vld [vmem:[%s21481_s10 + $0x348] sm:$0xff]  }
 0x19e   : > { %26877 = vst [vmem:[#allocation159_spill] sm:$0xff] %v22688_v55  ;;  %26878 = vst [vmem:[#allocation160_spill] sm:$0xff] %v22693_v13 }
 0x19f   : > { %17380 = vmatmul.mubr.msk.bf16.gmra.mrb[192].mxu1 %vm2037_vm2, %v22646_v57  ;;  %v22679_v57 = vld [vmem:[%s21481_s10 + $0x188] sm:$0xff]   ;;  %26881 = vst [vmem:[#allocation163_spill] sm:$0xff] %v22708_v7 }
 0x1a0   : > { %17383 = vmatprep.mubr.msk.bf16.mxu1 %vm2037_vm2, %v22650_v0  ;;  %18398 = vmatmul.mubr.msk.bf16.gmra.mrb[80].mxu0 %vm2037_vm2, %v22655_v21  ;;  %26875 = vst [vmem:[#allocation157_spill] sm:$0xff] %v22679_v57  ;;  %v4507_v0 = vrot.slane %v22679_v57, 1  ;;  %v1961_v21 = vshll.u32 %v22670_v45, 16  ;;  %v22701_v57 = vld [vmem:[%s21481_s10 + $0x340] sm:$0xff]  }
 0x1a1   : > { %18401 = vmatprep.mubr.msk.bf16.mxu0 %vm2037_vm2, %v22660_v11  ;;  %v1957_v11 = vshrl.u32 %v22663_v49, 16  ;;  %26880 = vst [vmem:[#allocation162_spill] sm:$0xff] %v22701_v57  ;;  %v1969_v61 = vshll.u32 %v22701_v57, 16 }
 0x1a2   : > { %v22698_v25 = vsel %vm4409_vm3, %v4505_v46, %v4507_v0  ;;  %v1963_v48 = vrot.slane %v1961_v21, 1  ;;  %v22713_v46 = vld [vmem:[%s21481_s10 + $0x190] sm:$0xff]   ;;  %v1965_v21 = vshrl.u32 %v22670_v45, 16 }
 0x1a3   : > { %26879 = vst [vmem:[#allocation161_spill] sm:$0xff] %v22698_v25  ;;  %v1959_v49 = vor.u32 %v1957_v11, %v1955_v12  ;;  %26882 = vst [vmem:[#allocation164_spill] sm:$0xff] %v22713_v46  ;;  %v4509_v17 = vrot.slane %v22713_v46, 1  ;;  %v22722_v11 = vsel %vm1136_vm1, %v1951_v42, %v1955_v12  ;;  %v1971_v42 = vrot.slane %v1969_v61, 1 }
 0x1a4   : > { %26884 = vst [vmem:[#allocation166_spill] sm:$0xff] %v22722_v11 }
 0x1a5   : > { %v22726_v3 = vsel %vm1136_vm1, %v1959_v49, %v1963_v48  ;;  %v22731_v46 = vsel %vm4409_vm3, %v4507_v0, %v4509_v17  ;;  %v1967_v49 = vor.u32 %v1965_v21, %v1963_v48  ;;  %v22746_v0 = vld [vmem:[%s21481_s10 + $0x358] sm:$0xff]  }
 0x1a6   : > { %26885 = vst [vmem:[#allocation167_spill] sm:$0xff] %v22726_v3  ;;  %26886 = vst [vmem:[#allocation168_spill] sm:$0xff] %v22731_v46 }
 0x1a7   : > { %17384 = vmatmul.mubr.msk.bf16.gmra.mrb[196].mxu1 %vm2037_vm2, %v22684_v6  ;;  %v22717_v6 = vld [vmem:[%s21481_s10 + $0x198] sm:$0xff]   ;;  %26889 = vst [vmem:[#allocation171_spill] sm:$0xff] %v22746_v0 }
 0x1a8   : > { %17387 = vmatprep.mubr.msk.bf16.mxu1 %vm2037_vm2, %v22688_v55  ;;  %18402 = vmatmul.mubr.msk.bf16.gmra.mrb[84].mxu0 %vm2037_vm2, %v22693_v13  ;;  %26883 = vst [vmem:[#allocation165_spill] sm:$0xff] %v22717_v6  ;;  %v4511_v55 = vrot.slane %v22717_v6, 1  ;;  %v1977_v13 = vshll.u32 %v22708_v7, 16  ;;  %v22739_v6 = vld [vmem:[%s21481_s10 + $0x350] sm:$0xff]  }
 0x1a9   : > { %18405 = vmatprep.mubr.msk.bf16.mxu0 %vm2037_vm2, %v22698_v25  ;;  %v1973_v25 = vshrl.u32 %v22701_v57, 16  ;;  %26888 = vst [vmem:[#allocation170_spill] sm:$0xff] %v22739_v6  ;;  %v1985_v48 = vshll.u32 %v22739_v6, 16 }
 0x1aa   : > { %v22736_v12 = vsel %vm4409_vm3, %v4509_v17, %v4511_v55  ;;  %v1979_v45 = vrot.slane %v1977_v13, 1  ;;  %v22751_v17 = vld [vmem:[%s21481_s10 + $0x1a0] sm:$0xff]   ;;  %v1981_v13 = vshrl.u32 %v22708_v7, 16 }
 0x1ab   : > { %26887 = vst [vmem:[#allocation169_spill] sm:$0xff] %v22736_v12  ;;  %v1975_v57 = vor.u32 %v1973_v25, %v1971_v42  ;;  %26890 = vst [vmem:[#allocation172_spill] sm:$0xff] %v22751_v17  ;;  %v4513_v61 = vrot.slane %v22751_v17, 1  ;;  %v22760_v25 = vsel %vm1136_vm1, %v1967_v49, %v1971_v42  ;;  %v1987_v49 = vrot.slane %v1985_v48, 1 }
 0x1ac   : > { %26892 = vst [vmem:[#allocation174_spill] sm:$0xff] %v22760_v25 }
 0x1ad   : > { %v22764_v21 = vsel %vm1136_vm1, %v1975_v57, %v1979_v45  ;;  %v22769_v17 = vsel %vm4409_vm3, %v4511_v55, %v4513_v61  ;;  %v1983_v57 = vor.u32 %v1981_v13, %v1979_v45  ;;  %v22784_v55 = vld [vmem:[%s21481_s10 + $0x368] sm:$0xff]  }
 0x1ae   : > { %26893 = vst [vmem:[#allocation175_spill] sm:$0xff] %v22764_v21  ;;  %26894 = vst [vmem:[#allocation176_spill] sm:$0xff] %v22769_v17 }
 0x1af   : > { %17388 = vmatmul.mubr.msk.bf16.gmra.mrb[200].mxu1 %vm2037_vm2, %v22722_v11  ;;  %v22755_v11 = vld [vmem:[%s21481_s10 + $0x1a8] sm:$0xff]   ;;  %26897 = vst [vmem:[#allocation179_spill] sm:$0xff] %v22784_v55 }
 0x1b0   : > { %17391 = vmatprep.mubr.msk.bf16.mxu1 %vm2037_vm2, %v22726_v3  ;;  %18406 = vmatmul.mubr.msk.bf16.gmra.mrb[88].mxu0 %vm2037_vm2, %v22731_v46  ;;  %26891 = vst [vmem:[#allocation173_spill] sm:$0xff] %v22755_v11  ;;  %v4515_v3 = vrot.slane %v22755_v11, 1  ;;  %v1993_v46 = vshll.u32 %v22746_v0, 16  ;;  %v22777_v11 = vld [vmem:[%s21481_s10 + $0x360] sm:$0xff]  }
 0x1b1   : > { %18409 = vmatprep.mubr.msk.bf16.mxu0 %vm2037_vm2, %v22736_v12  ;;  %v1989_v12 = vshrl.u32 %v22739_v6, 16  ;;  %26896 = vst [vmem:[#allocation178_spill] sm:$0xff] %v22777_v11  ;;  %v2001_v45 = vshll.u32 %v22777_v11, 16 }
 0x1b2   : > { %v22774_v42 = vsel %vm4409_vm3, %v4513_v61, %v4515_v3  ;;  %v1995_v7 = vrot.slane %v1993_v46, 1  ;;  %v22789_v61 = vld [vmem:[%s21481_s10 + $0x1b0] sm:$0xff]   ;;  %v1997_v46 = vshrl.u32 %v22746_v0, 16  ;;  %v22822_v0 = vld [vmem:[%s21481_s10 + $0x378] sm:$0xff]  }
 0x1b3   : > { %26895 = vst [vmem:[#allocation177_spill] sm:$0xff] %v22774_v42  ;;  %v1991_v6 = vor.u32 %v1989_v12, %v1987_v49  ;;  %26898 = vst [vmem:[#allocation180_spill] sm:$0xff] %v22789_v61  ;;  %v4517_v48 = vrot.slane %v22789_v61, 1  ;;  %v22798_v12 = vsel %vm1136_vm1, %v1983_v57, %v1987_v49  ;;  %v2003_v57 = vrot.slane %v2001_v45, 1 }
 0x1b4   : > { %26900 = vst [vmem:[#allocation182_spill] sm:$0xff] %v22798_v12 }
 0x1b5   : > { %v22802_v13 = vsel %vm1136_vm1, %v1991_v6, %v1995_v7  ;;  %v22807_v61 = vsel %vm4409_vm3, %v4515_v3, %v4517_v48  ;;  %v1999_v6 = vor.u32 %v1997_v46, %v1995_v7 }
 0x1b6   : > { %26901 = vst [vmem:[#allocation183_spill] sm:$0xff] %v22802_v13  ;;  %26902 = vst [vmem:[#allocation184_spill] sm:$0xff] %v22807_v61 }
 0x1b7   : > { %17392 = vmatmul.mubr.msk.bf16.gmra.mrb[204].mxu1 %vm2037_vm2, %v22760_v25  ;;  %v22793_v25 = vld [vmem:[%s21481_s10 + $0x1b8] sm:$0xff]   ;;  %v22836_v46 = vsel %vm1136_vm1, %v1999_v6, %v2003_v57 }
 0x1b8   : > { %17395 = vmatprep.mubr.msk.bf16.mxu1 %vm2037_vm2, %v22764_v21  ;;  %18410 = vmatmul.mubr.msk.bf16.gmra.mrb[92].mxu0 %vm2037_vm2, %v22769_v17  ;;  %26899 = vst [vmem:[#allocation181_spill] sm:$0xff] %v22793_v25  ;;  %v4519_v21 = vrot.slane %v22793_v25, 1  ;;  %v2009_v17 = vshll.u32 %v22784_v55, 16  ;;  %v22815_v25 = vld [vmem:[%s21481_s10 + $0x370] sm:$0xff]   ;;  %26907 = vst [vmem:[#allocation189_spill] sm:$0xff] %v22836_v46 }
 0x1b9   : > { %18413 = vmatprep.mubr.msk.bf16.mxu0 %vm2037_vm2, %v22774_v42  ;;  %v2005_v42 = vshrl.u32 %v22777_v11, 16  ;;  %26904 = vst [vmem:[#allocation186_spill] sm:$0xff] %v22815_v25  ;;  %v2017_v7 = vshll.u32 %v22815_v25, 16 }
 0x1ba   : > { %v22812_v49 = vsel %vm4409_vm3, %v4517_v48, %v4519_v21  ;;  %v2011_v3 = vrot.slane %v2009_v17, 1  ;;  %v22827_v48 = vld [vmem:[%s21481_s10 + $0x1c0] sm:$0xff]   ;;  %v2013_v17 = vshrl.u32 %v22784_v55, 16 }
 0x1bb   : > { %26903 = vst [vmem:[#allocation185_spill] sm:$0xff] %v22812_v49  ;;  %v2007_v11 = vor.u32 %v2005_v42, %v2003_v57  ;;  %26905 = vst [vmem:[#allocation187_spill] sm:$0xff] %v22827_v48  ;;  %v4521_v45 = vrot.slane %v22827_v48, 1  ;;  %v22845_v48 = vld [vmem:[%s22281_s16] sm:$0xf]  ;;  %v2019_v6 = vrot.slane %v2017_v7, 1 }
 0x1bc   : > { %v22870_v7 = vld [vmem:[%s21481_s10 + $0x1d8] sm:$0xff]  }
 0x1bd   : > { %v22840_v42 = vsel %vm1136_vm1, %v2007_v11, %v2011_v3  ;;  %v2015_v11 = vor.u32 %v2013_v17, %v2011_v3  ;;  %v4527_v3 = vrot.slane %v22870_v7, 1 }
 0x1be   : > { %26908 = vst [vmem:[#allocation190_spill] sm:$0xff] %v22840_v42 }
 0x1bf   : > { %17396 = vmatmul.mubr.msk.bf16.gmra.mrb[208].mxu1 %vm2037_vm2, %v22798_v12  ;;  %v22831_v12 = vld [vmem:[%s21481_s10 + $0x1c8] sm:$0xff]   ;;  %v22874_v17 = vsel %vm1136_vm1, %v2015_v11, %v2019_v6 }
 0x1c0   : > { %17399 = vmatprep.mubr.msk.bf16.mxu1 %vm2037_vm2, %v22802_v13  ;;  %18414 = vmatmul.mubr.msk.bf16.gmra.mrb[96].mxu0 %vm2037_vm2, %v22807_v61  ;;  %26906 = vst [vmem:[#allocation188_spill] sm:$0xff] %v22831_v12  ;;  %v4523_v13 = vrot.slane %v22831_v12, 1  ;;  %v2025_v61 = vshll.u32 %v22822_v0, 16  ;;  %v22848_v12 = vsel %vm4409_vm3, %v4519_v21, %v4521_v45  ;;  %26912 = vst [vmem:[#allocation194_spill] sm:$0xff] %v22874_v17 }
 0x1c1   : > { %18417 = vmatprep.mubr.msk.bf16.mxu0 %vm2037_vm2, %v22812_v49  ;;  %v2021_v49 = vshrl.u32 %v22815_v25, 16  ;;  %26909 = vst [vmem:[#allocation191_spill] sm:$0xff] %v22848_v12  ;;  %v22859_v25 = vcombine.low %v22845_v48, %v22845_v48 }
 0x1c2   : > { %v22853_v57 = vsel %vm4409_vm3, %v4521_v45, %v4523_v13  ;;  %v2027_v55 = vrot.slane %v2025_v61, 1 }
 0x1c3   : > { %26910 = vst [vmem:[#allocation192_spill] sm:$0xff] %v22853_v57  ;;  %26911 = vst [vmem:[#allocation193_spill] sm:$0xff] %v22859_v25  ;;  %v2023_v21 = vor.u32 %v2021_v49, %v2019_v6  ;;  %v2033_v61 = vshll.u32 %v22859_v25, 16 }
 0x1c5   : > { %v22879_v49 = vsel %vm1136_vm1, %v2023_v21, %v2027_v55  ;;  %v2035_v11 = vrot.slane %v2033_v61, 1 }
 0x1c6   : > { %26913 = vst [vmem:[#allocation195_spill] sm:$0xff] %v22879_v49 }
 0x1c7   : > { %17400 = vmatmul.mubr.msk.bf16.gmra.mrb[212].mxu1 %vm2037_vm2, %v22836_v46  ;;  %v22866_v46 = vld [vmem:[%s21481_s10 + $0x1d0] sm:$0xff]  }
 0x1c8   : > { %17403 = vmatprep.mubr.msk.bf16.mxu1 %vm2037_vm2, %v22840_v42  ;;  %18418 = vmatmul.mubr.msk.bf16.gmra.mrb[100].mxu0 %vm2037_vm2, %v22848_v12  ;;  %v4525_v45 = vrot.slane %v22866_v46, 1  ;;  %v2029_v42 = vshrl.u32 %v22822_v0, 16 }
 0x1c9   : > { %18421 = vmatprep.mubr.msk.bf16.mxu0 %vm2037_vm2, %v22853_v57 }
 0x1ca   : > { %v22882_v57 = vsel %vm4409_vm3, %v4523_v13, %v4525_v45  ;;  %v22887_v12 = vsel %vm4409_vm3, %v4525_v45, %v4527_v3  ;;  %v22891_v6 = vor.u32 %v2029_v42, %v2027_v55  ;;  %v22898_v13 = vld [vmem:[%s21481_s10 + $0x1e0] sm:$0xff]   ;;  %v22902_v45 = vld [vmem:[%s21481_s10 + $0x1e8] sm:$0xff]  }
 0x1cb   : > { %26914 = vst [vmem:[#allocation196_spill] sm:$0xff] %v22882_v57  ;;  %26915 = vst [vmem:[#allocation197_spill] sm:$0xff] %v22887_v12  ;;  %v4529_v21 = vrot.slane %v22898_v13, 1 }
 0x1cc   : > { %26916 = vst [vmem:[#allocation198_spill] sm:$0xff] %v22891_v6  ;;  %v2036_v55 = vsel %vm1136_vm1, %v22891_v6, %v2035_v11  ;;  %v4972_v6 = vsel %vm2374_vm0, %v22326_v63, 0  ;;  %v22954_v63 = vld [vmem:[%s21481_s10 + $0x200] sm:$0xff]  }
 0x1cd   : > { %v22908_v42 = vsel %vm4409_vm3, %v4527_v3, %v4529_v21  ;;  %v22924_v3 = vld [vmem:[%s21481_s10 + $0x1f0] sm:$0xff]  }
 0x1ce   : > { %26917 = vst [vmem:[#allocation199_spill] sm:$0xff] %v22908_v42  ;;  %v4533_v11 = vrot.slane %v22924_v3, 1 }
 0x1cf   : > { %17404 = vmatmul.mubr.msk.bf16.gmra.mrb[216].mxu1 %vm2037_vm2, %v22874_v17  ;;  %v22915_v17 = vld [vmem:[%s21481_s10] sm:$0xff]  }
 0x1d0   : > { %17407 = vmatprep.mubr.msk.bf16.mxu1 %vm2037_vm2, %v22879_v49  ;;  %18422 = vmatmul.mubr.msk.bf16.gmra.mrb[104].mxu0 %vm2037_vm2, %v22882_v57  ;;  %v4531_v49 = vrot.slane %v22902_v45, 1  ;;  %26919 = vst [vmem:[#allocation201_spill] sm:$0xff] %v22915_v17 }
 0x1d1   : > { %18425 = vmatprep.mubr.msk.bf16.mxu0 %vm2037_vm2, %v22887_v12  ;;  %v22945_v12 = vld [vmem:[%s21481_s10 + $0x10] sm:$0xff]  }
 0x1d2   : > { %v22912_v61 = vsel %vm4409_vm3, %v4529_v21, %v4531_v49  ;;  %v22934_v25 = vsel %vm4409_vm3, %v4531_v49, %v4533_v11  ;;  %26923 = vst [vmem:[#allocation205_spill] sm:$0xff] %v22945_v12  ;;  %v4537_v49 = vrot.slane %v22954_v63, 1 }
 0x1d3   : > { %26918 = vst [vmem:[#allocation200_spill] sm:$0xff] %v22912_v61  ;;  %26920 = vst [vmem:[#allocation202_spill] sm:$0xff] %v22934_v25 }
 0x1d7   : > { %17408 = vmatmul.mubr.msk.bf16.gmra.mrb[220].mxu1 %vm2037_vm2, %v2036_v55  ;;  %v22928_v55 = vld [vmem:[%s21481_s10 + $0x1f8] sm:$0xff]  }
 0x1d8   : > { %17413 = vmatprep.mubr.msk.bf16.mxu1 %vm2037_vm2, %v22915_v17  ;;  %18426 = vmatmul.mubr.msk.bf16.gmra.mrb[108].mxu0 %vm2037_vm2, %v22908_v42  ;;  %v4535_v21 = vrot.slane %v22928_v55, 1  ;;  %v22937_v42 = vld [vmem:[%s21481_s10 + $0x8] sm:$0xff]   ;;  %v22983_v17 = vld [vmem:[%s21481_s10 + $0x218] sm:$0xff]  }
 0x1d9   : > { %18429 = vmatprep.mubr.msk.bf16.mxu0 %vm2037_vm2, %v22912_v61  ;;  %26921 = vst [vmem:[#allocation203_spill] sm:$0xff] %v22937_v42  ;;  %26928 = vst [vmem:[#allocation210_spill] sm:$0xff] %v22983_v17 }
 0x1da   : > { %v22942_v61 = vsel %vm4409_vm3, %v4533_v11, %v4535_v21  ;;  %v22958_v11 = vld [vmem:[%s21481_s10 + $0x208] sm:$0xff]   ;;  %v22962_v57 = vsel %vm4409_vm3, %v4535_v21, %v4537_v49  ;;  %v22979_v21 = vld [vmem:[%s21481_s10 + $0x210] sm:$0xff]  }
 0x1db   : > { %26922 = vst [vmem:[#allocation204_spill] sm:$0xff] %v22942_v61  ;;  %26924 = vst [vmem:[#allocation206_spill] sm:$0xff] %v22962_v57 }
 0x1dc   : > { %26927 = vst [vmem:[#allocation209_spill] sm:$0xff] %v22979_v21 }
 0x1df   : > { %17414 = vmatmul.mubr.msk.bf16.vlgmr.msra.gmra.mrb[0].mxu1 %vm2037_vm2, %v22937_v42  ;;  %v4541_v42 = vrot.slane %v22979_v21, 1  ;;  %v21216_v21 = vld [vmem:[%s21481_s10 + $0x38] sm:$0xff]  }
 0x1e0   : > { %17638 = vmatpush3.bf16.msra.mxu1 %v4972_v6  ;;  %17417 = vmatprep.mubr.msk.bf16.mxu1 %vm2037_vm2, %v22945_v12  ;;  %v4539_v6 = vrot.slane %v22958_v11, 1  ;;  %v22965_v12 = vld [vmem:[%s21481_s10 + $0x18] sm:$0xff]  }
 0x1e1   : > { %18430 = vmatmul.mubr.msk.bf16.gmra.mrb[112].mxu0 %vm2037_vm2, %v22934_v25  ;;  %26925 = vst [vmem:[#allocation207_spill] sm:$0xff] %v22965_v12  ;;  %v21210_v25 = vld [vmem:[%s21481_s10 + $0x20] sm:$0xff]  }
 0x1e2   : > { %18433 = vmatprep.mubr.msk.bf16.mxu0 %vm2037_vm2, %v22942_v61  ;;  %v22970_v61 = vsel %vm4409_vm3, %v4537_v49, %v4539_v6  ;;  %v4543_v49 = vrot.slane %v22983_v17, 1  ;;  %v23001_v17 = vld [vmem:[%s21481_s10 + $0x220] sm:$0xff]  }
 0x1e3   : > { %26926 = vst [vmem:[#allocation208_spill] sm:$0xff] %v22970_v61  ;;  %26931 = vst [vmem:[#allocation213_spill] sm:$0xff] %v23001_v17 }
 0x1e7   : > { %17418 = vmatmul.mubr.msk.bf16.gmra.mrb[4].mxu1 %vm2037_vm2, %v22965_v12  ;;  %v22987_v12 = vsel %vm4409_vm3, %v4539_v6, %v4541_v42  ;;  %v4545_v6 = vrot.slane %v23001_v17, 1  ;;  %v23124_v17 = vld [vmem:[%s21481_s10 + $0x90] sm:$0xff]  }
 0x1e8   : > { %17421 = vmatprep.mubr.msk.bf16.mxu1 %vm2037_vm2, %v21210_v25  ;;  %26929 = vst [vmem:[#allocation211_spill] sm:$0xff] %v22987_v12  ;;  %v21213_v25 = vld [vmem:[%s21481_s10 + $0x28] sm:$0xff]  }
 0x1e9   : > { %18434 = vmatmul.mubr.msk.bf16.gmra.mrb[116].mxu0 %vm2037_vm2, %v22962_v57  ;;  %v22992_v57 = vsel %vm4409_vm3, %v4541_v42, %v4543_v49  ;;  %v23006_v42 = vsel %vm4409_vm3, %v4543_v49, %v4545_v6 }
 0x1ea   : > { %18437 = vmatprep.mubr.msk.bf16.mxu0 %vm2037_vm2, %v22970_v61  ;;  %26930 = vst [vmem:[#allocation212_spill] sm:$0xff] %v22992_v57  ;;  %v21214_v61 = vld [vmem:[%s21481_s10 + $0x30] sm:$0xff]   ;;  %26932 = vst [vmem:[#allocation214_spill] sm:$0xff] %v23006_v42 }
 0x1ef   : > { %17422 = vmatmul.mubr.msk.bf16.gmra.mrb[8].mxu1 %vm2037_vm2, %v21213_v25  ;;  %v4547_v25 = vrot.slane %v22031_v8, 1  ;;  %v4549_v8 = vrot.slane %v22053_v38, 1  ;;  %v4553_v38 = vrot.slane %v22085_v54, 1  ;;  %v4557_v54 = vrot.slane %v22117_v26, 1 }
 0x1f0   : > { %17425 = vmatprep.mubr.msk.bf16.mxu1 %vm2037_vm2, %v21214_v61  ;;  %v4561_v26 = vrot.slane %v22155_v50, 1  ;;  %v4565_v50 = vrot.slane %v22193_v62, 1  ;;  %v4569_v62 = vrot.slane %v22231_v16, 1  ;;  %v4575_v16 = vrot.slane %v22276_v39, 1 }
 0x1f1   : > { %18438 = vmatmul.mubr.msk.bf16.gmra.mrb[120].mxu0 %vm2037_vm2, %v22987_v12  ;;  %v23011_v61 = vsel %vm4409_vm3, %v4545_v6, %v4547_v25  ;;  %v23014_v12 = vld [vmem:[%s21481_s10 + $0x40] sm:$0xff]   ;;  %v23025_v49 = vsel %vm4409_vm3, %v4547_v25, %v4549_v8  ;;  %v23028_v6 = vld [vmem:[%s21481_s10 + $0x48] sm:$0xff]   ;;  %v4577_v39 = vrot.slane %v22314_v59, 1 }
 0x1f2   : > { %18441 = vmatprep.mubr.msk.bf16.mxu0 %vm2037_vm2, %v22992_v57  ;;  %26933 = vst [vmem:[#allocation215_spill] sm:$0xff] %v23011_v61  ;;  %26934 = vst [vmem:[#allocation216_spill] sm:$0xff] %v23025_v49 }
 0x1f7   : > { %17426 = vmatmul.mubr.msk.bf16.gmra.mrb[12].mxu1 %vm2037_vm2, %v21216_v21  ;;  %v4551_v21 = vrot.slane %v22060_v14, 1  ;;  %v4555_v14 = vrot.slane %v22092_v56, 1  ;;  %v4559_v56 = vrot.slane %v22124_v52, 1  ;;  %v4563_v52 = vrot.slane %v22162_v60, 1 }
 0x1f8   : > { %17429 = vmatprep.mubr.msk.bf16.mxu1 %vm2037_vm2, %v23014_v12  ;;  %v4567_v60 = vrot.slane %v22200_v33, 1  ;;  %v4571_v33 = vrot.slane %v22238_v1, 1  ;;  %v4573_v1 = vrot.slane %v22266_v41, 1  ;;  %v4579_v41 = vrot.slane %v22321_v51, 1 }
 0x1f9   : > { %18442 = vmatmul.mubr.msk.bf16.gmra.mrb[124].mxu0 %vm2037_vm2, %v23006_v42  ;;  %v23033_v57 = vsel %vm4409_vm3, %v4549_v8, %v4551_v21  ;;  %v23036_v42 = vld [vmem:[%s21481_s10 + $0x50] sm:$0xff]   ;;  %v23047_v25 = vsel %vm4409_vm3, %v4551_v21, %v4553_v38  ;;  %v23050_v8 = vld [vmem:[%s21481_s10 + $0x58] sm:$0xff]   ;;  %v23069_v21 = vsel %vm4409_vm3, %v4555_v14, %v4557_v54  ;;  %v4581_v51 = vrot.slane %v22359_v23, 1 }
 0x1fa   : > { %18445 = vmatprep.mubr.msk.bf16.mxu0 %vm2037_vm2, %v23011_v61  ;;  %26935 = vst [vmem:[#allocation217_spill] sm:$0xff] %v23033_v57  ;;  %26936 = vst [vmem:[#allocation218_spill] sm:$0xff] %v23047_v25  ;;  %v23055_v61 = vsel %vm4409_vm3, %v4553_v38, %v4555_v14  ;;  %v23072_v38 = vld [vmem:[%s21481_s10 + $0x68] sm:$0xff]   ;;  %v23091_v14 = vsel %vm4409_vm3, %v4559_v56, %v4561_v26  ;;  %v4585_v23 = vrot.slane %v22397_v30, 1  ;;  %v4589_v30 = vrot.slane %v22435_v10, 1 }
 0x1fb   : > { %26937 = vst [vmem:[#allocation219_spill] sm:$0xff] %v23055_v61  ;;  %26938 = vst [vmem:[#allocation220_spill] sm:$0xff] %v23069_v21  ;;  %v4593_v10 = vrot.slane %v22473_v18, 1  ;;  %v4597_v18 = vrot.slane %v22511_v34, 1  ;;  %v4601_v34 = vrot.slane %v22549_v9, 1 }
 0x1fc   : > { %26940 = vst [vmem:[#allocation222_spill] sm:$0xff] %v23091_v14 }
 0x1ff   : > { %17430 = vmatmul.mubr.msk.bf16.gmra.mrb[16].mxu1 %vm2037_vm2, %v23028_v6 }
 0x200   : > { %17433 = vmatprep.mubr.msk.bf16.mxu1 %vm2037_vm2, %v23036_v42 }
 0x201   : > { %18446 = vmatmul.mubr.msk.bf16.gmra.mrb[128].mxu0 %vm2037_vm2, %v23025_v49  ;;  %v23058_v49 = vld [vmem:[%s21481_s10 + $0x60] sm:$0xff]  }
 0x202   : > { %18449 = vmatprep.mubr.msk.bf16.mxu0 %vm2037_vm2, %v23033_v57  ;;  %v23077_v57 = vsel %vm4409_vm3, %v4557_v54, %v4559_v56  ;;  %v23094_v54 = vld [vmem:[%s21481_s10 + $0x78] sm:$0xff]   ;;  %v23113_v56 = vsel %vm4409_vm3, %v4563_v52, %v4565_v50 }
 0x203   : > { %26939 = vst [vmem:[#allocation221_spill] sm:$0xff] %v23077_v57  ;;  %26942 = vst [vmem:[#allocation224_spill] sm:$0xff] %v23113_v56 }
 0x207   : > { %17434 = vmatmul.mubr.msk.bf16.gmra.mrb[20].mxu1 %vm2037_vm2, %v23050_v8 }
 0x208   : > { %17437 = vmatprep.mubr.msk.bf16.mxu1 %vm2037_vm2, %v23058_v49 }
 0x209   : > { %18450 = vmatmul.mubr.msk.bf16.gmra.mrb[132].mxu0 %vm2037_vm2, %v23047_v25  ;;  %v23080_v25 = vld [vmem:[%s21481_s10 + $0x70] sm:$0xff]  }
 0x20a   : > { %18453 = vmatprep.mubr.msk.bf16.mxu0 %vm2037_vm2, %v23055_v61  ;;  %v23099_v61 = vsel %vm4409_vm3, %v4561_v26, %v4563_v52  ;;  %v23116_v26 = vld [vmem:[%s21481_s10 + $0x88] sm:$0xff]   ;;  %v23135_v52 = vsel %vm4409_vm3, %v4567_v60, %v4569_v62 }
 0x20b   : > { %26941 = vst [vmem:[#allocation223_spill] sm:$0xff] %v23099_v61  ;;  %26944 = vst [vmem:[#allocation226_spill] sm:$0xff] %v23135_v52 }
 0x20f   : > { %17438 = vmatmul.mubr.msk.bf16.gmra.mrb[24].mxu1 %vm2037_vm2, %v23072_v38 }
 0x210   : > { %17441 = vmatprep.mubr.msk.bf16.mxu1 %vm2037_vm2, %v23080_v25 }
 0x211   : > { %18454 = vmatmul.mubr.msk.bf16.gmra.mrb[136].mxu0 %vm2037_vm2, %v23069_v21  ;;  %v23102_v21 = vld [vmem:[%s21481_s10 + $0x80] sm:$0xff]  }
 0x212   : > { %18457 = vmatprep.mubr.msk.bf16.mxu0 %vm2037_vm2, %v23077_v57  ;;  %v23121_v57 = vsel %vm4409_vm3, %v4565_v50, %v4567_v60  ;;  %v23138_v50 = vld [vmem:[%s21481_s10 + $0x98] sm:$0xff]   ;;  %v23154_v60 = vsel %vm4409_vm3, %v4571_v33, %v4573_v1 }
 0x213   : > { %26943 = vst [vmem:[#allocation225_spill] sm:$0xff] %v23121_v57  ;;  %26946 = vst [vmem:[#allocation228_spill] sm:$0xff] %v23154_v60 }
 0x217   : > { %17442 = vmatmul.mubr.msk.bf16.gmra.mrb[28].mxu1 %vm2037_vm2, %v23094_v54 }
 0x218   : > { %17445 = vmatprep.mubr.msk.bf16.mxu1 %vm2037_vm2, %v23102_v21 }
 0x219   : > { %18458 = vmatmul.mubr.msk.bf16.gmra.mrb[140].mxu0 %vm2037_vm2, %v23091_v14 }
 0x21a   : > { %18461 = vmatprep.mubr.msk.bf16.mxu0 %vm2037_vm2, %v23099_v61  ;;  %v23143_v61 = vsel %vm4409_vm3, %v4569_v62, %v4571_v33  ;;  %v23159_v62 = vsel %vm4409_vm3, %v4573_v1, %v4575_v16  ;;  %v26963_v1 = vld [vmem:[#allocation138_spill] sm:$0xff] }
 0x21b   : > { %26945 = vst [vmem:[#allocation227_spill] sm:$0xff] %v23143_v61  ;;  %26947 = vst [vmem:[#allocation229_spill] sm:$0xff] %v23159_v62 }
 0x21f   : > { %17446 = vmatmul.mubr.msk.bf16.gmra.mrb[32].mxu1 %vm2037_vm2, %v23116_v26 }
 0x220   : > { %17449 = vmatprep.mubr.msk.bf16.mxu1 %vm2037_vm2, %v23124_v17 }
 0x221   : > { %18462 = vmatmul.mubr.msk.bf16.gmra.mrb[144].mxu0 %vm2037_vm2, %v23113_v56  ;;  %v27017_v56 = vld [vmem:[#allocation173_spill] sm:$0xff] }
 0x222   : > { %18465 = vmatprep.mubr.msk.bf16.mxu0 %vm2037_vm2, %v23121_v57 }
 0x227   : > { %17450 = vmatmul.mubr.msk.bf16.gmra.mrb[36].mxu1 %vm2037_vm2, %v23138_v50 }
 0x228   : > { %17453 = vmatprep.mubr.msk.bf16.mxu1 %vm2037_vm2, %v22129_v24  ;;  %v23170_v24 = vsel %vm4409_vm3, %v4575_v16, %v4577_v39  ;;  %v4605_v16 = vrot.slane %v26963_v1, 1 }
 0x229   : > { %18466 = vmatmul.mubr.msk.bf16.gmra.mrb[148].mxu0 %vm2037_vm2, %v23135_v52  ;;  %26948 = vst [vmem:[#allocation230_spill] sm:$0xff] %v23170_v24  ;;  %v23436_v52 = vld [vmem:[%s22281_s16 + $0x20] sm:$0xf] }
 0x22a   : > { %18469 = vmatprep.mubr.msk.bf16.mxu0 %vm2037_vm2, %v23143_v61  ;;  %v27012_v61 = vld [vmem:[#allocation172_spill] sm:$0xff]  ;;  %v23443_v57 = vcombine.low %v23436_v52, %v23436_v52 }
 0x22f   : > { %17454 = vmatmul.mubr.msk.bf16.gmra.mrb[40].mxu1 %vm2037_vm2, %v22133_v37  ;;  %v23175_v37 = vsel %vm4409_vm3, %v4577_v39, %v4579_v41  ;;  %v26964_v39 = vld [vmem:[#allocation139_spill] sm:$0xff] }
 0x230   : > { %17457 = vmatprep.mubr.msk.bf16.mxu1 %vm2037_vm2, %v22167_v43  ;;  %26949 = vst [vmem:[#allocation231_spill] sm:$0xff] %v23175_v37  ;;  %v23187_v43 = vld [vmem:[%s26213_s2 + $0x1c] sm:$0xf] }
 0x231   : > { %18470 = vmatmul.mubr.msk.bf16.gmra.mrb[152].mxu0 %vm2037_vm2, %v23154_v60  ;;  %20993 = vmatprep.subr.msk.bf16.mxu0 %vm2374_vm0, %v23187_v43 }
 0x232   : > { %18473 = vmatprep.mubr.msk.bf16.mxu0 %vm2037_vm2, %v23159_v62  ;;  %v27009_v62 = vld [vmem:[#allocation165_spill] sm:$0xff] }
 0x237   : > { %17458 = vmatmul.mubr.msk.bf16.gmra.mrb[44].mxu1 %vm2037_vm2, %v22171_v36  ;;  %v4583_v36 = vrot.slane %v22366_v44, 1  ;;  %v4587_v44 = vrot.slane %v22404_v27, 1 }
 0x238   : > { %17461 = vmatprep.mubr.msk.bf16.mxu1 %vm2037_vm2, %v22205_v4  ;;  %v23193_v4 = vsel %vm4409_vm3, %v4579_v41, %v4581_v51  ;;  %v4607_v41 = vrot.slane %v26964_v39, 1 }
 0x239   : > { %18474 = vmatmul.mubr.msk.bf16.gmra.mrb[156].mxu0 %vm2037_vm2, %v23170_v24  ;;  %26950 = vst [vmem:[#allocation232_spill] sm:$0xff] %v23193_v4  ;;  %v23198_v59 = vsel %vm4409_vm3, %v4581_v51, %v4583_v36  ;;  %v23209_v33 = vsel %vm4409_vm3, %v4583_v36, %v4585_v23  ;;  %v23225_v27 = vsel %vm4409_vm3, %v4587_v44, %v4589_v30  ;;  %v27006_v24 = vld [vmem:[#allocation164_spill] sm:$0xff] }
 0x23a   : > { %18477 = vmatprep.mubr.msk.bf16.mxu0 %vm2037_vm2, %v23175_v37  ;;  %26951 = vst [vmem:[#allocation233_spill] sm:$0xff] %v23198_v59  ;;  %26952 = vst [vmem:[#allocation234_spill] sm:$0xff] %v23209_v33  ;;  %v23294_v36 = vsel %vm4409_vm3, %v4605_v16, %v4607_v41  ;;  %v27003_v37 = vld [vmem:[#allocation157_spill] sm:$0xff] }
 0x23b   : > { %26954 = vst [vmem:[#allocation236_spill] sm:$0xff] %v23225_v27  ;;  %26967 = vst [vmem:[#allocation138_spill] sm:$0xff] %v23294_v36 }
 0x23f   : > { %17462 = vmatmul.mubr.msk.bf16.gmra.mrb[48].mxu1 %vm2037_vm2, %v22209_v20  ;;  %v23214_v20 = vsel %vm4409_vm3, %v4585_v23, %v4587_v44  ;;  %v26968_v23 = vld [vmem:[#allocation120_spill] sm:$0xff]  ;;  %v26969_v44 = vld [vmem:[#allocation146_spill] sm:$0xff] }
 0x240   : > { %17465 = vmatprep.mubr.msk.bf16.mxu1 %vm2037_vm2, %v22243_v22  ;;  %26953 = vst [vmem:[#allocation235_spill] sm:$0xff] %v23214_v20  ;;  %v4591_v22 = vrot.slane %v22442_v5, 1 }
 0x241   : > { %18478 = vmatmul.mubr.msk.bf16.gmra.mrb[160].mxu0 %vm2037_vm2, %v23193_v4 }
 0x242   : > { %18481 = vmatprep.mubr.msk.bf16.mxu0 %vm2037_vm2, %v23198_v59  ;;  %v23241_v5 = vsel %vm4409_vm3, %v4591_v22, %v4593_v10  ;;  %v23385_v59 = vrot.slane %v22822_v0, 1 }
 0x243   : > { %26956 = vst [vmem:[#allocation238_spill] sm:$0xff] %v23241_v5 }
 0x247   : > { %17466 = vmatmul.mubr.msk.bf16.gmra.mrb[52].mxu1 %vm2037_vm2, %v22248_v31  ;;  %v23230_v31 = vsel %vm4409_vm3, %v4589_v30, %v4591_v22  ;;  %v4609_v30 = vrot.slane %v26969_v44, 1  ;;  %v26970_v22 = vld [vmem:[#allocation147_spill] sm:$0xff] }
 0x248   : > { %17469 = vmatprep.mubr.msk.bf16.mxu1 %vm2037_vm2, %v22288_v35  ;;  %26955 = vst [vmem:[#allocation237_spill] sm:$0xff] %v23230_v31  ;;  %v4595_v35 = vrot.slane %v22480_v47, 1 }
 0x249   : > { %18482 = vmatmul.mubr.msk.bf16.gmra.mrb[164].mxu0 %vm2037_vm2, %v23209_v33  ;;  %v26998_v33 = vld [vmem:[#allocation156_spill] sm:$0xff] }
 0x24a   : > { %18485 = vmatprep.mubr.msk.bf16.mxu0 %vm2037_vm2, %v23214_v20  ;;  %v23257_v47 = vsel %vm4409_vm3, %v4595_v35, %v4597_v18  ;;  %v26996_v20 = vld [vmem:[#allocation149_spill] sm:$0xff]  ;;  %27016 = vst [vmem:[#allocation156_spill] sm:$0xff] %v23443_v57 }
 0x24b   : > { %26958 = vst [vmem:[#allocation240_spill] sm:$0xff] %v23257_v47 }
 0x24f   : > { %17470 = vmatmul.mubr.msk.bf16.gmra.mrb[56].mxu1 %vm2037_vm2, %v22292_v19  ;;  %v23246_v19 = vsel %vm4409_vm3, %v4593_v10, %v4595_v35  ;;  %v4611_v10 = vrot.slane %v26970_v22, 1  ;;  %v23305_v35 = vsel %vm4409_vm3, %v4607_v41, %v4609_v30 }
 0x250   : > { %17473 = vmatprep.mubr.msk.bf16.mxu1 %vm2037_vm2, %v22331_v29  ;;  %26957 = vst [vmem:[#allocation239_spill] sm:$0xff] %v23246_v19  ;;  %v4599_v29 = vrot.slane %v22518_v40, 1  ;;  %26971 = vst [vmem:[#allocation139_spill] sm:$0xff] %v23305_v35 }
 0x251   : > { %18486 = vmatmul.mubr.msk.bf16.gmra.mrb[168].mxu0 %vm2037_vm2, %v23225_v27 }
 0x252   : > { %18489 = vmatprep.mubr.msk.bf16.mxu0 %vm2037_vm2, %v23230_v31  ;;  %v23273_v40 = vsel %vm4409_vm3, %v4599_v29, %v4601_v34 }
 0x253   : > { %26960 = vst [vmem:[#allocation242_spill] sm:$0xff] %v23273_v40 }
 0x257   : > { %17474 = vmatmul.mubr.msk.bf16.gmra.mrb[60].mxu1 %vm2037_vm2, %v22337_v32  ;;  %v23262_v32 = vsel %vm4409_vm3, %v4597_v18, %v4599_v29  ;;  %v26972_v18 = vld [vmem:[#allocation121_spill] sm:$0xff]  ;;  %v23310_v29 = vsel %vm4409_vm3, %v4609_v30, %v4611_v10 }
 0x258   : > { %17477 = vmatprep.mubr.msk.bf16.mxu1 %vm2037_vm2, %v22371_v2  ;;  %26959 = vst [vmem:[#allocation241_spill] sm:$0xff] %v23262_v32  ;;  %v4603_v2 = vrot.slane %v22556_v28, 1 }
 0x259   : > { %18490 = vmatmul.mubr.msk.bf16.gmra.mrb[172].mxu0 %vm2037_vm2, %v23241_v5  ;;  %v26992_v5 = vld [vmem:[#allocation148_spill] sm:$0xff] }
 0x25a   : > { %18493 = vmatprep.mubr.msk.bf16.mxu0 %vm2037_vm2, %v23246_v19  ;;  %v23289_v51 = vsel %vm4409_vm3, %v4603_v2, %v4605_v16  ;;  %v26976_v16 = vld [vmem:[#allocation155_spill] sm:$0xff]  ;;  %v26990_v19 = vld [vmem:[#allocation141_spill] sm:$0xff] }
 0x25b   : > { %v4615_v41 = vrot.slane %v26976_v16, 1 }
 0x25f   : > { %17478 = vmatmul.mubr.msk.bf16.gmra.mrb[64].mxu1 %vm2037_vm2, %v22375_v53  ;;  %v23278_v53 = vsel %vm4409_vm3, %v4601_v34, %v4603_v2  ;;  %v26974_v34 = vld [vmem:[#allocation126_spill] sm:$0xff] }
 0x260   : > { %17481 = vmatprep.mubr.msk.bf16.mxu1 %vm2037_vm2, %v22409_v58  ;;  %26961 = vst [vmem:[#allocation243_spill] sm:$0xff] %v23278_v53  ;;  %v26962_v58 = vld [vmem:[#allocation114_spill] sm:$0xff] }
 0x261   : > { %18494 = vmatmul.mubr.msk.bf16.gmra.mrb[176].mxu0 %vm2037_vm2, %v23257_v47  ;;  %26965 = vst [vmem:[#allocation114_spill] sm:$0xff] %v23289_v51  ;;  %v26975_v2 = vld [vmem:[#allocation154_spill] sm:$0xff] }
 0x262   : > { %18497 = vmatprep.mubr.msk.bf16.mxu0 %vm2037_vm2, %v23262_v32  ;;  %v26988_v32 = vld [vmem:[#allocation171_spill] sm:$0xff] }
 0x267   : > { %17482 = vmatmul.mubr.msk.bf16.gmra.mrb[68].mxu1 %vm2037_vm2, %v22413_v15  ;;  %v26966_v15 = vld [vmem:[#allocation115_spill] sm:$0xff] }
 0x268   : > { %17485 = vmatprep.mubr.msk.bf16.mxu1 %vm2037_vm2, %v26962_v58  ;;  %26973 = vst [vmem:[#allocation115_spill] sm:$0xff] %v23310_v29  ;;  %v4613_v58 = vrot.slane %v26975_v2, 1 }
 0x269   : > { %18498 = vmatmul.mubr.msk.bf16.gmra.mrb[180].mxu0 %vm2037_vm2, %v23273_v40  ;;  %v26986_v40 = vld [vmem:[#allocation140_spill] sm:$0xff] }
 0x26a   : > { %18501 = vmatprep.mubr.msk.bf16.mxu0 %vm2037_vm2, %v23278_v53  ;;  %v23326_v30 = vsel %vm4409_vm3, %v4613_v58, %v4615_v41  ;;  %v26984_v53 = vld [vmem:[#allocation133_spill] sm:$0xff] }
 0x26b   : > { %26979 = vst [vmem:[#allocation146_spill] sm:$0xff] %v23326_v30 }
 0x26f   : > { %17486 = vmatmul.mubr.msk.bf16.gmra.mrb[72].mxu1 %vm2037_vm2, %v26966_v15  ;;  %v23321_v15 = vsel %vm4409_vm3, %v4611_v10, %v4613_v58 }
 0x270   : > { %17489 = vmatprep.mubr.msk.bf16.mxu1 %vm2037_vm2, %v26968_v23  ;;  %26977 = vst [vmem:[#allocation120_spill] sm:$0xff] %v23321_v15  ;;  %v26978_v23 = vld [vmem:[#allocation127_spill] sm:$0xff] }
 0x271   : > { %18502 = vmatmul.mubr.msk.bf16.gmra.mrb[184].mxu0 %vm2037_vm2, %v23289_v51 }
 0x272   : > { %18505 = vmatprep.mubr.msk.bf16.mxu0 %vm2037_vm2, %v23294_v36  ;;  %v26982_v36 = vld [vmem:[#allocation163_spill] sm:$0xff] }
 0x273   : > { %v4619_v10 = vrot.slane %v26982_v36, 1 }
 0x277   : > { %17490 = vmatmul.mubr.msk.bf16.gmra.mrb[76].mxu1 %vm2037_vm2, %v26972_v18  ;;  %v26980_v18 = vld [vmem:[#allocation132_spill] sm:$0xff] }
 0x278   : > { %17493 = vmatprep.mubr.msk.bf16.mxu1 %vm2037_vm2, %v26974_v34  ;;  %27000 = vst [vmem:[#allocation132_spill] sm:$0xff] %v23385_v59 }
 0x279   : > { %18506 = vmatmul.mubr.msk.bf16.gmra.mrb[188].mxu0 %vm2037_vm2, %v23305_v35 }
 0x27a   : > { %18509 = vmatprep.mubr.msk.bf16.mxu0 %vm2037_vm2, %v23310_v29  ;;  %v26981_v29 = vld [vmem:[#allocation162_spill] sm:$0xff] }
 0x27b   : > { %v4617_v35 = vrot.slane %v26981_v29, 1 }
 0x27d   : > { %v23337_v51 = vsel %vm4409_vm3, %v4615_v41, %v4617_v35  ;;  %v23342_v58 = vsel %vm4409_vm3, %v4617_v35, %v4619_v10  ;;  %v4623_v41 = vrot.slane %v26988_v32, 1 }
 0x27e   : > { %26983 = vst [vmem:[#allocation147_spill] sm:$0xff] %v23337_v51  ;;  %26985 = vst [vmem:[#allocation121_spill] sm:$0xff] %v23342_v58 }
 0x27f   : > { %17494 = vmatmul.mubr.msk.bf16.gmra.mrb[80].mxu1 %vm2037_vm2, %v26978_v23 }
 0x280   : > { %17497 = vmatprep.mubr.msk.bf16.mxu1 %vm2037_vm2, %v26980_v18 }
 0x281   : > { %18510 = vmatmul.mubr.msk.bf16.gmra.mrb[192].mxu0 %vm2037_vm2, %v23321_v15 }
 0x282   : > { %18513 = vmatprep.mubr.msk.bf16.mxu0 %vm2037_vm2, %v23326_v30  ;;  %v26987_v30 = vld [vmem:[#allocation170_spill] sm:$0xff] }
 0x283   : > { %v4621_v15 = vrot.slane %v26987_v30, 1 }
 0x285   : > { %v23353_v47 = vsel %vm4409_vm3, %v4619_v10, %v4621_v15  ;;  %v23358_v35 = vsel %vm4409_vm3, %v4621_v15, %v4623_v41  ;;  %v26994_v10 = vld [vmem:[#allocation179_spill] sm:$0xff] }
 0x286   : > { %26989 = vst [vmem:[#allocation126_spill] sm:$0xff] %v23353_v47  ;;  %26991 = vst [vmem:[#allocation154_spill] sm:$0xff] %v23358_v35  ;;  %v4627_v31 = vrot.slane %v26994_v10, 1 }
 0x287   : > { %17498 = vmatmul.mubr.msk.bf16.gmra.mrb[84].mxu1 %vm2037_vm2, %v26984_v53  ;;  %27014 = vst [vmem:[#allocation179_spill] sm:$0xff] %v23436_v52  ;;  %v27021_v52 = vld [vmem:[#allocation187_spill] sm:$0xff] }
 0x288   : > { %17501 = vmatprep.mubr.msk.bf16.mxu1 %vm2037_vm2, %v26986_v40 }
 0x289   : > { %18514 = vmatmul.mubr.msk.bf16.gmra.mrb[196].mxu0 %vm2037_vm2, %v23337_v51 }
 0x28a   : > { %18517 = vmatprep.mubr.msk.bf16.mxu0 %vm2037_vm2, %v23342_v58  ;;  %v26993_v58 = vld [vmem:[#allocation178_spill] sm:$0xff] }
 0x28b   : > { %v4625_v51 = vrot.slane %v26993_v58, 1 }
 0x28d   : > { %v23369_v27 = vsel %vm4409_vm3, %v4623_v41, %v4625_v51  ;;  %v23374_v15 = vsel %vm4409_vm3, %v4625_v51, %v4627_v31  ;;  %v554_v41 = vld [vmem:[%s22281_s16 + $0x4] sm:$0xf] }
 0x28e   : > { %26995 = vst [vmem:[#allocation155_spill] sm:$0xff] %v23369_v27  ;;  %26997 = vst [vmem:[#allocation127_spill] sm:$0xff] %v23374_v15  ;;  %v23388_v51 = vcombine.low %v22845_v48, %v554_v41  ;;  %v23415_v41 = vld [vmem:[%s22281_s16 + $0x10] sm:$0xff]  }
 0x28f   : > { %17502 = vmatmul.mubr.msk.bf16.gmra.mrb[88].mxu1 %vm2037_vm2, %v26990_v19  ;;  %27008 = vst [vmem:[#allocation171_spill] sm:$0xff] %v23415_v41 }
 0x290   : > { %17505 = vmatprep.mubr.msk.bf16.mxu1 %vm2037_vm2, %v26992_v5  ;;  %27001 = vst [vmem:[#allocation162_spill] sm:$0xff] %v23388_v51  ;;  %v8358_v48 = vrot.slane %v23388_v51, 1  ;;  %v23673_v51 = vld [vmem:[%s21481_s10 + $0x2a0] sm:$0xff]  }
 0x291   : > { %18518 = vmatmul.mubr.msk.bf16.gmra.mrb[200].mxu0 %vm2037_vm2, %v23353_v47  ;;  %27043 = vst [vmem:[#allocation249_spill] sm:$0xff] %v23673_v51 }
 0x292   : > { %18521 = vmatprep.mubr.msk.bf16.mxu0 %vm2037_vm2, %v23358_v35  ;;  %v26999_v35 = vld [vmem:[#allocation186_spill] sm:$0xff] }
 0x293   : > { %v4629_v47 = vrot.slane %v26999_v35, 1 }
 0x295   : > { %v23391_v4 = vsel %vm4409_vm3, %v4627_v31, %v4629_v47 }
 0x296   : > { %27002 = vst [vmem:[#allocation163_spill] sm:$0xff] %v23391_v4 }
 0x297   : > { %17506 = vmatmul.mubr.msk.bf16.gmra.mrb[92].mxu1 %vm2037_vm2, %v26996_v20 }
 0x298   : > { %17509 = vmatprep.mubr.msk.bf16.mxu1 %vm2037_vm2, %v26998_v33 }
 0x299   : > { %18522 = vmatmul.mubr.msk.bf16.gmra.mrb[204].mxu0 %vm2037_vm2, %v23369_v27  ;;  %v23397_v27 = vsel %vm4409_vm3, %v4629_v47, %v23385_v59  ;;  %v23412_v47 = vsel %vm4409_vm3, %v23385_v59, %v8358_v48  ;;  %v8362_v59 = vrot.slane %v23415_v41, 1  ;;  %v23658_v41 = vld [vmem:[%s21481_s10 + $0x108] sm:$0xff]  }
 0x29a   : > { %18525 = vmatprep.mubr.msk.bf16.mxu0 %vm2037_vm2, %v23374_v15  ;;  %27004 = vst [vmem:[#allocation133_spill] sm:$0xff] %v23397_v27  ;;  %v23400_v15 = vld [vmem:[%s22281_s16 + $0x8] sm:$0xff]   ;;  %27007 = vst [vmem:[#allocation170_spill] sm:$0xff] %v23412_v47 }
 0x29b   : > { %27005 = vst [vmem:[#allocation140_spill] sm:$0xff] %v23400_v15  ;;  %v8360_v31 = vrot.slane %v23400_v15, 1  ;;  %27040 = vst [vmem:[#allocation246_spill] sm:$0xff] %v23658_v41  ;;  %v23668_v15 = vld [vmem:[%s21481_s10 + $0x298] sm:$0xff]  }
 0x29c   : > { %27042 = vst [vmem:[#allocation248_spill] sm:$0xff] %v23668_v15 }
 0x29d   : > { %v23420_v60 = vsel %vm4409_vm3, %v8358_v48, %v8360_v31  ;;  %v23439_v48 = vsel %vm4409_vm3, %v8360_v31, %v8362_v59  ;;  %v8366_v31 = vrot.slane %v23443_v57, 1  ;;  %v10669_v57 = vsel %vm2374_vm0, %v23187_v43, 0  ;;  %v23571_v43 = vld [vmem:[%s21481_s10 + $0xc8] sm:$0xff]  }
 0x29e   : > { %27010 = vst [vmem:[#allocation141_spill] sm:$0xff] %v23420_v60  ;;  %27015 = vst [vmem:[#allocation149_spill] sm:$0xff] %v23439_v48 }
 0x29f   : > { %17510 = vmatmul.mubr.msk.bf16.gmra.mrb[96].mxu1 %vm2037_vm2, %v27003_v37 }
 0x2a0   : > { %17513 = vmatprep.mubr.msk.bf16.mxu1 %vm2037_vm2, %v27006_v24 }
 0x2a1   : > { %18526 = vmatmul.mubr.msk.bf16.gmra.mrb[208].mxu0 %vm2037_vm2, %v23391_v4  ;;  %v23423_v4 = vld [vmem:[%s22281_s16 + $0x18] sm:$0xff]  }
 0x2a2   : > { %18529 = vmatprep.mubr.msk.bf16.mxu0 %vm2037_vm2, %v23397_v27  ;;  %27011 = vst [vmem:[#allocation148_spill] sm:$0xff] %v23423_v4  ;;  %v23433_v27 = vrot.slane %v23423_v4, 1  ;;  %v27020_v4 = vld [vmem:[#allocation181_spill] sm:$0xff] }
 0x2a4   : > { %27013 = vst [vmem:[#allocation178_spill] sm:$0xff] %v23433_v27  ;;  %v8367_v14 = vsel %vm4409_vm3, %v23433_v27, %v8366_v31  ;;  %v23576_v31 = vld [vmem:[%s21481_s10 + $0xd0] sm:$0xff]  }
 0x2a5   : > { %27032 = vst [vmem:[#allocation181_spill] sm:$0xff] %v23576_v31 }
 0x2a7   : > { %17514 = vmatmul.mubr.msk.bf16.gmra.mrb[100].mxu1 %vm2037_vm2, %v27009_v62 }
 0x2a8   : > { %17517 = vmatprep.mubr.msk.bf16.mxu1 %vm2037_vm2, %v27012_v61 }
 0x2a9   : > { %18530 = vmatmul.mubr.msk.bf16.gmra.mrb[212].mxu0 %vm2037_vm2, %v23412_v47  ;;  %v27019_v47 = vld [vmem:[#allocation180_spill] sm:$0xff] }
 0x2aa   : > { %18533 = vmatprep.mubr.msk.bf16.mxu0 %vm2037_vm2, %v23420_v60  ;;  %v23449_v60 = vsel %vm4409_vm3, %v8362_v59, %v23433_v27  ;;  %v27022_v59 = vld [vmem:[#allocation188_spill] sm:$0xff]  ;;  %27031 = vst [vmem:[#allocation180_spill] sm:$0xff] %v23571_v43  ;;  %v23581_v27 = vld [vmem:[%s21481_s10 + $0x258] sm:$0xff]  }
 0x2ab   : > { %27018 = vst [vmem:[#allocation186_spill] sm:$0xff] %v23449_v60 }
 0x2af   : > { %17518 = vmatmul.mubr.msk.bf16.gmra.mrb[104].mxu1 %vm2037_vm2, %v27017_v56 }
 0x2b0   : > { %17521 = vmatprep.mubr.msk.bf16.mxu1 %vm2037_vm2, %v27019_v47 }
 0x2b1   : > { %18534 = vmatmul.mubr.msk.bf16.gmra.mrb[216].mxu0 %vm2037_vm2, %v23439_v48  ;;  %v23591_v48 = vld [vmem:[%s21481_s10 + $0xd8] sm:$0xff]  }
 0x2b2   : > { %18537 = vmatprep.mubr.msk.bf16.mxu0 %vm2037_vm2, %v23449_v60  ;;  %v23586_v60 = vld [vmem:[%s21481_s10 + $0x260] sm:$0xff]   ;;  %27033 = vst [vmem:[#allocation187_spill] sm:$0xff] %v23591_v48 }
 0x2b7   : > { %17522 = vmatmul.mubr.msk.bf16.gmra.mrb[108].mxu1 %vm2037_vm2, %v27020_v4 }
 0x2b8   : > { %17525 = vmatprep.mubr.msk.bf16.mxu1 %vm2037_vm2, %v27021_v52 }
 0x2b9   : > { %18538 = vmatmul.mubr.msk.bf16.gmra.mrb[220].mxu0 %vm2037_vm2, %v8367_v14  ;;  %v23551_v14 = vld [vmem:[%s21481_s10 + $0xb8] sm:$0xff]  }
 0x2ba   : > { %18543 = vmatprep.mubr.msk.bf16.mxu0 %vm2037_vm2, %v23014_v12  ;;  %v27023_v12 = vld [vmem:[#allocation209_spill] sm:$0xff]  ;;  %27029 = vst [vmem:[#allocation172_spill] sm:$0xff] %v23551_v14 }
 0x2bf   : > { %17526 = vmatmul.mubr.msk.bf16.gmra.mrb[112].mxu1 %vm2037_vm2, %v27022_v59 }
 0x2c0   : > { %17529 = vmatprep.mubr.msk.bf16.mxu1 %vm2037_vm2, %v22866_v46 }
 0x2c1   : > { %18544 = vmatmul.mubr.msk.bf16.vlgmr.msra.gmra.mrb[0].mxu0 %vm2037_vm2, %v23028_v6  ;;  %v23521_v6 = vld [vmem:[%s21481_s10 + $0x228] sm:$0xff]  }
 0x2c2   : > { %18768 = vmatpush3.bf16.msra.mxu0 %v10669_v57  ;;  %18547 = vmatprep.mubr.msk.bf16.mxu0 %vm2037_vm2, %v23036_v42  ;;  %v27024_v57 = vld [vmem:[#allocation210_spill] sm:$0xff]  ;;  %v27025_v42 = vld [vmem:[#allocation213_spill] sm:$0xff] }
 0x2c7   : > { %17530 = vmatmul.mubr.msk.bf16.gmra.mrb[116].mxu1 %vm2037_vm2, %v22870_v7 }
 0x2c8   : > { %17533 = vmatprep.mubr.msk.bf16.mxu1 %vm2037_vm2, %v22898_v13 }
 0x2c9   : > { %18548 = vmatmul.mubr.msk.bf16.gmra.mrb[4].mxu0 %vm2037_vm2, %v23050_v8  ;;  %v23536_v8 = vld [vmem:[%s21481_s10 + $0xb0] sm:$0xff]  }
 0x2ca   : > { %18551 = vmatprep.mubr.msk.bf16.mxu0 %vm2037_vm2, %v23058_v49  ;;  %v23516_v49 = vld [vmem:[%s21481_s10 + $0xa0] sm:$0xff]   ;;  %27028 = vst [vmem:[#allocation165_spill] sm:$0xff] %v23536_v8 }
 0x2cb   : > { %27026 = vst [vmem:[#allocation157_spill] sm:$0xff] %v23516_v49 }
 0x2cf   : > { %17534 = vmatmul.mubr.msk.bf16.gmra.mrb[120].mxu1 %vm2037_vm2, %v22902_v45 }
 0x2d0   : > { %17537 = vmatprep.mubr.msk.bf16.mxu1 %vm2037_vm2, %v22924_v3 }
 0x2d1   : > { %18552 = vmatmul.mubr.msk.bf16.gmra.mrb[8].mxu0 %vm2037_vm2, %v23072_v38  ;;  %v23546_v38 = vld [vmem:[%s21481_s10 + $0x240] sm:$0xff]  }
 0x2d2   : > { %18555 = vmatprep.mubr.msk.bf16.mxu0 %vm2037_vm2, %v23080_v25  ;;  %v23531_v25 = vld [vmem:[%s21481_s10 + $0xa8] sm:$0xff]  }
 0x2d3   : > { %27027 = vst [vmem:[#allocation164_spill] sm:$0xff] %v23531_v25 }
 0x2d7   : > { %17538 = vmatmul.mubr.msk.bf16.gmra.mrb[124].mxu1 %vm2037_vm2, %v22928_v55 }
 0x2d8   : > { %17541 = vmatprep.mubr.msk.bf16.mxu1 %vm2037_vm2, %v22954_v63 }
 0x2d9   : > { %18556 = vmatmul.mubr.msk.bf16.gmra.mrb[12].mxu0 %vm2037_vm2, %v23094_v54  ;;  %v23556_v54 = vld [vmem:[%s21481_s10 + $0xc0] sm:$0xff]  }
 0x2da   : > { %18559 = vmatprep.mubr.msk.bf16.mxu0 %vm2037_vm2, %v23102_v21  ;;  %v23541_v21 = vld [vmem:[%s21481_s10 + $0x238] sm:$0xff]   ;;  %27030 = vst [vmem:[#allocation173_spill] sm:$0xff] %v23556_v54 }
 0x2df   : > { %17542 = vmatmul.mubr.msk.bf16.gmra.mrb[128].mxu1 %vm2037_vm2, %v22958_v11 }
 0x2e0   : > { %17545 = vmatprep.mubr.msk.bf16.mxu1 %vm2037_vm2, %v27023_v12 }
 0x2e1   : > { %18560 = vmatmul.mubr.msk.bf16.gmra.mrb[16].mxu0 %vm2037_vm2, %v23116_v26  ;;  %v23561_v26 = vld [vmem:[%s21481_s10 + $0x248] sm:$0xff]  }
 0x2e2   : > { %18563 = vmatprep.mubr.msk.bf16.mxu0 %vm2037_vm2, %v23124_v17  ;;  %v23526_v17 = vld [vmem:[%s21481_s10 + $0x230] sm:$0xff]  }
 0x2e7   : > { %17546 = vmatmul.mubr.msk.bf16.gmra.mrb[132].mxu1 %vm2037_vm2, %v27024_v57 }
 0x2e8   : > { %17549 = vmatprep.mubr.msk.bf16.mxu1 %vm2037_vm2, %v27025_v42 }
 0x2e9   : > { %18564 = vmatmul.mubr.msk.bf16.gmra.mrb[20].mxu0 %vm2037_vm2, %v23138_v50  ;;  %v23566_v50 = vld [vmem:[%s21481_s10 + $0x250] sm:$0xff]  }
 0x2ea   : > { %18567 = vmatprep.mubr.msk.bf16.mxu0 %vm2037_vm2, %v23516_v49  ;;  %v23648_v49 = vld [vmem:[%s21481_s10 + $0x288] sm:$0xff]  }
 0x2ef   : > { %17550 = vmatmul.mubr.msk.bf16.gmra.mrb[136].mxu1 %vm2037_vm2, %v23521_v6 }
 0x2f0   : > { %17553 = vmatprep.mubr.msk.bf16.mxu1 %vm2037_vm2, %v23526_v17 }
 0x2f1   : > { %18568 = vmatmul.mubr.msk.bf16.gmra.mrb[24].mxu0 %vm2037_vm2, %v23531_v25  ;;  %v23631_v25 = vld [vmem:[%s21481_s10 + $0xf8] sm:$0xff]  }
 0x2f2   : > { %18571 = vmatprep.mubr.msk.bf16.mxu0 %vm2037_vm2, %v23536_v8  ;;  %v23626_v8 = vld [vmem:[%s21481_s10 + $0x280] sm:$0xff]   ;;  %27037 = vst [vmem:[#allocation213_spill] sm:$0xff] %v23631_v25 }
 0x2f7   : > { %17554 = vmatmul.mubr.msk.bf16.gmra.mrb[140].mxu1 %vm2037_vm2, %v23541_v21 }
 0x2f8   : > { %17557 = vmatprep.mubr.msk.bf16.mxu1 %vm2037_vm2, %v23546_v38 }
 0x2f9   : > { %18572 = vmatmul.mubr.msk.bf16.gmra.mrb[28].mxu0 %vm2037_vm2, %v23551_v14  ;;  %v23611_v14 = vld [vmem:[%s21481_s10 + $0xe8] sm:$0xff]  }
 0x2fa   : > { %18575 = vmatprep.mubr.msk.bf16.mxu0 %vm2037_vm2, %v23556_v54  ;;  %v23606_v54 = vld [vmem:[%s21481_s10 + $0x270] sm:$0xff]   ;;  %27035 = vst [vmem:[#allocation209_spill] sm:$0xff] %v23611_v14 }
 0x2ff   : > { %17558 = vmatmul.mubr.msk.bf16.gmra.mrb[144].mxu1 %vm2037_vm2, %v23561_v26 }
 0x300   : > { %17561 = vmatprep.mubr.msk.bf16.mxu1 %vm2037_vm2, %v23566_v50 }
 0x301   : > { %18576 = vmatmul.mubr.msk.bf16.gmra.mrb[32].mxu0 %vm2037_vm2, %v23571_v43  ;;  %v23596_v43 = vld [vmem:[%s21481_s10 + $0xe0] sm:$0xff]  }
 0x302   : > { %18579 = vmatprep.mubr.msk.bf16.mxu0 %vm2037_vm2, %v23576_v31  ;;  %27034 = vst [vmem:[#allocation188_spill] sm:$0xff] %v23596_v43  ;;  %v23601_v31 = vld [vmem:[%s21481_s10 + $0x268] sm:$0xff]  }
 0x307   : > { %17562 = vmatmul.mubr.msk.bf16.gmra.mrb[148].mxu1 %vm2037_vm2, %v23581_v27 }
 0x308   : > { %17565 = vmatprep.mubr.msk.bf16.mxu1 %vm2037_vm2, %v23586_v60 }
 0x309   : > { %18580 = vmatmul.mubr.msk.bf16.gmra.mrb[36].mxu0 %vm2037_vm2, %v23591_v48  ;;  %v23616_v48 = vld [vmem:[%s21481_s10 + $0xf0] sm:$0xff]  }
 0x30a   : > { %18583 = vmatprep.mubr.msk.bf16.mxu0 %vm2037_vm2, %v23596_v43  ;;  %27036 = vst [vmem:[#allocation210_spill] sm:$0xff] %v23616_v48  ;;  %v23621_v43 = vld [vmem:[%s21481_s10 + $0x278] sm:$0xff]  }
 0x30f   : > { %17566 = vmatmul.mubr.msk.bf16.gmra.mrb[152].mxu1 %vm2037_vm2, %v23601_v31 }
 0x310   : > { %17569 = vmatprep.mubr.msk.bf16.mxu1 %vm2037_vm2, %v23606_v54 }
 0x311   : > { %18584 = vmatmul.mubr.msk.bf16.gmra.mrb[40].mxu0 %vm2037_vm2, %v23611_v14  ;;  %v23641_v14 = vld [vmem:[%s21481_s10 + $0x100] sm:$0xff]  }
 0x312   : > { %18587 = vmatprep.mubr.msk.bf16.mxu0 %vm2037_vm2, %v23616_v48  ;;  %v23638_v48 = vld [vmem:[%s26213_s2 + $0xc] sm:$0xf]  ;;  %27038 = vst [vmem:[#allocation244_spill] sm:$0xff] %v23641_v14 }
 0x313   : > { %20988 = vmatprep.subr.msk.bf16.mxu1 %vm2374_vm0, %v23638_v48 }
 0x317   : > { %17570 = vmatmul.mubr.msk.bf16.gmra.mrb[156].mxu1 %vm2037_vm2, %v23621_v43 }
 0x318   : > { %17573 = vmatprep.mubr.msk.bf16.mxu1 %vm2037_vm2, %v23626_v8 }
 0x319   : > { %18588 = vmatmul.mubr.msk.bf16.gmra.mrb[44].mxu0 %vm2037_vm2, %v23631_v25  ;;  %v23653_v25 = vld [vmem:[%s21481_s10 + $0x290] sm:$0xff]  }
 0x31a   : > { %18591 = vmatprep.mubr.msk.bf16.mxu0 %vm2037_vm2, %v23641_v14  ;;  %27039 = vst [vmem:[#allocation245_spill] sm:$0xff] %v23653_v25  ;;  %v23663_v14 = vld [vmem:[%s21481_s10 + $0x110] sm:$0xff]  }
 0x31b   : > { %27041 = vst [vmem:[#allocation247_spill] sm:$0xff] %v23663_v14 }
 0x31f   : > { %17574 = vmatmul.mubr.msk.bf16.gmra.mrb[160].mxu1 %vm2037_vm2, %v23648_v49 }
 0x320   : > { %17577 = vmatprep.mubr.msk.bf16.mxu1 %vm2037_vm2, %v23653_v25  ;;  %v23678_v25 = vld [vmem:[%s21481_s10 + $0x118] sm:$0xff]  }
 0x321   : > { %18592 = vmatmul.mubr.msk.bf16.gmra.mrb[48].mxu0 %vm2037_vm2, %v23658_v41  ;;  %27044 = vst [vmem:[#allocation250_spill] sm:$0xff] %v23678_v25  ;;  %v23683_v41 = vld [vmem:[%s21481_s10 + $0x120] sm:$0xff]  }
 0x322   : > { %18595 = vmatprep.mubr.msk.bf16.mxu0 %vm2037_vm2, %v23663_v14  ;;  %27045 = vst [vmem:[#allocation251_spill] sm:$0xff] %v23683_v41  ;;  %v23688_v14 = vld [vmem:[%s21481_s10 + $0x2a8] sm:$0xff]  }
 0x323   : > { %27046 = vst [vmem:[#allocation252_spill] sm:$0xff] %v23688_v14 }
 0x327   : > { %17578 = vmatmul.mubr.msk.bf16.gmra.mrb[164].mxu1 %vm2037_vm2, %v23668_v15  ;;  %v23693_v15 = vld [vmem:[%s21481_s10 + $0x2b0] sm:$0xff]  }
 0x328   : > { %17581 = vmatprep.mubr.msk.bf16.mxu1 %vm2037_vm2, %v23673_v51  ;;  %27047 = vst [vmem:[#allocation253_spill] sm:$0xff] %v23693_v15  ;;  %v23698_v51 = vld [vmem:[%s21481_s10 + $0x128] sm:$0xff]  }
 0x329   : > { %18596 = vmatmul.mubr.msk.bf16.gmra.mrb[52].mxu0 %vm2037_vm2, %v23678_v25  ;;  %27048 = vst [vmem:[#allocation254_spill] sm:$0xff] %v23698_v51  ;;  %v23703_v25 = vld [vmem:[%s21481_s10 + $0x130] sm:$0xff]  }
 0x32a   : > { %18599 = vmatprep.mubr.msk.bf16.mxu0 %vm2037_vm2, %v23683_v41  ;;  %27049 = vst [vmem:[#allocation255_spill] sm:$0xff] %v23703_v25  ;;  %v23708_v41 = vld [vmem:[%s21481_s10 + $0x2b8] sm:$0xff]  }
 0x32f   : > { %17582 = vmatmul.mubr.msk.bf16.gmra.mrb[168].mxu1 %vm2037_vm2, %v23688_v14  ;;  %v23713_v14 = vld [vmem:[%s21481_s10 + $0x2c0] sm:$0xff]  }
 0x330   : > { %17585 = vmatprep.mubr.msk.bf16.mxu1 %vm2037_vm2, %v23693_v15  ;;  %v23718_v15 = vld [vmem:[%s21481_s10 + $0x138] sm:$0xff]  }
 0x331   : > { %18600 = vmatmul.mubr.msk.bf16.gmra.mrb[56].mxu0 %vm2037_vm2, %v23698_v51  ;;  %27050 = vst [vmem:[#allocation256_spill] sm:$0xff] %v23718_v15  ;;  %v23730_v51 = vld [vmem:[%s21481_s10 + $0x2d0] sm:$0xff]  }
 0x332   : > { %18603 = vmatprep.mubr.msk.bf16.mxu0 %vm2037_vm2, %v23703_v25  ;;  %v23725_v25 = vld [vmem:[%s21481_s10 + $0x2c8] sm:$0xff]  }
 0x337   : > { %17586 = vmatmul.mubr.msk.bf16.gmra.mrb[172].mxu1 %vm2037_vm2, %v23708_v41 }
 0x338   : > { %17589 = vmatprep.mubr.msk.bf16.mxu1 %vm2037_vm2, %v23713_v14 }
 0x339   : > { %18604 = vmatmul.mubr.msk.bf16.gmra.mrb[60].mxu0 %vm2037_vm2, %v23718_v15  ;;  %v23739_v15 = vld [vmem:[%s21481_s10 + $0x2d8] sm:$0xff]  }
 0x33a   : > { %18607 = vmatprep.mubr.msk.bf16.mxu0 %vm2037_vm2, %v26974_v34  ;;  %v23744_v34 = vld [vmem:[%s21481_s10 + $0x2e0] sm:$0xff]  }
 0x33f   : > { %17590 = vmatmul.mubr.msk.bf16.gmra.mrb[176].mxu1 %vm2037_vm2, %v23725_v25 }
 0x340   : > { %17593 = vmatprep.mubr.msk.bf16.mxu1 %vm2037_vm2, %v23730_v51 }
 0x341   : > { %18608 = vmatmul.mubr.msk.bf16.gmra.mrb[64].mxu0 %vm2037_vm2, %v26978_v23  ;;  %v23753_v23 = vld [vmem:[%s21481_s10 + $0x2e8] sm:$0xff]  }
 0x342   : > { %18611 = vmatprep.mubr.msk.bf16.mxu0 %vm2037_vm2, %v26980_v18  ;;  %v23758_v18 = vld [vmem:[%s21481_s10 + $0x2f0] sm:$0xff]  }
 0x347   : > { %17594 = vmatmul.mubr.msk.bf16.gmra.mrb[180].mxu1 %vm2037_vm2, %v23739_v15 }
 0x348   : > { %17597 = vmatprep.mubr.msk.bf16.mxu1 %vm2037_vm2, %v23744_v34 }
 0x349   : > { %18612 = vmatmul.mubr.msk.bf16.gmra.mrb[68].mxu0 %vm2037_vm2, %v26984_v53  ;;  %v23767_v53 = vld [vmem:[%s21481_s10 + $0x2f8] sm:$0xff]  }
 0x34a   : > { %18615 = vmatprep.mubr.msk.bf16.mxu0 %vm2037_vm2, %v26986_v40  ;;  %v27063_v40 = vld [vmem:[#allocation65_spill] sm:$0xff] }
 0x34f   : > { %17598 = vmatmul.mubr.msk.bf16.gmra.mrb[184].mxu1 %vm2037_vm2, %v23753_v23 }
 0x350   : > { %17601 = vmatprep.mubr.msk.bf16.mxu1 %vm2037_vm2, %v23758_v18 }
 0x351   : > { %18616 = vmatmul.mubr.msk.bf16.gmra.mrb[72].mxu0 %vm2037_vm2, %v26990_v19  ;;  %v27061_v19 = vld [vmem:[#allocation61_spill] sm:$0xff] }
 0x352   : > { %18619 = vmatprep.mubr.msk.bf16.mxu0 %vm2037_vm2, %v26992_v5  ;;  %v27060_v5 = vld [vmem:[#allocation60_spill] sm:$0xff] }
 0x357   : > { %17602 = vmatmul.mubr.msk.bf16.gmra.mrb[188].mxu1 %vm2037_vm2, %v23767_v53 }
 0x358   : > { %17605 = vmatprep.mubr.msk.bf16.mxu1 %vm2037_vm2, %v22549_v9  ;;  %v27051_v9 = vld [vmem:[#allocation201_spill] sm:$0xff] }
 0x359   : > { %18620 = vmatmul.mubr.msk.bf16.gmra.mrb[76].mxu0 %vm2037_vm2, %v26996_v20  ;;  %v27059_v20 = vld [vmem:[#allocation58_spill] sm:$0xff] }
 0x35a   : > { %18623 = vmatprep.mubr.msk.bf16.mxu0 %vm2037_vm2, %v26998_v33  ;;  %v27057_v33 = vld [vmem:[#allocation56_spill] sm:$0xff] }
 0x35f   : > { %17606 = vmatmul.mubr.msk.bf16.gmra.mrb[192].mxu1 %vm2037_vm2, %v22556_v28  ;;  %v4410_v28 = vrot.slane %v27051_v9, 1  ;;  %v24024_v9 = vld [vmem:[%s21481_s10 + $0x328] sm:$0xff]  }
 0x360   : > { %17609 = vmatprep.mubr.msk.bf16.mxu1 %vm2037_vm2, %v26963_v1  ;;  %v27064_v1 = vld [vmem:[#allocation68_spill] sm:$0xff] }
 0x361   : > { %18624 = vmatmul.mubr.msk.bf16.gmra.mrb[80].mxu0 %vm2037_vm2, %v27003_v37 }
 0x362   : > { %18627 = vmatprep.mubr.msk.bf16.mxu0 %vm2037_vm2, %v27006_v24 }
 0x367   : > { %17610 = vmatmul.mubr.msk.bf16.gmra.mrb[196].mxu1 %vm2037_vm2, %v26964_v39  ;;  %v27065_v39 = vld [vmem:[#allocation69_spill] sm:$0xff] }
 0x368   : > { %17613 = vmatprep.mubr.msk.bf16.mxu1 %vm2037_vm2, %v26969_v44  ;;  %v27067_v44 = vld [vmem:[#allocation73_spill] sm:$0xff] }
 0x369   : > { %18628 = vmatmul.mubr.msk.bf16.gmra.mrb[84].mxu0 %vm2037_vm2, %v27009_v62 }
 0x36a   : > { %18631 = vmatprep.mubr.msk.bf16.mxu0 %vm2037_vm2, %v27012_v61 }
 0x36f   : > { %17614 = vmatmul.mubr.msk.bf16.gmra.mrb[200].mxu1 %vm2037_vm2, %v26970_v22  ;;  %v27068_v22 = vld [vmem:[#allocation76_spill] sm:$0xff] }
 0x370   : > { %17617 = vmatprep.mubr.msk.bf16.mxu1 %vm2037_vm2, %v26975_v2  ;;  %v27072_v2 = vld [vmem:[#allocation245_spill] sm:$0xff] }
 0x371   : > { %18632 = vmatmul.mubr.msk.bf16.gmra.mrb[88].mxu0 %vm2037_vm2, %v27017_v56 }
 0x372   : > { %18635 = vmatprep.mubr.msk.bf16.mxu0 %vm2037_vm2, %v27019_v47  ;;  %v27077_v47 = vld [vmem:[#allocation88_spill] sm:$0xff] }
 0x377   : > { %17618 = vmatmul.mubr.msk.bf16.gmra.mrb[204].mxu1 %vm2037_vm2, %v26976_v16  ;;  %v27073_v16 = vld [vmem:[#allocation84_spill] sm:$0xff] }
 0x378   : > { %17621 = vmatprep.mubr.msk.bf16.mxu1 %vm2037_vm2, %v26981_v29  ;;  %v27069_v29 = vld [vmem:[#allocation77_spill] sm:$0xff] }
 0x379   : > { %18636 = vmatmul.mubr.msk.bf16.gmra.mrb[92].mxu0 %vm2037_vm2, %v27020_v4 }
 0x37a   : > { %18639 = vmatprep.mubr.msk.bf16.mxu0 %vm2037_vm2, %v27021_v52 }
 0x37f   : > { %17622 = vmatmul.mubr.msk.bf16.gmra.mrb[208].mxu1 %vm2037_vm2, %v26982_v36  ;;  %v27066_v36 = vld [vmem:[#allocation72_spill] sm:$0xff] }
 0x380   : > { %17625 = vmatprep.mubr.msk.bf16.mxu1 %vm2037_vm2, %v26987_v30  ;;  %v27074_v30 = vld [vmem:[#allocation85_spill] sm:$0xff] }
 0x381   : > { %18640 = vmatmul.mubr.msk.bf16.gmra.mrb[96].mxu0 %vm2037_vm2, %v27022_v59  ;;  %v27079_v59 = vld [vmem:[#allocation252_spill] sm:$0xff] }
 0x382   : > { %18643 = vmatprep.mubr.msk.bf16.mxu0 %vm2037_vm2, %v22866_v46  ;;  %v27052_v46 = vld [vmem:[#allocation203_spill] sm:$0xff] }
 0x383   : > { %v4411_v61 = vrot.slane %v27052_v46, 1  ;;  %27098 = vst [vmem:[#allocation203_spill] sm:$0xff] %v24024_v9  ;;  %v27100_v46 = vld [vmem:[#allocation130_spill] sm:$0xff] }
 0x387   : > { %17626 = vmatmul.mubr.msk.bf16.gmra.mrb[212].mxu1 %vm2037_vm2, %v26988_v32  ;;  %v27062_v32 = vld [vmem:[#allocation64_spill] sm:$0xff] }
 0x388   : > { %17629 = vmatprep.mubr.msk.bf16.mxu1 %vm2037_vm2, %v26993_v58  ;;  %v27075_v58 = vld [vmem:[#allocation248_spill] sm:$0xff] }
 0x389   : > { %18644 = vmatmul.mubr.msk.bf16.gmra.mrb[100].mxu0 %vm2037_vm2, %v22870_v7  ;;  %v4412_v7 = vsel %vm4409_vm3, %v4410_v28, %v4411_v61  ;;  %v24029_v28 = vld [vmem:[%s21481_s10 + $0x330] sm:$0xff]  }
 0x38a   : > { %18647 = vmatprep.mubr.msk.bf16.mxu0 %vm2037_vm2, %v22898_v13  ;;  %v27053_v13 = vld [vmem:[#allocation205_spill] sm:$0xff] }
 0x38b   : > { %v4413_v56 = vrot.slane %v27053_v13, 1  ;;  %27099 = vst [vmem:[#allocation205_spill] sm:$0xff] %v24029_v28  ;;  %v24043_v13 = vld [vmem:[%s21481_s10 + $0x340] sm:$0xff]  }
 0x38d   : > { %v4414_v62 = vsel %vm4409_vm3, %v4411_v61, %v4413_v56  ;;  %v27101_v61 = vld [vmem:[#allocation131_spill] sm:$0xff] }
 0x38f   : > { %17630 = vmatmul.mubr.msk.bf16.gmra.mrb[216].mxu1 %vm2037_vm2, %v26994_v10  ;;  %v27076_v10 = vld [vmem:[#allocation249_spill] sm:$0xff] }
 0x390   : > { %17633 = vmatprep.mubr.msk.bf16.mxu1 %vm2037_vm2, %v26999_v35 }
 0x391   : > { %18648 = vmatmul.mubr.msk.bf16.gmra.mrb[104].mxu0 %vm2037_vm2, %v22902_v45  ;;  %v27054_v45 = vld [vmem:[#allocation207_spill] sm:$0xff] }
 0x392   : > { %18651 = vmatprep.mubr.msk.bf16.mxu0 %vm2037_vm2, %v22924_v3  ;;  %v4415_v52 = vrot.slane %v27054_v45, 1  ;;  %v6104_v3 = vsel %vm2374_vm0, %v23638_v48, 0  ;;  %v27078_v48 = vld [vmem:[#allocation89_spill] sm:$0xff] }
 0x393   : > { %v27105_v45 = vld [vmem:[#allocation137_spill] sm:$0xff] }
 0x394   : > { %v4416_v24 = vsel %vm4409_vm3, %v4413_v56, %v4415_v52  ;;  %v27104_v56 = vld [vmem:[#allocation136_spill] sm:$0xff] }
 0x397   : > { %17634 = vmatmul.mubr.msk.bf16.gmra.mrb[220].mxu1 %vm2037_vm2, %v22822_v0 }
 0x398   : > { %17639 = vmatprep.mubr.msk.bf16.mxu1 %vm2037_vm2, %v4412_v7  ;;  %v24038_v7 = vld [vmem:[%s21481_s10 + $0x338] sm:$0xff]  }
 0x399   : > { %18652 = vmatmul.mubr.msk.bf16.gmra.mrb[108].mxu0 %vm2037_vm2, %v22928_v55  ;;  %v21276_v55 = vld [vmem:[%s26213_s2 + $0x10] sm:$0xf]  ;;  %27102 = vst [vmem:[#allocation207_spill] sm:$0xff] %v24038_v7 }
 0x39a   : > { %18655 = vmatprep.mubr.msk.bf16.mxu0 %vm2037_vm2, %v22954_v63  ;;  %v27055_v63 = vld [vmem:[#allocation54_spill] sm:$0xff] }
 0x39b   : > { %v27056_v37 = vrot.slane %v27055_v63, 1  ;;  %27103 = vst [vmem:[#allocation54_spill] sm:$0xff] %v24043_v13  ;;  %v24071_v63 = vld [vmem:[%s21481_s10 + $0x360] sm:$0xff]  }
 0x39c   : > { %27111 = vst [vmem:[#allocation60_spill] sm:$0xff] %v24071_v63 }
 0x39d   : > { %v4418_v4 = vsel %vm4409_vm3, %v4415_v52, %v27056_v37  ;;  %v24052_v52 = vld [vmem:[%s21481_s10 + $0x348] sm:$0xff]   ;;  %v27112_v37 = vld [vmem:[#allocation152_spill] sm:$0xff] }
 0x39e   : > { %27106 = vst [vmem:[#allocation56_spill] sm:$0xff] %v24052_v52 }
 0x39f   : > { %17640 = vmatmul.mubr.msk.bf16.vlgmr.msra.gmra.mrb[0].mxu1 %vm2037_vm2, %v4414_v62  ;;  %v24057_v62 = vld [vmem:[%s21481_s10 + $0x350] sm:$0xff]  }
 0x3a0   : > { %17864 = vmatpush3.bf16.msra.mxu1 %v6104_v3  ;;  %17643 = vmatprep.mubr.msk.bf16.mxu1 %vm2037_vm2, %v4416_v24  ;;  %v27108_v3 = vld [vmem:[#allocation144_spill] sm:$0xff]  ;;  %v27109_v24 = vld [vmem:[#allocation145_spill] sm:$0xff] }
 0x3a1   : > { %18656 = vmatmul.mubr.msk.bf16.gmra.mrb[112].mxu0 %vm2037_vm2, %v22958_v11  ;;  %20990 = vmatprep.subr.msk.bf16.mxu1 %vm2374_vm0, %v21276_v55  ;;  %v27058_v11 = vld [vmem:[#allocation57_spill] sm:$0xff] }
 0x3a2   : > { %18659 = vmatprep.mubr.msk.bf16.mxu0 %vm2037_vm2, %v27023_v12  ;;  %v27080_v12 = vld [vmem:[#allocation253_spill] sm:$0xff]  ;;  %27107 = vst [vmem:[#allocation57_spill] sm:$0xff] %v24057_v62 }
 0x3a3   : > { %v24066_v55 = vld [vmem:[%s21481_s10 + $0x358] sm:$0xff]  }
 0x3a4   : > { %27110 = vst [vmem:[#allocation58_spill] sm:$0xff] %v24066_v55 }
 0x3a7   : > { %17644 = vmatmul.mubr.msk.bf16.gmra.mrb[4].mxu1 %vm2037_vm2, %v4418_v4  ;;  %v27113_v4 = vld [vmem:[#allocation153_spill] sm:$0xff] }
 0x3a8   : > { %17647 = vmatprep.mubr.msk.bf16.mxu1 %vm2037_vm2, %v27057_v33  ;;  %v24080_v33 = vld [vmem:[%s21481_s10 + $0x368] sm:$0xff]  }
 0x3a9   : > { %18660 = vmatmul.mubr.msk.bf16.gmra.mrb[116].mxu0 %vm2037_vm2, %v27024_v57  ;;  %v27081_v57 = vld [vmem:[#allocation92_spill] sm:$0xff]  ;;  %27114 = vst [vmem:[#allocation61_spill] sm:$0xff] %v24080_v33 }
 0x3aa   : > { %18663 = vmatprep.mubr.msk.bf16.mxu0 %vm2037_vm2, %v27025_v42  ;;  %v27082_v42 = vld [vmem:[#allocation93_spill] sm:$0xff] }
 0x3af   : > { %17648 = vmatmul.mubr.msk.bf16.gmra.mrb[8].mxu1 %vm2037_vm2, %v27058_v11  ;;  %v27115_v11 = vld [vmem:[#allocation160_spill] sm:$0xff] }
 0x3b0   : > { %17651 = vmatprep.mubr.msk.bf16.mxu1 %vm2037_vm2, %v27059_v20  ;;  %v27116_v20 = vld [vmem:[#allocation161_spill] sm:$0xff] }
 0x3b1   : > { %18664 = vmatmul.mubr.msk.bf16.gmra.mrb[120].mxu0 %vm2037_vm2, %v23521_v6  ;;  %v27083_v6 = vld [vmem:[#allocation96_spill] sm:$0xff] }
 0x3b2   : > { %18667 = vmatprep.mubr.msk.bf16.mxu0 %vm2037_vm2, %v23526_v17  ;;  %v27084_v17 = vld [vmem:[#allocation97_spill] sm:$0xff] }
 0x3b7   : > { %17652 = vmatmul.mubr.msk.bf16.gmra.mrb[12].mxu1 %vm2037_vm2, %v27060_v5  ;;  %v27117_v5 = vld [vmem:[#allocation162_spill] sm:$0xff] }
 0x3b8   : > { %17655 = vmatprep.mubr.msk.bf16.mxu1 %vm2037_vm2, %v27061_v19 }
 0x3b9   : > { %18668 = vmatmul.mubr.msk.bf16.gmra.mrb[124].mxu0 %vm2037_vm2, %v23541_v21  ;;  %v27087_v21 = vld [vmem:[#allocation104_spill] sm:$0xff] }
 0x3ba   : > { %18671 = vmatprep.mubr.msk.bf16.mxu0 %vm2037_vm2, %v23546_v38  ;;  %v23987_v38 = vld [vmem:[%s21481_s10 + $0x300] sm:$0xff]  }
 0x3bf   : > { %17656 = vmatmul.mubr.msk.bf16.gmra.mrb[16].mxu1 %vm2037_vm2, %v27062_v32 }
 0x3c0   : > { %17659 = vmatprep.mubr.msk.bf16.mxu1 %vm2037_vm2, %v27063_v40 }
 0x3c1   : > { %18672 = vmatmul.mubr.msk.bf16.gmra.mrb[128].mxu0 %vm2037_vm2, %v23561_v26  ;;  %v23996_v26 = vld [vmem:[%s21481_s10 + $0x308] sm:$0xff]  }
 0x3c2   : > { %18675 = vmatprep.mubr.msk.bf16.mxu0 %vm2037_vm2, %v23566_v50  ;;  %v24001_v50 = vld [vmem:[%s21481_s10 + $0x310] sm:$0xff]  }
 0x3c7   : > { %17660 = vmatmul.mubr.msk.bf16.gmra.mrb[20].mxu1 %vm2037_vm2, %v27064_v1 }
 0x3c8   : > { %17663 = vmatprep.mubr.msk.bf16.mxu1 %vm2037_vm2, %v27065_v39 }
 0x3c9   : > { %18676 = vmatmul.mubr.msk.bf16.gmra.mrb[132].mxu0 %vm2037_vm2, %v23581_v27  ;;  %v27071_v27 = vld [vmem:[#allocation81_spill] sm:$0xff] }
 0x3ca   : > { %18679 = vmatprep.mubr.msk.bf16.mxu0 %vm2037_vm2, %v23586_v60  ;;  %v27070_v60 = vld [vmem:[#allocation80_spill] sm:$0xff] }
 0x3cf   : > { %17664 = vmatmul.mubr.msk.bf16.gmra.mrb[24].mxu1 %vm2037_vm2, %v27066_v36 }
 0x3d0   : > { %17667 = vmatprep.mubr.msk.bf16.mxu1 %vm2037_vm2, %v27067_v44 }
 0x3d1   : > { %18680 = vmatmul.mubr.msk.bf16.gmra.mrb[136].mxu0 %vm2037_vm2, %v23601_v31  ;;  %v27094_v31 = vld [vmem:[#allocation119_spill] sm:$0xff] }
 0x3d2   : > { %18683 = vmatprep.mubr.msk.bf16.mxu0 %vm2037_vm2, %v23606_v54  ;;  %v27092_v54 = vld [vmem:[#allocation113_spill] sm:$0xff] }
 0x3d7   : > { %17668 = vmatmul.mubr.msk.bf16.gmra.mrb[28].mxu1 %vm2037_vm2, %v27068_v22 }
 0x3d8   : > { %17671 = vmatprep.mubr.msk.bf16.mxu1 %vm2037_vm2, %v27069_v29 }
 0x3d9   : > { %18684 = vmatmul.mubr.msk.bf16.gmra.mrb[140].mxu0 %vm2037_vm2, %v23621_v43  ;;  %v27093_v43 = vld [vmem:[#allocation118_spill] sm:$0xff] }
 0x3da   : > { %18687 = vmatprep.mubr.msk.bf16.mxu0 %vm2037_vm2, %v23626_v8  ;;  %v27086_v8 = vld [vmem:[#allocation101_spill] sm:$0xff] }
 0x3df   : > { %17672 = vmatmul.mubr.msk.bf16.gmra.mrb[32].mxu1 %vm2037_vm2, %v27070_v60 }
 0x3e0   : > { %17675 = vmatprep.mubr.msk.bf16.mxu1 %vm2037_vm2, %v27071_v27 }
 0x3e1   : > { %18688 = vmatmul.mubr.msk.bf16.gmra.mrb[144].mxu0 %vm2037_vm2, %v23648_v49  ;;  %v23952_v49 = vld [vmem:[%s26213_s2 + $0x20] sm:$0xf] }
 0x3e2   : > { %18691 = vmatprep.mubr.msk.bf16.mxu0 %vm2037_vm2, %v27072_v2  ;;  %20994 = vmatprep.subr.msk.bf16.mxu0 %vm2374_vm0, %v23952_v49  ;;  %v27118_v2 = vld [vmem:[#allocation168_spill] sm:$0xff] }
 0x3e7   : > { %17676 = vmatmul.mubr.msk.bf16.gmra.mrb[36].mxu1 %vm2037_vm2, %v27073_v16 }
 0x3e8   : > { %17679 = vmatprep.mubr.msk.bf16.mxu1 %vm2037_vm2, %v27074_v30 }
 0x3e9   : > { %18692 = vmatmul.mubr.msk.bf16.gmra.mrb[148].mxu0 %vm2037_vm2, %v27075_v58  ;;  %v27119_v58 = vld [vmem:[#allocation169_spill] sm:$0xff] }
 0x3ea   : > { %18695 = vmatprep.mubr.msk.bf16.mxu0 %vm2037_vm2, %v27076_v10  ;;  %v27121_v10 = vld [vmem:[#allocation171_spill] sm:$0xff] }
 0x3ef   : > { %17680 = vmatmul.mubr.msk.bf16.gmra.mrb[40].mxu1 %vm2037_vm2, %v27077_v47 }
 0x3f0   : > { %17683 = vmatprep.mubr.msk.bf16.mxu1 %vm2037_vm2, %v27078_v48 }
 0x3f1   : > { %18696 = vmatmul.mubr.msk.bf16.gmra.mrb[152].mxu0 %vm2037_vm2, %v27079_v59  ;;  %v562_v59 = vld [vmem:[%s22281_s16 + $0x24] sm:$0xf] }
 0x3f2   : > { %18699 = vmatprep.mubr.msk.bf16.mxu0 %vm2037_vm2, %v27080_v12  ;;  %v27122_v12 = vld [vmem:[#allocation179_spill] sm:$0xff] }
 0x3f7   : > { %17684 = vmatmul.mubr.msk.bf16.gmra.mrb[44].mxu1 %vm2037_vm2, %v27081_v57 }
 0x3f8   : > { %17687 = vmatprep.mubr.msk.bf16.mxu1 %vm2037_vm2, %v27082_v42 }
 0x3f9   : > { %18700 = vmatmul.mubr.msk.bf16.gmra.mrb[156].mxu0 %vm2037_vm2, %v23708_v41  ;;  %v27085_v41 = vld [vmem:[#allocation100_spill] sm:$0xff] }
 0x3fa   : > { %18703 = vmatprep.mubr.msk.bf16.mxu0 %vm2037_vm2, %v23713_v14  ;;  %v27091_v14 = vld [vmem:[#allocation112_spill] sm:$0xff] }
 0x3ff   : > { %17688 = vmatmul.mubr.msk.bf16.gmra.mrb[48].mxu1 %vm2037_vm2, %v27083_v6 }
 0x400   : > { %17691 = vmatprep.mubr.msk.bf16.mxu1 %vm2037_vm2, %v27084_v17 }
 0x401   : > { %18704 = vmatmul.mubr.msk.bf16.gmra.mrb[160].mxu0 %vm2037_vm2, %v23725_v25  ;;  %v27088_v25 = vld [vmem:[#allocation105_spill] sm:$0xff] }
 0x402   : > { %18707 = vmatprep.mubr.msk.bf16.mxu0 %vm2037_vm2, %v23730_v51  ;;  %v27089_v51 = vld [vmem:[#allocation108_spill] sm:$0xff] }
 0x407   : > { %17692 = vmatmul.mubr.msk.bf16.gmra.mrb[52].mxu1 %vm2037_vm2, %v27085_v41 }
 0x408   : > { %17695 = vmatprep.mubr.msk.bf16.mxu1 %vm2037_vm2, %v27086_v8 }
 0x409   : > { %18708 = vmatmul.mubr.msk.bf16.gmra.mrb[164].mxu0 %vm2037_vm2, %v23739_v15  ;;  %v27090_v15 = vld [vmem:[#allocation109_spill] sm:$0xff] }
 0x40a   : > { %18711 = vmatprep.mubr.msk.bf16.mxu0 %vm2037_vm2, %v23744_v34  ;;  %v24010_v34 = vld [vmem:[%s21481_s10 + $0x318] sm:$0xff]  }
 0x40f   : > { %17696 = vmatmul.mubr.msk.bf16.gmra.mrb[56].mxu1 %vm2037_vm2, %v27087_v21 }
 0x410   : > { %17699 = vmatprep.mubr.msk.bf16.mxu1 %vm2037_vm2, %v27088_v25 }
 0x411   : > { %18712 = vmatmul.mubr.msk.bf16.gmra.mrb[168].mxu0 %vm2037_vm2, %v23753_v23  ;;  %v24015_v23 = vld [vmem:[%s21481_s10 + $0x320] sm:$0xff]  }
 0x412   : > { %18715 = vmatprep.mubr.msk.bf16.mxu0 %vm2037_vm2, %v23758_v18  ;;  %27095 = vst [vmem:[#allocation201_spill] sm:$0xff] %v24015_v23  ;;  %v27096_v18 = vld [vmem:[#allocation124_spill] sm:$0xff] }
 0x417   : > { %17700 = vmatmul.mubr.msk.bf16.gmra.mrb[60].mxu1 %vm2037_vm2, %v27089_v51 }
 0x418   : > { %17703 = vmatprep.mubr.msk.bf16.mxu1 %vm2037_vm2, %v27090_v15 }
 0x419   : > { %18716 = vmatmul.mubr.msk.bf16.gmra.mrb[172].mxu0 %vm2037_vm2, %v23767_v53  ;;  %v27097_v53 = vld [vmem:[#allocation125_spill] sm:$0xff] }
 0x41a   : > { %18719 = vmatprep.mubr.msk.bf16.mxu0 %vm2037_vm2, %v23987_v38 }
 0x41f   : > { %17704 = vmatmul.mubr.msk.bf16.gmra.mrb[64].mxu1 %vm2037_vm2, %v27091_v14 }
 0x420   : > { %17707 = vmatprep.mubr.msk.bf16.mxu1 %vm2037_vm2, %v27092_v54 }
 0x421   : > { %18720 = vmatmul.mubr.msk.bf16.gmra.mrb[176].mxu0 %vm2037_vm2, %v23996_v26 }
 0x422   : > { %18723 = vmatprep.mubr.msk.bf16.mxu0 %vm2037_vm2, %v24001_v50 }
 0x427   : > { %17708 = vmatmul.mubr.msk.bf16.gmra.mrb[68].mxu1 %vm2037_vm2, %v27093_v43 }
 0x428   : > { %17711 = vmatprep.mubr.msk.bf16.mxu1 %vm2037_vm2, %v27094_v31 }
 0x429   : > { %18724 = vmatmul.mubr.msk.bf16.gmra.mrb[180].mxu0 %vm2037_vm2, %v24010_v34 }
 0x42a   : > { %18727 = vmatprep.mubr.msk.bf16.mxu0 %vm2037_vm2, %v24015_v23  ;;  %v21318_v23 = vld [vmem:[%s21481_s10 + $0x198] sm:$0xff]  }
 0x42f   : > { %17712 = vmatmul.mubr.msk.bf16.gmra.mrb[72].mxu1 %vm2037_vm2, %v27096_v18 }
 0x430   : > { %17715 = vmatprep.mubr.msk.bf16.mxu1 %vm2037_vm2, %v27097_v53 }
 0x431   : > { %18728 = vmatmul.mubr.msk.bf16.gmra.mrb[184].mxu0 %vm2037_vm2, %v24024_v9 }
 0x432   : > { %18731 = vmatprep.mubr.msk.bf16.mxu0 %vm2037_vm2, %v24029_v28  ;;  %v27239_v28 = vld [vmem:[#allocation62_spill] sm:$0xff] }
 0x437   : > { %17716 = vmatmul.mubr.msk.bf16.gmra.mrb[76].mxu1 %vm2037_vm2, %v27100_v46 }
 0x438   : > { %17719 = vmatprep.mubr.msk.bf16.mxu1 %vm2037_vm2, %v27101_v61 }
 0x439   : > { %18732 = vmatmul.mubr.msk.bf16.gmra.mrb[188].mxu0 %vm2037_vm2, %v24038_v7  ;;  %v11796_v7 = vsel %vm2374_vm0, %v23952_v49, 0  ;;  %v27139_v49 = vld [vmem:[#allocation7_spill] sm:$0xff] }
 0x43a   : > { %18735 = vmatprep.mubr.msk.bf16.mxu0 %vm2037_vm2, %v24043_v13  ;;  %v27127_v13 = vld [vmem:[#allocation184_spill] sm:$0xff] }
 0x43f   : > { %17720 = vmatmul.mubr.msk.bf16.gmra.mrb[80].mxu1 %vm2037_vm2, %v27104_v56 }
 0x440   : > { %17723 = vmatprep.mubr.msk.bf16.mxu1 %vm2037_vm2, %v27105_v45 }
 0x441   : > { %18736 = vmatmul.mubr.msk.bf16.gmra.mrb[192].mxu0 %vm2037_vm2, %v24052_v52  ;;  %v24118_v52 = vld [vmem:[%s22281_s16 + $0x30] sm:$0xff]  }
 0x442   : > { %18739 = vmatprep.mubr.msk.bf16.mxu0 %vm2037_vm2, %v24057_v62  ;;  %v24115_v62 = vld [vmem:[%s22281_s16 + $0x28] sm:$0xff]  }
 0x447   : > { %17724 = vmatmul.mubr.msk.bf16.gmra.mrb[84].mxu1 %vm2037_vm2, %v27108_v3 }
 0x448   : > { %17727 = vmatprep.mubr.msk.bf16.mxu1 %vm2037_vm2, %v27109_v24 }
 0x449   : > { %18740 = vmatmul.mubr.msk.bf16.gmra.mrb[196].mxu0 %vm2037_vm2, %v24066_v55  ;;  %v27126_v55 = vld [vmem:[#allocation148_spill] sm:$0xff] }
 0x44a   : > { %18743 = vmatprep.mubr.msk.bf16.mxu0 %vm2037_vm2, %v24071_v63  ;;  %v27125_v63 = vld [vmem:[#allocation177_spill] sm:$0xff] }
 0x44f   : > { %17728 = vmatmul.mubr.msk.bf16.gmra.mrb[88].mxu1 %vm2037_vm2, %v27112_v37 }
 0x450   : > { %17731 = vmatprep.mubr.msk.bf16.mxu1 %vm2037_vm2, %v27113_v4 }
 0x451   : > { %18744 = vmatmul.mubr.msk.bf16.gmra.mrb[200].mxu0 %vm2037_vm2, %v24080_v33  ;;  %v24104_v33 = vcombine.low %v27122_v12, %v562_v59  ;;  %v27128_v59 = vld [vmem:[#allocation185_spill] sm:$0xff] }
 0x452   : > { %18747 = vmatprep.mubr.msk.bf16.mxu0 %vm2037_vm2, %v26999_v35  ;;  %v27120_v35 = vld [vmem:[#allocation140_spill] sm:$0xff]  ;;  %v24129_v12 = vld [vmem:[%s22281_s16 + $0x38] sm:$0xff]  }
 0x453   : > { %27123 = vst [vmem:[#allocation64_spill] sm:$0xff] %v24104_v33 }
 0x457   : > { %17732 = vmatmul.mubr.msk.bf16.gmra.mrb[92].mxu1 %vm2037_vm2, %v27115_v11  ;;  %v7219_v11 = vshrl.u32 %v27120_v35, 16 }
 0x458   : > { %17735 = vmatprep.mubr.msk.bf16.mxu1 %vm2037_vm2, %v27116_v20  ;;  %v7222_v20 = vshll.u32 %v27121_v10, 16 }
 0x459   : > { %18748 = vmatmul.mubr.msk.bf16.gmra.mrb[204].mxu0 %vm2037_vm2, %v22822_v0  ;;  %v27124_v0 = vld [vmem:[#allocation176_spill] sm:$0xff] }
 0x45a   : > { %18751 = vmatprep.mubr.msk.bf16.mxu0 %vm2037_vm2, %v27117_v5 }
 0x45f   : > { %17736 = vmatmul.mubr.msk.bf16.gmra.mrb[96].mxu1 %vm2037_vm2, %v27118_v2  ;;  %v27134_v2 = vld [vmem:[#allocation4_spill] sm:$0xff] }
 0x460   : > { %17739 = vmatprep.mubr.msk.bf16.mxu1 %vm2037_vm2, %v27119_v58  ;;  %v27133_v58 = vld [vmem:[#allocation197_spill] sm:$0xff] }
 0x461   : > { %18752 = vmatmul.mubr.msk.bf16.gmra.mrb[208].mxu0 %vm2037_vm2, %v27120_v35 }
 0x462   : > { %18755 = vmatprep.mubr.msk.bf16.mxu0 %vm2037_vm2, %v27121_v10 }
 0x467   : > { %17740 = vmatmul.mubr.msk.bf16.gmra.mrb[100].mxu1 %vm2037_vm2, %v27124_v0  ;;  %v27130_v0 = vld [vmem:[#allocation192_spill] sm:$0xff] }
 0x468   : > { %17743 = vmatprep.mubr.msk.bf16.mxu1 %vm2037_vm2, %v27125_v63  ;;  %v27129_v63 = vld [vmem:[#allocation191_spill] sm:$0xff] }
 0x469   : > { %18756 = vmatmul.mubr.msk.bf16.gmra.mrb[212].mxu0 %vm2037_vm2, %v27126_v55 }
 0x46a   : > { %18759 = vmatprep.mubr.msk.bf16.mxu0 %vm2037_vm2, %v24104_v33 }
 0x46f   : > { %17744 = vmatmul.mubr.msk.bf16.gmra.mrb[104].mxu1 %vm2037_vm2, %v27127_v13  ;;  %v27131_v13 = vld [vmem:[#allocation3_spill] sm:$0xff] }
 0x470   : > { %17747 = vmatprep.mubr.msk.bf16.mxu1 %vm2037_vm2, %v27128_v59  ;;  %v27132_v59 = vld [vmem:[#allocation196_spill] sm:$0xff] }
 0x471   : > { %18760 = vmatmul.mubr.msk.bf16.gmra.mrb[216].mxu0 %vm2037_vm2, %v24115_v62 }
 0x472   : > { %18763 = vmatprep.mubr.msk.bf16.mxu0 %vm2037_vm2, %v24118_v52 }
 0x477   : > { %17748 = vmatmul.mubr.msk.bf16.gmra.mrb[108].mxu1 %vm2037_vm2, %v27129_v63  ;;  %v27136_v63 = vld [vmem:[#allocation199_spill] sm:$0xff] }
 0x478   : > { %17751 = vmatprep.mubr.msk.bf16.mxu1 %vm2037_vm2, %v27130_v0  ;;  %v27135_v0 = vld [vmem:[#allocation5_spill] sm:$0xff] }
 0x479   : > { %18764 = vmatmul.mubr.msk.bf16.gmra.mrb[220].mxu0 %vm2037_vm2, %v24129_v12 }
 0x47a   : > { %18769 = vmatprep.mubr.msk.bf16.mxu0 %vm2037_vm2, %v27131_v13  ;;  %v27137_v13 = vld [vmem:[#allocation200_spill] sm:$0xff] }
 0x47f   : > { %17752 = vmatmul.mubr.msk.bf16.gmra.mrb[112].mxu1 %vm2037_vm2, %v27132_v59  ;;  %v27138_v59 = vld [vmem:[#allocation6_spill] sm:$0xff] }
 0x480   : > { %17755 = vmatprep.mubr.msk.bf16.mxu1 %vm2037_vm2, %v27133_v58  ;;  %v27140_v58 = vld [vmem:[#allocation202_spill] sm:$0xff] }
 0x481   : > { %18770 = vmatmul.mubr.msk.bf16.vlgmr.msra.gmra.mrb[0].mxu0 %vm2037_vm2, %v27134_v2  ;;  %v27141_v2 = vld [vmem:[#allocation204_spill] sm:$0xff] }
 0x482   : > { %18994 = vmatpush3.bf16.msra.mxu0 %v11796_v7  ;;  %18773 = vmatprep.mubr.msk.bf16.mxu0 %vm2037_vm2, %v27135_v0  ;;  %v27142_v7 = vld [vmem:[#allocation8_spill] sm:$0xff]  ;;  %v27143_v0 = vld [vmem:[#allocation9_spill] sm:$0xff] }
 0x487   : > { %17756 = vmatmul.mubr.msk.bf16.gmra.mrb[116].mxu1 %vm2037_vm2, %v27136_v63  ;;  %v27144_v63 = vld [vmem:[#allocation206_spill] sm:$0xff] }
 0x488   : > { %17759 = vmatprep.mubr.msk.bf16.mxu1 %vm2037_vm2, %v27137_v13  ;;  %v27145_v13 = vld [vmem:[#allocation208_spill] sm:$0xff] }
 0x489   : > { %18774 = vmatmul.mubr.msk.bf16.gmra.mrb[4].mxu0 %vm2037_vm2, %v27138_v59  ;;  %v27146_v59 = vld [vmem:[#allocation10_spill] sm:$0xff] }
 0x48a   : > { %18777 = vmatprep.mubr.msk.bf16.mxu0 %vm2037_vm2, %v27139_v49  ;;  %v27147_v49 = vld [vmem:[#allocation11_spill] sm:$0xff] }
 0x48f   : > { %17760 = vmatmul.mubr.msk.bf16.gmra.mrb[120].mxu1 %vm2037_vm2, %v27140_v58  ;;  %v27148_v58 = vld [vmem:[#allocation211_spill] sm:$0xff] }
 0x490   : > { %17763 = vmatprep.mubr.msk.bf16.mxu1 %vm2037_vm2, %v27141_v2  ;;  %v27149_v2 = vld [vmem:[#allocation212_spill] sm:$0xff] }
 0x491   : > { %18778 = vmatmul.mubr.msk.bf16.gmra.mrb[8].mxu0 %vm2037_vm2, %v27142_v7  ;;  %v27150_v7 = vld [vmem:[#allocation12_spill] sm:$0xff] }
 0x492   : > { %18781 = vmatprep.mubr.msk.bf16.mxu0 %vm2037_vm2, %v27143_v0  ;;  %v27151_v0 = vld [vmem:[#allocation13_spill] sm:$0xff] }
 0x497   : > { %17764 = vmatmul.mubr.msk.bf16.gmra.mrb[124].mxu1 %vm2037_vm2, %v27144_v63  ;;  %v27152_v63 = vld [vmem:[#allocation214_spill] sm:$0xff] }
 0x498   : > { %17767 = vmatprep.mubr.msk.bf16.mxu1 %vm2037_vm2, %v27145_v13  ;;  %v27153_v13 = vld [vmem:[#allocation215_spill] sm:$0xff] }
 0x499   : > { %18782 = vmatmul.mubr.msk.bf16.gmra.mrb[12].mxu0 %vm2037_vm2, %v27146_v59  ;;  %v27154_v59 = vld [vmem:[#allocation14_spill] sm:$0xff] }
 0x49a   : > { %18785 = vmatprep.mubr.msk.bf16.mxu0 %vm2037_vm2, %v27147_v49  ;;  %v27155_v49 = vld [vmem:[#allocation15_spill] sm:$0xff] }
 0x49f   : > { %17768 = vmatmul.mubr.msk.bf16.gmra.mrb[128].mxu1 %vm2037_vm2, %v27148_v58  ;;  %v27156_v58 = vld [vmem:[#allocation216_spill] sm:$0xff] }
 0x4a0   : > { %17771 = vmatprep.mubr.msk.bf16.mxu1 %vm2037_vm2, %v27149_v2  ;;  %v27157_v2 = vld [vmem:[#allocation217_spill] sm:$0xff] }
 0x4a1   : > { %18786 = vmatmul.mubr.msk.bf16.gmra.mrb[16].mxu0 %vm2037_vm2, %v27150_v7  ;;  %v27158_v7 = vld [vmem:[#allocation16_spill] sm:$0xff] }
 0x4a2   : > { %18789 = vmatprep.mubr.msk.bf16.mxu0 %vm2037_vm2, %v27151_v0  ;;  %v27159_v0 = vld [vmem:[#allocation17_spill] sm:$0xff] }
 0x4a7   : > { %17772 = vmatmul.mubr.msk.bf16.gmra.mrb[132].mxu1 %vm2037_vm2, %v27152_v63  ;;  %v27160_v63 = vld [vmem:[#allocation218_spill] sm:$0xff] }
 0x4a8   : > { %17775 = vmatprep.mubr.msk.bf16.mxu1 %vm2037_vm2, %v27153_v13  ;;  %v27161_v13 = vld [vmem:[#allocation219_spill] sm:$0xff] }
 0x4a9   : > { %18790 = vmatmul.mubr.msk.bf16.gmra.mrb[20].mxu0 %vm2037_vm2, %v27154_v59  ;;  %v27162_v59 = vld [vmem:[#allocation18_spill] sm:$0xff] }
 0x4aa   : > { %18793 = vmatprep.mubr.msk.bf16.mxu0 %vm2037_vm2, %v27155_v49  ;;  %v27163_v49 = vld [vmem:[#allocation19_spill] sm:$0xff] }
 0x4af   : > { %17776 = vmatmul.mubr.msk.bf16.gmra.mrb[136].mxu1 %vm2037_vm2, %v27156_v58  ;;  %v27164_v58 = vld [vmem:[#allocation220_spill] sm:$0xff] }
 0x4b0   : > { %17779 = vmatprep.mubr.msk.bf16.mxu1 %vm2037_vm2, %v27157_v2  ;;  %v27165_v2 = vld [vmem:[#allocation221_spill] sm:$0xff] }
 0x4b1   : > { %18794 = vmatmul.mubr.msk.bf16.gmra.mrb[24].mxu0 %vm2037_vm2, %v27158_v7  ;;  %v27166_v7 = vld [vmem:[#allocation20_spill] sm:$0xff] }
 0x4b2   : > { %18797 = vmatprep.mubr.msk.bf16.mxu0 %vm2037_vm2, %v27159_v0  ;;  %v27167_v0 = vld [vmem:[#allocation21_spill] sm:$0xff] }
 0x4b7   : > { %17780 = vmatmul.mubr.msk.bf16.gmra.mrb[140].mxu1 %vm2037_vm2, %v27160_v63  ;;  %v27168_v63 = vld [vmem:[#allocation222_spill] sm:$0xff] }
 0x4b8   : > { %17783 = vmatprep.mubr.msk.bf16.mxu1 %vm2037_vm2, %v27161_v13  ;;  %v27169_v13 = vld [vmem:[#allocation223_spill] sm:$0xff] }
 0x4b9   : > { %18798 = vmatmul.mubr.msk.bf16.gmra.mrb[28].mxu0 %vm2037_vm2, %v27162_v59  ;;  %v27170_v59 = vld [vmem:[#allocation22_spill] sm:$0xff] }
 0x4ba   : > { %18801 = vmatprep.mubr.msk.bf16.mxu0 %vm2037_vm2, %v27163_v49  ;;  %v27171_v49 = vld [vmem:[#allocation23_spill] sm:$0xff] }
 0x4bf   : > { %17784 = vmatmul.mubr.msk.bf16.gmra.mrb[144].mxu1 %vm2037_vm2, %v27164_v58  ;;  %v27172_v58 = vld [vmem:[#allocation224_spill] sm:$0xff] }
 0x4c0   : > { %17787 = vmatprep.mubr.msk.bf16.mxu1 %vm2037_vm2, %v27165_v2  ;;  %v27173_v2 = vld [vmem:[#allocation225_spill] sm:$0xff] }
 0x4c1   : > { %18802 = vmatmul.mubr.msk.bf16.gmra.mrb[32].mxu0 %vm2037_vm2, %v27166_v7  ;;  %v27174_v7 = vld [vmem:[#allocation24_spill] sm:$0xff] }
 0x4c2   : > { %18805 = vmatprep.mubr.msk.bf16.mxu0 %vm2037_vm2, %v27167_v0  ;;  %v27175_v0 = vld [vmem:[#allocation25_spill] sm:$0xff] }
 0x4c7   : > { %17788 = vmatmul.mubr.msk.bf16.gmra.mrb[148].mxu1 %vm2037_vm2, %v27168_v63  ;;  %v27176_v63 = vld [vmem:[#allocation226_spill] sm:$0xff] }
 0x4c8   : > { %17791 = vmatprep.mubr.msk.bf16.mxu1 %vm2037_vm2, %v27169_v13  ;;  %v27177_v13 = vld [vmem:[#allocation227_spill] sm:$0xff] }
 0x4c9   : > { %18806 = vmatmul.mubr.msk.bf16.gmra.mrb[36].mxu0 %vm2037_vm2, %v27170_v59  ;;  %v27178_v59 = vld [vmem:[#allocation26_spill] sm:$0xff] }
 0x4ca   : > { %18809 = vmatprep.mubr.msk.bf16.mxu0 %vm2037_vm2, %v27171_v49  ;;  %v27179_v49 = vld [vmem:[#allocation27_spill] sm:$0xff] }
 0x4cf   : > { %17792 = vmatmul.mubr.msk.bf16.gmra.mrb[152].mxu1 %vm2037_vm2, %v27172_v58  ;;  %v27180_v58 = vld [vmem:[#allocation228_spill] sm:$0xff] }
 0x4d0   : > { %17795 = vmatprep.mubr.msk.bf16.mxu1 %vm2037_vm2, %v27173_v2  ;;  %v27181_v2 = vld [vmem:[#allocation229_spill] sm:$0xff] }
 0x4d1   : > { %18810 = vmatmul.mubr.msk.bf16.gmra.mrb[40].mxu0 %vm2037_vm2, %v27174_v7  ;;  %v27182_v7 = vld [vmem:[#allocation28_spill] sm:$0xff] }
 0x4d2   : > { %18813 = vmatprep.mubr.msk.bf16.mxu0 %vm2037_vm2, %v27175_v0  ;;  %v27183_v0 = vld [vmem:[#allocation29_spill] sm:$0xff] }
 0x4d7   : > { %17796 = vmatmul.mubr.msk.bf16.gmra.mrb[156].mxu1 %vm2037_vm2, %v27176_v63  ;;  %v27184_v63 = vld [vmem:[#allocation230_spill] sm:$0xff] }
 0x4d8   : > { %17799 = vmatprep.mubr.msk.bf16.mxu1 %vm2037_vm2, %v27177_v13  ;;  %v27185_v13 = vld [vmem:[#allocation231_spill] sm:$0xff] }
 0x4d9   : > { %18814 = vmatmul.mubr.msk.bf16.gmra.mrb[44].mxu0 %vm2037_vm2, %v27178_v59  ;;  %v27186_v59 = vld [vmem:[#allocation30_spill] sm:$0xff] }
 0x4da   : > { %18817 = vmatprep.mubr.msk.bf16.mxu0 %vm2037_vm2, %v27179_v49  ;;  %v27187_v49 = vld [vmem:[#allocation31_spill] sm:$0xff] }
 0x4df   : > { %17800 = vmatmul.mubr.msk.bf16.gmra.mrb[160].mxu1 %vm2037_vm2, %v27180_v58  ;;  %v27188_v58 = vld [vmem:[#allocation232_spill] sm:$0xff] }
 0x4e0   : > { %17803 = vmatprep.mubr.msk.bf16.mxu1 %vm2037_vm2, %v27181_v2  ;;  %v27189_v2 = vld [vmem:[#allocation233_spill] sm:$0xff] }
 0x4e1   : > { %18818 = vmatmul.mubr.msk.bf16.gmra.mrb[48].mxu0 %vm2037_vm2, %v27182_v7  ;;  %v27190_v7 = vld [vmem:[#allocation32_spill] sm:$0xff] }
 0x4e2   : > { %18821 = vmatprep.mubr.msk.bf16.mxu0 %vm2037_vm2, %v27183_v0  ;;  %v27191_v0 = vld [vmem:[#allocation33_spill] sm:$0xff] }
 0x4e7   : > { %17804 = vmatmul.mubr.msk.bf16.gmra.mrb[164].mxu1 %vm2037_vm2, %v27184_v63  ;;  %v27192_v63 = vld [vmem:[#allocation234_spill] sm:$0xff] }
 0x4e8   : > { %17807 = vmatprep.mubr.msk.bf16.mxu1 %vm2037_vm2, %v27185_v13  ;;  %v27193_v13 = vld [vmem:[#allocation235_spill] sm:$0xff] }
 0x4e9   : > { %18822 = vmatmul.mubr.msk.bf16.gmra.mrb[52].mxu0 %vm2037_vm2, %v27186_v59  ;;  %v27194_v59 = vld [vmem:[#allocation34_spill] sm:$0xff] }
 0x4ea   : > { %18825 = vmatprep.mubr.msk.bf16.mxu0 %vm2037_vm2, %v27187_v49  ;;  %v27195_v49 = vld [vmem:[#allocation35_spill] sm:$0xff] }
 0x4ef   : > { %17808 = vmatmul.mubr.msk.bf16.gmra.mrb[168].mxu1 %vm2037_vm2, %v27188_v58  ;;  %v27196_v58 = vld [vmem:[#allocation236_spill] sm:$0xff] }
 0x4f0   : > { %17811 = vmatprep.mubr.msk.bf16.mxu1 %vm2037_vm2, %v27189_v2  ;;  %v27197_v2 = vld [vmem:[#allocation237_spill] sm:$0xff] }
 0x4f1   : > { %18826 = vmatmul.mubr.msk.bf16.gmra.mrb[56].mxu0 %vm2037_vm2, %v27190_v7  ;;  %v27198_v7 = vld [vmem:[#allocation36_spill] sm:$0xff] }
 0x4f2   : > { %18829 = vmatprep.mubr.msk.bf16.mxu0 %vm2037_vm2, %v27191_v0  ;;  %v27199_v0 = vld [vmem:[#allocation37_spill] sm:$0xff] }
 0x4f7   : > { %17812 = vmatmul.mubr.msk.bf16.gmra.mrb[172].mxu1 %vm2037_vm2, %v27192_v63  ;;  %v27200_v63 = vld [vmem:[#allocation238_spill] sm:$0xff] }
 0x4f8   : > { %17815 = vmatprep.mubr.msk.bf16.mxu1 %vm2037_vm2, %v27193_v13  ;;  %v27201_v13 = vld [vmem:[#allocation239_spill] sm:$0xff] }
 0x4f9   : > { %18830 = vmatmul.mubr.msk.bf16.gmra.mrb[60].mxu0 %vm2037_vm2, %v27194_v59  ;;  %v27202_v59 = vld [vmem:[#allocation38_spill] sm:$0xff] }
 0x4fa   : > { %18833 = vmatprep.mubr.msk.bf16.mxu0 %vm2037_vm2, %v27195_v49  ;;  %v27203_v49 = vld [vmem:[#allocation39_spill] sm:$0xff] }
 0x4ff   : > { %17816 = vmatmul.mubr.msk.bf16.gmra.mrb[176].mxu1 %vm2037_vm2, %v27196_v58  ;;  %v27204_v58 = vld [vmem:[#allocation240_spill] sm:$0xff] }
 0x500   : > { %17819 = vmatprep.mubr.msk.bf16.mxu1 %vm2037_vm2, %v27197_v2  ;;  %v27205_v2 = vld [vmem:[#allocation241_spill] sm:$0xff] }
 0x501   : > { %18834 = vmatmul.mubr.msk.bf16.gmra.mrb[64].mxu0 %vm2037_vm2, %v27198_v7  ;;  %v27206_v7 = vld [vmem:[#allocation40_spill] sm:$0xff] }
 0x502   : > { %18837 = vmatprep.mubr.msk.bf16.mxu0 %vm2037_vm2, %v27199_v0  ;;  %v27207_v0 = vld [vmem:[#allocation41_spill] sm:$0xff] }
 0x507   : > { %17820 = vmatmul.mubr.msk.bf16.gmra.mrb[180].mxu1 %vm2037_vm2, %v27200_v63  ;;  %v27208_v63 = vld [vmem:[#allocation242_spill] sm:$0xff] }
 0x508   : > { %17823 = vmatprep.mubr.msk.bf16.mxu1 %vm2037_vm2, %v27201_v13  ;;  %v27209_v13 = vld [vmem:[#allocation243_spill] sm:$0xff] }
 0x509   : > { %18838 = vmatmul.mubr.msk.bf16.gmra.mrb[68].mxu0 %vm2037_vm2, %v27202_v59  ;;  %v27210_v59 = vld [vmem:[#allocation42_spill] sm:$0xff] }
 0x50a   : > { %18841 = vmatprep.mubr.msk.bf16.mxu0 %vm2037_vm2, %v27203_v49  ;;  %v27211_v49 = vld [vmem:[#allocation43_spill] sm:$0xff] }
 0x50f   : > { %17824 = vmatmul.mubr.msk.bf16.gmra.mrb[184].mxu1 %vm2037_vm2, %v27204_v58  ;;  %v27212_v58 = vld [vmem:[#allocation114_spill] sm:$0xff] }
 0x510   : > { %17827 = vmatprep.mubr.msk.bf16.mxu1 %vm2037_vm2, %v27205_v2  ;;  %v27213_v2 = vld [vmem:[#allocation138_spill] sm:$0xff] }
 0x511   : > { %18842 = vmatmul.mubr.msk.bf16.gmra.mrb[72].mxu0 %vm2037_vm2, %v27206_v7  ;;  %v27214_v7 = vld [vmem:[#allocation44_spill] sm:$0xff] }
 0x512   : > { %18845 = vmatprep.mubr.msk.bf16.mxu0 %vm2037_vm2, %v27207_v0  ;;  %v27215_v0 = vld [vmem:[#allocation45_spill] sm:$0xff] }
 0x517   : > { %17828 = vmatmul.mubr.msk.bf16.gmra.mrb[188].mxu1 %vm2037_vm2, %v27208_v63  ;;  %v27216_v63 = vld [vmem:[#allocation139_spill] sm:$0xff] }
 0x518   : > { %17831 = vmatprep.mubr.msk.bf16.mxu1 %vm2037_vm2, %v27209_v13  ;;  %v27217_v13 = vld [vmem:[#allocation115_spill] sm:$0xff] }
 0x519   : > { %18846 = vmatmul.mubr.msk.bf16.gmra.mrb[76].mxu0 %vm2037_vm2, %v27210_v59  ;;  %v27218_v59 = vld [vmem:[#allocation46_spill] sm:$0xff] }
 0x51a   : > { %18849 = vmatprep.mubr.msk.bf16.mxu0 %vm2037_vm2, %v27211_v49  ;;  %v27219_v49 = vld [vmem:[#allocation47_spill] sm:$0xff] }
 0x51f   : > { %17832 = vmatmul.mubr.msk.bf16.gmra.mrb[192].mxu1 %vm2037_vm2, %v27212_v58  ;;  %v27220_v58 = vld [vmem:[#allocation120_spill] sm:$0xff] }
 0x520   : > { %17835 = vmatprep.mubr.msk.bf16.mxu1 %vm2037_vm2, %v27213_v2  ;;  %v27221_v2 = vld [vmem:[#allocation146_spill] sm:$0xff] }
 0x521   : > { %18850 = vmatmul.mubr.msk.bf16.gmra.mrb[80].mxu0 %vm2037_vm2, %v27214_v7  ;;  %v27222_v7 = vld [vmem:[#allocation48_spill] sm:$0xff] }
 0x522   : > { %18853 = vmatprep.mubr.msk.bf16.mxu0 %vm2037_vm2, %v27215_v0  ;;  %v27223_v0 = vld [vmem:[#allocation49_spill] sm:$0xff] }
 0x527   : > { %17836 = vmatmul.mubr.msk.bf16.gmra.mrb[196].mxu1 %vm2037_vm2, %v27216_v63  ;;  %v27224_v63 = vld [vmem:[#allocation147_spill] sm:$0xff] }
 0x528   : > { %17839 = vmatprep.mubr.msk.bf16.mxu1 %vm2037_vm2, %v27217_v13  ;;  %v27225_v13 = vld [vmem:[#allocation121_spill] sm:$0xff] }
 0x529   : > { %18854 = vmatmul.mubr.msk.bf16.gmra.mrb[84].mxu0 %vm2037_vm2, %v27218_v59  ;;  %v27226_v59 = vld [vmem:[#allocation50_spill] sm:$0xff] }
 0x52a   : > { %18857 = vmatprep.mubr.msk.bf16.mxu0 %vm2037_vm2, %v27219_v49  ;;  %v27227_v49 = vld [vmem:[#allocation51_spill] sm:$0xff] }
 0x52f   : > { %17840 = vmatmul.mubr.msk.bf16.gmra.mrb[200].mxu1 %vm2037_vm2, %v27220_v58  ;;  %v27228_v58 = vld [vmem:[#allocation126_spill] sm:$0xff] }
 0x530   : > { %17843 = vmatprep.mubr.msk.bf16.mxu1 %vm2037_vm2, %v27221_v2 }
 0x531   : > { %18858 = vmatmul.mubr.msk.bf16.gmra.mrb[88].mxu0 %vm2037_vm2, %v27222_v7  ;;  %v27229_v7 = vld [vmem:[#allocation154_spill] sm:$0xff] }
 0x532   : > { %18861 = vmatprep.mubr.msk.bf16.mxu0 %vm2037_vm2, %v27223_v0  ;;  %v27230_v0 = vld [vmem:[#allocation52_spill] sm:$0xff] }
 0x537   : > { %17844 = vmatmul.mubr.msk.bf16.gmra.mrb[204].mxu1 %vm2037_vm2, %v27224_v63  ;;  %v27231_v63 = vld [vmem:[#allocation53_spill] sm:$0xff] }
 0x538   : > { %17847 = vmatprep.mubr.msk.bf16.mxu1 %vm2037_vm2, %v27225_v13  ;;  %v27232_v13 = vld [vmem:[#allocation155_spill] sm:$0xff] }
 0x539   : > { %18862 = vmatmul.mubr.msk.bf16.gmra.mrb[92].mxu0 %vm2037_vm2, %v27226_v59  ;;  %v27233_v59 = vld [vmem:[#allocation127_spill] sm:$0xff] }
 0x53a   : > { %18865 = vmatprep.mubr.msk.bf16.mxu0 %vm2037_vm2, %v27227_v49  ;;  %v27234_v49 = vld [vmem:[#allocation55_spill] sm:$0xff] }
 0x53f   : > { %17848 = vmatmul.mubr.msk.bf16.gmra.mrb[208].mxu1 %vm2037_vm2, %v27228_v58  ;;  %v27235_v58 = vld [vmem:[#allocation59_spill] sm:$0xff] }
 0x540   : > { %17851 = vmatprep.mubr.msk.bf16.mxu1 %vm2037_vm2, %v27229_v7  ;;  %v27236_v7 = vld [vmem:[#allocation163_spill] sm:$0xff] }
 0x541   : > { %18866 = vmatmul.mubr.msk.bf16.gmra.mrb[96].mxu0 %vm2037_vm2, %v27230_v0  ;;  %v27237_v0 = vld [vmem:[#allocation133_spill] sm:$0xff] }
 0x542   : > { %18869 = vmatprep.mubr.msk.bf16.mxu0 %vm2037_vm2, %v27231_v63  ;;  %v27238_v63 = vld [vmem:[#allocation193_spill] sm:$0xff] }
 0x543   : > { %v4633_v2 = vrot.slane %v27238_v63, 1  ;;  %v27243_v63 = vld [vmem:[#allocation67_spill] sm:$0xff] }
 0x547   : > { %17852 = vmatmul.mubr.msk.bf16.gmra.mrb[212].mxu1 %vm2037_vm2, %v27232_v13 }
 0x548   : > { %17855 = vmatprep.mubr.msk.bf16.mxu1 %vm2037_vm2, %v27233_v59  ;;  %v27240_v59 = vld [vmem:[#allocation63_spill] sm:$0xff] }
 0x549   : > { %18870 = vmatmul.mubr.msk.bf16.gmra.mrb[100].mxu0 %vm2037_vm2, %v27234_v49  ;;  %v27241_v49 = vld [vmem:[#allocation132_spill] sm:$0xff] }
 0x54a   : > { %18873 = vmatprep.mubr.msk.bf16.mxu0 %vm2037_vm2, %v27235_v58  ;;  %v4634_v13 = vsel %vm4409_vm3, %v27241_v49, %v4633_v2  ;;  %v21291_v58 = vld [vmem:[%s21481_s10 + $0x20] sm:$0xff]   ;;  %v21294_v2 = vld [vmem:[%s21481_s10 + $0x38] sm:$0xff]  }
 0x54b   : > { %v21295_v49 = vld [vmem:[%s21481_s10 + $0x40] sm:$0xff]  }
 0x54f   : > { %17856 = vmatmul.mubr.msk.bf16.gmra.mrb[216].mxu1 %vm2037_vm2, %v27236_v7  ;;  %v27242_v7 = vld [vmem:[#allocation66_spill] sm:$0xff] }
 0x550   : > { %17859 = vmatprep.mubr.msk.bf16.mxu1 %vm2037_vm2, %v27237_v0  ;;  %v21292_v0 = vld [vmem:[%s21481_s10 + $0x28] sm:$0xff]  }
 0x551   : > { %18874 = vmatmul.mubr.msk.bf16.gmra.mrb[104].mxu0 %vm2037_vm2, %v27239_v28  ;;  %v21293_v28 = vld [vmem:[%s21481_s10 + $0x30] sm:$0xff]  }
 0x552   : > { %18877 = vmatprep.mubr.msk.bf16.mxu0 %vm2037_vm2, %v27240_v59  ;;  %v27244_v59 = vld [vmem:[#allocation2_spill] sm:$0xff] }
 0x557   : > { %17860 = vmatmul.mubr.msk.bf16.gmra.mrb[220].mxu1 %vm2037_vm2, %v4634_v13  ;;  %v27245_v13 = vld [vmem:[#allocation70_spill] sm:$0xff] }
 0x558   : > { %17865 = vmatprep.mubr.msk.bf16.mxu1 %vm2037_vm2, %v21291_v58  ;;  %v27246_v58 = vld [vmem:[#allocation71_spill] sm:$0xff] }
 0x559   : > { %18878 = vmatmul.mubr.msk.bf16.gmra.mrb[108].mxu0 %vm2037_vm2, %v27242_v7  ;;  %v27310_v7 = vld [vmem:[#allocation195_spill] sm:$0xff] }
 0x55a   : > { %18881 = vmatprep.mubr.msk.bf16.mxu0 %vm2037_vm2, %v27243_v63  ;;  %v21304_v63 = vld [vmem:[%s21481_s10 + $0x88] sm:$0xff]  }
 0x55f   : > { %17866 = vmatmul.mubr.msk.bf16.vlgmr.msra.gmra.mrb[0].mxu1 %vm2037_vm2, %v21292_v0  ;;  %v27247_v0 = vld [vmem:[#allocation74_spill] sm:$0xff] }
 0x560   : > { %19220 = vmatpush3.bf16.msra.mxu1 %v27244_v59  ;;  %17869 = vmatprep.mubr.msk.bf16.mxu1 %vm2037_vm2, %v21293_v28  ;;  %v27248_v59 = vld [vmem:[#allocation75_spill] sm:$0xff] }
 0x561   : > { %18882 = vmatmul.mubr.msk.bf16.gmra.mrb[112].mxu0 %vm2037_vm2, %v27245_v13  ;;  %v21296_v28 = vld [vmem:[%s21481_s10 + $0x48] sm:$0xff]   ;;  %v21297_v13 = vld [vmem:[%s21481_s10 + $0x50] sm:$0xff]  }
 0x562   : > { %18885 = vmatprep.mubr.msk.bf16.mxu0 %vm2037_vm2, %v27246_v58  ;;  %v27249_v58 = vld [vmem:[#allocation78_spill] sm:$0xff] }
 0x567   : > { %17870 = vmatmul.mubr.msk.bf16.gmra.mrb[4].mxu1 %vm2037_vm2, %v21294_v2  ;;  %v27250_v2 = vld [vmem:[#allocation79_spill] sm:$0xff] }
 0x568   : > { %17873 = vmatprep.mubr.msk.bf16.mxu1 %vm2037_vm2, %v21295_v49  ;;  %v21298_v49 = vld [vmem:[%s21481_s10 + $0x58] sm:$0xff]  }
 0x569   : > { %18886 = vmatmul.mubr.msk.bf16.gmra.mrb[116].mxu0 %vm2037_vm2, %v27247_v0  ;;  %v21299_v0 = vld [vmem:[%s21481_s10 + $0x60] sm:$0xff]  }
 0x56a   : > { %18889 = vmatprep.mubr.msk.bf16.mxu0 %vm2037_vm2, %v27248_v59  ;;  %v27251_v59 = vld [vmem:[#allocation82_spill] sm:$0xff] }
 0x56f   : > { %17874 = vmatmul.mubr.msk.bf16.gmra.mrb[8].mxu1 %vm2037_vm2, %v21296_v28  ;;  %v27252_v28 = vld [vmem:[#allocation83_spill] sm:$0xff] }
 0x570   : > { %17877 = vmatprep.mubr.msk.bf16.mxu1 %vm2037_vm2, %v21297_v13  ;;  %v21300_v13 = vld [vmem:[%s21481_s10 + $0x68] sm:$0xff]  }
 0x571   : > { %18890 = vmatmul.mubr.msk.bf16.gmra.mrb[120].mxu0 %vm2037_vm2, %v27249_v58  ;;  %v21301_v58 = vld [vmem:[%s21481_s10 + $0x70] sm:$0xff]  }
 0x572   : > { %18893 = vmatprep.mubr.msk.bf16.mxu0 %vm2037_vm2, %v27250_v2  ;;  %v27253_v2 = vld [vmem:[#allocation86_spill] sm:$0xff] }
 0x577   : > { %17878 = vmatmul.mubr.msk.bf16.gmra.mrb[12].mxu1 %vm2037_vm2, %v21298_v49  ;;  %v27254_v49 = vld [vmem:[#allocation87_spill] sm:$0xff] }
 0x578   : > { %17881 = vmatprep.mubr.msk.bf16.mxu1 %vm2037_vm2, %v21299_v0  ;;  %v21302_v0 = vld [vmem:[%s21481_s10 + $0x78] sm:$0xff]  }
 0x579   : > { %18894 = vmatmul.mubr.msk.bf16.gmra.mrb[124].mxu0 %vm2037_vm2, %v27251_v59  ;;  %v21303_v59 = vld [vmem:[%s21481_s10 + $0x80] sm:$0xff]  }
 0x57a   : > { %18897 = vmatprep.mubr.msk.bf16.mxu0 %vm2037_vm2, %v27252_v28  ;;  %v27255_v28 = vld [vmem:[#allocation90_spill] sm:$0xff] }
 0x57f   : > { %17882 = vmatmul.mubr.msk.bf16.gmra.mrb[16].mxu1 %vm2037_vm2, %v21300_v13  ;;  %v27256_v13 = vld [vmem:[#allocation91_spill] sm:$0xff] }
 0x580   : > { %17885 = vmatprep.mubr.msk.bf16.mxu1 %vm2037_vm2, %v21301_v58  ;;  %v21305_v58 = vld [vmem:[%s21481_s10 + $0x90] sm:$0xff]  }
 0x581   : > { %18898 = vmatmul.mubr.msk.bf16.gmra.mrb[128].mxu0 %vm2037_vm2, %v27253_v2  ;;  %v27257_v2 = vld [vmem:[#allocation94_spill] sm:$0xff] }
 0x582   : > { %18901 = vmatprep.mubr.msk.bf16.mxu0 %vm2037_vm2, %v27254_v49  ;;  %v27258_v49 = vld [vmem:[#allocation95_spill] sm:$0xff] }
 0x587   : > { %17886 = vmatmul.mubr.msk.bf16.gmra.mrb[20].mxu1 %vm2037_vm2, %v21302_v0  ;;  %v21306_v0 = vld [vmem:[%s21481_s10 + $0x98] sm:$0xff]  }
 0x588   : > { %17889 = vmatprep.mubr.msk.bf16.mxu1 %vm2037_vm2, %v21303_v59  ;;  %v27259_v59 = vld [vmem:[#allocation157_spill] sm:$0xff] }
 0x589   : > { %18902 = vmatmul.mubr.msk.bf16.gmra.mrb[132].mxu0 %vm2037_vm2, %v27255_v28  ;;  %v27260_v28 = vld [vmem:[#allocation98_spill] sm:$0xff] }
 0x58a   : > { %18905 = vmatprep.mubr.msk.bf16.mxu0 %vm2037_vm2, %v27256_v13  ;;  %v27261_v13 = vld [vmem:[#allocation99_spill] sm:$0xff] }
 0x58f   : > { %17890 = vmatmul.mubr.msk.bf16.gmra.mrb[24].mxu1 %vm2037_vm2, %v21304_v63  ;;  %v27262_v63 = vld [vmem:[#allocation164_spill] sm:$0xff] }
 0x590   : > { %17893 = vmatprep.mubr.msk.bf16.mxu1 %vm2037_vm2, %v21305_v58  ;;  %v27263_v58 = vld [vmem:[#allocation165_spill] sm:$0xff] }
 0x591   : > { %18906 = vmatmul.mubr.msk.bf16.gmra.mrb[136].mxu0 %vm2037_vm2, %v27257_v2  ;;  %v27264_v2 = vld [vmem:[#allocation102_spill] sm:$0xff] }
 0x592   : > { %18909 = vmatprep.mubr.msk.bf16.mxu0 %vm2037_vm2, %v27258_v49  ;;  %v27265_v49 = vld [vmem:[#allocation103_spill] sm:$0xff] }
 0x597   : > { %17894 = vmatmul.mubr.msk.bf16.gmra.mrb[28].mxu1 %vm2037_vm2, %v21306_v0  ;;  %v27266_v0 = vld [vmem:[#allocation172_spill] sm:$0xff] }
 0x598   : > { %17897 = vmatprep.mubr.msk.bf16.mxu1 %vm2037_vm2, %v27259_v59  ;;  %v27267_v59 = vld [vmem:[#allocation173_spill] sm:$0xff] }
 0x599   : > { %18910 = vmatmul.mubr.msk.bf16.gmra.mrb[140].mxu0 %vm2037_vm2, %v27260_v28  ;;  %v27268_v28 = vld [vmem:[#allocation106_spill] sm:$0xff] }
 0x59a   : > { %18913 = vmatprep.mubr.msk.bf16.mxu0 %vm2037_vm2, %v27261_v13  ;;  %v27269_v13 = vld [vmem:[#allocation107_spill] sm:$0xff] }
 0x59f   : > { %17898 = vmatmul.mubr.msk.bf16.gmra.mrb[32].mxu1 %vm2037_vm2, %v27262_v63  ;;  %v27270_v63 = vld [vmem:[#allocation180_spill] sm:$0xff] }
 0x5a0   : > { %17901 = vmatprep.mubr.msk.bf16.mxu1 %vm2037_vm2, %v27263_v58  ;;  %v27271_v58 = vld [vmem:[#allocation181_spill] sm:$0xff] }
 0x5a1   : > { %18914 = vmatmul.mubr.msk.bf16.gmra.mrb[144].mxu0 %vm2037_vm2, %v27264_v2  ;;  %v27272_v2 = vld [vmem:[#allocation110_spill] sm:$0xff] }
 0x5a2   : > { %18917 = vmatprep.mubr.msk.bf16.mxu0 %vm2037_vm2, %v27265_v49  ;;  %v27273_v49 = vld [vmem:[#allocation111_spill] sm:$0xff] }
 0x5a7   : > { %17902 = vmatmul.mubr.msk.bf16.gmra.mrb[36].mxu1 %vm2037_vm2, %v27266_v0  ;;  %v27274_v0 = vld [vmem:[#allocation187_spill] sm:$0xff] }
 0x5a8   : > { %17905 = vmatprep.mubr.msk.bf16.mxu1 %vm2037_vm2, %v27267_v59  ;;  %v27275_v59 = vld [vmem:[#allocation188_spill] sm:$0xff] }
 0x5a9   : > { %18918 = vmatmul.mubr.msk.bf16.gmra.mrb[148].mxu0 %vm2037_vm2, %v27268_v28  ;;  %v27276_v28 = vld [vmem:[#allocation116_spill] sm:$0xff] }
 0x5aa   : > { %18921 = vmatprep.mubr.msk.bf16.mxu0 %vm2037_vm2, %v27269_v13  ;;  %v27277_v13 = vld [vmem:[#allocation117_spill] sm:$0xff] }
 0x5af   : > { %17906 = vmatmul.mubr.msk.bf16.gmra.mrb[40].mxu1 %vm2037_vm2, %v27270_v63  ;;  %v27278_v63 = vld [vmem:[#allocation209_spill] sm:$0xff] }
 0x5b0   : > { %17909 = vmatprep.mubr.msk.bf16.mxu1 %vm2037_vm2, %v27271_v58  ;;  %v27279_v58 = vld [vmem:[#allocation210_spill] sm:$0xff] }
 0x5b1   : > { %18922 = vmatmul.mubr.msk.bf16.gmra.mrb[152].mxu0 %vm2037_vm2, %v27272_v2  ;;  %v27280_v2 = vld [vmem:[#allocation122_spill] sm:$0xff] }
 0x5b2   : > { %18925 = vmatprep.mubr.msk.bf16.mxu0 %vm2037_vm2, %v27273_v49  ;;  %v27281_v49 = vld [vmem:[#allocation123_spill] sm:$0xff] }
 0x5b7   : > { %17910 = vmatmul.mubr.msk.bf16.gmra.mrb[44].mxu1 %vm2037_vm2, %v27274_v0  ;;  %v27282_v0 = vld [vmem:[#allocation213_spill] sm:$0xff] }
 0x5b8   : > { %17913 = vmatprep.mubr.msk.bf16.mxu1 %vm2037_vm2, %v27275_v59  ;;  %v27283_v59 = vld [vmem:[#allocation244_spill] sm:$0xff] }
 0x5b9   : > { %18926 = vmatmul.mubr.msk.bf16.gmra.mrb[156].mxu0 %vm2037_vm2, %v27276_v28  ;;  %v27284_v28 = vld [vmem:[#allocation128_spill] sm:$0xff] }
 0x5ba   : > { %18929 = vmatprep.mubr.msk.bf16.mxu0 %vm2037_vm2, %v27277_v13  ;;  %v21316_v13 = vld [vmem:[%s21481_s10 + $0x188] sm:$0xff]  }
 0x5bf   : > { %17914 = vmatmul.mubr.msk.bf16.gmra.mrb[48].mxu1 %vm2037_vm2, %v27278_v63  ;;  %v27285_v63 = vld [vmem:[#allocation129_spill] sm:$0xff] }
 0x5c0   : > { %17917 = vmatprep.mubr.msk.bf16.mxu1 %vm2037_vm2, %v27279_v58  ;;  %v27286_v58 = vld [vmem:[#allocation246_spill] sm:$0xff] }
 0x5c1   : > { %18930 = vmatmul.mubr.msk.bf16.gmra.mrb[160].mxu0 %vm2037_vm2, %v27280_v2  ;;  %v27287_v2 = vld [vmem:[#allocation247_spill] sm:$0xff] }
 0x5c2   : > { %18933 = vmatprep.mubr.msk.bf16.mxu0 %vm2037_vm2, %v27281_v49  ;;  %v27288_v49 = vld [vmem:[#allocation134_spill] sm:$0xff] }
 0x5c7   : > { %17918 = vmatmul.mubr.msk.bf16.gmra.mrb[52].mxu1 %vm2037_vm2, %v27282_v0  ;;  %v27289_v0 = vld [vmem:[#allocation135_spill] sm:$0xff] }
 0x5c8   : > { %17921 = vmatprep.mubr.msk.bf16.mxu1 %vm2037_vm2, %v27283_v59  ;;  %v27290_v59 = vld [vmem:[#allocation250_spill] sm:$0xff] }
 0x5c9   : > { %18934 = vmatmul.mubr.msk.bf16.gmra.mrb[164].mxu0 %vm2037_vm2, %v27284_v28  ;;  %v27291_v28 = vld [vmem:[#allocation251_spill] sm:$0xff] }
 0x5ca   : > { %18937 = vmatprep.mubr.msk.bf16.mxu0 %vm2037_vm2, %v27285_v63  ;;  %v27292_v63 = vld [vmem:[#allocation142_spill] sm:$0xff] }
 0x5cf   : > { %17922 = vmatmul.mubr.msk.bf16.gmra.mrb[56].mxu1 %vm2037_vm2, %v27286_v58  ;;  %v27293_v58 = vld [vmem:[#allocation143_spill] sm:$0xff] }
 0x5d0   : > { %17925 = vmatprep.mubr.msk.bf16.mxu1 %vm2037_vm2, %v27287_v2  ;;  %v27294_v2 = vld [vmem:[#allocation254_spill] sm:$0xff] }
 0x5d1   : > { %18938 = vmatmul.mubr.msk.bf16.gmra.mrb[168].mxu0 %vm2037_vm2, %v27288_v49  ;;  %v27295_v49 = vld [vmem:[#allocation255_spill] sm:$0xff] }
 0x5d2   : > { %18941 = vmatprep.mubr.msk.bf16.mxu0 %vm2037_vm2, %v27289_v0  ;;  %v27296_v0 = vld [vmem:[#allocation150_spill] sm:$0xff] }
 0x5d7   : > { %17926 = vmatmul.mubr.msk.bf16.gmra.mrb[60].mxu1 %vm2037_vm2, %v27290_v59  ;;  %v27297_v59 = vld [vmem:[#allocation151_spill] sm:$0xff] }
 0x5d8   : > { %17929 = vmatprep.mubr.msk.bf16.mxu1 %vm2037_vm2, %v27291_v28  ;;  %v27298_v28 = vld [vmem:[#allocation256_spill] sm:$0xff] }
 0x5d9   : > { %18942 = vmatmul.mubr.msk.bf16.gmra.mrb[172].mxu0 %vm2037_vm2, %v27292_v63  ;;  %v21307_v63 = vld [vmem:[%s21481_s10 + $0x140] sm:$0xff]  }
 0x5da   : > { %18945 = vmatprep.mubr.msk.bf16.mxu0 %vm2037_vm2, %v27293_v58  ;;  %v27299_v58 = vld [vmem:[#allocation158_spill] sm:$0xff] }
 0x5df   : > { %17930 = vmatmul.mubr.msk.bf16.gmra.mrb[64].mxu1 %vm2037_vm2, %v27294_v2  ;;  %v27300_v2 = vld [vmem:[#allocation159_spill] sm:$0xff] }
 0x5e0   : > { %17933 = vmatprep.mubr.msk.bf16.mxu1 %vm2037_vm2, %v27295_v49  ;;  %v21308_v49 = vld [vmem:[%s21481_s10 + $0x148] sm:$0xff]  }
 0x5e1   : > { %18946 = vmatmul.mubr.msk.bf16.gmra.mrb[176].mxu0 %vm2037_vm2, %v27296_v0  ;;  %v21309_v0 = vld [vmem:[%s21481_s10 + $0x150] sm:$0xff]  }
 0x5e2   : > { %18949 = vmatprep.mubr.msk.bf16.mxu0 %vm2037_vm2, %v27297_v59  ;;  %v27301_v59 = vld [vmem:[#allocation166_spill] sm:$0xff] }
 0x5e7   : > { %17934 = vmatmul.mubr.msk.bf16.gmra.mrb[68].mxu1 %vm2037_vm2, %v27298_v28  ;;  %v27302_v28 = vld [vmem:[#allocation167_spill] sm:$0xff] }
 0x5e8   : > { %17937 = vmatprep.mubr.msk.bf16.mxu1 %vm2037_vm2, %v21307_v63  ;;  %v21310_v63 = vld [vmem:[%s21481_s10 + $0x158] sm:$0xff]  }
 0x5e9   : > { %18950 = vmatmul.mubr.msk.bf16.gmra.mrb[180].mxu0 %vm2037_vm2, %v27299_v58  ;;  %v21311_v58 = vld [vmem:[%s21481_s10 + $0x160] sm:$0xff]  }
 0x5ea   : > { %18953 = vmatprep.mubr.msk.bf16.mxu0 %vm2037_vm2, %v27300_v2  ;;  %v27303_v2 = vld [vmem:[#allocation174_spill] sm:$0xff] }
 0x5ef   : > { %17938 = vmatmul.mubr.msk.bf16.gmra.mrb[72].mxu1 %vm2037_vm2, %v21308_v49  ;;  %v27304_v49 = vld [vmem:[#allocation175_spill] sm:$0xff] }
 0x5f0   : > { %17941 = vmatprep.mubr.msk.bf16.mxu1 %vm2037_vm2, %v21309_v0  ;;  %v21312_v0 = vld [vmem:[%s21481_s10 + $0x168] sm:$0xff]  }
 0x5f1   : > { %18954 = vmatmul.mubr.msk.bf16.gmra.mrb[184].mxu0 %vm2037_vm2, %v27301_v59  ;;  %v21313_v59 = vld [vmem:[%s21481_s10 + $0x170] sm:$0xff]  }
 0x5f2   : > { %18957 = vmatprep.mubr.msk.bf16.mxu0 %vm2037_vm2, %v27302_v28  ;;  %v27305_v28 = vld [vmem:[#allocation182_spill] sm:$0xff] }
 0x5f7   : > { %17942 = vmatmul.mubr.msk.bf16.gmra.mrb[76].mxu1 %vm2037_vm2, %v21310_v63  ;;  %v27306_v63 = vld [vmem:[#allocation183_spill] sm:$0xff] }
 0x5f8   : > { %17945 = vmatprep.mubr.msk.bf16.mxu1 %vm2037_vm2, %v21311_v58  ;;  %v21314_v58 = vld [vmem:[%s21481_s10 + $0x178] sm:$0xff]  }
 0x5f9   : > { %18958 = vmatmul.mubr.msk.bf16.gmra.mrb[188].mxu0 %vm2037_vm2, %v27303_v2  ;;  %v21315_v2 = vld [vmem:[%s21481_s10 + $0x180] sm:$0xff]  }
 0x5fa   : > { %18961 = vmatprep.mubr.msk.bf16.mxu0 %vm2037_vm2, %v27304_v49  ;;  %v27307_v49 = vld [vmem:[#allocation189_spill] sm:$0xff] }
 0x5ff   : > { %17946 = vmatmul.mubr.msk.bf16.gmra.mrb[80].mxu1 %vm2037_vm2, %v21312_v0  ;;  %v27308_v0 = vld [vmem:[#allocation190_spill] sm:$0xff] }
 0x600   : > { %17949 = vmatprep.mubr.msk.bf16.mxu1 %vm2037_vm2, %v21313_v59  ;;  %v7208_v59 = vshll.u32 %v27117_v5, 16 }
 0x601   : > { %18962 = vmatmul.mubr.msk.bf16.gmra.mrb[192].mxu0 %vm2037_vm2, %v27305_v28  ;;  %v7215_v28 = vshll.u32 %v27120_v35, 16 }
 0x602   : > { %18965 = vmatprep.mubr.msk.bf16.mxu0 %vm2037_vm2, %v27306_v63  ;;  %v7212_v63 = vshrl.u32 %v27117_v5, 16 }
 0x603   : > { %v7217_v9 = vrot.slane %v7215_v28, 1  ;;  %v21319_v28 = vld [vmem:[%s21481_s10 + $0x1a0] sm:$0xff]  }
 0x605   : > { %v7221_v35 = vor.u32 %v7219_v11, %v7217_v9  ;;  %v21321_v11 = vld [vmem:[%s21481_s10 + $0x1b0] sm:$0xff]  }
 0x607   : > { %17950 = vmatmul.mubr.msk.bf16.gmra.mrb[84].mxu1 %vm2037_vm2, %v21314_v58  ;;  %v21317_v58 = vld [vmem:[%s21481_s10 + $0x190] sm:$0xff]  }
 0x608   : > { %17953 = vmatprep.mubr.msk.bf16.mxu1 %vm2037_vm2, %v21315_v2  ;;  %v27309_v2 = vld [vmem:[#allocation194_spill] sm:$0xff] }
 0x609   : > { %18966 = vmatmul.mubr.msk.bf16.gmra.mrb[196].mxu0 %vm2037_vm2, %v27307_v49  ;;  %v7210_v49 = vrot.slane %v7208_v59, 1  ;;  %v7226_v59 = vshrl.u32 %v27121_v10, 16 }
 0x60a   : > { %18969 = vmatprep.mubr.msk.bf16.mxu0 %vm2037_vm2, %v27308_v0 }
 0x60b   : > { %v7214_v0 = vor.u32 %v7212_v63, %v7210_v49  ;;  %v7229_v63 = vshll.u32 %v27126_v55, 16 }
 0x60f   : > { %17954 = vmatmul.mubr.msk.bf16.gmra.mrb[88].mxu1 %vm2037_vm2, %v21316_v13  ;;  %v27311_v13 = vld [vmem:[#allocation198_spill] sm:$0xff] }
 0x610   : > { %17957 = vmatprep.mubr.msk.bf16.mxu1 %vm2037_vm2, %v21317_v58  ;;  %v24558_v5 = vsel %vm1136_vm1, %v27311_v13, %v7210_v49  ;;  %v24564_v58 = vsel %vm1136_vm1, %v7214_v0, %v7217_v9  ;;  %v7224_v49 = vrot.slane %v7222_v20, 1  ;;  %v7231_v13 = vrot.slane %v7229_v63, 1 }
 0x611   : > { %18970 = vmatmul.mubr.msk.bf16.gmra.mrb[200].mxu0 %vm2037_vm2, %v27309_v2  ;;  %27312 = vst [vmem:[#allocation65_spill] sm:$0xff] %v24558_v5  ;;  %27313 = vst [vmem:[#allocation68_spill] sm:$0xff] %v24564_v58  ;;  %v10620_v0 = vshll.u32 %v24104_v33, 16  ;;  %v21320_v2 = vld [vmem:[%s21481_s10 + $0x1a8] sm:$0xff]   ;;  %v10624_v20 = vshrl.u32 %v24104_v33, 16  ;;  %v10627_v9 = vshll.u32 %v24115_v62, 16 }
 0x612   : > { %18973 = vmatprep.mubr.msk.bf16.mxu0 %vm2037_vm2, %v27310_v7  ;;  %v24576_v10 = vsel %vm1136_vm1, %v7221_v35, %v7224_v49  ;;  %v7233_v7 = vshrl.u32 %v27126_v55, 16  ;;  %v21340_v33 = vld [vmem:[%s21481_s10 + $0x248] sm:$0xff]  }
 0x613   : > { %27314 = vst [vmem:[#allocation69_spill] sm:$0xff] %v24576_v10  ;;  %v10629_v63 = vrot.slane %v10627_v9, 1  ;;  %v21143_v9 = vld [vmem:[%s22281_s16 + $0x40] ss:$0 sps:$4 sm:$0xff]  }
 0x614   : > { %v24592_v55 = vor.u32 %v7233_v7, %v7231_v13  ;;  %v10641_v7 = vshll.u32 %v24129_v12, 16 }
 0x616   : > { %27316 = vst [vmem:[#allocation73_spill] sm:$0xff] %v24592_v55 }
 0x617   : > { %17958 = vmatmul.mubr.msk.bf16.gmra.mrb[92].mxu1 %vm2037_vm2, %v21318_v23  ;;  %v7228_v23 = vor.u32 %v7226_v59, %v7224_v49  ;;  %v10622_v59 = vrot.slane %v10620_v0, 1  ;;  %v10634_v49 = vshll.u32 %v24118_v52, 16 }
 0x618   : > { %17961 = vmatprep.mubr.msk.bf16.mxu1 %vm2037_vm2, %v21319_v28 }
 0x619   : > { %18974 = vmatmul.mubr.msk.bf16.gmra.mrb[204].mxu0 %vm2037_vm2, %v24558_v5  ;;  %v24582_v28 = vsel %vm1136_vm1, %v7228_v23, %v7231_v13  ;;  %v10623_v35 = vsel %vm1136_vm1, %v24592_v55, %v10622_v59  ;;  %v10631_v23 = vshrl.u32 %v24115_v62, 16  ;;  %v21323_v13 = vld [vmem:[%s21481_s10 + $0x1c0] sm:$0xff]  }
 0x61a   : > { %18977 = vmatprep.mubr.msk.bf16.mxu0 %vm2037_vm2, %v24564_v58  ;;  %27315 = vst [vmem:[#allocation72_spill] sm:$0xff] %v24582_v28 }
 0x61b   : > { %v10633_v62 = vor.u32 %v10631_v23, %v10629_v63 }
 0x61f   : > { %17962 = vmatmul.mubr.msk.bf16.gmra.mrb[96].mxu1 %vm2037_vm2, %v21320_v2  ;;  %v10626_v2 = vor.u32 %v10624_v20, %v10622_v59  ;;  %v10636_v20 = vrot.slane %v10634_v49, 1 }
 0x620   : > { %17965 = vmatprep.mubr.msk.bf16.mxu1 %vm2037_vm2, %v21321_v11  ;;  %v21322_v11 = vld [vmem:[%s21481_s10 + $0x1b8] sm:$0xff]  }
 0x621   : > { %18978 = vmatmul.mubr.msk.bf16.gmra.mrb[208].mxu0 %vm2037_vm2, %v24576_v10  ;;  %v10630_v0 = vsel %vm1136_vm1, %v10626_v2, %v10629_v63  ;;  %v10637_v55 = vsel %vm1136_vm1, %v10633_v62, %v10636_v20  ;;  %v10645_v2 = vshrl.u32 %v24129_v12, 16  ;;  %v21324_v10 = vld [vmem:[%s21481_s10 + $0x1c8] sm:$0xff]  }
 0x622   : > { %18981 = vmatprep.mubr.msk.bf16.mxu0 %vm2037_vm2, %v24582_v28  ;;  %v10638_v28 = vshrl.u32 %v24118_v52, 16  ;;  %v10649_v52 = vshll.u32 %v21143_v9, 16 }
 0x624   : > { %v10640_v59 = vor.u32 %v10638_v28, %v10636_v20  ;;  %v10651_v12 = vrot.slane %v10649_v52, 1 }
 0x627   : > { %17966 = vmatmul.mubr.msk.bf16.gmra.mrb[100].mxu1 %vm2037_vm2, %v21322_v11  ;;  %v10643_v11 = vrot.slane %v10641_v7, 1  ;;  %v21326_v7 = vld [vmem:[%s21481_s10 + $0x1d8] sm:$0xff]  }
 0x628   : > { %17969 = vmatprep.mubr.msk.bf16.mxu1 %vm2037_vm2, %v21323_v13 }
 0x629   : > { %18982 = vmatmul.mubr.msk.bf16.gmra.mrb[212].mxu0 %vm2037_vm2, %v10623_v35  ;;  %v10644_v13 = vsel %vm1136_vm1, %v10640_v59, %v10643_v11  ;;  %v21325_v35 = vld [vmem:[%s21481_s10 + $0x1d0] sm:$0xff]   ;;  %v10647_v28 = vor.u32 %v10645_v2, %v10643_v11  ;;  %v21328_v11 = vld [vmem:[%s21481_s10 + $0x1e8] sm:$0xff]  }
 0x62a   : > { %18985 = vmatprep.mubr.msk.bf16.mxu0 %vm2037_vm2, %v10630_v0  ;;  %v21329_v2 = vld [vmem:[%s21481_s10 + $0x1f0] sm:$0xff]  }
 0x62b   : > { %v10652_v0 = vsel %vm1136_vm1, %v10647_v28, %v10651_v12  ;;  %v21330_v28 = vld [vmem:[%s21481_s10 + $0x1f8] sm:$0xff]   ;;  %v21331_v12 = vld [vmem:[%s21481_s10 + $0x200] sm:$0xff]  }
 0x62f   : > { %17970 = vmatmul.mubr.msk.bf16.gmra.mrb[104].mxu1 %vm2037_vm2, %v21324_v10 }
 0x630   : > { %17973 = vmatprep.mubr.msk.bf16.mxu1 %vm2037_vm2, %v21325_v35 }
 0x631   : > { %18986 = vmatmul.mubr.msk.bf16.gmra.mrb[216].mxu0 %vm2037_vm2, %v10637_v55  ;;  %v21327_v55 = vld [vmem:[%s21481_s10 + $0x1e0] sm:$0xff]  }
 0x632   : > { %v24616_v63 = vpop.f32.mrb[0].mxu1  ;;  %18989 = vmatprep.mubr.msk.bf16.mxu0 %vm2037_vm2, %v10644_v13 }
 0x633   : > { %v24619_v49 = vpop.f32.mrb[1].mxu1 }
 0x634   : > { %v24621_v23 = vpop.f32.mrb[2].mxu1 }
 0x635   : > { %v24623_v10 = vpop.f32.mrb[3].mxu1 }
 0x637   : > { %17974 = vmatmul.mubr.msk.bf16.gmra.mrb[108].mxu1 %vm2037_vm2, %v21326_v7 }
 0x638   : > { %17977 = vmatprep.mubr.msk.bf16.mxu1 %vm2037_vm2, %v21327_v55  ;;  %v21332_v55 = vld [vmem:[%s21481_s10 + $0x208] sm:$0xff]  }
 0x639   : > { %18990 = vmatmul.mubr.msk.bf16.gmra.mrb[220].mxu0 %vm2037_vm2, %v10652_v0 }
 0x63a   : > { %v24631_v20 = vpop.f32.mrb[4].mxu1  ;;  %18995 = vmatprep.mubr.msk.bf16.mxu0 %vm2037_vm2, %v27061_v19 }
 0x63b   : > { %v24635_v62 = vpop.f32.mrb[5].mxu1 }
 0x63c   : > { %v17872_v9 = vpop.f32.mrb[6].mxu1 }
 0x63d   : > { %v24637_v59 = vpop.f32.mrb[7].mxu1  ;;  %v21333_v9 = vld [vmem:[%s21481_s10 + $0x210] sm:$0xff]  }
 0x63f   : > { %17978 = vmatmul.mubr.msk.bf16.gmra.mrb[112].mxu1 %vm2037_vm2, %v21328_v11 }
 0x640   : > { %17981 = vmatprep.mubr.msk.bf16.mxu1 %vm2037_vm2, %v21329_v2 }
 0x641   : > { %18996 = vmatmul.mubr.msk.bf16.vlgmr.msra.gmra.mrb[0].mxu0 %vm2037_vm2, %v27062_v32 }
 0x642   : > { %v24645_v52 = vpop.f32.mrb[8].mxu1  ;;  %18999 = vmatprep.mubr.msk.bf16.mxu0 %vm2037_vm2, %v27063_v40 }
 0x643   : > { %v24649_v19 = vpop.f32.mrb[9].mxu1 }
 0x644   : > { %v24651_v13 = vpop.f32.mrb[10].mxu1 }
 0x645   : > { %v24653_v35 = vpop.f32.mrb[11].mxu1 }
 0x647   : > { %17982 = vmatmul.mubr.msk.bf16.gmra.mrb[116].mxu1 %vm2037_vm2, %v21330_v28  ;;  %v21334_v28 = vld [vmem:[%s21481_s10 + $0x218] sm:$0xff]  }
 0x648   : > { %17985 = vmatprep.mubr.msk.bf16.mxu1 %vm2037_vm2, %v21331_v12  ;;  %v21335_v12 = vld [vmem:[%s21481_s10 + $0x220] sm:$0xff]  }
 0x649   : > { %19000 = vmatmul.mubr.msk.bf16.gmra.mrb[4].mxu0 %vm2037_vm2, %v27064_v1 }
 0x64a   : > { %v24661_v32 = vpop.f32.mrb[12].mxu1  ;;  %19003 = vmatprep.mubr.msk.bf16.mxu0 %vm2037_vm2, %v27065_v39 }
 0x64b   : > { %v24665_v40 = vpop.f32.mrb[13].mxu1 }
 0x64c   : > { %v17880_v0 = vpop.f32.mrb[14].mxu1 }
 0x64d   : > { %v24667_v7 = vpop.f32.mrb[15].mxu1 }
 0x64f   : > { %17986 = vmatmul.mubr.msk.bf16.gmra.mrb[120].mxu1 %vm2037_vm2, %v21332_v55 }
 0x650   : > { %17989 = vmatprep.mubr.msk.bf16.mxu1 %vm2037_vm2, %v21333_v9  ;;  %v21336_v9 = vld [vmem:[%s21481_s10 + $0x228] sm:$0xff]  }
 0x651   : > { %19004 = vmatmul.mubr.msk.bf16.gmra.mrb[8].mxu0 %vm2037_vm2, %v27066_v36 }
 0x652   : > { %v24675_v1 = vpop.f32.mrb[16].mxu1  ;;  %19007 = vmatprep.mubr.msk.bf16.mxu0 %vm2037_vm2, %v27067_v44 }
 0x653   : > { %v24679_v39 = vpop.f32.mrb[17].mxu1 }
 0x654   : > { %v24681_v11 = vpop.f32.mrb[18].mxu1 }
 0x655   : > { %v24683_v2 = vpop.f32.mrb[19].mxu1 }
 0x657   : > { %17990 = vmatmul.mubr.msk.bf16.gmra.mrb[124].mxu1 %vm2037_vm2, %v21334_v28  ;;  %v21337_v28 = vld [vmem:[%s21481_s10 + $0x230] sm:$0xff]  }
 0x658   : > { %17993 = vmatprep.mubr.msk.bf16.mxu1 %vm2037_vm2, %v21335_v12 }
 0x659   : > { %19008 = vmatmul.mubr.msk.bf16.gmra.mrb[12].mxu0 %vm2037_vm2, %v27068_v22 }
 0x65a   : > { %v24691_v36 = vpop.f32.mrb[20].mxu1  ;;  %19011 = vmatprep.mubr.msk.bf16.mxu0 %vm2037_vm2, %v27069_v29 }
 0x65b   : > { %v24695_v44 = vpop.f32.mrb[21].mxu1 }
 0x65c   : > { %v17888_v0 = vpop.f32.mrb[22].mxu1 }
 0x65d   : > { %v24697_v55 = vpop.f32.mrb[23].mxu1 }
 0x65f   : > { %17994 = vmatmul.mubr.msk.bf16.gmra.mrb[128].mxu1 %vm2037_vm2, %v21336_v9  ;;  %v21338_v9 = vld [vmem:[%s21481_s10 + $0x238] sm:$0xff]  }
 0x660   : > { %17997 = vmatprep.mubr.msk.bf16.mxu1 %vm2037_vm2, %v21337_v28  ;;  %v21339_v28 = vld [vmem:[%s21481_s10 + $0x240] sm:$0xff]  }
 0x661   : > { %19012 = vmatmul.mubr.msk.bf16.gmra.mrb[16].mxu0 %vm2037_vm2, %v27070_v60 }
 0x662   : > { %v24705_v22 = vpop.f32.mrb[24].mxu1  ;;  %19015 = vmatprep.mubr.msk.bf16.mxu0 %vm2037_vm2, %v27071_v27 }
 0x663   : > { %v24709_v29 = vpop.f32.mrb[25].mxu1 }
 0x664   : > { %v24711_v12 = vpop.f32.mrb[26].mxu1 }
 0x665   : > { %v24713_v0 = vpop.f32.mrb[27].mxu1 }
 0x667   : > { %17998 = vmatmul.mubr.msk.bf16.gmra.mrb[132].mxu1 %vm2037_vm2, %v21338_v9  ;;  %v21341_v9 = vld [vmem:[%s21481_s10 + $0x250] sm:$0xff]  }
 0x668   : > { %18001 = vmatprep.mubr.msk.bf16.mxu1 %vm2037_vm2, %v21339_v28 }
 0x669   : > { %19016 = vmatmul.mubr.msk.bf16.gmra.mrb[20].mxu0 %vm2037_vm2, %v27073_v16 }
 0x66a   : > { %v24721_v60 = vpop.f32.mrb[28].mxu1  ;;  %19019 = vmatprep.mubr.msk.bf16.mxu0 %vm2037_vm2, %v27074_v30 }
 0x66b   : > { %v24725_v27 = vpop.f32.mrb[29].mxu1 }
 0x66c   : > { %v17896_v58 = vpop.f32.mrb[30].mxu1 }
 0x66d   : > { %v24727_v5 = vpop.f32.mrb[31].mxu1 }
 0x66f   : > { %18002 = vmatmul.mubr.msk.bf16.gmra.mrb[136].mxu1 %vm2037_vm2, %v21340_v33  ;;  %v21342_v33 = vld [vmem:[%s21481_s10 + $0x258] sm:$0xff]  }
 0x670   : > { %18005 = vmatprep.mubr.msk.bf16.mxu1 %vm2037_vm2, %v21341_v9  ;;  %v21343_v9 = vld [vmem:[%s21481_s10 + $0x260] sm:$0xff]  }
 0x671   : > { %19020 = vmatmul.mubr.msk.bf16.gmra.mrb[24].mxu0 %vm2037_vm2, %v27077_v47 }
 0x672   : > { %v24735_v16 = vpop.f32.mrb[32].mxu1  ;;  %19023 = vmatprep.mubr.msk.bf16.mxu0 %vm2037_vm2, %v27078_v48 }
 0x673   : > { %v24739_v30 = vpop.f32.mrb[33].mxu1 }
 0x674   : > { %27317 = vst [vmem:[#allocation76_spill] sm:$0xff] %v24739_v30  ;;  %v24741_v58 = vpop.f32.mrb[34].mxu1  ;;  %v21344_v30 = vld [vmem:[%s21481_s10 + $0x268] sm:$0xff]  }
 0x675   : > { %27318 = vst [vmem:[#allocation77_spill] sm:$0xff] %v24741_v58  ;;  %v24743_v28 = vpop.f32.mrb[35].mxu1 }
 0x676   : > { %27319 = vst [vmem:[#allocation80_spill] sm:$0xff] %v24743_v28 }
 0x677   : > { %18006 = vmatmul.mubr.msk.bf16.gmra.mrb[140].mxu1 %vm2037_vm2, %v21342_v33  ;;  %v21345_v33 = vld [vmem:[%s21481_s10 + $0x270] sm:$0xff]  }
 0x678   : > { %18009 = vmatprep.mubr.msk.bf16.mxu1 %vm2037_vm2, %v21343_v9 }
 0x679   : > { %19024 = vmatmul.mubr.msk.bf16.gmra.mrb[28].mxu0 %vm2037_vm2, %v27081_v57 }
 0x67a   : > { %v24751_v47 = vpop.f32.mrb[36].mxu1  ;;  %19027 = vmatprep.mubr.msk.bf16.mxu0 %vm2037_vm2, %v27082_v42 }
 0x67b   : > { %v24755_v48 = vpop.f32.mrb[37].mxu1 }
 0x67c   : > { %v17904_v58 = vpop.f32.mrb[38].mxu1 }
 0x67d   : > { %v24757_v28 = vpop.f32.mrb[39].mxu1 }
 0x67f   : > { %18010 = vmatmul.mubr.msk.bf16.gmra.mrb[144].mxu1 %vm2037_vm2, %v21344_v30  ;;  %v21346_v30 = vld [vmem:[%s21481_s10 + $0x278] sm:$0xff]  }
 0x680   : > { %18013 = vmatprep.mubr.msk.bf16.mxu1 %vm2037_vm2, %v21345_v33  ;;  %v21347_v33 = vld [vmem:[%s21481_s10 + $0x280] sm:$0xff]  }
 0x681   : > { %19028 = vmatmul.mubr.msk.bf16.gmra.mrb[32].mxu0 %vm2037_vm2, %v27083_v6 }
 0x682   : > { %v24765_v57 = vpop.f32.mrb[40].mxu1  ;;  %19031 = vmatprep.mubr.msk.bf16.mxu0 %vm2037_vm2, %v27084_v17 }
 0x683   : > { %v24769_v42 = vpop.f32.mrb[41].mxu1 }
 0x684   : > { %27320 = vst [vmem:[#allocation81_spill] sm:$0xff] %v24769_v42  ;;  %v24771_v58 = vpop.f32.mrb[42].mxu1  ;;  %v21348_v42 = vld [vmem:[%s21481_s10 + $0x288] sm:$0xff]  }
 0x685   : > { %27321 = vst [vmem:[#allocation245_spill] sm:$0xff] %v24771_v58  ;;  %v24773_v9 = vpop.f32.mrb[43].mxu1 }
 0x686   : > { %27322 = vst [vmem:[#allocation84_spill] sm:$0xff] %v24773_v9 }
 0x687   : > { %18014 = vmatmul.mubr.msk.bf16.gmra.mrb[148].mxu1 %vm2037_vm2, %v21346_v30  ;;  %v21349_v30 = vld [vmem:[%s21481_s10 + $0x290] sm:$0xff]  }
 0x688   : > { %18017 = vmatprep.mubr.msk.bf16.mxu1 %vm2037_vm2, %v21347_v33 }
 0x689   : > { %19032 = vmatmul.mubr.msk.bf16.gmra.mrb[36].mxu0 %vm2037_vm2, %v27085_v41 }
 0x68a   : > { %v24781_v6 = vpop.f32.mrb[44].mxu1  ;;  %19035 = vmatprep.mubr.msk.bf16.mxu0 %vm2037_vm2, %v27086_v8 }
 0x68b   : > { %v24785_v17 = vpop.f32.mrb[45].mxu1 }
 0x68c   : > { %v17912_v58 = vpop.f32.mrb[46].mxu1 }
 0x68d   : > { %v24787_v9 = vpop.f32.mrb[47].mxu1 }
 0x68f   : > { %18018 = vmatmul.mubr.msk.bf16.gmra.mrb[152].mxu1 %vm2037_vm2, %v21348_v42  ;;  %v21350_v42 = vld [vmem:[%s21481_s10 + $0x298] sm:$0xff]  }
 0x690   : > { %18021 = vmatprep.mubr.msk.bf16.mxu1 %vm2037_vm2, %v21349_v30  ;;  %v21351_v30 = vld [vmem:[%s21481_s10 + $0x2a0] sm:$0xff]  }
 0x691   : > { %19036 = vmatmul.mubr.msk.bf16.gmra.mrb[40].mxu0 %vm2037_vm2, %v27087_v21 }
 0x692   : > { %v24795_v41 = vpop.f32.mrb[48].mxu1  ;;  %19039 = vmatprep.mubr.msk.bf16.mxu0 %vm2037_vm2, %v27088_v25 }
 0x693   : > { %v24799_v8 = vpop.f32.mrb[49].mxu1 }
 0x694   : > { %27323 = vst [vmem:[#allocation85_spill] sm:$0xff] %v24799_v8  ;;  %v24801_v58 = vpop.f32.mrb[50].mxu1  ;;  %v21352_v8 = vld [vmem:[%s21481_s10 + $0x2a8] sm:$0xff]  }
 0x695   : > { %27324 = vst [vmem:[#allocation248_spill] sm:$0xff] %v24801_v58  ;;  %v24803_v33 = vpop.f32.mrb[51].mxu1 }
 0x696   : > { %27325 = vst [vmem:[#allocation249_spill] sm:$0xff] %v24803_v33 }
 0x697   : > { %18022 = vmatmul.mubr.msk.bf16.gmra.mrb[156].mxu1 %vm2037_vm2, %v21350_v42  ;;  %v21353_v42 = vld [vmem:[%s21481_s10 + $0x2b0] sm:$0xff]  }
 0x698   : > { %18025 = vmatprep.mubr.msk.bf16.mxu1 %vm2037_vm2, %v21351_v30 }
 0x699   : > { %19040 = vmatmul.mubr.msk.bf16.gmra.mrb[44].mxu0 %vm2037_vm2, %v27089_v51 }
 0x69a   : > { %v24811_v21 = vpop.f32.mrb[52].mxu1  ;;  %19043 = vmatprep.mubr.msk.bf16.mxu0 %vm2037_vm2, %v27090_v15 }
 0x69b   : > { %v24815_v25 = vpop.f32.mrb[53].mxu1 }
 0x69c   : > { %v17920_v58 = vpop.f32.mrb[54].mxu1 }
 0x69d   : > { %v24817_v33 = vpop.f32.mrb[55].mxu1 }
 0x69f   : > { %18026 = vmatmul.mubr.msk.bf16.gmra.mrb[160].mxu1 %vm2037_vm2, %v21352_v8  ;;  %v21354_v8 = vld [vmem:[%s21481_s10 + $0x2b8] sm:$0xff]  }
 0x6a0   : > { %18029 = vmatprep.mubr.msk.bf16.mxu1 %vm2037_vm2, %v21353_v42  ;;  %v21355_v42 = vld [vmem:[%s21481_s10 + $0x2c0] sm:$0xff]  }
 0x6a1   : > { %19044 = vmatmul.mubr.msk.bf16.gmra.mrb[48].mxu0 %vm2037_vm2, %v27091_v14 }
 0x6a2   : > { %v24825_v51 = vpop.f32.mrb[56].mxu1  ;;  %19047 = vmatprep.mubr.msk.bf16.mxu0 %vm2037_vm2, %v27092_v54 }
 0x6a3   : > { %v24829_v15 = vpop.f32.mrb[57].mxu1 }
 0x6a4   : > { %27326 = vst [vmem:[#allocation88_spill] sm:$0xff] %v24829_v15  ;;  %v24831_v58 = vpop.f32.mrb[58].mxu1  ;;  %v21356_v15 = vld [vmem:[%s21481_s10 + $0x2c8] sm:$0xff]  }
 0x6a5   : > { %27327 = vst [vmem:[#allocation89_spill] sm:$0xff] %v24831_v58  ;;  %v24833_v30 = vpop.f32.mrb[59].mxu1 }
 0x6a6   : > { %27328 = vst [vmem:[#allocation252_spill] sm:$0xff] %v24833_v30 }
 0x6a7   : > { %18030 = vmatmul.mubr.msk.bf16.gmra.mrb[164].mxu1 %vm2037_vm2, %v21354_v8  ;;  %v21357_v8 = vld [vmem:[%s21481_s10 + $0x2d0] sm:$0xff]  }
 0x6a8   : > { %18033 = vmatprep.mubr.msk.bf16.mxu1 %vm2037_vm2, %v21355_v42 }
 0x6a9   : > { %19048 = vmatmul.mubr.msk.bf16.gmra.mrb[52].mxu0 %vm2037_vm2, %v27093_v43 }
 0x6aa   : > { %v24841_v14 = vpop.f32.mrb[60].mxu1  ;;  %19051 = vmatprep.mubr.msk.bf16.mxu0 %vm2037_vm2, %v27094_v31 }
 0x6ab   : > { %v24845_v54 = vpop.f32.mrb[61].mxu1 }
 0x6ac   : > { %v17928_v58 = vpop.f32.mrb[62].mxu1 }
 0x6ad   : > { %v24847_v30 = vpop.f32.mrb[63].mxu1 }
 0x6af   : > { %18034 = vmatmul.mubr.msk.bf16.gmra.mrb[168].mxu1 %vm2037_vm2, %v21356_v15  ;;  %v21358_v15 = vld [vmem:[%s21481_s10 + $0x2d8] sm:$0xff]  }
 0x6b0   : > { %18037 = vmatprep.mubr.msk.bf16.mxu1 %vm2037_vm2, %v21357_v8  ;;  %v21359_v8 = vld [vmem:[%s21481_s10 + $0x2e0] sm:$0xff]  }
 0x6b1   : > { %19052 = vmatmul.mubr.msk.bf16.gmra.mrb[56].mxu0 %vm2037_vm2, %v27096_v18 }
 0x6b2   : > { %v24855_v43 = vpop.f32.mrb[64].mxu1  ;;  %19055 = vmatprep.mubr.msk.bf16.mxu0 %vm2037_vm2, %v27097_v53 }
 0x6b3   : > { %v24859_v31 = vpop.f32.mrb[65].mxu1 }
 0x6b4   : > { %27329 = vst [vmem:[#allocation253_spill] sm:$0xff] %v24859_v31  ;;  %v24861_v58 = vpop.f32.mrb[66].mxu1 }
 0x6b5   : > { %27330 = vst [vmem:[#allocation92_spill] sm:$0xff] %v24861_v58  ;;  %v24863_v42 = vpop.f32.mrb[67].mxu1 }
 0x6b6   : > { %27331 = vst [vmem:[#allocation93_spill] sm:$0xff] %v24863_v42  ;;  %v21360_v42 = vld [vmem:[%s21481_s10 + $0x2e8] sm:$0xff]  }
 0x6b7   : > { %18038 = vmatmul.mubr.msk.bf16.gmra.mrb[172].mxu1 %vm2037_vm2, %v21358_v15  ;;  %v21361_v15 = vld [vmem:[%s21481_s10 + $0x2f0] sm:$0xff]  }
 0x6b8   : > { %18041 = vmatprep.mubr.msk.bf16.mxu1 %vm2037_vm2, %v21359_v8 }
 0x6b9   : > { %19056 = vmatmul.mubr.msk.bf16.gmra.mrb[60].mxu0 %vm2037_vm2, %v27100_v46 }
 0x6ba   : > { %v24871_v18 = vpop.f32.mrb[68].mxu1  ;;  %19059 = vmatprep.mubr.msk.bf16.mxu0 %vm2037_vm2, %v27101_v61 }
 0x6bb   : > { %v24875_v53 = vpop.f32.mrb[69].mxu1 }
 0x6bc   : > { %v17936_v58 = vpop.f32.mrb[70].mxu1 }
 0x6bd   : > { %v24877_v31 = vpop.f32.mrb[71].mxu1 }
 0x6be   : > { %27332 = vst [vmem:[#allocation96_spill] sm:$0xff] %v24877_v31  ;;  %v21362_v31 = vld [vmem:[%s21481_s10 + $0x2f8] sm:$0xff]  }
 0x6bf   : > { %18042 = vmatmul.mubr.msk.bf16.gmra.mrb[176].mxu1 %vm2037_vm2, %v21360_v42 }
 0x6c0   : > { %18045 = vmatprep.mubr.msk.bf16.mxu1 %vm2037_vm2, %v21361_v15 }
 0x6c1   : > { %19060 = vmatmul.mubr.msk.bf16.gmra.mrb[64].mxu0 %vm2037_vm2, %v27104_v56 }
 0x6c2   : > { %v24885_v46 = vpop.f32.mrb[72].mxu1  ;;  %19063 = vmatprep.mubr.msk.bf16.mxu0 %vm2037_vm2, %v27105_v45 }
 0x6c3   : > { %v24889_v61 = vpop.f32.mrb[73].mxu1 }
 0x6c4   : > { %v24891_v8 = vpop.f32.mrb[74].mxu1 }
 0x6c5   : > { %27333 = vst [vmem:[#allocation97_spill] sm:$0xff] %v24891_v8  ;;  %v24893_v58 = vpop.f32.mrb[75].mxu1 }
 0x6c6   : > { %27334 = vst [vmem:[#allocation100_spill] sm:$0xff] %v24893_v58 }
 0x6c7   : > { %18046 = vmatmul.mubr.msk.bf16.gmra.mrb[180].mxu1 %vm2037_vm2, %v21362_v31 }
 0x6c8   : > { %18049 = vmatprep.mubr.msk.bf16.mxu1 %vm2037_vm2, %v23987_v38 }
 0x6c9   : > { %19064 = vmatmul.mubr.msk.bf16.gmra.mrb[68].mxu0 %vm2037_vm2, %v27108_v3 }
 0x6ca   : > { %v24901_v56 = vpop.f32.mrb[76].mxu1  ;;  %19067 = vmatprep.mubr.msk.bf16.mxu0 %vm2037_vm2, %v27109_v24 }
 0x6cb   : > { %27335 = vst [vmem:[#allocation101_spill] sm:$0xff] %v24901_v56  ;;  %v24905_v45 = vpop.f32.mrb[77].mxu1 }
 0x6cc   : > { %27336 = vst [vmem:[#allocation104_spill] sm:$0xff] %v24905_v45  ;;  %v17944_v42 = vpop.f32.mrb[78].mxu1  ;;  %v27393_v45 = vld [vmem:[#allocation59_spill] sm:$0xff] }
 0x6cd   : > { %v24907_v15 = vpop.f32.mrb[79].mxu1  ;;  %v27345_v42 = vld [vmem:[#allocation161_spill] sm:$0xff] }
 0x6ce   : > { %27337 = vst [vmem:[#allocation105_spill] sm:$0xff] %v24907_v15  ;;  %v21367_v15 = vld [vmem:[%s22281_s16 + $0x18] sm:$0xff]  }
 0x6cf   : > { %18050 = vmatmul.mubr.msk.bf16.gmra.mrb[184].mxu1 %vm2037_vm2, %v23996_v26  ;;  %v27342_v26 = vld [vmem:[#allocation201_spill] sm:$0xff] }
 0x6d0   : > { %18053 = vmatprep.mubr.msk.bf16.mxu1 %vm2037_vm2, %v24001_v50  ;;  %v27343_v50 = vld [vmem:[#allocation160_spill] sm:$0xff] }
 0x6d1   : > { %19068 = vmatmul.mubr.msk.bf16.gmra.mrb[72].mxu0 %vm2037_vm2, %v27112_v37 }
 0x6d2   : > { %v24915_v38 = vpop.f32.mrb[80].mxu1  ;;  %19071 = vmatprep.mubr.msk.bf16.mxu0 %vm2037_vm2, %v27113_v4 }
 0x6d3   : > { %27338 = vst [vmem:[#allocation108_spill] sm:$0xff] %v24915_v38  ;;  %v24919_v3 = vpop.f32.mrb[81].mxu1 }
 0x6d4   : > { %27339 = vst [vmem:[#allocation109_spill] sm:$0xff] %v24919_v3  ;;  %v24921_v24 = vpop.f32.mrb[82].mxu1 }
 0x6d5   : > { %27340 = vst [vmem:[#allocation112_spill] sm:$0xff] %v24921_v24  ;;  %v24923_v31 = vpop.f32.mrb[83].mxu1 }
 0x6d6   : > { %27341 = vst [vmem:[#allocation113_spill] sm:$0xff] %v24923_v31  ;;  %v27348_v31 = vld [vmem:[#allocation203_spill] sm:$0xff] }
 0x6d7   : > { %18054 = vmatmul.mubr.msk.bf16.gmra.mrb[188].mxu1 %vm2037_vm2, %v24010_v34  ;;  %v27349_v34 = vld [vmem:[#allocation205_spill] sm:$0xff] }
 0x6d8   : > { %18057 = vmatprep.mubr.msk.bf16.mxu1 %vm2037_vm2, %v27342_v26  ;;  %v27350_v26 = vld [vmem:[#allocation168_spill] sm:$0xff] }
 0x6d9   : > { %19072 = vmatmul.mubr.msk.bf16.gmra.mrb[76].mxu0 %vm2037_vm2, %v27343_v50 }
 0x6da   : > { %v24931_v37 = vpop.f32.mrb[84].mxu1  ;;  %19075 = vmatprep.mubr.msk.bf16.mxu0 %vm2037_vm2, %v27345_v42 }
 0x6db   : > { %27344 = vst [vmem:[#allocation118_spill] sm:$0xff] %v24931_v37  ;;  %v24935_v4 = vpop.f32.mrb[85].mxu1  ;;  %v27352_v37 = vld [vmem:[#allocation169_spill] sm:$0xff] }
 0x6dc   : > { %27346 = vst [vmem:[#allocation119_spill] sm:$0xff] %v24935_v4  ;;  %v17952_v3 = vpop.f32.mrb[86].mxu1 }
 0x6dd   : > { %v24937_v24 = vpop.f32.mrb[87].mxu1 }
 0x6de   : > { %27347 = vst [vmem:[#allocation124_spill] sm:$0xff] %v24937_v24  ;;  %v27356_v24 = vld [vmem:[#allocation207_spill] sm:$0xff] }
 0x6df   : > { %18058 = vmatmul.mubr.msk.bf16.gmra.mrb[192].mxu1 %vm2037_vm2, %v27348_v31  ;;  %v27357_v31 = vld [vmem:[#allocation54_spill] sm:$0xff] }
 0x6e0   : > { %18061 = vmatprep.mubr.msk.bf16.mxu1 %vm2037_vm2, %v27349_v34  ;;  %v27358_v34 = vld [vmem:[#allocation176_spill] sm:$0xff] }
 0x6e1   : > { %19076 = vmatmul.mubr.msk.bf16.gmra.mrb[80].mxu0 %vm2037_vm2, %v27350_v26 }
 0x6e2   : > { %v24945_v50 = vpop.f32.mrb[88].mxu1  ;;  %19079 = vmatprep.mubr.msk.bf16.mxu0 %vm2037_vm2, %v27352_v37 }
 0x6e3   : > { %27351 = vst [vmem:[#allocation125_spill] sm:$0xff] %v24945_v50  ;;  %v24949_v42 = vpop.f32.mrb[89].mxu1  ;;  %v27360_v50 = vld [vmem:[#allocation177_spill] sm:$0xff] }
 0x6e4   : > { %27353 = vst [vmem:[#allocation130_spill] sm:$0xff] %v24949_v42  ;;  %v24951_v4 = vpop.f32.mrb[90].mxu1 }
 0x6e5   : > { %27354 = vst [vmem:[#allocation131_spill] sm:$0xff] %v24951_v4  ;;  %v24953_v3 = vpop.f32.mrb[91].mxu1 }
 0x6e6   : > { %27355 = vst [vmem:[#allocation136_spill] sm:$0xff] %v24953_v3  ;;  %v27363_v3 = vld [vmem:[#allocation56_spill] sm:$0xff] }
 0x6e7   : > { %18062 = vmatmul.mubr.msk.bf16.gmra.mrb[196].mxu1 %vm2037_vm2, %v27356_v24  ;;  %v27364_v24 = vld [vmem:[#allocation57_spill] sm:$0xff] }
 0x6e8   : > { %18065 = vmatprep.mubr.msk.bf16.mxu1 %vm2037_vm2, %v27357_v31  ;;  %v27365_v31 = vld [vmem:[#allocation184_spill] sm:$0xff] }
 0x6e9   : > { %19080 = vmatmul.mubr.msk.bf16.gmra.mrb[84].mxu0 %vm2037_vm2, %v27358_v34 }
 0x6ea   : > { %v24961_v26 = vpop.f32.mrb[92].mxu1  ;;  %19083 = vmatprep.mubr.msk.bf16.mxu0 %vm2037_vm2, %v27360_v50 }
 0x6eb   : > { %27359 = vst [vmem:[#allocation137_spill] sm:$0xff] %v24961_v26  ;;  %v24965_v37 = vpop.f32.mrb[93].mxu1  ;;  %v27367_v26 = vld [vmem:[#allocation185_spill] sm:$0xff] }
 0x6ec   : > { %27361 = vst [vmem:[#allocation144_spill] sm:$0xff] %v24965_v37  ;;  %v17960_v42 = vpop.f32.mrb[94].mxu1  ;;  %v27371_v37 = vld [vmem:[#allocation58_spill] sm:$0xff] }
 0x6ed   : > { %v24967_v4 = vpop.f32.mrb[95].mxu1 }
 0x6ee   : > { %27362 = vst [vmem:[#allocation145_spill] sm:$0xff] %v24967_v4 }
 0x6ef   : > { %18066 = vmatmul.mubr.msk.bf16.gmra.mrb[200].mxu1 %vm2037_vm2, %v27363_v3  ;;  %v27372_v3 = vld [vmem:[#allocation60_spill] sm:$0xff] }
 0x6f0   : > { %18069 = vmatprep.mubr.msk.bf16.mxu1 %vm2037_vm2, %v27364_v24  ;;  %v27373_v24 = vld [vmem:[#allocation191_spill] sm:$0xff] }
 0x6f1   : > { %19084 = vmatmul.mubr.msk.bf16.gmra.mrb[88].mxu0 %vm2037_vm2, %v27365_v31 }
 0x6f2   : > { %v24975_v34 = vpop.f32.mrb[96].mxu1  ;;  %19087 = vmatprep.mubr.msk.bf16.mxu0 %vm2037_vm2, %v27367_v26 }
 0x6f3   : > { %27366 = vst [vmem:[#allocation152_spill] sm:$0xff] %v24975_v34  ;;  %v24979_v50 = vpop.f32.mrb[97].mxu1  ;;  %v27375_v34 = vld [vmem:[#allocation192_spill] sm:$0xff] }
 0x6f4   : > { %27368 = vst [vmem:[#allocation153_spill] sm:$0xff] %v24979_v50  ;;  %v24981_v42 = vpop.f32.mrb[98].mxu1 }
 0x6f5   : > { %27369 = vst [vmem:[#allocation140_spill] sm:$0xff] %v24981_v42  ;;  %v24983_v4 = vpop.f32.mrb[99].mxu1 }
 0x6f6   : > { %27370 = vst [vmem:[#allocation171_spill] sm:$0xff] %v24983_v4  ;;  %v27378_v4 = vld [vmem:[#allocation61_spill] sm:$0xff] }
 0x6f7   : > { %18070 = vmatmul.mubr.msk.bf16.gmra.mrb[204].mxu1 %vm2037_vm2, %v27371_v37  ;;  %v21363_v37 = vld [vmem:[%s21481_s10 + $0x370] sm:$0xff]  }
 0x6f8   : > { %18073 = vmatprep.mubr.msk.bf16.mxu1 %vm2037_vm2, %v27372_v3  ;;  %v27379_v3 = vld [vmem:[#allocation196_spill] sm:$0xff] }
 0x6f9   : > { %19088 = vmatmul.mubr.msk.bf16.gmra.mrb[92].mxu0 %vm2037_vm2, %v27373_v24 }
 0x6fa   : > { %v24991_v31 = vpop.f32.mrb[100].mxu1  ;;  %19091 = vmatprep.mubr.msk.bf16.mxu0 %vm2037_vm2, %v27375_v34 }
 0x6fb   : > { %27374 = vst [vmem:[#allocation179_spill] sm:$0xff] %v24991_v31  ;;  %v24995_v26 = vpop.f32.mrb[101].mxu1  ;;  %v27381_v31 = vld [vmem:[#allocation197_spill] sm:$0xff] }
 0x6fc   : > { %27376 = vst [vmem:[#allocation148_spill] sm:$0xff] %v24995_v26  ;;  %v17968_v42 = vpop.f32.mrb[102].mxu1 }
 0x6fd   : > { %v24997_v50 = vpop.f32.mrb[103].mxu1 }
 0x6fe   : > { %27377 = vst [vmem:[#allocation3_spill] sm:$0xff] %v24997_v50 }
 0x6ff   : > { %18074 = vmatmul.mubr.msk.bf16.gmra.mrb[208].mxu1 %vm2037_vm2, %v27378_v4  ;;  %v21364_v4 = vld [vmem:[%s21481_s10 + $0x378] sm:$0xff]   ;;  %s20996_s10 = smul.u32 28, %s27560_s26 }
 0x700   : > { %18077 = vmatprep.mubr.msk.bf16.mxu1 %vm2037_vm2, %v21363_v37  ;;  %v27385_v37 = vld [vmem:[#allocation162_spill] sm:$0xff] }
 0x701   : > { %19092 = vmatmul.mubr.msk.bf16.gmra.mrb[96].mxu0 %vm2037_vm2, %v27379_v3  ;;  %v27386_v3 = vld [vmem:[#allocation199_spill] sm:$0xff]  ;;  %s25071_s12 = scalar_lea.vmem %s26216_s5, %s20996_s10 }
 0x702   : > { %v25005_v24 = vpop.f32.mrb[104].mxu1  ;;  %19095 = vmatprep.mubr.msk.bf16.mxu0 %vm2037_vm2, %v27381_v31  ;;  %v27388_v31 = vld [vmem:[#allocation200_spill] sm:$0xff] }
 0x703   : > { %27380 = vst [vmem:[#allocation4_spill] sm:$0xff] %v25005_v24  ;;  %v25009_v34 = vpop.f32.mrb[105].mxu1 }
 0x704   : > { %27382 = vst [vmem:[#allocation5_spill] sm:$0xff] %v25009_v34  ;;  %v25011_v42 = vpop.f32.mrb[106].mxu1 }
 0x705   : > { %27383 = vst [vmem:[#allocation6_spill] sm:$0xff] %v25011_v42  ;;  %v25013_v50 = vpop.f32.mrb[107].mxu1 }
 0x706   : > { %27384 = vst [vmem:[#allocation7_spill] sm:$0xff] %v25013_v50  ;;  %v21365_v50 = vld [vmem:[%s22281_s16 + $0x8] sm:$0xff]  }
 0x707   : > { %18078 = vmatmul.mubr.msk.bf16.gmra.mrb[212].mxu1 %vm2037_vm2, %v21364_v4  ;;  %v21366_v4 = vld [vmem:[%s22281_s16 + $0x10] sm:$0xff]  }
 0x708   : > { %18081 = vmatprep.mubr.msk.bf16.mxu1 %vm2037_vm2, %v27385_v37  ;;  %v27391_v37 = vld [vmem:[#allocation202_spill] sm:$0xff] }
 0x709   : > { %19096 = vmatmul.mubr.msk.bf16.gmra.mrb[100].mxu0 %vm2037_vm2, %v27386_v3  ;;  %v27392_v3 = vld [vmem:[#allocation204_spill] sm:$0xff] }
 0x70a   : > { %v25021_v24 = vpop.f32.mrb[108].mxu1  ;;  %19099 = vmatprep.mubr.msk.bf16.mxu0 %vm2037_vm2, %v27388_v31 }
 0x70b   : > { %27387 = vst [vmem:[#allocation8_spill] sm:$0xff] %v25021_v24  ;;  %v25025_v34 = vpop.f32.mrb[109].mxu1 }
 0x70c   : > { %27389 = vst [vmem:[#allocation9_spill] sm:$0xff] %v25025_v34  ;;  %v17976_v42 = vpop.f32.mrb[110].mxu1 }
 0x70d   : > { %v25027_v26 = vpop.f32.mrb[111].mxu1  ;;  %v25042_v42 = vld [vmem:[%s26214_s3] ss:$0 sm:$0xff] }
 0x70e   : > { %27390 = vst [vmem:[#allocation10_spill] sm:$0xff] %v25027_v26 }
 0x70f   : > { %18082 = vmatmul.mubr.msk.bf16.gmra.mrb[216].mxu1 %vm2037_vm2, %v21365_v50 }
 0x710   : > { %18085 = vmatprep.mubr.msk.bf16.mxu1 %vm2037_vm2, %v21366_v4  ;;  %v25048_v4 = vld [vmem:[%s26215_s4] ss:$0 sm:$0xff] }
 0x711   : > { %19100 = vmatmul.mubr.msk.bf16.gmra.mrb[104].mxu0 %vm2037_vm2, %v27391_v37 }
 0x712   : > { %19103 = vmatprep.mubr.msk.bf16.mxu0 %vm2037_vm2, %v27392_v3 }
 0x714   : > { %v18997_v31 = vpop.f32.mrb[0].mxu0 }
 0x715   : > { %v19221_v50 = vadd.f32 %v18997_v31, %v24616_v63  ;;  %v11832_v26 = vpop.f32.mrb[1].mxu0 }
 0x716   : > { %v19222_v37 = vadd.f32 %v11832_v26, %v24619_v49  ;;  %v18998_v34 = vpop.f32.mrb[2].mxu0  ;;  %v27394_v26 = vld [vmem:[#allocation206_spill] sm:$0xff] }
 0x717   : > { %v12904_v3 = vmul.f32 %v19221_v50, %v25042_v42  ;;  %v19223_v24 = vadd.f32 %v18998_v34, %v24621_v23  ;;  %v11835_v38 = vpop.f32.mrb[3].mxu0  ;;  %18086 = vmatmul.mubr.msk.bf16.gmra.mrb[220].mxu1 %vm2037_vm2, %v21367_v15  ;;  %v27395_v15 = vld [vmem:[#allocation208_spill] sm:$0xff] }
 0x718   : > { %v12902_v63 = vmul.f32 %v19222_v37, %v25042_v42  ;;  %v19224_v31 = vadd.f32 %v11835_v38, %v24623_v10  ;;  %18203 = vmatprep.mubr.msk.bf16.mxu1 %vm2037_vm2, %v27393_v45 }
 0x719   : > { %v13107_v56 = vadd.f32 %v25048_v4, %v12904_v3  ;;  %v12905_v49 = vmul.f32 %v19223_v24, %v25042_v42  ;;  %19104 = vmatmul.mubr.msk.bf16.gmra.mrb[108].mxu0 %vm2037_vm2, %v27394_v26 }
 0x71a   : > { %v13105_v23 = vadd.f32 %v25048_v4, %v12902_v63  ;;  %v12903_v34 = vmul.f32 %v19224_v31, %v25042_v42  ;;  %19107 = vmatprep.mubr.msk.bf16.mxu0 %vm2037_vm2, %v27395_v15 }
 0x71b   : > { %v13303_v50 = vmax.f32 %v13107_v56, 0.0  ;;  %v13108_v10 = vadd.f32 %v25048_v4, %v12905_v49 }
 0x71c   : > { %v13301_v45 = vmax.f32 %v13105_v23, 0.0  ;;  %v13106_v38 = vadd.f32 %v25048_v4, %v12903_v34  ;;  %v19001_v24 = vpop.f32.mrb[4].mxu0  ;;  %v27396_v34 = vld [vmem:[#allocation62_spill] sm:$0xff] }
 0x71d   : > { %v15974_v37 = vpack.c.bf16 %v13303_v50, %v13303_v50  ;;  %v13304_v3 = vmax.f32 %v13108_v10, 0.0  ;;  %v19225_v63 = vadd.f32 %v19001_v24, %v24631_v20  ;;  %v11848_v56 = vpop.f32.mrb[5].mxu0 }
 0x71e   : > { %v15972_v31 = vpack.c.bf16 %v13301_v45, %v13301_v45  ;;  %v13302_v49 = vmax.f32 %v13106_v38, 0.0  ;;  %v19226_v26 = vadd.f32 %v11848_v56, %v24635_v62  ;;  %v19002_v15 = vpop.f32.mrb[6].mxu0  ;;  %v27397_v45 = vld [vmem:[#allocation63_spill] sm:$0xff] }
 0x71f   : > { %14312 = vst.msk [vmem:[%s25071_s12 + $0x8] sm:$0xf] %vm14309_vm4, %v15974_v37  ;;  %v15975_v58 = vpack.c.bf16 %v13304_v3, %v13304_v3  ;;  %v12908_v23 = vmul.f32 %v19225_v63, %v25042_v42  ;;  %v11851_v8 = vpop.f32.mrb[7].mxu0  ;;  %18204 = vmatmul.mubr.msk.bf16.vlgmr.msra.gmra.mrb[112].mxu1 %vm2037_vm2, %v27396_v34  ;;  %v27398_v38 = vld [vmem:[#allocation211_spill] sm:$0xff]  ;;  %v27399_v3 = vld [vmem:[#allocation212_spill] sm:$0xff] }
 0x720   : > { %14310 = vst.msk [vmem:[%s25071_s12] sm:$0xf] %vm14309_vm4, %v15972_v31  ;;  %v15973_v20 = vpack.c.bf16 %v13302_v49, %v13302_v49  ;;  %v12906_v50 = vmul.f32 %v19226_v26, %v25042_v42  ;;  %v19227_v10 = vadd.f32 %v11851_v8, %v24637_v59  ;;  %18207 = vmatprep.mubr.msk.bf16.mxu1 %vm2037_vm2, %v27397_v45  ;;  %v27400_v45 = vld [vmem:[#allocation66_spill] sm:$0xff] }
 0x721   : > { %14313 = vst.msk [vmem:[%s25071_s12 + $0xc] sm:$0xf] %vm14309_vm4, %v15975_v58  ;;  %v13111_v62 = vadd.f32 %v25048_v4, %v12908_v23  ;;  %19108 = vmatmul.mubr.msk.bf16.gmra.mrb[112].mxu0 %vm2037_vm2, %v27398_v38 }
 0x722   : > { %14311 = vst.msk [vmem:[%s25071_s12 + $0x4] sm:$0xf] %vm14309_vm4, %v15973_v20  ;;  %v13109_v24 = vadd.f32 %v25048_v4, %v12906_v50  ;;  %v12907_v37 = vmul.f32 %v19227_v10, %v25042_v42  ;;  %19111 = vmatprep.mubr.msk.bf16.mxu0 %vm2037_vm2, %v27399_v3  ;;  %v27402_v3 = vld [vmem:[#allocation214_spill] sm:$0xff] }
 0x723   : > { %v13307_v59 = vmax.f32 %v13111_v62, 0.0 }
 0x724   : > { %v13305_v8 = vmax.f32 %v13109_v24, 0.0  ;;  %v13110_v58 = vadd.f32 %v25048_v4, %v12907_v37  ;;  %v19005_v63 = vpop.f32.mrb[8].mxu0  ;;  %v27401_v24 = vld [vmem:[#allocation67_spill] sm:$0xff] }
 0x725   : > { %v15978_v56 = vpack.c.bf16 %v13307_v59, %v13307_v59  ;;  %v19228_v31 = vadd.f32 %v19005_v63, %v24645_v52  ;;  %v11863_v49 = vpop.f32.mrb[9].mxu0 }
 0x726   : > { %v15976_v26 = vpack.c.bf16 %v13305_v8, %v13305_v8  ;;  %v13306_v15 = vmax.f32 %v13110_v58, 0.0  ;;  %v19229_v23 = vadd.f32 %v11863_v49, %v24649_v19  ;;  %v19006_v34 = vpop.f32.mrb[10].mxu0  ;;  %v27403_v8 = vld [vmem:[#allocation215_spill] sm:$0xff] }
 0x727   : > { %14316 = vst.msk [vmem:[%s25071_s12 + $0x18] sm:$0xf] %vm14309_vm4, %v15978_v56  ;;  %v12911_v20 = vmul.f32 %v19228_v31, %v25042_v42  ;;  %v19230_v50 = vadd.f32 %v19006_v34, %v24651_v13  ;;  %v11866_v10 = vpop.f32.mrb[11].mxu0  ;;  %18208 = vmatmul.mubr.msk.bf16.gmra.mrb[116].mxu1 %vm2037_vm2, %v27400_v45 }
 0x728   : > { %14314 = vst.msk [vmem:[%s25071_s12 + $0x10] sm:$0xf] %vm14309_vm4, %v15976_v26  ;;  %v15977_v52 = vpack.c.bf16 %v13306_v15, %v13306_v15  ;;  %v12909_v62 = vmul.f32 %v19229_v23, %v25042_v42  ;;  %v19231_v38 = vadd.f32 %v11866_v10, %v24653_v35  ;;  %18211 = vmatprep.mubr.msk.bf16.mxu1 %vm2037_vm2, %v27401_v24 }
 0x729   : > { %v13114_v19 = vadd.f32 %v25048_v4, %v12911_v20  ;;  %v12912_v37 = vmul.f32 %v19230_v50, %v25042_v42  ;;  %19112 = vmatmul.mubr.msk.bf16.gmra.mrb[116].mxu0 %vm2037_vm2, %v27402_v3  ;;  %v27406_v3 = vld [vmem:[#allocation216_spill] sm:$0xff] }
 0x72a   : > { %14315 = vst.msk [vmem:[%s25071_s12 + $0x14] sm:$0xf] %vm14309_vm4, %v15977_v52  ;;  %v13112_v13 = vadd.f32 %v25048_v4, %v12909_v62  ;;  %v12910_v59 = vmul.f32 %v19231_v38, %v25042_v42  ;;  %19115 = vmatprep.mubr.msk.bf16.mxu0 %vm2037_vm2, %v27403_v8  ;;  %v27404_v38 = vld [vmem:[#allocation70_spill] sm:$0xff]  ;;  %v27407_v8 = vld [vmem:[#allocation217_spill] sm:$0xff] }
 0x72b   : > { %v13310_v35 = vmax.f32 %v13114_v19, 0.0  ;;  %v13115_v58 = vadd.f32 %v25048_v4, %v12912_v37  ;;  %v27405_v37 = vld [vmem:[#allocation71_spill] sm:$0xff] }
 0x72c   : > { %v13308_v63 = vmax.f32 %v13112_v13, 0.0  ;;  %v13113_v56 = vadd.f32 %v25048_v4, %v12910_v59  ;;  %v19009_v31 = vpop.f32.mrb[12].mxu0 }
 0x72d   : > { %v15981_v49 = vpack.c.bf16 %v13310_v35, %v13310_v35  ;;  %v13311_v26 = vmax.f32 %v13115_v58, 0.0  ;;  %v19232_v15 = vadd.f32 %v19009_v31, %v24661_v32  ;;  %v11879_v23 = vpop.f32.mrb[13].mxu0 }
 0x72e   : > { %v15979_v34 = vpack.c.bf16 %v13308_v63, %v13308_v63  ;;  %v13309_v20 = vmax.f32 %v13113_v56, 0.0  ;;  %v19233_v50 = vadd.f32 %v11879_v23, %v24665_v40  ;;  %v19010_v10 = vpop.f32.mrb[14].mxu0 }
 0x72f   : > { %14319 = vst.msk [vmem:[%s25071_s12 + $0x24] sm:$0xf] %vm14309_vm4, %v15981_v49  ;;  %v15982_v45 = vpack.c.bf16 %v13311_v26, %v13311_v26  ;;  %v12915_v52 = vmul.f32 %v19232_v15, %v25042_v42  ;;  %v11882_v62 = vpop.f32.mrb[15].mxu0  ;;  %18212 = vmatmul.mubr.msk.bf16.gmra.mrb[120].mxu1 %vm2037_vm2, %v27404_v38  ;;  %v27409_v38 = vld [vmem:[#allocation75_spill] sm:$0xff] }
 0x730   : > { %14317 = vst.msk [vmem:[%s25071_s12 + $0x1c] sm:$0xf] %vm14309_vm4, %v15979_v34  ;;  %v15980_v32 = vpack.c.bf16 %v13309_v20, %v13309_v20  ;;  %v12913_v24 = vmul.f32 %v19233_v50, %v25042_v42  ;;  %v19234_v19 = vadd.f32 %v11882_v62, %v24667_v7  ;;  %18215 = vmatprep.mubr.msk.bf16.mxu1 %vm2037_vm2, %v27405_v37  ;;  %v27411_v37 = vld [vmem:[#allocation219_spill] sm:$0xff] }
 0x731   : > { %14320 = vst.msk [vmem:[%s25071_s12 + $0x28] sm:$0xf] %vm14309_vm4, %v15982_v45  ;;  %v13118_v40 = vadd.f32 %v25048_v4, %v12915_v52  ;;  %19116 = vmatmul.mubr.msk.bf16.gmra.mrb[120].mxu0 %vm2037_vm2, %v27406_v3  ;;  %v27408_v45 = vld [vmem:[#allocation74_spill] sm:$0xff] }
 0x732   : > { %14318 = vst.msk [vmem:[%s25071_s12 + $0x20] sm:$0xf] %vm14309_vm4, %v15980_v32  ;;  %v13116_v13 = vadd.f32 %v25048_v4, %v12913_v24  ;;  %v12914_v59 = vmul.f32 %v19234_v19, %v25042_v42  ;;  %19119 = vmatprep.mubr.msk.bf16.mxu0 %vm2037_vm2, %v27407_v8  ;;  %v27410_v24 = vld [vmem:[#allocation218_spill] sm:$0xff] }
 0x733   : > { %v13314_v7 = vmax.f32 %v13118_v40, 0.0 }
 0x734   : > { %v13312_v35 = vmax.f32 %v13116_v13, 0.0  ;;  %v13117_v58 = vadd.f32 %v25048_v4, %v12914_v59  ;;  %v19013_v63 = vpop.f32.mrb[16].mxu0 }
 0x735   : > { %v15985_v56 = vpack.c.bf16 %v13314_v7, %v13314_v7  ;;  %v19235_v31 = vadd.f32 %v19013_v63, %v24675_v1  ;;  %v11894_v49 = vpop.f32.mrb[17].mxu0 }
 0x736   : > { %v15983_v26 = vpack.c.bf16 %v13312_v35, %v13312_v35  ;;  %v13313_v15 = vmax.f32 %v13117_v58, 0.0  ;;  %v19236_v23 = vadd.f32 %v11894_v49, %v24679_v39  ;;  %v19014_v34 = vpop.f32.mrb[18].mxu0 }
 0x737   : > { %14323 = vst.msk [vmem:[%s25071_s12 + $0x34] sm:$0xf] %vm14309_vm4, %v15985_v56  ;;  %v12918_v20 = vmul.f32 %v19235_v31, %v25042_v42  ;;  %v19237_v50 = vadd.f32 %v19014_v34, %v24681_v11  ;;  %v11897_v10 = vpop.f32.mrb[19].mxu0  ;;  %18216 = vmatmul.mubr.msk.bf16.gmra.mrb[124].mxu1 %vm2037_vm2, %v27408_v45  ;;  %v27412_v34 = vld [vmem:[#allocation78_spill] sm:$0xff]  ;;  %v27414_v45 = vld [vmem:[#allocation220_spill] sm:$0xff] }
 0x738   : > { %14321 = vst.msk [vmem:[%s25071_s12 + $0x2c] sm:$0xf] %vm14309_vm4, %v15983_v26  ;;  %v15984_v1 = vpack.c.bf16 %v13313_v15, %v13313_v15  ;;  %v12916_v52 = vmul.f32 %v19236_v23, %v25042_v42  ;;  %v19238_v62 = vadd.f32 %v11897_v10, %v24683_v2  ;;  %18219 = vmatprep.mubr.msk.bf16.mxu1 %vm2037_vm2, %v27409_v38  ;;  %v27413_v10 = vld [vmem:[#allocation79_spill] sm:$0xff] }
 0x739   : > { %v13121_v39 = vadd.f32 %v25048_v4, %v12918_v20  ;;  %v12919_v32 = vmul.f32 %v19237_v50, %v25042_v42  ;;  %19120 = vmatmul.mubr.msk.bf16.gmra.mrb[124].mxu0 %vm2037_vm2, %v27410_v24 }
 0x73a   : > { %14322 = vst.msk [vmem:[%s25071_s12 + $0x30] sm:$0xf] %vm14309_vm4, %v15984_v1  ;;  %v13119_v11 = vadd.f32 %v25048_v4, %v12916_v52  ;;  %v12917_v19 = vmul.f32 %v19238_v62, %v25042_v42  ;;  %19123 = vmatprep.mubr.msk.bf16.mxu0 %vm2037_vm2, %v27411_v37  ;;  %v27415_v62 = vld [vmem:[#allocation221_spill] sm:$0xff] }
 0x73b   : > { %v13317_v2 = vmax.f32 %v13121_v39, 0.0  ;;  %v13122_v40 = vadd.f32 %v25048_v4, %v12919_v32 }
 0x73c   : > { %v13315_v3 = vmax.f32 %v13119_v11, 0.0  ;;  %v13120_v13 = vadd.f32 %v25048_v4, %v12917_v19  ;;  %v19017_v59 = vpop.f32.mrb[20].mxu0 }
 0x73d   : > { %v15988_v8 = vpack.c.bf16 %v13317_v2, %v13317_v2  ;;  %v13318_v7 = vmax.f32 %v13122_v40, 0.0  ;;  %v19239_v35 = vadd.f32 %v19017_v59, %v24691_v36  ;;  %v11910_v58 = vpop.f32.mrb[21].mxu0 }
 0x73e   : > { %v15986_v63 = vpack.c.bf16 %v13315_v3, %v13315_v3  ;;  %v13316_v56 = vmax.f32 %v13120_v13, 0.0  ;;  %v19240_v31 = vadd.f32 %v11910_v58, %v24695_v44  ;;  %v19018_v49 = vpop.f32.mrb[22].mxu0 }
 0x73f   : > { %14326 = vst.msk [vmem:[%s25071_s12 + $0x40] sm:$0xf] %vm14309_vm4, %v15988_v8  ;;  %v15989_v26 = vpack.c.bf16 %v13318_v7, %v13318_v7  ;;  %v12922_v15 = vmul.f32 %v19239_v35, %v25042_v42  ;;  %v11913_v23 = vpop.f32.mrb[23].mxu0  ;;  %18220 = vmatmul.mubr.msk.bf16.gmra.mrb[128].mxu1 %vm2037_vm2, %v27412_v34  ;;  %v27416_v7 = vld [vmem:[#allocation82_spill] sm:$0xff] }
 0x740   : > { %14324 = vst.msk [vmem:[%s25071_s12 + $0x38] sm:$0xf] %vm14309_vm4, %v15986_v63  ;;  %v15987_v36 = vpack.c.bf16 %v13316_v56, %v13316_v56  ;;  %v12920_v20 = vmul.f32 %v19240_v31, %v25042_v42  ;;  %v19241_v50 = vadd.f32 %v11913_v23, %v24697_v55  ;;  %18223 = vmatprep.mubr.msk.bf16.mxu1 %vm2037_vm2, %v27413_v10  ;;  %v27417_v63 = vld [vmem:[#allocation83_spill] sm:$0xff]  ;;  %v27418_v31 = vld [vmem:[#allocation222_spill] sm:$0xff] }
 0x741   : > { %14327 = vst.msk [vmem:[%s25071_s12 + $0x44] sm:$0xf] %vm14309_vm4, %v15989_v26  ;;  %v13125_v44 = vadd.f32 %v25048_v4, %v12922_v15  ;;  %19124 = vmatmul.mubr.msk.bf16.gmra.mrb[128].mxu0 %vm2037_vm2, %v27414_v45  ;;  %v27419_v26 = vld [vmem:[#allocation223_spill] sm:$0xff] }
 0x742   : > { %14325 = vst.msk [vmem:[%s25071_s12 + $0x3c] sm:$0xf] %vm14309_vm4, %v15987_v36  ;;  %v13123_v1 = vadd.f32 %v25048_v4, %v12920_v20  ;;  %v12921_v52 = vmul.f32 %v19241_v50, %v25042_v42  ;;  %19127 = vmatprep.mubr.msk.bf16.mxu0 %vm2037_vm2, %v27415_v62 }
 0x743   : > { %v13321_v55 = vmax.f32 %v13125_v44, 0.0 }
 0x744   : > { %v13319_v38 = vmax.f32 %v13123_v1, 0.0  ;;  %v13124_v39 = vadd.f32 %v25048_v4, %v12921_v52  ;;  %v19021_v32 = vpop.f32.mrb[24].mxu0 }
 0x745   : > { %v15992_v24 = vpack.c.bf16 %v13321_v55, %v13321_v55  ;;  %v19242_v11 = vadd.f32 %v19021_v32, %v24705_v22  ;;  %v11925_v19 = vpop.f32.mrb[25].mxu0  ;;  %v27420_v32 = vld [vmem:[#allocation86_spill] sm:$0xff] }
 0x746   : > { %v15990_v37 = vpack.c.bf16 %v13319_v38, %v13319_v38  ;;  %v13320_v2 = vmax.f32 %v13124_v39, 0.0  ;;  %v19243_v40 = vadd.f32 %v11925_v19, %v24709_v29  ;;  %v19022_v3 = vpop.f32.mrb[26].mxu0  ;;  %v27421_v19 = vld [vmem:[#allocation87_spill] sm:$0xff] }
 0x747   : > { %14330 = vst.msk [vmem:[%s25071_s12 + $0x50] sm:$0xf] %vm14309_vm4, %v15992_v24  ;;  %v12925_v13 = vmul.f32 %v19242_v11, %v25042_v42  ;;  %v19244_v59 = vadd.f32 %v19022_v3, %v24711_v12  ;;  %v11928_v8 = vpop.f32.mrb[27].mxu0  ;;  %18224 = vmatmul.mubr.msk.bf16.gmra.mrb[132].mxu1 %vm2037_vm2, %v27416_v7  ;;  %v27423_v3 = vld [vmem:[#allocation225_spill] sm:$0xff] }
 0x748   : > { %14328 = vst.msk [vmem:[%s25071_s12 + $0x48] sm:$0xf] %vm14309_vm4, %v15990_v37  ;;  %v15991_v22 = vpack.c.bf16 %v13320_v2, %v13320_v2  ;;  %v12923_v35 = vmul.f32 %v19243_v40, %v25042_v42  ;;  %v19245_v58 = vadd.f32 %v11928_v8, %v24713_v0  ;;  %18227 = vmatprep.mubr.msk.bf16.mxu1 %vm2037_vm2, %v27417_v63  ;;  %v27422_v37 = vld [vmem:[#allocation224_spill] sm:$0xff] }
 0x749   : > { %v13128_v29 = vadd.f32 %v25048_v4, %v12925_v13  ;;  %v12926_v56 = vmul.f32 %v19244_v59, %v25042_v42  ;;  %19128 = vmatmul.mubr.msk.bf16.gmra.mrb[132].mxu0 %vm2037_vm2, %v27418_v31 }
 0x74a   : > { %14329 = vst.msk [vmem:[%s25071_s12 + $0x4c] sm:$0xf] %vm14309_vm4, %v15991_v22  ;;  %v13126_v12 = vadd.f32 %v25048_v4, %v12923_v35  ;;  %v12924_v49 = vmul.f32 %v19245_v58, %v25042_v42  ;;  %19131 = vmatprep.mubr.msk.bf16.mxu0 %vm2037_vm2, %v27419_v26 }
 0x74b   : > { %v13324_v0 = vmax.f32 %v13128_v29, 0.0  ;;  %v13129_v15 = vadd.f32 %v25048_v4, %v12926_v56  ;;  %v27424_v29 = vld [vmem:[#allocation76_spill] sm:$0xff] }
 0x74c   : > { %v13322_v23 = vmax.f32 %v13126_v12, 0.0  ;;  %v13127_v34 = vadd.f32 %v25048_v4, %v12924_v49  ;;  %v19025_v36 = vpop.f32.mrb[28].mxu0  ;;  %v27425_v49 = vld [vmem:[#allocation77_spill] sm:$0xff] }
 0x74d   : > { %v15995_v20 = vpack.c.bf16 %v13324_v0, %v13324_v0  ;;  %v13325_v50 = vmax.f32 %v13129_v15, 0.0  ;;  %v19246_v10 = vadd.f32 %v19025_v36, %v24721_v60  ;;  %v11941_v44 = vpop.f32.mrb[29].mxu0  ;;  %v27426_v15 = vld [vmem:[#allocation90_spill] sm:$0xff] }
 0x74e   : > { %v15993_v45 = vpack.c.bf16 %v13322_v23, %v13322_v23  ;;  %v13323_v1 = vmax.f32 %v13127_v34, 0.0  ;;  %v19247_v52 = vadd.f32 %v11941_v44, %v24725_v27  ;;  %v19026_v62 = vpop.f32.mrb[30].mxu0  ;;  %v27427_v34 = vld [vmem:[#allocation80_spill] sm:$0xff]  ;;  %v27429_v44 = vld [vmem:[#allocation226_spill] sm:$0xff] }
 0x74f   : > { %14333 = vst.msk [vmem:[%s25071_s12 + $0x5c] sm:$0xf] %vm14309_vm4, %v15995_v20  ;;  %v15996_v55 = vpack.c.bf16 %v13325_v50, %v13325_v50  ;;  %v12929_v38 = vmul.f32 %v19246_v10, %v25042_v42  ;;  %v11944_v39 = vpop.f32.mrb[31].mxu0  ;;  %18228 = vmatmul.mubr.msk.bf16.gmra.mrb[136].mxu1 %vm2037_vm2, %v27420_v32  ;;  %v27428_v20 = vld [vmem:[#allocation91_spill] sm:$0xff] }
 0x750   : > { %14331 = vst.msk [vmem:[%s25071_s12 + $0x54] sm:$0xf] %vm14309_vm4, %v15993_v45  ;;  %v15994_v60 = vpack.c.bf16 %v13323_v1, %v13323_v1  ;;  %v12927_v24 = vmul.f32 %v19247_v52, %v25042_v42  ;;  %v19248_v11 = vadd.f32 %v11944_v39, %v24727_v5  ;;  %18231 = vmatprep.mubr.msk.bf16.mxu1 %vm2037_vm2, %v27421_v19  ;;  %v27430_v52 = vld [vmem:[#allocation227_spill] sm:$0xff] }
 0x751   : > { %14334 = vst.msk [vmem:[%s25071_s12 + $0x60] sm:$0xf] %vm14309_vm4, %v15996_v55  ;;  %v13132_v27 = vadd.f32 %v25048_v4, %v12929_v38  ;;  %19132 = vmatmul.mubr.msk.bf16.gmra.mrb[136].mxu0 %vm2037_vm2, %v27422_v37 }
 0x752   : > { %14332 = vst.msk [vmem:[%s25071_s12 + $0x58] sm:$0xf] %vm14309_vm4, %v15994_v60  ;;  %v13130_v2 = vadd.f32 %v25048_v4, %v12927_v24  ;;  %v12928_v40 = vmul.f32 %v19248_v11, %v25042_v42  ;;  %19135 = vmatprep.mubr.msk.bf16.mxu0 %vm2037_vm2, %v27423_v3 }
 0x753   : > { %v13328_v5 = vmax.f32 %v13132_v27, 0.0 }
 0x754   : > { %v13326_v13 = vmax.f32 %v13130_v2, 0.0  ;;  %v13131_v59 = vadd.f32 %v25048_v4, %v12928_v40  ;;  %v19029_v8 = vpop.f32.mrb[32].mxu0 }
 0x755   : > { %v15999_v7 = vpack.c.bf16 %v13328_v5, %v13328_v5  ;;  %v19249_v22 = vadd.f32 %v19029_v8, %v24735_v16  ;;  %v11956_v35 = vpop.f32.mrb[33].mxu0 }
 0x756   : > { %v15997_v58 = vpack.c.bf16 %v13326_v13, %v13326_v13  ;;  %v13327_v63 = vmax.f32 %v13131_v59, 0.0  ;;  %v19250_v56 = vadd.f32 %v11956_v35, %v27424_v29  ;;  %v19030_v31 = vpop.f32.mrb[34].mxu0  ;;  %v27431_v59 = vld [vmem:[#allocation94_spill] sm:$0xff]  ;;  %v27433_v35 = vld [vmem:[#allocation228_spill] sm:$0xff]  ;;  %v27434_v29 = vld [vmem:[#allocation229_spill] sm:$0xff] }
 0x757   : > { %14337 = vst.msk [vmem:[%s25071_s12 + $0x6c] sm:$0xf] %vm14309_vm4, %v15999_v7  ;;  %v12932_v12 = vmul.f32 %v19249_v22, %v25042_v42  ;;  %v19251_v26 = vadd.f32 %v19030_v31, %v27425_v49  ;;  %v11959_v0 = vpop.f32.mrb[35].mxu0  ;;  %18232 = vmatmul.mubr.msk.bf16.gmra.mrb[140].mxu1 %vm2037_vm2, %v27426_v15  ;;  %v27432_v22 = vld [vmem:[#allocation95_spill] sm:$0xff] }
 0x758   : > { %14335 = vst.msk [vmem:[%s25071_s12 + $0x64] sm:$0xf] %vm14309_vm4, %v15997_v58  ;;  %v15998_v16 = vpack.c.bf16 %v13327_v63, %v13327_v63  ;;  %v12930_v23 = vmul.f32 %v19250_v56, %v25042_v42  ;;  %v19252_v36 = vadd.f32 %v11959_v0, %v27427_v34  ;;  %18235 = vmatprep.mubr.msk.bf16.mxu1 %vm2037_vm2, %v27428_v20 }
 0x759   : > { %v13135_v50 = vadd.f32 %v25048_v4, %v12932_v12  ;;  %v12933_v10 = vmul.f32 %v19251_v26, %v25042_v42  ;;  %19136 = vmatmul.mubr.msk.bf16.gmra.mrb[140].mxu0 %vm2037_vm2, %v27429_v44 }
 0x75a   : > { %14336 = vst.msk [vmem:[%s25071_s12 + $0x68] sm:$0xf] %vm14309_vm4, %v15998_v16  ;;  %v13133_v45 = vadd.f32 %v25048_v4, %v12930_v23  ;;  %v12931_v1 = vmul.f32 %v19252_v36, %v25042_v42  ;;  %19139 = vmatprep.mubr.msk.bf16.mxu0 %vm2037_vm2, %v27430_v52  ;;  %v27435_v23 = vld [vmem:[#allocation81_spill] sm:$0xff]  ;;  %v27438_v52 = vld [vmem:[#allocation84_spill] sm:$0xff] }
 0x75b   : > { %v13331_v62 = vmax.f32 %v13135_v50, 0.0  ;;  %v13136_v55 = vadd.f32 %v25048_v4, %v12933_v10  ;;  %v27436_v50 = vld [vmem:[#allocation245_spill] sm:$0xff] }
 0x75c   : > { %v13329_v38 = vmax.f32 %v13133_v45, 0.0  ;;  %v13134_v39 = vadd.f32 %v25048_v4, %v12931_v1  ;;  %v19033_v32 = vpop.f32.mrb[36].mxu0  ;;  %v27437_v45 = vld [vmem:[#allocation98_spill] sm:$0xff] }
 0x75d   : > { %v16002_v60 = vpack.c.bf16 %v13331_v62, %v13331_v62  ;;  %v13332_v24 = vmax.f32 %v13136_v55, 0.0  ;;  %v19253_v11 = vadd.f32 %v19033_v32, %v24751_v47  ;;  %v11972_v19 = vpop.f32.mrb[37].mxu0  ;;  %v27439_v55 = vld [vmem:[#allocation99_spill] sm:$0xff]  ;;  %v27440_v32 = vld [vmem:[#allocation230_spill] sm:$0xff] }
 0x75e   : > { %v16000_v27 = vpack.c.bf16 %v13329_v38, %v13329_v38  ;;  %v13330_v37 = vmax.f32 %v13134_v39, 0.0  ;;  %v19254_v2 = vadd.f32 %v11972_v19, %v24755_v48  ;;  %v19034_v40 = vpop.f32.mrb[38].mxu0 }
 0x75f   : > { %14340 = vst.msk [vmem:[%s25071_s12 + $0x78] sm:$0xf] %vm14309_vm4, %v16002_v60  ;;  %v16003_v3 = vpack.c.bf16 %v13332_v24, %v13332_v24  ;;  %v12936_v5 = vmul.f32 %v19253_v11, %v25042_v42  ;;  %v11975_v13 = vpop.f32.mrb[39].mxu0  ;;  %18236 = vmatmul.mubr.msk.bf16.gmra.mrb[144].mxu1 %vm2037_vm2, %v27431_v59  ;;  %v27441_v11 = vld [vmem:[#allocation231_spill] sm:$0xff] }
 0x760   : > { %14338 = vst.msk [vmem:[%s25071_s12 + $0x70] sm:$0xf] %vm14309_vm4, %v16000_v27  ;;  %v16001_v47 = vpack.c.bf16 %v13330_v37, %v13330_v37  ;;  %v12934_v8 = vmul.f32 %v19254_v2, %v25042_v42  ;;  %v19255_v7 = vadd.f32 %v11975_v13, %v24757_v28  ;;  %18239 = vmatprep.mubr.msk.bf16.mxu1 %vm2037_vm2, %v27432_v22 }
 0x761   : > { %14341 = vst.msk [vmem:[%s25071_s12 + $0x7c] sm:$0xf] %vm14309_vm4, %v16003_v3  ;;  %v13139_v48 = vadd.f32 %v25048_v4, %v12936_v5  ;;  %19140 = vmatmul.mubr.msk.bf16.gmra.mrb[144].mxu0 %vm2037_vm2, %v27433_v35 }
 0x762   : > { %14339 = vst.msk [vmem:[%s25071_s12 + $0x74] sm:$0xf] %vm14309_vm4, %v16001_v47  ;;  %v13137_v58 = vadd.f32 %v25048_v4, %v12934_v8  ;;  %v12935_v63 = vmul.f32 %v19255_v7, %v25042_v42  ;;  %19143 = vmatprep.mubr.msk.bf16.mxu0 %vm2037_vm2, %v27434_v29 }
 0x763   : > { %v13335_v28 = vmax.f32 %v13139_v48, 0.0 }
 0x764   : > { %v13333_v56 = vmax.f32 %v13137_v58, 0.0  ;;  %v13138_v31 = vadd.f32 %v25048_v4, %v12935_v63  ;;  %v19037_v12 = vpop.f32.mrb[40].mxu0  ;;  %v27442_v63 = vld [vmem:[#allocation102_spill] sm:$0xff] }
 0x765   : > { %v16006_v49 = vpack.c.bf16 %v13335_v28, %v13335_v28  ;;  %v19256_v26 = vadd.f32 %v19037_v12, %v24765_v57  ;;  %v11987_v0 = vpop.f32.mrb[41].mxu0 }
 0x766   : > { %v16004_v15 = vpack.c.bf16 %v13333_v56, %v13333_v56  ;;  %v13334_v16 = vmax.f32 %v13138_v31, 0.0  ;;  %v19257_v34 = vadd.f32 %v11987_v0, %v27435_v23  ;;  %v19038_v36 = vpop.f32.mrb[42].mxu0  ;;  %v27443_v56 = vld [vmem:[#allocation103_spill] sm:$0xff]  ;;  %v27444_v31 = vld [vmem:[#allocation232_spill] sm:$0xff] }
 0x767   : > { %14344 = vst.msk [vmem:[%s25071_s12 + $0x88] sm:$0xf] %vm14309_vm4, %v16006_v49  ;;  %v12939_v20 = vmul.f32 %v19256_v26, %v25042_v42  ;;  %v19258_v10 = vadd.f32 %v19038_v36, %v27436_v50  ;;  %v11990_v44 = vpop.f32.mrb[43].mxu0  ;;  %18240 = vmatmul.mubr.msk.bf16.gmra.mrb[148].mxu1 %vm2037_vm2, %v27437_v45  ;;  %v27445_v26 = vld [vmem:[#allocation233_spill] sm:$0xff] }
 0x768   : > { %14342 = vst.msk [vmem:[%s25071_s12 + $0x80] sm:$0xf] %vm14309_vm4, %v16004_v15  ;;  %v16005_v57 = vpack.c.bf16 %v13334_v16, %v13334_v16  ;;  %v12937_v1 = vmul.f32 %v19257_v34, %v25042_v42  ;;  %v19259_v62 = vadd.f32 %v11990_v44, %v27438_v52  ;;  %18243 = vmatprep.mubr.msk.bf16.mxu1 %vm2037_vm2, %v27439_v55  ;;  %v27448_v55 = vld [vmem:[#allocation106_spill] sm:$0xff] }
 0x769   : > { %v13142_v38 = vadd.f32 %v25048_v4, %v12939_v20  ;;  %v12940_v39 = vmul.f32 %v19258_v10, %v25042_v42  ;;  %19144 = vmatmul.mubr.msk.bf16.gmra.mrb[148].mxu0 %vm2037_vm2, %v27440_v32  ;;  %v27446_v10 = vld [vmem:[#allocation85_spill] sm:$0xff] }
 0x76a   : > { %14343 = vst.msk [vmem:[%s25071_s12 + $0x84] sm:$0xf] %vm14309_vm4, %v16005_v57  ;;  %v13140_v60 = vadd.f32 %v25048_v4, %v12937_v1  ;;  %v12938_v24 = vmul.f32 %v19259_v62, %v25042_v42  ;;  %19147 = vmatprep.mubr.msk.bf16.mxu0 %vm2037_vm2, %v27441_v11  ;;  %v27447_v1 = vld [vmem:[#allocation248_spill] sm:$0xff] }
 0x76b   : > { %v13338_v19 = vmax.f32 %v13142_v38, 0.0  ;;  %v13143_v27 = vadd.f32 %v25048_v4, %v12940_v39  ;;  %v27449_v39 = vld [vmem:[#allocation249_spill] sm:$0xff] }
 0x76c   : > { %v13336_v37 = vmax.f32 %v13140_v60, 0.0  ;;  %v13141_v2 = vadd.f32 %v25048_v4, %v12938_v24  ;;  %v19041_v40 = vpop.f32.mrb[44].mxu0  ;;  %v27450_v60 = vld [vmem:[#allocation107_spill] sm:$0xff] }
 0x76d   : > { %v16009_v3 = vpack.c.bf16 %v13338_v19, %v13338_v19  ;;  %v13339_v5 = vmax.f32 %v13143_v27, 0.0  ;;  %v19260_v13 = vadd.f32 %v19041_v40, %v24781_v6  ;;  %v12003_v59 = vpop.f32.mrb[45].mxu0  ;;  %v27451_v19 = vld [vmem:[#allocation234_spill] sm:$0xff] }
 0x76e   : > { %v16007_v47 = vpack.c.bf16 %v13336_v37, %v13336_v37  ;;  %v13337_v8 = vmax.f32 %v13141_v2, 0.0  ;;  %v19261_v7 = vadd.f32 %v12003_v59, %v24785_v17  ;;  %v19042_v22 = vpop.f32.mrb[46].mxu0  ;;  %v27452_v2 = vld [vmem:[#allocation235_spill] sm:$0xff] }
 0x76f   : > { %14347 = vst.msk [vmem:[%s25071_s12 + $0x94] sm:$0xf] %vm14309_vm4, %v16009_v3  ;;  %v16010_v48 = vpack.c.bf16 %v13339_v5, %v13339_v5  ;;  %v12943_v35 = vmul.f32 %v19260_v13, %v25042_v42  ;;  %v12006_v58 = vpop.f32.mrb[47].mxu0  ;;  %18244 = vmatmul.mubr.msk.bf16.gmra.mrb[152].mxu1 %vm2037_vm2, %v27442_v63 }
 0x770   : > { %14345 = vst.msk [vmem:[%s25071_s12 + $0x8c] sm:$0xf] %vm14309_vm4, %v16007_v47  ;;  %v16008_v6 = vpack.c.bf16 %v13337_v8, %v13337_v8  ;;  %v12941_v29 = vmul.f32 %v19261_v7, %v25042_v42  ;;  %v19262_v28 = vadd.f32 %v12006_v58, %v24787_v9  ;;  %18247 = vmatprep.mubr.msk.bf16.mxu1 %vm2037_vm2, %v27443_v56  ;;  %v27453_v56 = vld [vmem:[#allocation110_spill] sm:$0xff] }
 0x771   : > { %14348 = vst.msk [vmem:[%s25071_s12 + $0x98] sm:$0xf] %vm14309_vm4, %v16010_v48  ;;  %v13146_v17 = vadd.f32 %v25048_v4, %v12943_v35  ;;  %19148 = vmatmul.mubr.msk.bf16.gmra.mrb[152].mxu0 %vm2037_vm2, %v27444_v31 }
 0x772   : > { %14346 = vst.msk [vmem:[%s25071_s12 + $0x90] sm:$0xf] %vm14309_vm4, %v16008_v6  ;;  %v13144_v12 = vadd.f32 %v25048_v4, %v12941_v29  ;;  %v12942_v49 = vmul.f32 %v19262_v28, %v25042_v42  ;;  %19151 = vmatprep.mubr.msk.bf16.mxu0 %vm2037_vm2, %v27445_v26 }
 0x773   : > { %v13342_v9 = vmax.f32 %v13146_v17, 0.0 }
 0x774   : > { %v13340_v0 = vmax.f32 %v13144_v12, 0.0  ;;  %v13145_v15 = vadd.f32 %v25048_v4, %v12942_v49  ;;  %v19045_v16 = vpop.f32.mrb[48].mxu0  ;;  %v27454_v12 = vld [vmem:[#allocation111_spill] sm:$0xff]  ;;  %v27455_v49 = vld [vmem:[#allocation236_spill] sm:$0xff] }
 0x775   : > { %v16013_v23 = vpack.c.bf16 %v13342_v9, %v13342_v9  ;;  %v19263_v34 = vadd.f32 %v19045_v16, %v24795_v41  ;;  %v12018_v36 = vpop.f32.mrb[49].mxu0 }
 0x776   : > { %v16011_v20 = vpack.c.bf16 %v13340_v0, %v13340_v0  ;;  %v13341_v50 = vmax.f32 %v13145_v15, 0.0  ;;  %v19264_v44 = vadd.f32 %v12018_v36, %v27446_v10  ;;  %v19046_v45 = vpop.f32.mrb[50].mxu0  ;;  %v27456_v0 = vld [vmem:[#allocation237_spill] sm:$0xff] }
 0x777   : > { %14351 = vst.msk [vmem:[%s25071_s12 + $0xa4] sm:$0xf] %vm14309_vm4, %v16013_v23  ;;  %v12946_v57 = vmul.f32 %v19263_v34, %v25042_v42  ;;  %v19265_v52 = vadd.f32 %v19046_v45, %v27447_v1  ;;  %v12021_v62 = vpop.f32.mrb[51].mxu0  ;;  %18248 = vmatmul.mubr.msk.bf16.gmra.mrb[156].mxu1 %vm2037_vm2, %v27448_v55 }
 0x778   : > { %14349 = vst.msk [vmem:[%s25071_s12 + $0x9c] sm:$0xf] %vm14309_vm4, %v16011_v20  ;;  %v16012_v41 = vpack.c.bf16 %v13341_v50, %v13341_v50  ;;  %v12944_v38 = vmul.f32 %v19264_v44, %v25042_v42  ;;  %v19266_v32 = vadd.f32 %v12021_v62, %v27449_v39  ;;  %18251 = vmatprep.mubr.msk.bf16.mxu1 %vm2037_vm2, %v27450_v60  ;;  %v27457_v44 = vld [vmem:[#allocation88_spill] sm:$0xff]  ;;  %v27461_v60 = vld [vmem:[#allocation117_spill] sm:$0xff] }
 0x779   : > { %v13149_v24 = vadd.f32 %v25048_v4, %v12946_v57  ;;  %v12947_v11 = vmul.f32 %v19265_v52, %v25042_v42  ;;  %19152 = vmatmul.mubr.msk.bf16.gmra.mrb[156].mxu0 %vm2037_vm2, %v27451_v19  ;;  %v27458_v52 = vld [vmem:[#allocation89_spill] sm:$0xff]  ;;  %v27460_v39 = vld [vmem:[#allocation252_spill] sm:$0xff]  ;;  %v27462_v19 = vld [vmem:[#allocation238_spill] sm:$0xff] }
 0x77a   : > { %14350 = vst.msk [vmem:[%s25071_s12 + $0xa0] sm:$0xf] %vm14309_vm4, %v16012_v41  ;;  %v13147_v27 = vadd.f32 %v25048_v4, %v12944_v38  ;;  %v12945_v37 = vmul.f32 %v19266_v32, %v25042_v42  ;;  %19155 = vmatprep.mubr.msk.bf16.mxu0 %vm2037_vm2, %v27452_v2  ;;  %v27459_v41 = vld [vmem:[#allocation116_spill] sm:$0xff]  ;;  %v27463_v2 = vld [vmem:[#allocation239_spill] sm:$0xff] }
 0x77b   : > { %v13345_v40 = vmax.f32 %v13149_v24, 0.0  ;;  %v13150_v3 = vadd.f32 %v25048_v4, %v12947_v11 }
 0x77c   : > { %v13343_v5 = vmax.f32 %v13147_v27, 0.0  ;;  %v13148_v13 = vadd.f32 %v25048_v4, %v12945_v37  ;;  %v19049_v59 = vpop.f32.mrb[52].mxu0 }
 0x77d   : > { %v16016_v47 = vpack.c.bf16 %v13345_v40, %v13345_v40  ;;  %v13346_v8 = vmax.f32 %v13150_v3, 0.0  ;;  %v19267_v7 = vadd.f32 %v19049_v59, %v24811_v21  ;;  %v12034_v22 = vpop.f32.mrb[53].mxu0 }
 0x77e   : > { %v16014_v48 = vpack.c.bf16 %v13343_v5, %v13343_v5  ;;  %v13344_v35 = vmax.f32 %v13148_v13, 0.0  ;;  %v19268_v58 = vadd.f32 %v12034_v22, %v24815_v25  ;;  %v19050_v63 = vpop.f32.mrb[54].mxu0 }
 0x77f   : > { %14354 = vst.msk [vmem:[%s25071_s12 + $0xb0] sm:$0xf] %vm14309_vm4, %v16016_v47  ;;  %v16017_v6 = vpack.c.bf16 %v13346_v8, %v13346_v8  ;;  %v12950_v29 = vmul.f32 %v19267_v7, %v25042_v42  ;;  %v12037_v28 = vpop.f32.mrb[55].mxu0  ;;  %18252 = vmatmul.mubr.msk.bf16.gmra.mrb[160].mxu1 %vm2037_vm2, %v27453_v56  ;;  %v27464_v56 = vld [vmem:[#allocation122_spill] sm:$0xff] }
 0x780   : > { %14352 = vst.msk [vmem:[%s25071_s12 + $0xa8] sm:$0xf] %vm14309_vm4, %v16014_v48  ;;  %v16015_v21 = vpack.c.bf16 %v13344_v35, %v13344_v35  ;;  %v12948_v17 = vmul.f32 %v19268_v58, %v25042_v42  ;;  %v19269_v31 = vadd.f32 %v12037_v28, %v24817_v33  ;;  %18255 = vmatprep.mubr.msk.bf16.mxu1 %vm2037_vm2, %v27454_v12  ;;  %v27466_v12 = vld [vmem:[#allocation240_spill] sm:$0xff] }
 0x781   : > { %14355 = vst.msk [vmem:[%s25071_s12 + $0xb4] sm:$0xf] %vm14309_vm4, %v16017_v6  ;;  %v13153_v25 = vadd.f32 %v25048_v4, %v12950_v29  ;;  %19156 = vmatmul.mubr.msk.bf16.gmra.mrb[160].mxu0 %vm2037_vm2, %v27455_v49 }
 0x782   : > { %14353 = vst.msk [vmem:[%s25071_s12 + $0xac] sm:$0xf] %vm14309_vm4, %v16015_v21  ;;  %v13151_v26 = vadd.f32 %v25048_v4, %v12948_v17  ;;  %v12949_v9 = vmul.f32 %v19269_v31, %v25042_v42  ;;  %19159 = vmatprep.mubr.msk.bf16.mxu0 %vm2037_vm2, %v27456_v0  ;;  %v27465_v31 = vld [vmem:[#allocation123_spill] sm:$0xff] }
 0x783   : > { %v13349_v33 = vmax.f32 %v13153_v25, 0.0 }
 0x784   : > { %v13347_v15 = vmax.f32 %v13151_v26, 0.0  ;;  %v13152_v16 = vadd.f32 %v25048_v4, %v12949_v9  ;;  %v19053_v23 = vpop.f32.mrb[56].mxu0  ;;  %v27467_v26 = vld [vmem:[#allocation241_spill] sm:$0xff] }
 0x785   : > { %v16020_v34 = vpack.c.bf16 %v13349_v33, %v13349_v33  ;;  %v19270_v36 = vadd.f32 %v19053_v23, %v24825_v51  ;;  %v12049_v20 = vpop.f32.mrb[57].mxu0 }
 0x786   : > { %v16018_v50 = vpack.c.bf16 %v13347_v15, %v13347_v15  ;;  %v13348_v10 = vmax.f32 %v13152_v16, 0.0  ;;  %v19271_v45 = vadd.f32 %v12049_v20, %v27457_v44  ;;  %v19054_v57 = vpop.f32.mrb[58].mxu0  ;;  %v27468_v20 = vld [vmem:[#allocation253_spill] sm:$0xff] }
 0x787   : > { %14358 = vst.msk [vmem:[%s25071_s12 + $0xc0] sm:$0xf] %vm14309_vm4, %v16020_v34  ;;  %v12953_v1 = vmul.f32 %v19270_v36, %v25042_v42  ;;  %v19272_v62 = vadd.f32 %v19054_v57, %v27458_v52  ;;  %v12052_v55 = vpop.f32.mrb[59].mxu0  ;;  %18256 = vmatmul.mubr.msk.bf16.gmra.mrb[164].mxu1 %vm2037_vm2, %v27459_v41  ;;  %v27470_v52 = vld [vmem:[#allocation128_spill] sm:$0xff] }
 0x788   : > { %14356 = vst.msk [vmem:[%s25071_s12 + $0xb8] sm:$0xf] %vm14309_vm4, %v16018_v50  ;;  %v16019_v51 = vpack.c.bf16 %v13348_v10, %v13348_v10  ;;  %v12951_v38 = vmul.f32 %v19271_v45, %v25042_v42  ;;  %v19273_v32 = vadd.f32 %v12052_v55, %v27460_v39  ;;  %18259 = vmatprep.mubr.msk.bf16.mxu1 %vm2037_vm2, %v27461_v60  ;;  %v27469_v45 = vld [vmem:[#allocation92_spill] sm:$0xff]  ;;  %v27471_v55 = vld [vmem:[#allocation93_spill] sm:$0xff] }
 0x789   : > { %v13156_v24 = vadd.f32 %v25048_v4, %v12953_v1  ;;  %v12954_v11 = vmul.f32 %v19272_v62, %v25042_v42  ;;  %19160 = vmatmul.mubr.msk.bf16.gmra.mrb[164].mxu0 %vm2037_vm2, %v27462_v19 }
 0x78a   : > { %14357 = vst.msk [vmem:[%s25071_s12 + $0xbc] sm:$0xf] %vm14309_vm4, %v16019_v51  ;;  %v13154_v27 = vadd.f32 %v25048_v4, %v12951_v38  ;;  %v12952_v37 = vmul.f32 %v19273_v32, %v25042_v42  ;;  %19163 = vmatprep.mubr.msk.bf16.mxu0 %vm2037_vm2, %v27463_v2  ;;  %v27472_v51 = vld [vmem:[#allocation129_spill] sm:$0xff]  ;;  %v27473_v32 = vld [vmem:[#allocation242_spill] sm:$0xff] }
 0x78b   : > { %v13352_v40 = vmax.f32 %v13156_v24, 0.0  ;;  %v13157_v3 = vadd.f32 %v25048_v4, %v12954_v11  ;;  %v27474_v11 = vld [vmem:[#allocation243_spill] sm:$0xff] }
 0x78c   : > { %v13350_v5 = vmax.f32 %v13154_v27, 0.0  ;;  %v13155_v13 = vadd.f32 %v25048_v4, %v12952_v37  ;;  %v19057_v59 = vpop.f32.mrb[60].mxu0 }
 0x78d   : > { %v16023_v47 = vpack.c.bf16 %v13352_v40, %v13352_v40  ;;  %v13353_v8 = vmax.f32 %v13157_v3, 0.0  ;;  %v19274_v7 = vadd.f32 %v19057_v59, %v24841_v14  ;;  %v12065_v22 = vpop.f32.mrb[61].mxu0 }
 0x78e   : > { %v16021_v48 = vpack.c.bf16 %v13350_v5, %v13350_v5  ;;  %v13351_v35 = vmax.f32 %v13155_v13, 0.0  ;;  %v19275_v58 = vadd.f32 %v12065_v22, %v24845_v54  ;;  %v19058_v63 = vpop.f32.mrb[62].mxu0 }
 0x78f   : > { %14361 = vst.msk [vmem:[%s25071_s12 + $0xcc] sm:$0xf] %vm14309_vm4, %v16023_v47  ;;  %v16024_v6 = vpack.c.bf16 %v13353_v8, %v13353_v8  ;;  %v12957_v29 = vmul.f32 %v19274_v7, %v25042_v42  ;;  %v12068_v28 = vpop.f32.mrb[63].mxu0  ;;  %18260 = vmatmul.mubr.msk.bf16.gmra.mrb[168].mxu1 %vm2037_vm2, %v27464_v56  ;;  %v27475_v63 = vld [vmem:[#allocation134_spill] sm:$0xff]  ;;  %v27477_v56 = vld [vmem:[#allocation135_spill] sm:$0xff] }
 0x790   : > { %14359 = vst.msk [vmem:[%s25071_s12 + $0xc4] sm:$0xf] %vm14309_vm4, %v16021_v48  ;;  %v16022_v14 = vpack.c.bf16 %v13351_v35, %v13351_v35  ;;  %v12955_v21 = vmul.f32 %v19275_v58, %v25042_v42  ;;  %v19276_v17 = vadd.f32 %v12068_v28, %v24847_v30  ;;  %18263 = vmatprep.mubr.msk.bf16.mxu1 %vm2037_vm2, %v27465_v31  ;;  %v27479_v31 = vld [vmem:[#allocation138_spill] sm:$0xff] }
 0x791   : > { %14362 = vst.msk [vmem:[%s25071_s12 + $0xd0] sm:$0xf] %vm14309_vm4, %v16024_v6  ;;  %v13160_v54 = vadd.f32 %v25048_v4, %v12957_v29  ;;  %19164 = vmatmul.mubr.msk.bf16.gmra.mrb[168].mxu0 %vm2037_vm2, %v27466_v12  ;;  %v27476_v29 = vld [vmem:[#allocation96_spill] sm:$0xff] }
 0x792   : > { %14360 = vst.msk [vmem:[%s25071_s12 + $0xc8] sm:$0xf] %vm14309_vm4, %v16022_v14  ;;  %v13158_v25 = vadd.f32 %v25048_v4, %v12955_v21  ;;  %v12956_v49 = vmul.f32 %v19276_v17, %v25042_v42  ;;  %19167 = vmatprep.mubr.msk.bf16.mxu0 %vm2037_vm2, %v27467_v26  ;;  %v27478_v14 = vld [vmem:[#allocation114_spill] sm:$0xff] }
 0x793   : > { %v13356_v30 = vmax.f32 %v13160_v54, 0.0 }
 0x794   : > { %v13354_v9 = vmax.f32 %v13158_v25, 0.0  ;;  %v13159_v0 = vadd.f32 %v25048_v4, %v12956_v49  ;;  %v19061_v33 = vpop.f32.mrb[64].mxu0  ;;  %v25514_v25 = vld [vmem:[%s26215_s4] ss:$0 sm:$0xff] }
 0x795   : > { %v16027_v15 = vpack.c.bf16 %v13356_v30, %v13356_v30  ;;  %v19277_v16 = vadd.f32 %v19061_v33, %v24855_v43  ;;  %v12080_v23 = vpop.f32.mrb[65].mxu0 }
 0x796   : > { %v16025_v34 = vpack.c.bf16 %v13354_v9, %v13354_v9  ;;  %v13355_v36 = vmax.f32 %v13159_v0, 0.0  ;;  %v19278_v50 = vadd.f32 %v12080_v23, %v27468_v20  ;;  %v19062_v10 = vpop.f32.mrb[66].mxu0 }
 0x797   : > { %14365 = vst.msk [vmem:[%s25071_s12 + $0xdc] sm:$0xf] %vm14309_vm4, %v16027_v15  ;;  %v12960_v44 = vmul.f32 %v19277_v16, %v25042_v42  ;;  %v19279_v57 = vadd.f32 %v19062_v10, %v27469_v45  ;;  %v12083_v1 = vpop.f32.mrb[67].mxu0  ;;  %18264 = vmatmul.mubr.msk.bf16.gmra.mrb[172].mxu1 %vm2037_vm2, %v27470_v52  ;;  %v27484_v52 = vld [vmem:[#allocation139_spill] sm:$0xff] }
 0x798   : > { %14363 = vst.msk [vmem:[%s25071_s12 + $0xd4] sm:$0xf] %vm14309_vm4, %v16025_v34  ;;  %v16026_v43 = vpack.c.bf16 %v13355_v36, %v13355_v36  ;;  %v12958_v62 = vmul.f32 %v19278_v50, %v25042_v42  ;;  %v19280_v41 = vadd.f32 %v12083_v1, %v27471_v55  ;;  %18267 = vmatprep.mubr.msk.bf16.mxu1 %vm2037_vm2, %v27472_v51  ;;  %v27480_v34 = vld [vmem:[#allocation97_spill] sm:$0xff]  ;;  %v27481_v50 = vld [vmem:[#allocation142_spill] sm:$0xff]  ;;  %v27485_v55 = vld [vmem:[#allocation115_spill] sm:$0xff] }
 0x799   : > { %v13163_v38 = vadd.f32 %v25048_v4, %v12960_v44  ;;  %v12961_v39 = vmul.f32 %v19279_v57, %v25042_v42  ;;  %19168 = vmatmul.mubr.msk.bf16.gmra.mrb[172].mxu0 %vm2037_vm2, %v27473_v32  ;;  %v27482_v44 = vld [vmem:[#allocation100_spill] sm:$0xff]  ;;  %v27483_v57 = vld [vmem:[#allocation143_spill] sm:$0xff] }
 0x79a   : > { %14364 = vst.msk [vmem:[%s25071_s12 + $0xd8] sm:$0xf] %vm14309_vm4, %v16026_v43  ;;  %v13161_v60 = vadd.f32 %v25048_v4, %v12958_v62  ;;  %v12959_v24 = vmul.f32 %v19280_v41, %v25042_v42  ;;  %19171 = vmatprep.mubr.msk.bf16.mxu0 %vm2037_vm2, %v27474_v11  ;;  %v27486_v11 = vld [vmem:[#allocation101_spill] sm:$0xff] }
 0x79b   : > { %v13359_v19 = vmax.f32 %v13163_v38, 0.0  ;;  %v13164_v27 = vadd.f32 %v25048_v4, %v12961_v39 }
 0x79c   : > { %v13357_v37 = vmax.f32 %v13161_v60, 0.0  ;;  %v13162_v2 = vadd.f32 %v25048_v4, %v12959_v24  ;;  %v19065_v40 = vpop.f32.mrb[68].mxu0 }
 0x79d   : > { %v16030_v3 = vpack.c.bf16 %v13359_v19, %v13359_v19  ;;  %v13360_v5 = vmax.f32 %v13164_v27, 0.0  ;;  %v19281_v13 = vadd.f32 %v19065_v40, %v24871_v18  ;;  %v12096_v59 = vpop.f32.mrb[69].mxu0  ;;  %v27487_v40 = vld [vmem:[#allocation104_spill] sm:$0xff] }
 0x79e   : > { %v16028_v47 = vpack.c.bf16 %v13357_v37, %v13357_v37  ;;  %v13358_v8 = vmax.f32 %v13162_v2, 0.0  ;;  %v19282_v7 = vadd.f32 %v12096_v59, %v24875_v53  ;;  %v19066_v22 = vpop.f32.mrb[70].mxu0 }
 0x79f   : > { %14368 = vst.msk [vmem:[%s25071_s12 + $0xe8] sm:$0xf] %vm14309_vm4, %v16030_v3  ;;  %v16031_v48 = vpack.c.bf16 %v13360_v5, %v13360_v5  ;;  %v12964_v35 = vmul.f32 %v19281_v13, %v25042_v42  ;;  %v12099_v58 = vpop.f32.mrb[71].mxu0  ;;  %18268 = vmatmul.mubr.msk.bf16.gmra.mrb[176].mxu1 %vm2037_vm2, %v27475_v63 }
 0x7a0   : > { %14366 = vst.msk [vmem:[%s25071_s12 + $0xe0] sm:$0xf] %vm14309_vm4, %v16028_v47  ;;  %v16029_v18 = vpack.c.bf16 %v13358_v8, %v13358_v8  ;;  %v12962_v6 = vmul.f32 %v19282_v7, %v25042_v42  ;;  %v19283_v28 = vadd.f32 %v12099_v58, %v27476_v29  ;;  %18271 = vmatprep.mubr.msk.bf16.mxu1 %vm2037_vm2, %v27477_v56  ;;  %v25506_v42 = vld [vmem:[%s26214_s3] ss:$0 sm:$0xff]  ;;  %v27490_v58 = vld [vmem:[#allocation151_spill] sm:$0xff] }
 0x7a1   : > { %14369 = vst.msk [vmem:[%s25071_s12 + $0xec] sm:$0xf] %vm14309_vm4, %v16031_v48  ;;  %v13167_v53 = vadd.f32 %v25048_v4, %v12964_v35  ;;  %19172 = vmatmul.mubr.msk.bf16.gmra.mrb[176].mxu0 %vm2037_vm2, %v27478_v14  ;;  %v27488_v8 = vld [vmem:[#allocation150_spill] sm:$0xff]  ;;  %v27489_v48 = vld [vmem:[#allocation105_spill] sm:$0xff] }
 0x7a2   : > { %14367 = vst.msk [vmem:[%s25071_s12 + $0xe4] sm:$0xf] %vm14309_vm4, %v16029_v18  ;;  %v13165_v21 = vadd.f32 %v25048_v4, %v12962_v6  ;;  %v12963_v17 = vmul.f32 %v25506_v42, %v19283_v28  ;;  %19175 = vmatprep.mubr.msk.bf16.mxu0 %vm2037_vm2, %v27479_v31  ;;  %v27491_v18 = vld [vmem:[#allocation120_spill] sm:$0xff]  ;;  %v27492_v28 = vld [vmem:[#allocation146_spill] sm:$0xff] }
 0x7a3   : > { %v13363_v54 = vmax.f32 %v13167_v53, 0.0  ;;  %v27493_v31 = vld [vmem:[#allocation108_spill] sm:$0xff] }
 0x7a4   : > { %v13361_v12 = vmax.f32 %v13165_v21, 0.0  ;;  %v13166_v4 = vadd.f32 %v25514_v25, %v12963_v17  ;;  %v19069_v49 = vpop.f32.mrb[72].mxu0 }
 0x7a5   : > { %v16034_v26 = vpack.c.bf16 %v13363_v54, %v13363_v54  ;;  %v19284_v30 = vadd.f32 %v19069_v49, %v24885_v46  ;;  %v12111_v9 = vpop.f32.mrb[73].mxu0 }
 0x7a6   : > { %v16032_v0 = vpack.c.bf16 %v13361_v12, %v13361_v12  ;;  %v13362_v33 = vmax.f32 %v13166_v4, 0.0  ;;  %v19285_v15 = vadd.f32 %v12111_v9, %v24889_v61  ;;  %v19070_v16 = vpop.f32.mrb[74].mxu0 }
 0x7a7   : > { %14372 = vst.msk [vmem:[%s25071_s12 + $0xf8] sm:$0xf] %vm14309_vm4, %v16034_v26  ;;  %v12967_v23 = vmul.f32 %v25506_v42, %v19284_v30  ;;  %v19286_v36 = vadd.f32 %v19070_v16, %v27480_v34  ;;  %v12114_v20 = vpop.f32.mrb[75].mxu0  ;;  %18272 = vmatmul.mubr.msk.bf16.gmra.mrb[180].mxu1 %vm2037_vm2, %v27481_v50  ;;  %v27494_v26 = vld [vmem:[#allocation109_spill] sm:$0xff] }
 0x7a8   : > { %14370 = vst.msk [vmem:[%s25071_s12 + $0xf0] sm:$0xf] %vm14309_vm4, %v16032_v0  ;;  %v16033_v46 = vpack.c.bf16 %v13362_v33, %v13362_v33  ;;  %v12965_v10 = vmul.f32 %v25506_v42, %v19285_v15  ;;  %v19287_v45 = vadd.f32 %v12114_v20, %v27482_v44  ;;  %18275 = vmatprep.mubr.msk.bf16.mxu1 %vm2037_vm2, %v27483_v57  ;;  %v27495_v33 = vld [vmem:[#allocation112_spill] sm:$0xff]  ;;  %v27497_v20 = vld [vmem:[#allocation113_spill] sm:$0xff] }
 0x7a9   : > { %v13170_v61 = vadd.f32 %v25514_v25, %v12967_v23  ;;  %v12968_v1 = vmul.f32 %v25506_v42, %v19286_v36  ;;  %19176 = vmatmul.mubr.msk.bf16.gmra.mrb[180].mxu0 %vm2037_vm2, %v27484_v52  ;;  %v27496_v23 = vld [vmem:[#allocation158_spill] sm:$0xff] }
 0x7aa   : > { %14371 = vst.msk [vmem:[%s25071_s12 + $0xf4] sm:$0xf] %vm14309_vm4, %v16033_v46  ;;  %v13168_v43 = vadd.f32 %v25514_v25, %v12965_v10  ;;  %v12966_v62 = vmul.f32 %v25506_v42, %v19287_v45  ;;  %19179 = vmatprep.mubr.msk.bf16.mxu0 %vm2037_vm2, %v27485_v55  ;;  %v27498_v46 = vld [vmem:[#allocation159_spill] sm:$0xff] }
 0x7ab   : > { %v13366_v41 = vmax.f32 %v13170_v61, 0.0  ;;  %v13171_v51 = vadd.f32 %v25514_v25, %v12968_v1  ;;  %v27499_v45 = vld [vmem:[#allocation147_spill] sm:$0xff]  ;;  %v27500_v1 = vld [vmem:[#allocation121_spill] sm:$0xff] }
 0x7ac   : > { %v13364_v38 = vmax.f32 %v13168_v43, 0.0  ;;  %v13169_v39 = vadd.f32 %v25514_v25, %v12966_v62  ;;  %v19073_v32 = vpop.f32.mrb[76].mxu0 }
 0x7ad   : > { %v16037_v60 = vpack.c.bf16 %v13366_v41, %v13366_v41  ;;  %v13367_v24 = vmax.f32 %v13171_v51, 0.0  ;;  %v19288_v19 = vadd.f32 %v19073_v32, %v27486_v11  ;;  %v12127_v27 = vpop.f32.mrb[77].mxu0 }
 0x7ae   : > { %v16035_v37 = vpack.c.bf16 %v13364_v38, %v13364_v38  ;;  %v13365_v2 = vmax.f32 %v13169_v39, 0.0  ;;  %v19289_v3 = vadd.f32 %v12127_v27, %v27487_v40  ;;  %v19074_v5 = vpop.f32.mrb[78].mxu0  ;;  %v27501_v39 = vld [vmem:[#allocation118_spill] sm:$0xff] }
 0x7af   : > { %14375 = vst.msk [vmem:[%s25071_s12 + $0x104] sm:$0xf] %vm14309_vm4, %v16037_v60  ;;  %v16038_v13 = vpack.c.bf16 %v13367_v24, %v13367_v24  ;;  %v12971_v59 = vmul.f32 %v25506_v42, %v19288_v19  ;;  %v12130_v47 = vpop.f32.mrb[79].mxu0  ;;  %18276 = vmatmul.mubr.msk.bf16.gmra.mrb[184].mxu1 %vm2037_vm2, %v27488_v8  ;;  %v27502_v19 = vld [vmem:[#allocation119_spill] sm:$0xff]  ;;  %v27503_v5 = vld [vmem:[#allocation166_spill] sm:$0xff] }
 0x7b0   : > { %14373 = vst.msk [vmem:[%s25071_s12 + $0xfc] sm:$0xf] %vm14309_vm4, %v16035_v37  ;;  %v16036_v7 = vpack.c.bf16 %v13365_v2, %v13365_v2  ;;  %v12969_v22 = vmul.f32 %v25506_v42, %v19289_v3  ;;  %v19290_v35 = vadd.f32 %v12130_v47, %v27489_v48  ;;  %18279 = vmatprep.mubr.msk.bf16.mxu1 %vm2037_vm2, %v27490_v58  ;;  %v27504_v47 = vld [vmem:[#allocation124_spill] sm:$0xff]  ;;  %v27506_v48 = vld [vmem:[#allocation126_spill] sm:$0xff] }
 0x7b1   : > { %14376 = vst.msk [vmem:[%s25071_s12 + $0x108] sm:$0xf] %vm14309_vm4, %v16038_v13  ;;  %v13174_v63 = vadd.f32 %v25514_v25, %v12971_v59  ;;  %19180 = vmatmul.mubr.msk.bf16.gmra.mrb[184].mxu0 %vm2037_vm2, %v27491_v18 }
 0x7b2   : > { %14374 = vst.msk [vmem:[%s25071_s12 + $0x100] sm:$0xf] %vm14309_vm4, %v16036_v7  ;;  %v13172_v6 = vadd.f32 %v25514_v25, %v12969_v22  ;;  %v12970_v29 = vmul.f32 %v25506_v42, %v19290_v35  ;;  %19183 = vmatprep.mubr.msk.bf16.mxu0 %vm2037_vm2, %v27492_v28  ;;  %v27505_v7 = vld [vmem:[#allocation167_spill] sm:$0xff] }
 0x7b3   : > { %v13370_v56 = vmax.f32 %v13174_v63, 0.0  ;;  %v27507_v63 = vld [vmem:[#allocation154_spill] sm:$0xff] }
 0x7b4   : > { %v13368_v53 = vmax.f32 %v13172_v6, 0.0  ;;  %v13173_v14 = vadd.f32 %v25514_v25, %v12970_v29  ;;  %v19077_v21 = vpop.f32.mrb[80].mxu0 }
 0x7b5   : > { %v16041_v17 = vpack.c.bf16 %v13370_v56, %v13370_v56  ;;  %v19291_v54 = vadd.f32 %v19077_v21, %v27493_v31  ;;  %v12142_v12 = vpop.f32.mrb[81].mxu0 }
 0x7b6   : > { %v16039_v4 = vpack.c.bf16 %v13368_v53, %v13368_v53  ;;  %v13369_v49 = vmax.f32 %v13173_v14, 0.0  ;;  %v19292_v30 = vadd.f32 %v12142_v12, %v27494_v26  ;;  %v19078_v9 = vpop.f32.mrb[82].mxu0  ;;  %v27508_v53 = vld [vmem:[#allocation125_spill] sm:$0xff]  ;;  %v27510_v26 = vld [vmem:[#allocation131_spill] sm:$0xff] }
 0x7b7   : > { %14379 = vst.msk [vmem:[%s25071_s12 + $0x114] sm:$0xf] %vm14309_vm4, %v16041_v17  ;;  %v12974_v0 = vmul.f32 %v25506_v42, %v19291_v54  ;;  %v19293_v15 = vadd.f32 %v19078_v9, %v27495_v33  ;;  %v12145_v16 = vpop.f32.mrb[83].mxu0  ;;  %18280 = vmatmul.mubr.msk.bf16.gmra.mrb[188].mxu1 %vm2037_vm2, %v27496_v23  ;;  %v27509_v54 = vld [vmem:[#allocation130_spill] sm:$0xff] }
 0x7b8   : > { %14377 = vst.msk [vmem:[%s25071_s12 + $0x10c] sm:$0xf] %vm14309_vm4, %v16039_v4  ;;  %v16040_v34 = vpack.c.bf16 %v13369_v49, %v13369_v49  ;;  %v12972_v36 = vmul.f32 %v25506_v42, %v19292_v30  ;;  %v19294_v50 = vadd.f32 %v12145_v16, %v27497_v20  ;;  %18283 = vmatprep.mubr.msk.bf16.mxu1 %vm2037_vm2, %v27498_v46  ;;  %v27512_v16 = vld [vmem:[#allocation136_spill] sm:$0xff] }
 0x7b9   : > { %v13177_v10 = vadd.f32 %v25514_v25, %v12974_v0  ;;  %v12975_v44 = vmul.f32 %v25506_v42, %v19293_v15  ;;  %19184 = vmatmul.mubr.msk.bf16.gmra.mrb[188].mxu0 %vm2037_vm2, %v27499_v45  ;;  %v27511_v0 = vld [vmem:[#allocation174_spill] sm:$0xff] }
 0x7ba   : > { %14378 = vst.msk [vmem:[%s25071_s12 + $0x110] sm:$0xf] %vm14309_vm4, %v16040_v34  ;;  %v13175_v57 = vadd.f32 %v25514_v25, %v12972_v36  ;;  %v12973_v61 = vmul.f32 %v25506_v42, %v19294_v50  ;;  %19187 = vmatprep.mubr.msk.bf16.mxu0 %vm2037_vm2, %v27500_v1  ;;  %v27513_v34 = vld [vmem:[#allocation175_spill] sm:$0xff] }
 0x7bb   : > { %v13373_v52 = vmax.f32 %v13177_v10, 0.0  ;;  %v13178_v43 = vadd.f32 %v25514_v25, %v12975_v44  ;;  %v27514_v50 = vld [vmem:[#allocation155_spill] sm:$0xff] }
 0x7bc   : > { %v13371_v62 = vmax.f32 %v13175_v57, 0.0  ;;  %v13176_v55 = vadd.f32 %v25514_v25, %v12973_v61  ;;  %v19081_v41 = vpop.f32.mrb[84].mxu0  ;;  %v27515_v44 = vld [vmem:[#allocation127_spill] sm:$0xff] }
 0x7bd   : > { %v16044_v51 = vpack.c.bf16 %v13373_v52, %v13373_v52  ;;  %v13374_v38 = vmax.f32 %v13178_v43, 0.0  ;;  %v19295_v32 = vadd.f32 %v19081_v41, %v27501_v39  ;;  %v12158_v60 = vpop.f32.mrb[85].mxu0 }
 0x7be   : > { %v16042_v24 = vpack.c.bf16 %v13371_v62, %v13371_v62  ;;  %v13372_v11 = vmax.f32 %v13176_v55, 0.0  ;;  %v19296_v27 = vadd.f32 %v12158_v60, %v27502_v19  ;;  %v19082_v37 = vpop.f32.mrb[86].mxu0  ;;  %v27516_v55 = vld [vmem:[#allocation137_spill] sm:$0xff] }
 0x7bf   : > { %14382 = vst.msk [vmem:[%s25071_s12 + $0x120] sm:$0xf] %vm14309_vm4, %v16044_v51  ;;  %v16045_v2 = vpack.c.bf16 %v13374_v38, %v13374_v38  ;;  %v12978_v40 = vmul.f32 %v25506_v42, %v19295_v32  ;;  %v12161_v3 = vpop.f32.mrb[87].mxu0  ;;  %18284 = vmatmul.mubr.msk.bf16.gmra.mrb[192].mxu1 %vm2037_vm2, %v27503_v5  ;;  %v27517_v32 = vld [vmem:[#allocation144_spill] sm:$0xff]  ;;  %v27518_v37 = vld [vmem:[#allocation182_spill] sm:$0xff] }
 0x7c0   : > { %14380 = vst.msk [vmem:[%s25071_s12 + $0x118] sm:$0xf] %vm14309_vm4, %v16042_v24  ;;  %v16043_v13 = vpack.c.bf16 %v13372_v11, %v13372_v11  ;;  %v12976_v59 = vmul.f32 %v25506_v42, %v19296_v27  ;;  %v19297_v8 = vadd.f32 %v12161_v3, %v27504_v47  ;;  %18287 = vmatprep.mubr.msk.bf16.mxu1 %vm2037_vm2, %v27505_v7  ;;  %v27519_v3 = vld [vmem:[#allocation145_spill] sm:$0xff]  ;;  %v27521_v47 = vld [vmem:[#allocation163_spill] sm:$0xff] }
 0x7c1   : > { %14383 = vst.msk [vmem:[%s25071_s12 + $0x124] sm:$0xf] %vm14309_vm4, %v16045_v2  ;;  %v13181_v22 = vadd.f32 %v25514_v25, %v12978_v40  ;;  %19188 = vmatmul.mubr.msk.bf16.gmra.mrb[192].mxu0 %vm2037_vm2, %v27506_v48 }
 0x7c2   : > { %14381 = vst.msk [vmem:[%s25071_s12 + $0x11c] sm:$0xf] %vm14309_vm4, %v16043_v13  ;;  %v13179_v35 = vadd.f32 %v25514_v25, %v12976_v59  ;;  %v12977_v58 = vmul.f32 %v25506_v42, %v19297_v8  ;;  %19191 = vmatprep.mubr.msk.bf16.mxu0 %vm2037_vm2, %v27507_v63  ;;  %v27520_v13 = vld [vmem:[#allocation183_spill] sm:$0xff] }
 0x7c3   : > { %v13377_v18 = vmax.f32 %v13181_v22, 0.0  ;;  %v27522_v22 = vld [vmem:[#allocation133_spill] sm:$0xff] }
 0x7c4   : > { %v13375_v6 = vmax.f32 %v13179_v35, 0.0  ;;  %v13180_v29 = vadd.f32 %v25514_v25, %v12977_v58  ;;  %v19085_v28 = vpop.f32.mrb[88].mxu0 }
 0x7c5   : > { %v16048_v56 = vpack.c.bf16 %v13377_v18, %v13377_v18  ;;  %v19298_v14 = vadd.f32 %v19085_v28, %v27508_v53  ;;  %v12173_v21 = vpop.f32.mrb[89].mxu0 }
 0x7c6   : > { %v16046_v17 = vpack.c.bf16 %v13375_v6, %v13375_v6  ;;  %v13376_v31 = vmax.f32 %v13180_v29, 0.0  ;;  %v19299_v12 = vadd.f32 %v12173_v21, %v27509_v54  ;;  %v19086_v4 = vpop.f32.mrb[90].mxu0  ;;  %v27523_v6 = vld [vmem:[#allocation152_spill] sm:$0xff] }
 0x7c7   : > { %14386 = vst.msk [vmem:[%s25071_s12 + $0x130] sm:$0xf] %vm14309_vm4, %v16048_v56  ;;  %v12981_v49 = vmul.f32 %v25506_v42, %v19298_v14  ;;  %v19300_v30 = vadd.f32 %v19086_v4, %v27510_v26  ;;  %v12176_v9 = vpop.f32.mrb[91].mxu0  ;;  %18288 = vmatmul.mubr.msk.bf16.gmra.mrb[196].mxu1 %vm2037_vm2, %v27511_v0  ;;  %v27524_v14 = vld [vmem:[#allocation153_spill] sm:$0xff]  ;;  %v27525_v54 = vld [vmem:[#allocation140_spill] sm:$0xff] }
 0x7c8   : > { %14384 = vst.msk [vmem:[%s25071_s12 + $0x128] sm:$0xf] %vm14309_vm4, %v16046_v17  ;;  %v16047_v33 = vpack.c.bf16 %v13376_v31, %v13376_v31  ;;  %v12979_v15 = vmul.f32 %v25506_v42, %v19299_v12  ;;  %v19301_v23 = vadd.f32 %v12176_v9, %v27512_v16  ;;  %18291 = vmatprep.mubr.msk.bf16.mxu1 %vm2037_vm2, %v27513_v34  ;;  %v27527_v9 = vld [vmem:[#allocation171_spill] sm:$0xff] }
 0x7c9   : > { %v13184_v36 = vadd.f32 %v25514_v25, %v12981_v49  ;;  %v12982_v20 = vmul.f32 %v25506_v42, %v19300_v30  ;;  %19192 = vmatmul.mubr.msk.bf16.gmra.mrb[196].mxu0 %vm2037_vm2, %v27514_v50  ;;  %v27526_v49 = vld [vmem:[#allocation189_spill] sm:$0xff] }
 0x7ca   : > { %14385 = vst.msk [vmem:[%s25071_s12 + $0x12c] sm:$0xf] %vm14309_vm4, %v16047_v33  ;;  %v13182_v46 = vadd.f32 %v25514_v25, %v12979_v15  ;;  %v12980_v10 = vmul.f32 %v25506_v42, %v19301_v23  ;;  %19195 = vmatprep.mubr.msk.bf16.mxu0 %vm2037_vm2, %v27515_v44  ;;  %v27528_v33 = vld [vmem:[#allocation190_spill] sm:$0xff] }
 0x7cb   : > { %v13380_v45 = vmax.f32 %v13184_v36, 0.0  ;;  %v13185_v57 = vadd.f32 %v25514_v25, %v12982_v20  ;;  %v27529_v23 = vld [vmem:[#allocation170_spill] sm:$0xff]  ;;  %v27530_v20 = vld [vmem:[#allocation141_spill] sm:$0xff] }
 0x7cc   : > { %v13378_v61 = vmax.f32 %v13182_v46, 0.0  ;;  %v13183_v1 = vadd.f32 %v25514_v25, %v12980_v10  ;;  %v19089_v52 = vpop.f32.mrb[92].mxu0 }
 0x7cd   : > { %v16051_v43 = vpack.c.bf16 %v13380_v45, %v13380_v45  ;;  %v13381_v62 = vmax.f32 %v13185_v57, 0.0  ;;  %v19302_v41 = vadd.f32 %v19089_v52, %v27516_v55  ;;  %v12189_v51 = vpop.f32.mrb[93].mxu0 }
 0x7ce   : > { %v16049_v38 = vpack.c.bf16 %v13378_v61, %v13378_v61  ;;  %v13379_v39 = vmax.f32 %v13183_v1, 0.0  ;;  %v19303_v60 = vadd.f32 %v12189_v51, %v27517_v32  ;;  %v19090_v24 = vpop.f32.mrb[94].mxu0  ;;  %v27531_v1 = vld [vmem:[#allocation179_spill] sm:$0xff] }
 0x7cf   : > { %14389 = vst.msk [vmem:[%s25071_s12 + $0x13c] sm:$0xf] %vm14309_vm4, %v16051_v43  ;;  %v16052_v11 = vpack.c.bf16 %v13381_v62, %v13381_v62  ;;  %v12985_v19 = vmul.f32 %v25506_v42, %v19302_v41  ;;  %v12192_v27 = vpop.f32.mrb[95].mxu0  ;;  %18292 = vmatmul.mubr.msk.bf16.gmra.mrb[200].mxu1 %vm2037_vm2, %v27518_v37  ;;  %v27532_v41 = vld [vmem:[#allocation148_spill] sm:$0xff]  ;;  %v27533_v24 = vld [vmem:[#allocation194_spill] sm:$0xff] }
 0x7d0   : > { %14387 = vst.msk [vmem:[%s25071_s12 + $0x134] sm:$0xf] %vm14309_vm4, %v16049_v38  ;;  %v16050_v2 = vpack.c.bf16 %v13379_v39, %v13379_v39  ;;  %v12983_v40 = vmul.f32 %v25506_v42, %v19303_v60  ;;  %v19304_v5 = vadd.f32 %v12192_v27, %v27519_v3  ;;  %18295 = vmatprep.mubr.msk.bf16.mxu1 %vm2037_vm2, %v27520_v13  ;;  %v27534_v27 = vld [vmem:[#allocation3_spill] sm:$0xff]  ;;  %v27536_v3 = vld [vmem:[#allocation149_spill] sm:$0xff] }
 0x7d1   : > { %14390 = vst.msk [vmem:[%s25071_s12 + $0x140] sm:$0xf] %vm14309_vm4, %v16052_v11  ;;  %v13188_v59 = vadd.f32 %v25514_v25, %v12985_v19  ;;  %19196 = vmatmul.mubr.msk.bf16.gmra.mrb[200].mxu0 %vm2037_vm2, %v27521_v47  ;;  %v27538_v47 = vld [vmem:[#allocation64_spill] sm:$0xff] }
 0x7d2   : > { %14388 = vst.msk [vmem:[%s25071_s12 + $0x138] sm:$0xf] %vm14309_vm4, %v16050_v2  ;;  %v13186_v8 = vadd.f32 %v25514_v25, %v12983_v40  ;;  %v12984_v7 = vmul.f32 %v25506_v42, %v19304_v5  ;;  %19199 = vmatprep.mubr.msk.bf16.mxu0 %vm2037_vm2, %v27522_v22  ;;  %v27535_v2 = vld [vmem:[#allocation195_spill] sm:$0xff] }
 0x7d3   : > { %v13384_v48 = vmax.f32 %v13188_v59, 0.0  ;;  %v27537_v59 = vld [vmem:[#allocation186_spill] sm:$0xff]  ;;  %v21370_v22 = vld [vmem:[%s22281_s16 + $0x28] sm:$0xff]  }
 0x7d4   : > { %v13382_v35 = vmax.f32 %v13186_v8, 0.0  ;;  %v13187_v58 = vadd.f32 %v25514_v25, %v12984_v7  ;;  %v19093_v63 = vpop.f32.mrb[96].mxu0  ;;  %v11770_v8 = vrot.slane %v27538_v47, 1 }
 0x7d5   : > { %v16055_v18 = vpack.c.bf16 %v13384_v48, %v13384_v48  ;;  %v19305_v29 = vadd.f32 %v19093_v63, %v27523_v6  ;;  %v12204_v28 = vpop.f32.mrb[97].mxu0  ;;  %v11772_v48 = vrot.slane %v21370_v22, 1  ;;  %v27539_v6 = vld [vmem:[#allocation4_spill] sm:$0xff] }
 0x7d6   : > { %v16053_v56 = vpack.c.bf16 %v13382_v35, %v13382_v35  ;;  %v13383_v53 = vmax.f32 %v13187_v58, 0.0  ;;  %v19306_v21 = vadd.f32 %v12204_v28, %v27524_v14  ;;  %v19094_v17 = vpop.f32.mrb[98].mxu0  ;;  %v27540_v14 = vld [vmem:[#allocation5_spill] sm:$0xff]  ;;  %v27551_v22 = vld [vmem:[#allocation72_spill] sm:$0xff] }
 0x7d7   : > { %14393 = vst.msk [vmem:[%s25071_s12 + $0x14c] sm:$0xf] %vm14309_vm4, %v16055_v18  ;;  %v12988_v31 = vmul.f32 %v25506_v42, %v19305_v29  ;;  %v19307_v12 = vadd.f32 %v19094_v17, %v27525_v54  ;;  %v12207_v4 = vpop.f32.mrb[99].mxu0  ;;  %18296 = vmatmul.mubr.msk.bf16.gmra.mrb[204].mxu1 %vm2037_vm2, %v27526_v49 }
 0x7d8   : > { %14391 = vst.msk [vmem:[%s25071_s12 + $0x144] sm:$0xf] %vm14309_vm4, %v16053_v56  ;;  %v16054_v26 = vpack.c.bf16 %v13383_v53, %v13383_v53  ;;  %v12986_v30 = vmul.f32 %v25506_v42, %v19306_v21  ;;  %v19308_v0 = vadd.f32 %v12207_v4, %v27527_v9  ;;  %18299 = vmatprep.mubr.msk.bf16.mxu1 %vm2037_vm2, %v27528_v33  ;;  %v27542_v4 = vld [vmem:[#allocation6_spill] sm:$0xff] }
 0x7d9   : > { %v13191_v15 = vadd.f32 %v25514_v25, %v12988_v31  ;;  %v12989_v16 = vmul.f32 %v25506_v42, %v19307_v12  ;;  %19200 = vmatmul.mubr.msk.bf16.gmra.mrb[204].mxu0 %vm2037_vm2, %v27529_v23  ;;  %v27541_v31 = vld [vmem:[#allocation178_spill] sm:$0xff]  ;;  %v11773_v9 = vsel %vm4409_vm3, %v11770_v8, %v11772_v48  ;;  %v27545_v23 = vld [vmem:[#allocation68_spill] sm:$0xff] }
 0x7da   : > { %14392 = vst.msk [vmem:[%s25071_s12 + $0x148] sm:$0xf] %vm14309_vm4, %v16054_v26  ;;  %v13189_v34 = vadd.f32 %v25514_v25, %v12986_v30  ;;  %v12987_v36 = vmul.f32 %v25506_v42, %v19308_v0  ;;  %19203 = vmatprep.mubr.msk.bf16.mxu0 %vm2037_vm2, %v27530_v20  ;;  %v11771_v54 = vsel %vm4409_vm3, %v27541_v31, %v11770_v8  ;;  %v27543_v30 = vld [vmem:[#allocation65_spill] sm:$0xff]  ;;  %v27550_v8 = vld [vmem:[#allocation10_spill] sm:$0xff] }
 0x7db   : > { %v13387_v50 = vmax.f32 %v13191_v15, 0.0  ;;  %v13192_v46 = vadd.f32 %v25514_v25, %v12989_v16  ;;  %v27544_v15 = vld [vmem:[#allocation7_spill] sm:$0xff]  ;;  %v27552_v31 = vld [vmem:[#allocation73_spill] sm:$0xff] }
 0x7dc   : > { %v13385_v10 = vmax.f32 %v13189_v34, 0.0  ;;  %v13190_v44 = vadd.f32 %v25514_v25, %v12987_v36  ;;  %v19097_v45 = vpop.f32.mrb[100].mxu0 }
 0x7dd   : > { %v16058_v57 = vpack.c.bf16 %v13387_v50, %v13387_v50  ;;  %v13388_v61 = vmax.f32 %v13192_v46, 0.0  ;;  %v19309_v52 = vadd.f32 %v19097_v45, %v27531_v1  ;;  %v12220_v43 = vpop.f32.mrb[101].mxu0  ;;  %v21371_v46 = vld [vmem:[%s22281_s16 + $0x30] sm:$0xff]  }
 0x7de   : > { %v16056_v62 = vpack.c.bf16 %v13385_v10, %v13385_v10  ;;  %v13386_v55 = vmax.f32 %v13190_v44, 0.0  ;;  %v19310_v51 = vadd.f32 %v12220_v43, %v27532_v41  ;;  %v19098_v38 = vpop.f32.mrb[102].mxu0  ;;  %v11774_v10 = vrot.slane %v21371_v46, 1 }
 0x7df   : > { %14396 = vst.msk [vmem:[%s25071_s12 + $0x158] sm:$0xf] %vm14309_vm4, %v16058_v57  ;;  %v16059_v39 = vpack.c.bf16 %v13388_v61, %v13388_v61  ;;  %v12992_v32 = vmul.f32 %v25506_v42, %v19309_v52  ;;  %v12223_v60 = vpop.f32.mrb[103].mxu0  ;;  %18300 = vmatmul.mubr.msk.bf16.gmra.mrb[208].mxu1 %vm2037_vm2, %v27533_v24  ;;  %v21372_v57 = vld [vmem:[%s22281_s16 + $0x38] sm:$0xff]   ;;  %v27547_v38 = vld [vmem:[#allocation8_spill] sm:$0xff] }
 0x7e0   : > { %14394 = vst.msk [vmem:[%s25071_s12 + $0x150] sm:$0xf] %vm14309_vm4, %v16056_v62  ;;  %v16057_v11 = vpack.c.bf16 %v13386_v55, %v13386_v55  ;;  %v12990_v19 = vmul.f32 %v25506_v42, %v19310_v51  ;;  %v19311_v37 = vadd.f32 %v12223_v60, %v27534_v27  ;;  %18303 = vmatprep.mubr.msk.bf16.mxu1 %vm2037_vm2, %v27535_v2  ;;  %v11776_v61 = vrot.slane %v21372_v57, 1  ;;  %v27546_v62 = vld [vmem:[#allocation156_spill] sm:$0xff] }
 0x7e1   : > { %14397 = vst.msk [vmem:[%s25071_s12 + $0x15c] sm:$0xf] %vm14309_vm4, %v16059_v39  ;;  %v13195_v40 = vadd.f32 %v25514_v25, %v12992_v32  ;;  %19204 = vmatmul.mubr.msk.bf16.gmra.mrb[208].mxu0 %vm2037_vm2, %v27536_v3  ;;  %v7237_v55 = vshll.u32 %v27546_v62, 16 }
 0x7e2   : > { %14395 = vst.msk [vmem:[%s25071_s12 + $0x154] sm:$0xf] %vm14309_vm4, %v16057_v11  ;;  %v13193_v5 = vadd.f32 %v25514_v25, %v12990_v19  ;;  %v12991_v13 = vmul.f32 %v25506_v42, %v19311_v37  ;;  %19207 = vmatprep.mubr.msk.bf16.mxu0 %vm2037_vm2, %v27537_v59  ;;  %v27548_v11 = vld [vmem:[#allocation9_spill] sm:$0xff]  ;;  %v11775_v37 = vsel %vm4409_vm3, %v11772_v48, %v11774_v10 }
 0x7e3   : > { %v13391_v7 = vmax.f32 %v13195_v40, 0.0  ;;  %v7239_v48 = vrot.slane %v7237_v55, 1 }
 0x7e4   : > { %v13389_v35 = vmax.f32 %v13193_v5, 0.0  ;;  %v13194_v58 = vadd.f32 %v25514_v25, %v12991_v13  ;;  %v19101_v63 = vpop.f32.mrb[104].mxu0  ;;  %v27549_v5 = vld [vmem:[#allocation69_spill] sm:$0xff]  ;;  %v11777_v13 = vsel %vm4409_vm3, %v11774_v10, %v11776_v61 }
 0x7e5   : > { %v16062_v18 = vpack.c.bf16 %v13391_v7, %v13391_v7  ;;  %v19312_v29 = vadd.f32 %v19101_v63, %v27539_v6  ;;  %v12235_v28 = vpop.f32.mrb[105].mxu0  ;;  %v21373_v6 = vld [vmem:[%s22281_s16 + $0x40] ss:$0 sps:$4 sm:$0xff]  }
 0x7e6   : > { %v16060_v56 = vpack.c.bf16 %v13389_v35, %v13389_v35  ;;  %v13390_v53 = vmax.f32 %v13194_v58, 0.0  ;;  %v19313_v21 = vadd.f32 %v12235_v28, %v27540_v14  ;;  %v19102_v17 = vpop.f32.mrb[106].mxu0 }
 0x7e7   : > { %14400 = vst.msk [vmem:[%s25071_s12 + $0x168] sm:$0xf] %vm14309_vm4, %v16062_v18  ;;  %v12995_v12 = vmul.f32 %v25506_v42, %v19312_v29  ;;  %v19314_v49 = vadd.f32 %v19102_v17, %v27542_v4  ;;  %v12238_v26 = vpop.f32.mrb[107].mxu0  ;;  %18304 = vmatmul.mubr.msk.bf16.gmra.mrb[212].mxu1 %vm2037_vm2, %v27543_v30  ;;  %v11778_v29 = vrot.slane %v21373_v6, 1 }
 0x7e8   : > { %14398 = vst.msk [vmem:[%s25071_s12 + $0x160] sm:$0xf] %vm14309_vm4, %v16060_v56  ;;  %v16061_v0 = vpack.c.bf16 %v13390_v53, %v13390_v53  ;;  %v12993_v33 = vmul.f32 %v25506_v42, %v19313_v21  ;;  %v19315_v16 = vadd.f32 %v12238_v26, %v27544_v15  ;;  %18307 = vmatprep.mubr.msk.bf16.mxu1 %vm2037_vm2, %v27545_v23 }
 0x7e9   : > { %v13198_v34 = vadd.f32 %v25514_v25, %v12995_v12  ;;  %v12996_v36 = vmul.f32 %v25506_v42, %v19314_v49  ;;  %19208 = vmatmul.mubr.msk.bf16.gmra.mrb[212].mxu0 %vm2037_vm2, %v11771_v54  ;;  %v7240_v54 = vsel %vm1136_vm1, %v27552_v31, %v7239_v48  ;;  %v11779_v15 = vsel %vm4409_vm3, %v11776_v61, %v11778_v29 }
 0x7ea   : > { %14399 = vst.msk [vmem:[%s25071_s12 + $0x164] sm:$0xf] %vm14309_vm4, %v16061_v0  ;;  %v13196_v20 = vadd.f32 %v25514_v25, %v12993_v33  ;;  %v12994_v50 = vmul.f32 %v25506_v42, %v19315_v16  ;;  %19211 = vmatprep.mubr.msk.bf16.mxu0 %vm2037_vm2, %v11773_v9 }
 0x7eb   : > { %v13394_v44 = vmax.f32 %v13198_v34, 0.0  ;;  %v13199_v45 = vadd.f32 %v25514_v25, %v12996_v36 }
 0x7ec   : > { %v13392_v1 = vmax.f32 %v13196_v20, 0.0  ;;  %v13197_v52 = vadd.f32 %v25514_v25, %v12994_v50  ;;  %v19105_v43 = vpop.f32.mrb[108].mxu0 }
 0x7ed   : > { %v16065_v41 = vpack.c.bf16 %v13394_v44, %v13394_v44  ;;  %v13395_v51 = vmax.f32 %v13199_v45, 0.0  ;;  %v19316_v39 = vadd.f32 %v19105_v43, %v27547_v38  ;;  %v12251_v32 = vpop.f32.mrb[109].mxu0 }
 0x7ee   : > { %v16063_v60 = vpack.c.bf16 %v13392_v1, %v13392_v1  ;;  %v13393_v24 = vmax.f32 %v13197_v52, 0.0  ;;  %v19317_v19 = vadd.f32 %v12251_v32, %v27548_v11  ;;  %v19106_v27 = vpop.f32.mrb[110].mxu0 }
 0x7ef   : > { %14403 = vst.msk [vmem:[%s25071_s12 + $0x174] sm:$0xf] %vm14309_vm4, %v16065_v41  ;;  %v16066_v2 = vpack.c.bf16 %v13395_v51, %v13395_v51  ;;  %v12999_v40 = vmul.f32 %v25506_v42, %v19316_v39  ;;  %v12254_v3 = vpop.f32.mrb[111].mxu0  ;;  %18308 = vmatmul.mubr.msk.bf16.gmra.mrb[216].mxu1 %vm2037_vm2, %v27549_v5 }
 0x7f0   : > { %14401 = vst.msk [vmem:[%s25071_s12 + $0x16c] sm:$0xf] %vm14309_vm4, %v16063_v60  ;;  %v16064_v59 = vpack.c.bf16 %v13393_v24, %v13393_v24  ;;  %v12997_v47 = vmul.f32 %v25506_v42, %v19317_v19  ;;  %v19318_v7 = vadd.f32 %v12254_v3, %v27550_v8  ;;  %18311 = vmatprep.mubr.msk.bf16.mxu1 %vm2037_vm2, %v27551_v22 }
 0x7f1   : > { %14404 = vst.msk [vmem:[%s25071_s12 + $0x178] sm:$0xf] %vm14309_vm4, %v16066_v2  ;;  %v13202_v35 = vadd.f32 %v25514_v25, %v12999_v40  ;;  %19212 = vmatmul.mubr.msk.bf16.gmra.mrb[216].mxu0 %vm2037_vm2, %v11775_v37 }
 0x7f2   : > { %14402 = vst.msk [vmem:[%s25071_s12 + $0x170] sm:$0xf] %vm14309_vm4, %v16064_v59  ;;  %v13200_v58 = vadd.f32 %v25514_v25, %v12997_v47  ;;  %v12998_v63 = vmul.f32 %v25506_v42, %v19318_v7  ;;  %v18205_v18 = vpop.f32.mrb[112].mxu1  ;;  %19215 = vmatprep.mubr.msk.bf16.mxu0 %vm2037_vm2, %v11777_v13 }
 0x7f3   : > { %v13398_v28 = vmax.f32 %v13202_v35, 0.0  ;;  %v7727_v56 = vpop.f32.mrb[113].mxu1 }
 0x7f4   : > { %v13396_v53 = vmax.f32 %v13200_v58, 0.0  ;;  %v13201_v14 = vadd.f32 %v25514_v25, %v12998_v63  ;;  %v19109_v21 = vpop.f32.mrb[112].mxu0  ;;  %v18206_v17 = vpop.f32.mrb[114].mxu1 }
 0x7f5   : > { %v16069_v12 = vpack.c.bf16 %v13398_v28, %v13398_v28  ;;  %v19319_v4 = vadd.f32 %v19109_v21, %v18205_v18  ;;  %v12266_v49 = vpop.f32.mrb[113].mxu0  ;;  %v7730_v26 = vpop.f32.mrb[115].mxu1 }
 0x7f6   : > { %v16067_v30 = vpack.c.bf16 %v13396_v53, %v13396_v53  ;;  %v13397_v9 = vmax.f32 %v13201_v14, 0.0  ;;  %v19320_v0 = vadd.f32 %v12266_v49, %v7727_v56  ;;  %v19110_v33 = vpop.f32.mrb[114].mxu0 }
 0x7f7   : > { %14407 = vst.msk [vmem:[%s25071_s12 + $0x184] sm:$0xf] %vm14309_vm4, %v16069_v12  ;;  %v13002_v16 = vmul.f32 %v25506_v42, %v19319_v4  ;;  %v19321_v23 = vadd.f32 %v19110_v33, %v18206_v17  ;;  %v12269_v34 = vpop.f32.mrb[115].mxu0  ;;  %18312 = vmatmul.mubr.msk.bf16.gmra.mrb[220].mxu1 %vm2037_vm2, %v7240_v54 }
 0x7f8   : > { %14405 = vst.msk [vmem:[%s25071_s12 + $0x17c] sm:$0xf] %vm14309_vm4, %v16067_v30  ;;  %v16068_v36 = vpack.c.bf16 %v13397_v9, %v13397_v9  ;;  %v13000_v20 = vmul.f32 %v25506_v42, %v19320_v0  ;;  %v19322_v50 = vadd.f32 %v12269_v34, %v7730_v26 }
 0x7f9   : > { %v13205_v46 = vadd.f32 %v25514_v25, %v13002_v16  ;;  %v13003_v10 = vmul.f32 %v25506_v42, %v19321_v23  ;;  %19216 = vmatmul.mubr.msk.bf16.gmra.mrb[220].mxu0 %vm2037_vm2, %v11779_v15 }
 0x7fa   : > { %14406 = vst.msk [vmem:[%s25071_s12 + $0x180] sm:$0xf] %vm14309_vm4, %v16068_v36  ;;  %v13203_v44 = vadd.f32 %v25514_v25, %v13000_v20  ;;  %v13001_v45 = vmul.f32 %v25506_v42, %v19322_v50  ;;  %v18209_v57 = vpop.f32.mrb[116].mxu1 }
 0x7fb   : > { %v13401_v61 = vmax.f32 %v13205_v46, 0.0  ;;  %v13206_v1 = vadd.f32 %v25514_v25, %v13003_v10  ;;  %v7743_v52 = vpop.f32.mrb[117].mxu1 }
 0x7fc   : > { %v13399_v43 = vmax.f32 %v13203_v44, 0.0  ;;  %v13204_v62 = vadd.f32 %v25514_v25, %v13001_v45  ;;  %v19113_v55 = vpop.f32.mrb[116].mxu0  ;;  %v18210_v41 = vpop.f32.mrb[118].mxu1 }
 0x7fd   : > { %v16072_v51 = vpack.c.bf16 %v13401_v61, %v13401_v61  ;;  %v13402_v38 = vmax.f32 %v13206_v1, 0.0  ;;  %v19323_v39 = vadd.f32 %v19113_v55, %v18209_v57  ;;  %v12282_v32 = vpop.f32.mrb[117].mxu0  ;;  %v7746_v60 = vpop.f32.mrb[119].mxu1 }
 0x7fe   : > { %v16070_v24 = vpack.c.bf16 %v13399_v43, %v13399_v43  ;;  %v13400_v11 = vmax.f32 %v13204_v62, 0.0  ;;  %v19324_v19 = vadd.f32 %v12282_v32, %v7743_v52  ;;  %v19114_v27 = vpop.f32.mrb[118].mxu0 }
 0x7ff   : > { %14410 = vst.msk [vmem:[%s25071_s12 + $0x190] sm:$0xf] %vm14309_vm4, %v16072_v51  ;;  %v16073_v37 = vpack.c.bf16 %v13402_v38, %v13402_v38  ;;  %v13006_v2 = vmul.f32 %v25506_v42, %v19323_v39  ;;  %v12285_v40 = vpop.f32.mrb[119].mxu0 }
 0x800   : > { %14408 = vst.msk [vmem:[%s25071_s12 + $0x188] sm:$0xf] %vm14309_vm4, %v16070_v24  ;;  %v16071_v3 = vpack.c.bf16 %v13400_v11, %v13400_v11  ;;  %v13004_v5 = vmul.f32 %v25506_v42, %v19324_v19  ;;  %v19325_v13 = vadd.f32 %v12285_v40, %v7746_v60 }
 0x801   : > { %14411 = vst.msk [vmem:[%s25071_s12 + $0x194] sm:$0xf] %vm14309_vm4, %v16073_v37  ;;  %v13209_v59 = vadd.f32 %v25514_v25, %v13006_v2 }
 0x802   : > { %14409 = vst.msk [vmem:[%s25071_s12 + $0x18c] sm:$0xf] %vm14309_vm4, %v16071_v3  ;;  %v13207_v47 = vadd.f32 %v25514_v25, %v13004_v5  ;;  %v13005_v8 = vmul.f32 %v25506_v42, %v19325_v13  ;;  %v18213_v7 = vpop.f32.mrb[120].mxu1 }
 0x803   : > { %v13405_v22 = vmax.f32 %v13209_v59, 0.0  ;;  %v7758_v48 = vpop.f32.mrb[121].mxu1 }
 0x804   : > { %v13403_v35 = vmax.f32 %v13207_v47, 0.0  ;;  %v13208_v58 = vadd.f32 %v25514_v25, %v13005_v8  ;;  %v19117_v63 = vpop.f32.mrb[120].mxu0  ;;  %v18214_v18 = vpop.f32.mrb[122].mxu1 }
 0x805   : > { %v16076_v6 = vpack.c.bf16 %v13405_v22, %v13405_v22  ;;  %v19326_v29 = vadd.f32 %v19117_v63, %v18213_v7  ;;  %v12297_v28 = vpop.f32.mrb[121].mxu0  ;;  %v7761_v56 = vpop.f32.mrb[123].mxu1 }
 0x806   : > { %v16074_v53 = vpack.c.bf16 %v13403_v35, %v13403_v35  ;;  %v13404_v14 = vmax.f32 %v13208_v58, 0.0  ;;  %v19327_v21 = vadd.f32 %v12297_v28, %v7758_v48  ;;  %v19118_v17 = vpop.f32.mrb[122].mxu0 }
 0x807   : > { %14414 = vst.msk [vmem:[%s25071_s12 + $0x1a0] sm:$0xf] %vm14309_vm4, %v16076_v6  ;;  %v13009_v31 = vmul.f32 %v25506_v42, %v19326_v29  ;;  %v19328_v54 = vadd.f32 %v19118_v17, %v18214_v18  ;;  %v12300_v12 = vpop.f32.mrb[123].mxu0 }
 0x808   : > { %14412 = vst.msk [vmem:[%s25071_s12 + $0x198] sm:$0xf] %vm14309_vm4, %v16074_v53  ;;  %v16075_v4 = vpack.c.bf16 %v13404_v14, %v13404_v14  ;;  %v13007_v49 = vmul.f32 %v25506_v42, %v19327_v21  ;;  %v19329_v26 = vadd.f32 %v12300_v12, %v7761_v56 }
 0x809   : > { %v13212_v30 = vadd.f32 %v25514_v25, %v13009_v31  ;;  %v13010_v9 = vmul.f32 %v25506_v42, %v19328_v54 }
 0x80a   : > { %14413 = vst.msk [vmem:[%s25071_s12 + $0x19c] sm:$0xf] %vm14309_vm4, %v16075_v4  ;;  %v13210_v0 = vadd.f32 %v25514_v25, %v13007_v49  ;;  %v13008_v33 = vmul.f32 %v25506_v42, %v19329_v26  ;;  %v18217_v15 = vpop.f32.mrb[124].mxu1 }
 0x80b   : > { %v13408_v16 = vmax.f32 %v13212_v30, 0.0  ;;  %v13213_v23 = vadd.f32 %v25514_v25, %v13010_v9  ;;  %v7774_v34 = vpop.f32.mrb[125].mxu1 }
 0x80c   : > { %v13406_v36 = vmax.f32 %v13210_v0, 0.0  ;;  %v13211_v20 = vadd.f32 %v25514_v25, %v13008_v33  ;;  %v19121_v50 = vpop.f32.mrb[124].mxu0  ;;  %v18218_v46 = vpop.f32.mrb[126].mxu1 }
 0x80d   : > { %v16079_v10 = vpack.c.bf16 %v13408_v16, %v13408_v16  ;;  %v13409_v44 = vmax.f32 %v13213_v23, 0.0  ;;  %v19330_v45 = vadd.f32 %v19121_v50, %v18217_v15  ;;  %v12313_v57 = vpop.f32.mrb[125].mxu0  ;;  %v7777_v61 = vpop.f32.mrb[127].mxu1 }
 0x80e   : > { %v16077_v1 = vpack.c.bf16 %v13406_v36, %v13406_v36  ;;  %v13407_v52 = vmax.f32 %v13211_v20, 0.0  ;;  %v19331_v43 = vadd.f32 %v12313_v57, %v7774_v34  ;;  %v19122_v62 = vpop.f32.mrb[126].mxu0 }
 0x80f   : > { %14417 = vst.msk [vmem:[%s25071_s12 + $0x1ac] sm:$0xf] %vm14309_vm4, %v16079_v10  ;;  %v16080_v55 = vpack.c.bf16 %v13409_v44, %v13409_v44  ;;  %v13013_v41 = vmul.f32 %v25506_v42, %v19330_v45  ;;  %v12316_v51 = vpop.f32.mrb[127].mxu0 }
 0x810   : > { %14415 = vst.msk [vmem:[%s25071_s12 + $0x1a4] sm:$0xf] %vm14309_vm4, %v16077_v1  ;;  %v16078_v38 = vpack.c.bf16 %v13407_v52, %v13407_v52  ;;  %v13011_v39 = vmul.f32 %v25506_v42, %v19331_v43  ;;  %v19332_v32 = vadd.f32 %v12316_v51, %v7777_v61 }
 0x811   : > { %14418 = vst.msk [vmem:[%s25071_s12 + $0x1b0] sm:$0xf] %vm14309_vm4, %v16080_v55  ;;  %v13216_v60 = vadd.f32 %v25514_v25, %v13013_v41 }
 0x812   : > { %14416 = vst.msk [vmem:[%s25071_s12 + $0x1a8] sm:$0xf] %vm14309_vm4, %v16078_v38  ;;  %v13214_v24 = vadd.f32 %v25514_v25, %v13011_v39  ;;  %v13012_v11 = vmul.f32 %v25506_v42, %v19332_v32  ;;  %v18221_v19 = vpop.f32.mrb[128].mxu1 }
 0x813   : > { %v13412_v27 = vmax.f32 %v13216_v60, 0.0  ;;  %v7789_v37 = vpop.f32.mrb[129].mxu1 }
 0x814   : > { %v13410_v2 = vmax.f32 %v13214_v24, 0.0  ;;  %v13215_v40 = vadd.f32 %v25514_v25, %v13012_v11  ;;  %v19125_v3 = vpop.f32.mrb[128].mxu0  ;;  %v18222_v5 = vpop.f32.mrb[130].mxu1 }
 0x815   : > { %v16083_v13 = vpack.c.bf16 %v13412_v27, %v13412_v27  ;;  %v19333_v59 = vadd.f32 %v19125_v3, %v18221_v19  ;;  %v12328_v47 = vpop.f32.mrb[129].mxu0  ;;  %v7792_v8 = vpop.f32.mrb[131].mxu1 }
 0x816   : > { %v16081_v7 = vpack.c.bf16 %v13410_v2, %v13410_v2  ;;  %v13411_v22 = vmax.f32 %v13215_v40, 0.0  ;;  %v19334_v48 = vadd.f32 %v12328_v47, %v7789_v37  ;;  %v19126_v35 = vpop.f32.mrb[130].mxu0 }
 0x817   : > { %14421 = vst.msk [vmem:[%s25071_s12 + $0x1bc] sm:$0xf] %vm14309_vm4, %v16083_v13  ;;  %v13016_v58 = vmul.f32 %v25506_v42, %v19333_v59  ;;  %v19335_v63 = vadd.f32 %v19126_v35, %v18222_v5  ;;  %v12331_v18 = vpop.f32.mrb[131].mxu0 }
 0x818   : > { %14419 = vst.msk [vmem:[%s25071_s12 + $0x1b4] sm:$0xf] %vm14309_vm4, %v16081_v7  ;;  %v16082_v6 = vpack.c.bf16 %v13411_v22, %v13411_v22  ;;  %v13014_v29 = vmul.f32 %v25506_v42, %v19334_v48  ;;  %v19336_v28 = vadd.f32 %v12331_v18, %v7792_v8 }
 0x819   : > { %v13219_v56 = vadd.f32 %v25514_v25, %v13016_v58  ;;  %v13017_v53 = vmul.f32 %v25506_v42, %v19335_v63 }
 0x81a   : > { %14420 = vst.msk [vmem:[%s25071_s12 + $0x1b8] sm:$0xf] %vm14309_vm4, %v16082_v6  ;;  %v13217_v14 = vadd.f32 %v25514_v25, %v13014_v29  ;;  %v13015_v21 = vmul.f32 %v25506_v42, %v19336_v28  ;;  %v18225_v17 = vpop.f32.mrb[132].mxu1 }
 0x81b   : > { %v13415_v31 = vmax.f32 %v13219_v56, 0.0  ;;  %v13220_v54 = vadd.f32 %v25514_v25, %v13017_v53  ;;  %v7805_v12 = vpop.f32.mrb[133].mxu1 }
 0x81c   : > { %v13413_v4 = vmax.f32 %v13217_v14, 0.0  ;;  %v13218_v49 = vadd.f32 %v25514_v25, %v13015_v21  ;;  %v19129_v26 = vpop.f32.mrb[132].mxu0  ;;  %v18226_v30 = vpop.f32.mrb[134].mxu1 }
 0x81d   : > { %v16086_v9 = vpack.c.bf16 %v13415_v31, %v13415_v31  ;;  %v13416_v0 = vmax.f32 %v13220_v54, 0.0  ;;  %v19337_v33 = vadd.f32 %v19129_v26, %v18225_v17  ;;  %v12344_v15 = vpop.f32.mrb[133].mxu0  ;;  %v7808_v16 = vpop.f32.mrb[135].mxu1 }
 0x81e   : > { %v16084_v23 = vpack.c.bf16 %v13413_v4, %v13413_v4  ;;  %v13414_v34 = vmax.f32 %v13218_v49, 0.0  ;;  %v19338_v36 = vadd.f32 %v12344_v15, %v7805_v12  ;;  %v19130_v20 = vpop.f32.mrb[134].mxu0  ;;  %v25898_v15 = vld [vmem:[%s26215_s4] ss:$0 sm:$0xff] }
 0x81f   : > { %14424 = vst.msk [vmem:[%s25071_s12 + $0x1c8] sm:$0xf] %vm14309_vm4, %v16086_v9  ;;  %v16087_v50 = vpack.c.bf16 %v13416_v0, %v13416_v0  ;;  %v13020_v46 = vmul.f32 %v25506_v42, %v19337_v33  ;;  %v12347_v10 = vpop.f32.mrb[135].mxu0 }
 0x820   : > { %14422 = vst.msk [vmem:[%s25071_s12 + $0x1c0] sm:$0xf] %vm14309_vm4, %v16084_v23  ;;  %v16085_v44 = vpack.c.bf16 %v13414_v34, %v13414_v34  ;;  %v13018_v45 = vmul.f32 %v25506_v42, %v19338_v36  ;;  %v19339_v57 = vadd.f32 %v12347_v10, %v7808_v16 }
 0x821   : > { %14425 = vst.msk [vmem:[%s25071_s12 + $0x1cc] sm:$0xf] %vm14309_vm4, %v16087_v50  ;;  %v13223_v61 = vadd.f32 %v25514_v25, %v13020_v46 }
 0x822   : > { %14423 = vst.msk [vmem:[%s25071_s12 + $0x1c4] sm:$0xf] %vm14309_vm4, %v16085_v44  ;;  %v13221_v1 = vadd.f32 %v25514_v25, %v13018_v45  ;;  %v13019_v52 = vmul.f32 %v25506_v42, %v19339_v57  ;;  %v18229_v43 = vpop.f32.mrb[136].mxu1 }
 0x823   : > { %v13419_v62 = vmax.f32 %v13223_v61, 0.0  ;;  %v7820_v55 = vpop.f32.mrb[137].mxu1 }
 0x824   : > { %v13417_v41 = vmax.f32 %v13221_v1, 0.0  ;;  %v13222_v51 = vadd.f32 %v25514_v25, %v13019_v52  ;;  %v19133_v38 = vpop.f32.mrb[136].mxu0  ;;  %v18230_v39 = vpop.f32.mrb[138].mxu1 }
 0x825   : > { %v16090_v32 = vpack.c.bf16 %v13419_v62, %v13419_v62  ;;  %v19340_v60 = vadd.f32 %v19133_v38, %v18229_v43  ;;  %v12359_v24 = vpop.f32.mrb[137].mxu0  ;;  %v7823_v11 = vpop.f32.mrb[139].mxu1 }
 0x826   : > { %v16088_v19 = vpack.c.bf16 %v13417_v41, %v13417_v41  ;;  %v13418_v27 = vmax.f32 %v13222_v51, 0.0  ;;  %v19341_v37 = vadd.f32 %v12359_v24, %v7820_v55  ;;  %v19134_v2 = vpop.f32.mrb[138].mxu0 }
 0x827   : > { %14428 = vst.msk [vmem:[%s25071_s12 + $0x1d8] sm:$0xf] %vm14309_vm4, %v16090_v32  ;;  %v13023_v40 = vmul.f32 %v25506_v42, %v19340_v60  ;;  %v19342_v3 = vadd.f32 %v19134_v2, %v18230_v39  ;;  %v12362_v5 = vpop.f32.mrb[139].mxu0 }
 0x828   : > { %14426 = vst.msk [vmem:[%s25071_s12 + $0x1d0] sm:$0xf] %vm14309_vm4, %v16088_v19  ;;  %v16089_v13 = vpack.c.bf16 %v13418_v27, %v13418_v27  ;;  %v13021_v59 = vmul.f32 %v25506_v42, %v19341_v37  ;;  %v19343_v47 = vadd.f32 %v12362_v5, %v7823_v11 }
 0x829   : > { %v13226_v8 = vadd.f32 %v25514_v25, %v13023_v40  ;;  %v13024_v7 = vmul.f32 %v25506_v42, %v19342_v3 }
 0x82a   : > { %14427 = vst.msk [vmem:[%s25071_s12 + $0x1d4] sm:$0xf] %vm14309_vm4, %v16089_v13  ;;  %v13224_v22 = vadd.f32 %v25514_v25, %v13021_v59  ;;  %v13022_v48 = vmul.f32 %v25506_v42, %v19343_v47  ;;  %v18233_v35 = vpop.f32.mrb[140].mxu1 }
 0x82b   : > { %v13422_v58 = vmax.f32 %v13226_v8, 0.0  ;;  %v13227_v63 = vadd.f32 %v25514_v25, %v13024_v7  ;;  %v7836_v18 = vpop.f32.mrb[141].mxu1 }
 0x82c   : > { %v13420_v6 = vmax.f32 %v13224_v22, 0.0  ;;  %v13225_v29 = vadd.f32 %v25514_v25, %v13022_v48  ;;  %v19137_v28 = vpop.f32.mrb[140].mxu0  ;;  %v18234_v56 = vpop.f32.mrb[142].mxu1  ;;  %v25887_v25 = vld [vmem:[%s26214_s3] ss:$0 sm:$0xff] }
 0x82d   : > { %v16093_v53 = vpack.c.bf16 %v13422_v58, %v13422_v58  ;;  %v13423_v14 = vmax.f32 %v13227_v63, 0.0  ;;  %v19344_v21 = vadd.f32 %v19137_v28, %v18233_v35  ;;  %v12375_v17 = vpop.f32.mrb[141].mxu0  ;;  %v7839_v31 = vpop.f32.mrb[143].mxu1 }
 0x82e   : > { %v16091_v54 = vpack.c.bf16 %v13420_v6, %v13420_v6  ;;  %v13421_v42 = vmax.f32 %v13225_v29, 0.0  ;;  %v19345_v12 = vadd.f32 %v12375_v17, %v7836_v18  ;;  %v19138_v4 = vpop.f32.mrb[142].mxu0 }
 0x82f   : > { %14431 = vst.msk [vmem:[%s25071_s12 + $0x1e4] sm:$0xf] %vm14309_vm4, %v16093_v53  ;;  %v16094_v49 = vpack.c.bf16 %v13423_v14, %v13423_v14  ;;  %v13027_v26 = vmul.f32 %v25887_v25, %v19344_v21  ;;  %v12378_v30 = vpop.f32.mrb[143].mxu0 }
 0x830   : > { %14429 = vst.msk [vmem:[%s25071_s12 + $0x1dc] sm:$0xf] %vm14309_vm4, %v16091_v54  ;;  %v16092_v9 = vpack.c.bf16 %v13421_v42, %v13421_v42  ;;  %v13025_v0 = vmul.f32 %v25887_v25, %v19345_v12  ;;  %v19346_v33 = vadd.f32 %v12378_v30, %v7839_v31 }
 0x831   : > { %14432 = vst.msk [vmem:[%s25071_s12 + $0x1e8] sm:$0xf] %vm14309_vm4, %v16094_v49  ;;  %v13230_v16 = vadd.f32 %v25898_v15, %v13027_v26 }
 0x832   : > { %14430 = vst.msk [vmem:[%s25071_s12 + $0x1e0] sm:$0xf] %vm14309_vm4, %v16092_v9  ;;  %v13228_v23 = vadd.f32 %v25898_v15, %v13025_v0  ;;  %v13026_v34 = vmul.f32 %v25887_v25, %v19346_v33  ;;  %v18237_v36 = vpop.f32.mrb[144].mxu1 }
 0x833   : > { %v13426_v20 = vmax.f32 %v13230_v16, 0.0  ;;  %v7851_v50 = vpop.f32.mrb[145].mxu1 }
 0x834   : > { %v13424_v46 = vmax.f32 %v13228_v23, 0.0  ;;  %v13229_v10 = vadd.f32 %v25898_v15, %v13026_v34  ;;  %v19141_v44 = vpop.f32.mrb[144].mxu0  ;;  %v18238_v45 = vpop.f32.mrb[146].mxu1 }
 0x835   : > { %v16097_v57 = vpack.c.bf16 %v13426_v20, %v13426_v20  ;;  %v19347_v61 = vadd.f32 %v19141_v44, %v18237_v36  ;;  %v12390_v1 = vpop.f32.mrb[145].mxu0  ;;  %v7854_v52 = vpop.f32.mrb[147].mxu1 }
 0x836   : > { %v16095_v43 = vpack.c.bf16 %v13424_v46, %v13424_v46  ;;  %v13425_v62 = vmax.f32 %v13229_v10, 0.0  ;;  %v19348_v55 = vadd.f32 %v12390_v1, %v7851_v50  ;;  %v19142_v41 = vpop.f32.mrb[146].mxu0 }
 0x837   : > { %14435 = vst.msk [vmem:[%s25071_s12 + $0x1f4] sm:$0xf] %vm14309_vm4, %v16097_v57  ;;  %v13030_v51 = vmul.f32 %v25887_v25, %v19347_v61  ;;  %v19349_v38 = vadd.f32 %v19142_v41, %v18238_v45  ;;  %v12393_v39 = vpop.f32.mrb[147].mxu0 }
 0x838   : > { %14433 = vst.msk [vmem:[%s25071_s12 + $0x1ec] sm:$0xf] %vm14309_vm4, %v16095_v43  ;;  %v16096_v32 = vpack.c.bf16 %v13425_v62, %v13425_v62  ;;  %v13028_v60 = vmul.f32 %v25887_v25, %v19348_v55  ;;  %v19350_v24 = vadd.f32 %v12393_v39, %v7854_v52 }
 0x839   : > { %v13233_v11 = vadd.f32 %v25898_v15, %v13030_v51  ;;  %v13031_v19 = vmul.f32 %v25887_v25, %v19349_v38 }
 0x83a   : > { %14434 = vst.msk [vmem:[%s25071_s12 + $0x1f0] sm:$0xf] %vm14309_vm4, %v16096_v32  ;;  %v13231_v27 = vadd.f32 %v25898_v15, %v13028_v60  ;;  %v13029_v37 = vmul.f32 %v25887_v25, %v19350_v24  ;;  %v18241_v2 = vpop.f32.mrb[148].mxu1 }
 0x83b   : > { %v13429_v40 = vmax.f32 %v13233_v11, 0.0  ;;  %v13234_v3 = vadd.f32 %v25898_v15, %v13031_v19  ;;  %v7867_v5 = vpop.f32.mrb[149].mxu1 }
 0x83c   : > { %v13427_v13 = vmax.f32 %v13231_v27, 0.0  ;;  %v13232_v59 = vadd.f32 %v25898_v15, %v13029_v37  ;;  %v19145_v47 = vpop.f32.mrb[148].mxu0  ;;  %v18242_v8 = vpop.f32.mrb[150].mxu1 }
 0x83d   : > { %v16100_v7 = vpack.c.bf16 %v13429_v40, %v13429_v40  ;;  %v13430_v22 = vmax.f32 %v13234_v3, 0.0  ;;  %v19351_v48 = vadd.f32 %v19145_v47, %v18241_v2  ;;  %v12406_v35 = vpop.f32.mrb[149].mxu0  ;;  %v7870_v58 = vpop.f32.mrb[151].mxu1 }
 0x83e   : > { %v16098_v63 = vpack.c.bf16 %v13427_v13, %v13427_v13  ;;  %v13428_v18 = vmax.f32 %v13232_v59, 0.0  ;;  %v19352_v6 = vadd.f32 %v12406_v35, %v7867_v5  ;;  %v19146_v29 = vpop.f32.mrb[150].mxu0 }
 0x83f   : > { %14438 = vst.msk [vmem:[%s25071_s12 + $0x200] sm:$0xf] %vm14309_vm4, %v16100_v7  ;;  %v16101_v28 = vpack.c.bf16 %v13430_v22, %v13430_v22  ;;  %v13034_v56 = vmul.f32 %v25887_v25, %v19351_v48  ;;  %v12409_v53 = vpop.f32.mrb[151].mxu0 }
 0x840   : > { %14436 = vst.msk [vmem:[%s25071_s12 + $0x1f8] sm:$0xf] %vm14309_vm4, %v16098_v63  ;;  %v16099_v14 = vpack.c.bf16 %v13428_v18, %v13428_v18  ;;  %v13032_v21 = vmul.f32 %v25887_v25, %v19352_v6  ;;  %v19353_v17 = vadd.f32 %v12409_v53, %v7870_v58 }
 0x841   : > { %14439 = vst.msk [vmem:[%s25071_s12 + $0x204] sm:$0xf] %vm14309_vm4, %v16101_v28  ;;  %v13237_v31 = vadd.f32 %v25898_v15, %v13034_v56 }
 0x842   : > { %14437 = vst.msk [vmem:[%s25071_s12 + $0x1fc] sm:$0xf] %vm14309_vm4, %v16099_v14  ;;  %v13235_v54 = vadd.f32 %v25898_v15, %v13032_v21  ;;  %v13033_v42 = vmul.f32 %v25887_v25, %v19353_v17  ;;  %v18245_v12 = vpop.f32.mrb[152].mxu1 }
 0x843   : > { %v13433_v4 = vmax.f32 %v13237_v31, 0.0  ;;  %v7882_v49 = vpop.f32.mrb[153].mxu1 }
 0x844   : > { %v13431_v26 = vmax.f32 %v13235_v54, 0.0  ;;  %v13236_v30 = vadd.f32 %v25898_v15, %v13033_v42  ;;  %v19149_v9 = vpop.f32.mrb[152].mxu0  ;;  %v18246_v0 = vpop.f32.mrb[154].mxu1 }
 0x845   : > { %v16104_v33 = vpack.c.bf16 %v13433_v4, %v13433_v4  ;;  %v19354_v16 = vadd.f32 %v19149_v9, %v18245_v12  ;;  %v12421_v23 = vpop.f32.mrb[153].mxu0  ;;  %v7885_v34 = vpop.f32.mrb[155].mxu1 }
 0x846   : > { %v16102_v36 = vpack.c.bf16 %v13431_v26, %v13431_v26  ;;  %v13432_v20 = vmax.f32 %v13236_v30, 0.0  ;;  %v19355_v50 = vadd.f32 %v12421_v23, %v7882_v49  ;;  %v19150_v46 = vpop.f32.mrb[154].mxu0 }
 0x847   : > { %14442 = vst.msk [vmem:[%s25071_s12 + $0x210] sm:$0xf] %vm14309_vm4, %v16104_v33  ;;  %v13037_v10 = vmul.f32 %v25887_v25, %v19354_v16  ;;  %v19356_v44 = vadd.f32 %v19150_v46, %v18246_v0  ;;  %v12424_v45 = vpop.f32.mrb[155].mxu0 }
 0x848   : > { %14440 = vst.msk [vmem:[%s25071_s12 + $0x208] sm:$0xf] %vm14309_vm4, %v16102_v36  ;;  %v16103_v57 = vpack.c.bf16 %v13432_v20, %v13432_v20  ;;  %v13035_v61 = vmul.f32 %v25887_v25, %v19355_v50  ;;  %v19357_v1 = vadd.f32 %v12424_v45, %v7885_v34 }
 0x849   : > { %v13240_v52 = vadd.f32 %v25898_v15, %v13037_v10  ;;  %v13038_v43 = vmul.f32 %v25887_v25, %v19356_v44 }
 0x84a   : > { %14441 = vst.msk [vmem:[%s25071_s12 + $0x20c] sm:$0xf] %vm14309_vm4, %v16103_v57  ;;  %v13238_v62 = vadd.f32 %v25898_v15, %v13035_v61  ;;  %v13036_v55 = vmul.f32 %v25887_v25, %v19357_v1  ;;  %v18249_v41 = vpop.f32.mrb[156].mxu1 }
 0x84b   : > { %v13436_v51 = vmax.f32 %v13240_v52, 0.0  ;;  %v13241_v38 = vadd.f32 %v25898_v15, %v13038_v43  ;;  %v7898_v39 = vpop.f32.mrb[157].mxu1 }
 0x84c   : > { %v13434_v32 = vmax.f32 %v13238_v62, 0.0  ;;  %v13239_v60 = vadd.f32 %v25898_v15, %v13036_v55  ;;  %v19153_v24 = vpop.f32.mrb[156].mxu0  ;;  %v18250_v11 = vpop.f32.mrb[158].mxu1 }
 0x84d   : > { %v16107_v19 = vpack.c.bf16 %v13436_v51, %v13436_v51  ;;  %v13437_v27 = vmax.f32 %v13241_v38, 0.0  ;;  %v19358_v37 = vadd.f32 %v19153_v24, %v18249_v41  ;;  %v12437_v2 = vpop.f32.mrb[157].mxu0  ;;  %v7901_v40 = vpop.f32.mrb[159].mxu1 }
 0x84e   : > { %v16105_v3 = vpack.c.bf16 %v13434_v32, %v13434_v32  ;;  %v13435_v5 = vmax.f32 %v13239_v60, 0.0  ;;  %v19359_v13 = vadd.f32 %v12437_v2, %v7898_v39  ;;  %v19154_v59 = vpop.f32.mrb[158].mxu0 }
 0x84f   : > { %14445 = vst.msk [vmem:[%s25071_s12 + $0x21c] sm:$0xf] %vm14309_vm4, %v16107_v19  ;;  %v16108_v47 = vpack.c.bf16 %v13437_v27, %v13437_v27  ;;  %v13041_v8 = vmul.f32 %v25887_v25, %v19358_v37  ;;  %v12440_v7 = vpop.f32.mrb[159].mxu0 }
 0x850   : > { %14443 = vst.msk [vmem:[%s25071_s12 + $0x214] sm:$0xf] %vm14309_vm4, %v16105_v3  ;;  %v16106_v22 = vpack.c.bf16 %v13435_v5, %v13435_v5  ;;  %v13039_v48 = vmul.f32 %v25887_v25, %v19359_v13  ;;  %v19360_v35 = vadd.f32 %v12440_v7, %v7901_v40 }
 0x851   : > { %14446 = vst.msk [vmem:[%s25071_s12 + $0x220] sm:$0xf] %vm14309_vm4, %v16108_v47  ;;  %v13244_v58 = vadd.f32 %v25898_v15, %v13041_v8 }
 0x852   : > { %14444 = vst.msk [vmem:[%s25071_s12 + $0x218] sm:$0xf] %vm14309_vm4, %v16106_v22  ;;  %v13242_v63 = vadd.f32 %v25898_v15, %v13039_v48  ;;  %v13040_v18 = vmul.f32 %v25887_v25, %v19360_v35  ;;  %v18253_v6 = vpop.f32.mrb[160].mxu1 }
 0x853   : > { %v13440_v29 = vmax.f32 %v13244_v58, 0.0  ;;  %v7913_v28 = vpop.f32.mrb[161].mxu1 }
 0x854   : > { %v13438_v56 = vmax.f32 %v13242_v63, 0.0  ;;  %v13243_v53 = vadd.f32 %v25898_v15, %v13040_v18  ;;  %v19157_v14 = vpop.f32.mrb[160].mxu0  ;;  %v18254_v21 = vpop.f32.mrb[162].mxu1 }
 0x855   : > { %v16111_v17 = vpack.c.bf16 %v13440_v29, %v13440_v29  ;;  %v19361_v31 = vadd.f32 %v19157_v14, %v18253_v6  ;;  %v12452_v54 = vpop.f32.mrb[161].mxu0  ;;  %v7916_v42 = vpop.f32.mrb[163].mxu1 }
 0x856   : > { %v16109_v12 = vpack.c.bf16 %v13438_v56, %v13438_v56  ;;  %v13439_v4 = vmax.f32 %v13243_v53, 0.0  ;;  %v19362_v49 = vadd.f32 %v12452_v54, %v7913_v28  ;;  %v19158_v26 = vpop.f32.mrb[162].mxu0 }
 0x857   : > { %14449 = vst.msk [vmem:[%s25071_s12 + $0x22c] sm:$0xf] %vm14309_vm4, %v16111_v17  ;;  %v13044_v30 = vmul.f32 %v25887_v25, %v19361_v31  ;;  %v19363_v9 = vadd.f32 %v19158_v26, %v18254_v21  ;;  %v12455_v0 = vpop.f32.mrb[163].mxu0 }
 0x858   : > { %14447 = vst.msk [vmem:[%s25071_s12 + $0x224] sm:$0xf] %vm14309_vm4, %v16109_v12  ;;  %v16110_v33 = vpack.c.bf16 %v13439_v4, %v13439_v4  ;;  %v13042_v16 = vmul.f32 %v25887_v25, %v19362_v49  ;;  %v19364_v23 = vadd.f32 %v12455_v0, %v7916_v42 }
 0x859   : > { %v13247_v34 = vadd.f32 %v25898_v15, %v13044_v30  ;;  %v13045_v36 = vmul.f32 %v25887_v25, %v19363_v9 }
 0x85a   : > { %14448 = vst.msk [vmem:[%s25071_s12 + $0x228] sm:$0xf] %vm14309_vm4, %v16110_v33  ;;  %v13245_v20 = vadd.f32 %v25898_v15, %v13042_v16  ;;  %v13043_v50 = vmul.f32 %v25887_v25, %v19364_v23  ;;  %v18257_v46 = vpop.f32.mrb[164].mxu1 }
 0x85b   : > { %v13443_v10 = vmax.f32 %v13247_v34, 0.0  ;;  %v13248_v44 = vadd.f32 %v25898_v15, %v13045_v36  ;;  %v7929_v45 = vpop.f32.mrb[165].mxu1 }
 0x85c   : > { %v13441_v57 = vmax.f32 %v13245_v20, 0.0  ;;  %v13246_v61 = vadd.f32 %v25898_v15, %v13043_v50  ;;  %v19161_v1 = vpop.f32.mrb[164].mxu0  ;;  %v18258_v52 = vpop.f32.mrb[166].mxu1 }
 0x85d   : > { %v16114_v43 = vpack.c.bf16 %v13443_v10, %v13443_v10  ;;  %v13444_v62 = vmax.f32 %v13248_v44, 0.0  ;;  %v19365_v55 = vadd.f32 %v19161_v1, %v18257_v46  ;;  %v12468_v41 = vpop.f32.mrb[165].mxu0  ;;  %v7932_v51 = vpop.f32.mrb[167].mxu1 }
 0x85e   : > { %v16112_v38 = vpack.c.bf16 %v13441_v57, %v13441_v57  ;;  %v13442_v39 = vmax.f32 %v13246_v61, 0.0  ;;  %v19366_v32 = vadd.f32 %v12468_v41, %v7929_v45  ;;  %v19162_v60 = vpop.f32.mrb[166].mxu0 }
 0x85f   : > { %14452 = vst.msk [vmem:[%s25071_s12 + $0x238] sm:$0xf] %vm14309_vm4, %v16114_v43  ;;  %v16115_v24 = vpack.c.bf16 %v13444_v62, %v13444_v62  ;;  %v13048_v11 = vmul.f32 %v25887_v25, %v19365_v55  ;;  %v12471_v19 = vpop.f32.mrb[167].mxu0 }
 0x860   : > { %14450 = vst.msk [vmem:[%s25071_s12 + $0x230] sm:$0xf] %vm14309_vm4, %v16112_v38  ;;  %v16113_v27 = vpack.c.bf16 %v13442_v39, %v13442_v39  ;;  %v13046_v37 = vmul.f32 %v25887_v25, %v19366_v32  ;;  %v19367_v2 = vadd.f32 %v12471_v19, %v7932_v51 }
 0x861   : > { %14453 = vst.msk [vmem:[%s25071_s12 + $0x23c] sm:$0xf] %vm14309_vm4, %v16115_v24  ;;  %v13251_v40 = vadd.f32 %v25898_v15, %v13048_v11 }
 0x862   : > { %14451 = vst.msk [vmem:[%s25071_s12 + $0x234] sm:$0xf] %vm14309_vm4, %v16113_v27  ;;  %v13249_v3 = vadd.f32 %v25898_v15, %v13046_v37  ;;  %v13047_v5 = vmul.f32 %v25887_v25, %v19367_v2  ;;  %v18261_v13 = vpop.f32.mrb[168].mxu1 }
 0x863   : > { %v13447_v59 = vmax.f32 %v13251_v40, 0.0  ;;  %v7944_v47 = vpop.f32.mrb[169].mxu1 }
 0x864   : > { %v13445_v8 = vmax.f32 %v13249_v3, 0.0  ;;  %v13250_v7 = vadd.f32 %v25898_v15, %v13047_v5  ;;  %v19165_v22 = vpop.f32.mrb[168].mxu0  ;;  %v18262_v48 = vpop.f32.mrb[170].mxu1 }
 0x865   : > { %v16118_v35 = vpack.c.bf16 %v13447_v59, %v13447_v59  ;;  %v19368_v58 = vadd.f32 %v19165_v22, %v18261_v13  ;;  %v12483_v63 = vpop.f32.mrb[169].mxu0  ;;  %v7947_v18 = vpop.f32.mrb[171].mxu1 }
 0x866   : > { %v16116_v6 = vpack.c.bf16 %v13445_v8, %v13445_v8  ;;  %v13446_v29 = vmax.f32 %v13250_v7, 0.0  ;;  %v19369_v28 = vadd.f32 %v12483_v63, %v7944_v47  ;;  %v19166_v56 = vpop.f32.mrb[170].mxu0 }
 0x867   : > { %14456 = vst.msk [vmem:[%s25071_s12 + $0x248] sm:$0xf] %vm14309_vm4, %v16118_v35  ;;  %v13051_v53 = vmul.f32 %v25887_v25, %v19368_v58  ;;  %v19370_v14 = vadd.f32 %v19166_v56, %v18262_v48  ;;  %v12486_v21 = vpop.f32.mrb[171].mxu0 }
 0x868   : > { %14454 = vst.msk [vmem:[%s25071_s12 + $0x240] sm:$0xf] %vm14309_vm4, %v16116_v6  ;;  %v16117_v17 = vpack.c.bf16 %v13446_v29, %v13446_v29  ;;  %v13049_v31 = vmul.f32 %v25887_v25, %v19369_v28  ;;  %v19371_v54 = vadd.f32 %v12486_v21, %v7947_v18 }
 0x869   : > { %v13254_v42 = vadd.f32 %v25898_v15, %v13051_v53  ;;  %v13052_v12 = vmul.f32 %v25887_v25, %v19370_v14 }
 0x86a   : > { %14455 = vst.msk [vmem:[%s25071_s12 + $0x244] sm:$0xf] %vm14309_vm4, %v16117_v17  ;;  %v13252_v4 = vadd.f32 %v25898_v15, %v13049_v31  ;;  %v13050_v49 = vmul.f32 %v25887_v25, %v19371_v54  ;;  %v18265_v26 = vpop.f32.mrb[172].mxu1 }
 0x86b   : > { %v13450_v30 = vmax.f32 %v13254_v42, 0.0  ;;  %v13255_v9 = vadd.f32 %v25898_v15, %v13052_v12  ;;  %v7960_v0 = vpop.f32.mrb[173].mxu1 }
 0x86c   : > { %v13448_v33 = vmax.f32 %v13252_v4, 0.0  ;;  %v13253_v16 = vadd.f32 %v25898_v15, %v13050_v49  ;;  %v19169_v23 = vpop.f32.mrb[172].mxu0  ;;  %v18266_v34 = vpop.f32.mrb[174].mxu1 }
 0x86d   : > { %v16121_v36 = vpack.c.bf16 %v13450_v30, %v13450_v30  ;;  %v13451_v20 = vmax.f32 %v13255_v9, 0.0  ;;  %v19372_v50 = vadd.f32 %v19169_v23, %v18265_v26  ;;  %v12499_v46 = vpop.f32.mrb[173].mxu0  ;;  %v7963_v10 = vpop.f32.mrb[175].mxu1 }
 0x86e   : > { %v16119_v44 = vpack.c.bf16 %v13448_v33, %v13448_v33  ;;  %v13449_v45 = vmax.f32 %v13253_v16, 0.0  ;;  %v19373_v57 = vadd.f32 %v12499_v46, %v7960_v0  ;;  %v19170_v61 = vpop.f32.mrb[174].mxu0 }
 0x86f   : > { %14459 = vst.msk [vmem:[%s25071_s12 + $0x254] sm:$0xf] %vm14309_vm4, %v16121_v36  ;;  %v16122_v1 = vpack.c.bf16 %v13451_v20, %v13451_v20  ;;  %v13055_v52 = vmul.f32 %v25887_v25, %v19372_v50  ;;  %v12502_v43 = vpop.f32.mrb[175].mxu0 }
 0x870   : > { %14457 = vst.msk [vmem:[%s25071_s12 + $0x24c] sm:$0xf] %vm14309_vm4, %v16119_v44  ;;  %v16120_v62 = vpack.c.bf16 %v13449_v45, %v13449_v45  ;;  %v13053_v55 = vmul.f32 %v25887_v25, %v19373_v57  ;;  %v19374_v41 = vadd.f32 %v12502_v43, %v7963_v10 }
 0x871   : > { %14460 = vst.msk [vmem:[%s25071_s12 + $0x258] sm:$0xf] %vm14309_vm4, %v16122_v1  ;;  %v13258_v51 = vadd.f32 %v25898_v15, %v13055_v52 }
 0x872   : > { %14458 = vst.msk [vmem:[%s25071_s12 + $0x250] sm:$0xf] %vm14309_vm4, %v16120_v62  ;;  %v13256_v38 = vadd.f32 %v25898_v15, %v13053_v55  ;;  %v13054_v39 = vmul.f32 %v25887_v25, %v19374_v41  ;;  %v18269_v32 = vpop.f32.mrb[176].mxu1 }
 0x873   : > { %v13454_v60 = vmax.f32 %v13258_v51, 0.0  ;;  %v7975_v24 = vpop.f32.mrb[177].mxu1 }
 0x874   : > { %v13452_v11 = vmax.f32 %v13256_v38, 0.0  ;;  %v13257_v19 = vadd.f32 %v25898_v15, %v13054_v39  ;;  %v19173_v27 = vpop.f32.mrb[176].mxu0  ;;  %v18270_v37 = vpop.f32.mrb[178].mxu1 }
 0x875   : > { %v16125_v2 = vpack.c.bf16 %v13454_v60, %v13454_v60  ;;  %v19375_v40 = vadd.f32 %v19173_v27, %v18269_v32  ;;  %v12514_v3 = vpop.f32.mrb[177].mxu0  ;;  %v7978_v5 = vpop.f32.mrb[179].mxu1 }
 0x876   : > { %v16123_v13 = vpack.c.bf16 %v13452_v11, %v13452_v11  ;;  %v13453_v59 = vmax.f32 %v13257_v19, 0.0  ;;  %v19376_v47 = vadd.f32 %v12514_v3, %v7975_v24  ;;  %v19174_v8 = vpop.f32.mrb[178].mxu0 }
 0x877   : > { %14463 = vst.msk [vmem:[%s25071_s12 + $0x264] sm:$0xf] %vm14309_vm4, %v16125_v2  ;;  %v13058_v7 = vmul.f32 %v25887_v25, %v19375_v40  ;;  %v19377_v22 = vadd.f32 %v19174_v8, %v18270_v37  ;;  %v12517_v48 = vpop.f32.mrb[179].mxu0 }
 0x878   : > { %14461 = vst.msk [vmem:[%s25071_s12 + $0x25c] sm:$0xf] %vm14309_vm4, %v16123_v13  ;;  %v16124_v35 = vpack.c.bf16 %v13453_v59, %v13453_v59  ;;  %v13056_v58 = vmul.f32 %v25887_v25, %v19376_v47  ;;  %v19378_v63 = vadd.f32 %v12517_v48, %v7978_v5 }
 0x879   : > { %v13261_v18 = vadd.f32 %v25898_v15, %v13058_v7  ;;  %v13059_v6 = vmul.f32 %v25887_v25, %v19377_v22 }
 0x87a   : > { %14462 = vst.msk [vmem:[%s25071_s12 + $0x260] sm:$0xf] %vm14309_vm4, %v16124_v35  ;;  %v13259_v29 = vadd.f32 %v25898_v15, %v13056_v58  ;;  %v13057_v28 = vmul.f32 %v25887_v25, %v19378_v63  ;;  %v18273_v56 = vpop.f32.mrb[180].mxu1 }
 0x87b   : > { %v13457_v53 = vmax.f32 %v13261_v18, 0.0  ;;  %v13262_v14 = vadd.f32 %v25898_v15, %v13059_v6  ;;  %v7991_v21 = vpop.f32.mrb[181].mxu1 }
 0x87c   : > { %v13455_v17 = vmax.f32 %v13259_v29, 0.0  ;;  %v13260_v31 = vadd.f32 %v25898_v15, %v13057_v28  ;;  %v19177_v54 = vpop.f32.mrb[180].mxu0  ;;  %v18274_v42 = vpop.f32.mrb[182].mxu1 }
 0x87d   : > { %v16128_v12 = vpack.c.bf16 %v13457_v53, %v13457_v53  ;;  %v13458_v4 = vmax.f32 %v13262_v14, 0.0  ;;  %v19379_v49 = vadd.f32 %v19177_v54, %v18273_v56  ;;  %v12530_v26 = vpop.f32.mrb[181].mxu0  ;;  %v7994_v30 = vpop.f32.mrb[183].mxu1 }
 0x87e   : > { %v16126_v9 = vpack.c.bf16 %v13455_v17, %v13455_v17  ;;  %v13456_v0 = vmax.f32 %v13260_v31, 0.0  ;;  %v19380_v33 = vadd.f32 %v12530_v26, %v7991_v21  ;;  %v19178_v16 = vpop.f32.mrb[182].mxu0 }
 0x87f   : > { %14466 = vst.msk [vmem:[%s25071_s12 + $0x270] sm:$0xf] %vm14309_vm4, %v16128_v12  ;;  %v16129_v23 = vpack.c.bf16 %v13458_v4, %v13458_v4  ;;  %v13062_v34 = vmul.f32 %v25887_v25, %v19379_v49  ;;  %v12533_v36 = vpop.f32.mrb[183].mxu0 }
 0x880   : > { %14464 = vst.msk [vmem:[%s25071_s12 + $0x268] sm:$0xf] %vm14309_vm4, %v16126_v9  ;;  %v16127_v20 = vpack.c.bf16 %v13456_v0, %v13456_v0  ;;  %v13060_v50 = vmul.f32 %v25887_v25, %v19380_v33  ;;  %v19381_v46 = vadd.f32 %v12533_v36, %v7994_v30 }
 0x881   : > { %14467 = vst.msk [vmem:[%s25071_s12 + $0x274] sm:$0xf] %vm14309_vm4, %v16129_v23  ;;  %v13265_v10 = vadd.f32 %v25898_v15, %v13062_v34 }
 0x882   : > { %14465 = vst.msk [vmem:[%s25071_s12 + $0x26c] sm:$0xf] %vm14309_vm4, %v16127_v20  ;;  %v13263_v44 = vadd.f32 %v25898_v15, %v13060_v50  ;;  %v13061_v45 = vmul.f32 %v25887_v25, %v19381_v46  ;;  %v18277_v57 = vpop.f32.mrb[184].mxu1 }
 0x883   : > { %v13461_v61 = vmax.f32 %v13265_v10, 0.0  ;;  %v8006_v1 = vpop.f32.mrb[185].mxu1 }
 0x884   : > { %v13459_v52 = vmax.f32 %v13263_v44, 0.0  ;;  %v13264_v43 = vadd.f32 %v25898_v15, %v13061_v45  ;;  %v19181_v62 = vpop.f32.mrb[184].mxu0  ;;  %v18278_v55 = vpop.f32.mrb[186].mxu1 }
 0x885   : > { %v16132_v41 = vpack.c.bf16 %v13461_v61, %v13461_v61  ;;  %v19382_v51 = vadd.f32 %v19181_v62, %v18277_v57  ;;  %v12545_v38 = vpop.f32.mrb[185].mxu0  ;;  %v8009_v39 = vpop.f32.mrb[187].mxu1 }
 0x886   : > { %v16130_v32 = vpack.c.bf16 %v13459_v52, %v13459_v52  ;;  %v13460_v60 = vmax.f32 %v13264_v43, 0.0  ;;  %v19383_v24 = vadd.f32 %v12545_v38, %v8006_v1  ;;  %v19182_v11 = vpop.f32.mrb[186].mxu0 }
 0x887   : > { %14470 = vst.msk [vmem:[%s25071_s12 + $0x280] sm:$0xf] %vm14309_vm4, %v16132_v41  ;;  %v13065_v19 = vmul.f32 %v25887_v25, %v19382_v51  ;;  %v19384_v27 = vadd.f32 %v19182_v11, %v18278_v55  ;;  %v12548_v37 = vpop.f32.mrb[187].mxu0 }
 0x888   : > { %14468 = vst.msk [vmem:[%s25071_s12 + $0x278] sm:$0xf] %vm14309_vm4, %v16130_v32  ;;  %v16131_v2 = vpack.c.bf16 %v13460_v60, %v13460_v60  ;;  %v13063_v40 = vmul.f32 %v25887_v25, %v19383_v24  ;;  %v19385_v3 = vadd.f32 %v12548_v37, %v8009_v39 }
 0x889   : > { %v13268_v5 = vadd.f32 %v25898_v15, %v13065_v19  ;;  %v13066_v13 = vmul.f32 %v25887_v25, %v19384_v27 }
 0x88a   : > { %14469 = vst.msk [vmem:[%s25071_s12 + $0x27c] sm:$0xf] %vm14309_vm4, %v16131_v2  ;;  %v13266_v59 = vadd.f32 %v25898_v15, %v13063_v40  ;;  %v13064_v47 = vmul.f32 %v25887_v25, %v19385_v3  ;;  %v18281_v8 = vpop.f32.mrb[188].mxu1 }
 0x88b   : > { %v13464_v7 = vmax.f32 %v13268_v5, 0.0  ;;  %v13269_v22 = vadd.f32 %v25898_v15, %v13066_v13  ;;  %v8022_v48 = vpop.f32.mrb[189].mxu1 }
 0x88c   : > { %v13462_v35 = vmax.f32 %v13266_v59, 0.0  ;;  %v13267_v58 = vadd.f32 %v25898_v15, %v13064_v47  ;;  %v19185_v63 = vpop.f32.mrb[188].mxu0  ;;  %v18282_v18 = vpop.f32.mrb[190].mxu1 }
 0x88d   : > { %v16135_v6 = vpack.c.bf16 %v13464_v7, %v13464_v7  ;;  %v13465_v29 = vmax.f32 %v13269_v22, 0.0  ;;  %v19386_v28 = vadd.f32 %v19185_v63, %v18281_v8  ;;  %v12561_v56 = vpop.f32.mrb[189].mxu0  ;;  %v8025_v53 = vpop.f32.mrb[191].mxu1 }
 0x88e   : > { %v16133_v14 = vpack.c.bf16 %v13462_v35, %v13462_v35  ;;  %v13463_v21 = vmax.f32 %v13267_v58, 0.0  ;;  %v19387_v17 = vadd.f32 %v12561_v56, %v8022_v48  ;;  %v19186_v31 = vpop.f32.mrb[190].mxu0 }
 0x88f   : > { %14473 = vst.msk [vmem:[%s25071_s12 + $0x28c] sm:$0xf] %vm14309_vm4, %v16135_v6  ;;  %v16136_v54 = vpack.c.bf16 %v13465_v29, %v13465_v29  ;;  %v13069_v42 = vmul.f32 %v25887_v25, %v19386_v28  ;;  %v12564_v12 = vpop.f32.mrb[191].mxu0 }
 0x890   : > { %14471 = vst.msk [vmem:[%s25071_s12 + $0x284] sm:$0xf] %vm14309_vm4, %v16133_v14  ;;  %v16134_v4 = vpack.c.bf16 %v13463_v21, %v13463_v21  ;;  %v13067_v49 = vmul.f32 %v25887_v25, %v19387_v17  ;;  %v19388_v26 = vadd.f32 %v12564_v12, %v8025_v53 }
 0x891   : > { %14474 = vst.msk [vmem:[%s25071_s12 + $0x290] sm:$0xf] %vm14309_vm4, %v16136_v54  ;;  %v13272_v30 = vadd.f32 %v25898_v15, %v13069_v42 }
 0x892   : > { %14472 = vst.msk [vmem:[%s25071_s12 + $0x288] sm:$0xf] %vm14309_vm4, %v16134_v4  ;;  %v13270_v9 = vadd.f32 %v25898_v15, %v13067_v49  ;;  %v13068_v0 = vmul.f32 %v25887_v25, %v19388_v26  ;;  %v18285_v33 = vpop.f32.mrb[192].mxu1 }
 0x893   : > { %v13468_v16 = vmax.f32 %v13272_v30, 0.0  ;;  %v8037_v23 = vpop.f32.mrb[193].mxu1 }
 0x894   : > { %v13466_v34 = vmax.f32 %v13270_v9, 0.0  ;;  %v13271_v36 = vadd.f32 %v25898_v15, %v13068_v0  ;;  %v19189_v20 = vpop.f32.mrb[192].mxu0  ;;  %v18286_v50 = vpop.f32.mrb[194].mxu1 }
 0x895   : > { %v16139_v46 = vpack.c.bf16 %v13468_v16, %v13468_v16  ;;  %v19389_v10 = vadd.f32 %v19189_v20, %v18285_v33  ;;  %v12576_v44 = vpop.f32.mrb[193].mxu0  ;;  %v8040_v45 = vpop.f32.mrb[195].mxu1 }
 0x896   : > { %v16137_v57 = vpack.c.bf16 %v13466_v34, %v13466_v34  ;;  %v13467_v61 = vmax.f32 %v13271_v36, 0.0  ;;  %v19390_v1 = vadd.f32 %v12576_v44, %v8037_v23  ;;  %v19190_v52 = vpop.f32.mrb[194].mxu0 }
 0x897   : > { %14477 = vst.msk [vmem:[%s25071_s12 + $0x29c] sm:$0xf] %vm14309_vm4, %v16139_v46  ;;  %v13072_v43 = vmul.f32 %v25887_v25, %v19389_v10  ;;  %v19391_v62 = vadd.f32 %v19190_v52, %v18286_v50  ;;  %v12579_v55 = vpop.f32.mrb[195].mxu0 }
 0x898   : > { %14475 = vst.msk [vmem:[%s25071_s12 + $0x294] sm:$0xf] %vm14309_vm4, %v16137_v57  ;;  %v16138_v41 = vpack.c.bf16 %v13467_v61, %v13467_v61  ;;  %v13070_v51 = vmul.f32 %v25887_v25, %v19390_v1  ;;  %v19392_v38 = vadd.f32 %v12579_v55, %v8040_v45 }
 0x899   : > { %v13275_v39 = vadd.f32 %v25898_v15, %v13072_v43  ;;  %v13073_v32 = vmul.f32 %v25887_v25, %v19391_v62 }
 0x89a   : > { %14476 = vst.msk [vmem:[%s25071_s12 + $0x298] sm:$0xf] %vm14309_vm4, %v16138_v41  ;;  %v13273_v60 = vadd.f32 %v25898_v15, %v13070_v51  ;;  %v13071_v24 = vmul.f32 %v25887_v25, %v19392_v38  ;;  %v18289_v11 = vpop.f32.mrb[196].mxu1 }
 0x89b   : > { %v13471_v19 = vmax.f32 %v13275_v39, 0.0  ;;  %v13276_v27 = vadd.f32 %v25898_v15, %v13073_v32  ;;  %v8053_v37 = vpop.f32.mrb[197].mxu1 }
 0x89c   : > { %v13469_v2 = vmax.f32 %v13273_v60, 0.0  ;;  %v13274_v40 = vadd.f32 %v25898_v15, %v13071_v24  ;;  %v19193_v3 = vpop.f32.mrb[196].mxu0  ;;  %v18290_v5 = vpop.f32.mrb[198].mxu1 }
 0x89d   : > { %v16142_v13 = vpack.c.bf16 %v13471_v19, %v13471_v19  ;;  %v13472_v59 = vmax.f32 %v13276_v27, 0.0  ;;  %v19393_v47 = vadd.f32 %v19193_v3, %v18289_v11  ;;  %v12592_v8 = vpop.f32.mrb[197].mxu0  ;;  %v8056_v7 = vpop.f32.mrb[199].mxu1 }
 0x89e   : > { %v16140_v22 = vpack.c.bf16 %v13469_v2, %v13469_v2  ;;  %v13470_v48 = vmax.f32 %v13274_v40, 0.0  ;;  %v19394_v35 = vadd.f32 %v12592_v8, %v8053_v37  ;;  %v19194_v58 = vpop.f32.mrb[198].mxu0 }
 0x89f   : > { %14480 = vst.msk [vmem:[%s25071_s12 + $0x2a8] sm:$0xf] %vm14309_vm4, %v16142_v13  ;;  %v16143_v63 = vpack.c.bf16 %v13472_v59, %v13472_v59  ;;  %v13076_v18 = vmul.f32 %v25887_v25, %v19393_v47  ;;  %v12595_v6 = vpop.f32.mrb[199].mxu0 }
 0x8a0   : > { %14478 = vst.msk [vmem:[%s25071_s12 + $0x2a0] sm:$0xf] %vm14309_vm4, %v16140_v22  ;;  %v16141_v29 = vpack.c.bf16 %v13470_v48, %v13470_v48  ;;  %v13074_v28 = vmul.f32 %v25887_v25, %v19394_v35  ;;  %v19395_v56 = vadd.f32 %v12595_v6, %v8056_v7 }
 0x8a1   : > { %14481 = vst.msk [vmem:[%s25071_s12 + $0x2ac] sm:$0xf] %vm14309_vm4, %v16143_v63  ;;  %v13279_v53 = vadd.f32 %v25898_v15, %v13076_v18 }
 0x8a2   : > { %14479 = vst.msk [vmem:[%s25071_s12 + $0x2a4] sm:$0xf] %vm14309_vm4, %v16141_v29  ;;  %v13277_v14 = vadd.f32 %v25898_v15, %v13074_v28  ;;  %v13075_v21 = vmul.f32 %v25887_v25, %v19395_v56  ;;  %v18293_v17 = vpop.f32.mrb[200].mxu1 }
 0x8a3   : > { %v13475_v31 = vmax.f32 %v13279_v53, 0.0  ;;  %v8068_v54 = vpop.f32.mrb[201].mxu1 }
 0x8a4   : > { %v13473_v42 = vmax.f32 %v13277_v14, 0.0  ;;  %v13278_v12 = vadd.f32 %v25898_v15, %v13075_v21  ;;  %v19197_v4 = vpop.f32.mrb[200].mxu0  ;;  %v18294_v49 = vpop.f32.mrb[202].mxu1 }
 0x8a5   : > { %v16146_v26 = vpack.c.bf16 %v13475_v31, %v13475_v31  ;;  %v19396_v30 = vadd.f32 %v19197_v4, %v18293_v17  ;;  %v12607_v9 = vpop.f32.mrb[201].mxu0  ;;  %v8071_v0 = vpop.f32.mrb[203].mxu1 }
 0x8a6   : > { %v16144_v33 = vpack.c.bf16 %v13473_v42, %v13473_v42  ;;  %v13474_v16 = vmax.f32 %v13278_v12, 0.0  ;;  %v19397_v23 = vadd.f32 %v12607_v9, %v8068_v54  ;;  %v19198_v34 = vpop.f32.mrb[202].mxu0 }
 0x8a7   : > { %14484 = vst.msk [vmem:[%s25071_s12 + $0x2b8] sm:$0xf] %vm14309_vm4, %v16146_v26  ;;  %v13079_v36 = vmul.f32 %v25887_v25, %v19396_v30  ;;  %v19398_v20 = vadd.f32 %v19198_v34, %v18294_v49  ;;  %v12610_v50 = vpop.f32.mrb[203].mxu0 }
 0x8a8   : > { %14482 = vst.msk [vmem:[%s25071_s12 + $0x2b0] sm:$0xf] %vm14309_vm4, %v16144_v33  ;;  %v16145_v46 = vpack.c.bf16 %v13474_v16, %v13474_v16  ;;  %v13077_v10 = vmul.f32 %v25887_v25, %v19397_v23  ;;  %v19399_v44 = vadd.f32 %v12610_v50, %v8071_v0 }
 0x8a9   : > { %v13282_v45 = vadd.f32 %v25898_v15, %v13079_v36  ;;  %v13080_v57 = vmul.f32 %v25887_v25, %v19398_v20 }
 0x8aa   : > { %14483 = vst.msk [vmem:[%s25071_s12 + $0x2b4] sm:$0xf] %vm14309_vm4, %v16145_v46  ;;  %v13280_v61 = vadd.f32 %v25898_v15, %v13077_v10  ;;  %v13078_v1 = vmul.f32 %v25887_v25, %v19399_v44  ;;  %v18297_v52 = vpop.f32.mrb[204].mxu1 }
 0x8ab   : > { %v13478_v43 = vmax.f32 %v13282_v45, 0.0  ;;  %v13283_v62 = vadd.f32 %v25898_v15, %v13080_v57  ;;  %v8084_v55 = vpop.f32.mrb[205].mxu1 }
 0x8ac   : > { %v13476_v41 = vmax.f32 %v13280_v61, 0.0  ;;  %v13281_v51 = vadd.f32 %v25898_v15, %v13078_v1  ;;  %v19201_v38 = vpop.f32.mrb[204].mxu0  ;;  %v18298_v39 = vpop.f32.mrb[206].mxu1 }
 0x8ad   : > { %v16149_v32 = vpack.c.bf16 %v13478_v43, %v13478_v43  ;;  %v13479_v60 = vmax.f32 %v13283_v62, 0.0  ;;  %v19400_v24 = vadd.f32 %v19201_v38, %v18297_v52  ;;  %v12623_v11 = vpop.f32.mrb[205].mxu0  ;;  %v8087_v19 = vpop.f32.mrb[207].mxu1 }
 0x8ae   : > { %v16147_v27 = vpack.c.bf16 %v13476_v41, %v13476_v41  ;;  %v13477_v37 = vmax.f32 %v13281_v51, 0.0  ;;  %v19401_v2 = vadd.f32 %v12623_v11, %v8084_v55  ;;  %v19202_v40 = vpop.f32.mrb[206].mxu0  ;;  %v26160_v11 = vld [vmem:[%s26215_s4] ss:$0 sm:$0xff] }
 0x8af   : > { %14487 = vst.msk [vmem:[%s25071_s12 + $0x2c4] sm:$0xf] %vm14309_vm4, %v16149_v32  ;;  %v16150_v3 = vpack.c.bf16 %v13479_v60, %v13479_v60  ;;  %v13083_v5 = vmul.f32 %v25887_v25, %v19400_v24  ;;  %v12626_v13 = vpop.f32.mrb[207].mxu0 }
 0x8b0   : > { %14485 = vst.msk [vmem:[%s25071_s12 + $0x2bc] sm:$0xf] %vm14309_vm4, %v16147_v27  ;;  %v16148_v59 = vpack.c.bf16 %v13477_v37, %v13477_v37  ;;  %v13081_v47 = vmul.f32 %v25887_v25, %v19401_v2  ;;  %v19402_v8 = vadd.f32 %v12626_v13, %v8087_v19 }
 0x8b1   : > { %14488 = vst.msk [vmem:[%s25071_s12 + $0x2c8] sm:$0xf] %vm14309_vm4, %v16150_v3  ;;  %v13286_v7 = vadd.f32 %v25898_v15, %v13083_v5 }
 0x8b2   : > { %14486 = vst.msk [vmem:[%s25071_s12 + $0x2c0] sm:$0xf] %vm14309_vm4, %v16148_v59  ;;  %v13284_v22 = vadd.f32 %v25898_v15, %v13081_v47  ;;  %v13082_v48 = vmul.f32 %v25887_v25, %v19402_v8  ;;  %v18301_v35 = vpop.f32.mrb[208].mxu1 }
 0x8b3   : > { %v13482_v58 = vmax.f32 %v13286_v7, 0.0  ;;  %v8099_v63 = vpop.f32.mrb[209].mxu1 }
 0x8b4   : > { %v13480_v18 = vmax.f32 %v13284_v22, 0.0  ;;  %v13285_v6 = vadd.f32 %v25898_v15, %v13082_v48  ;;  %v19205_v29 = vpop.f32.mrb[208].mxu0  ;;  %v18302_v28 = vpop.f32.mrb[210].mxu1 }
 0x8b5   : > { %v16153_v56 = vpack.c.bf16 %v13482_v58, %v13482_v58  ;;  %v19403_v53 = vadd.f32 %v19205_v29, %v18301_v35  ;;  %v12638_v14 = vpop.f32.mrb[209].mxu0  ;;  %v8102_v21 = vpop.f32.mrb[211].mxu1 }
 0x8b6   : > { %v16151_v17 = vpack.c.bf16 %v13480_v18, %v13480_v18  ;;  %v13481_v31 = vmax.f32 %v13285_v6, 0.0  ;;  %v19404_v54 = vadd.f32 %v12638_v14, %v8099_v63  ;;  %v19206_v42 = vpop.f32.mrb[210].mxu0 }
 0x8b7   : > { %14491 = vst.msk [vmem:[%s25071_s12 + $0x2d4] sm:$0xf] %vm14309_vm4, %v16153_v56  ;;  %v13086_v12 = vmul.f32 %v25887_v25, %v19403_v53  ;;  %v19405_v4 = vadd.f32 %v19206_v42, %v18302_v28  ;;  %v12641_v49 = vpop.f32.mrb[211].mxu0 }
 0x8b8   : > { %14489 = vst.msk [vmem:[%s25071_s12 + $0x2cc] sm:$0xf] %vm14309_vm4, %v16151_v17  ;;  %v16152_v26 = vpack.c.bf16 %v13481_v31, %v13481_v31  ;;  %v13084_v30 = vmul.f32 %v25887_v25, %v19404_v54  ;;  %v19406_v9 = vadd.f32 %v12641_v49, %v8102_v21 }
 0x8b9   : > { %v13289_v0 = vadd.f32 %v25898_v15, %v13086_v12  ;;  %v13087_v33 = vmul.f32 %v25887_v25, %v19405_v4 }
 0x8ba   : > { %14490 = vst.msk [vmem:[%s25071_s12 + $0x2d0] sm:$0xf] %vm14309_vm4, %v16152_v26  ;;  %v13287_v16 = vadd.f32 %v25898_v15, %v13084_v30  ;;  %v13085_v23 = vmul.f32 %v25887_v25, %v19406_v9  ;;  %v18305_v34 = vpop.f32.mrb[212].mxu1 }
 0x8bb   : > { %v13485_v36 = vmax.f32 %v13289_v0, 0.0  ;;  %v13290_v20 = vadd.f32 %v25898_v15, %v13087_v33  ;;  %v8115_v50 = vpop.f32.mrb[213].mxu1 }
 0x8bc   : > { %v13483_v46 = vmax.f32 %v13287_v16, 0.0  ;;  %v13288_v10 = vadd.f32 %v25898_v15, %v13085_v23  ;;  %v19209_v44 = vpop.f32.mrb[212].mxu0  ;;  %v18306_v45 = vpop.f32.mrb[214].mxu1  ;;  %v26149_v15 = vld [vmem:[%s26214_s3] ss:$0 sm:$0xff] }
 0x8bd   : > { %v16156_v57 = vpack.c.bf16 %v13485_v36, %v13485_v36  ;;  %v13486_v61 = vmax.f32 %v13290_v20, 0.0  ;;  %v19407_v1 = vadd.f32 %v19209_v44, %v18305_v34  ;;  %v12654_v52 = vpop.f32.mrb[213].mxu0  ;;  %v8118_v43 = vpop.f32.mrb[215].mxu1 }
 0x8be   : > { %v16154_v62 = vpack.c.bf16 %v13483_v46, %v13483_v46  ;;  %v13484_v25 = vmax.f32 %v13288_v10, 0.0  ;;  %v19408_v55 = vadd.f32 %v12654_v52, %v8115_v50  ;;  %v19210_v41 = vpop.f32.mrb[214].mxu0 }
 0x8bf   : > { %14494 = vst.msk [vmem:[%s25071_s12 + $0x2e0] sm:$0xf] %vm14309_vm4, %v16156_v57  ;;  %v16157_v51 = vpack.c.bf16 %v13486_v61, %v13486_v61  ;;  %v13090_v38 = vmul.f32 %v26149_v15, %v19407_v1  ;;  %v12657_v39 = vpop.f32.mrb[215].mxu0 }
 0x8c0   : > { %14492 = vst.msk [vmem:[%s25071_s12 + $0x2d8] sm:$0xf] %vm14309_vm4, %v16154_v62  ;;  %v16155_v32 = vpack.c.bf16 %v13484_v25, %v13484_v25  ;;  %v13088_v60 = vmul.f32 %v26149_v15, %v19408_v55  ;;  %v19409_v24 = vadd.f32 %v12657_v39, %v8118_v43 }
 0x8c1   : > { %14495 = vst.msk [vmem:[%s25071_s12 + $0x2e4] sm:$0xf] %vm14309_vm4, %v16157_v51  ;;  %v13293_v19 = vadd.f32 %v26160_v11, %v13090_v38 }
 0x8c2   : > { %14493 = vst.msk [vmem:[%s25071_s12 + $0x2dc] sm:$0xf] %vm14309_vm4, %v16155_v32  ;;  %v13291_v27 = vadd.f32 %v26160_v11, %v13088_v60  ;;  %v13089_v37 = vmul.f32 %v26149_v15, %v19409_v24  ;;  %v18309_v2 = vpop.f32.mrb[216].mxu1 }
 0x8c3   : > { %v13489_v40 = vmax.f32 %v13293_v19, 0.0  ;;  %v8130_v3 = vpop.f32.mrb[217].mxu1 }
 0x8c4   : > { %v13487_v5 = vmax.f32 %v13291_v27, 0.0  ;;  %v13292_v13 = vadd.f32 %v26160_v11, %v13089_v37  ;;  %v19213_v59 = vpop.f32.mrb[216].mxu0  ;;  %v18310_v47 = vpop.f32.mrb[218].mxu1 }
 0x8c5   : > { %v16160_v8 = vpack.c.bf16 %v13489_v40, %v13489_v40  ;;  %v19410_v7 = vadd.f32 %v19213_v59, %v18309_v2  ;;  %v12669_v22 = vpop.f32.mrb[217].mxu0  ;;  %v8133_v48 = vpop.f32.mrb[219].mxu1 }
 0x8c6   : > { %v16158_v35 = vpack.c.bf16 %v13487_v5, %v13487_v5  ;;  %v13488_v58 = vmax.f32 %v13292_v13, 0.0  ;;  %v19411_v63 = vadd.f32 %v12669_v22, %v8130_v3  ;;  %v19214_v18 = vpop.f32.mrb[218].mxu0 }
 0x8c7   : > { %14498 = vst.msk [vmem:[%s25071_s12 + $0x2f0] sm:$0xf] %vm14309_vm4, %v16160_v8  ;;  %v13093_v6 = vmul.f32 %v26149_v15, %v19410_v7  ;;  %v19412_v29 = vadd.f32 %v19214_v18, %v18310_v47  ;;  %v12672_v28 = vpop.f32.mrb[219].mxu0 }
 0x8c8   : > { %14496 = vst.msk [vmem:[%s25071_s12 + $0x2e8] sm:$0xf] %vm14309_vm4, %v16158_v35  ;;  %v16159_v56 = vpack.c.bf16 %v13488_v58, %v13488_v58  ;;  %v13091_v53 = vmul.f32 %v26149_v15, %v19411_v63  ;;  %v19413_v14 = vadd.f32 %v12672_v28, %v8133_v48 }
 0x8c9   : > { %v13296_v21 = vadd.f32 %v26160_v11, %v13093_v6  ;;  %v13094_v17 = vmul.f32 %v26149_v15, %v19412_v29 }
 0x8ca   : > { %14497 = vst.msk [vmem:[%s25071_s12 + $0x2ec] sm:$0xf] %vm14309_vm4, %v16159_v56  ;;  %v13294_v31 = vadd.f32 %v26160_v11, %v13091_v53  ;;  %v13092_v54 = vmul.f32 %v26149_v15, %v19413_v14  ;;  %v18313_v42 = vpop.f32.mrb[220].mxu1 }
 0x8cb   : > { %v13492_v12 = vmax.f32 %v13296_v21, 0.0  ;;  %v13297_v4 = vadd.f32 %v26160_v11, %v13094_v17  ;;  %v8146_v49 = vpop.f32.mrb[221].mxu1 }
 0x8cc   : > { %v13490_v26 = vmax.f32 %v13294_v31, 0.0  ;;  %v13295_v30 = vadd.f32 %v26160_v11, %v13092_v54  ;;  %v19217_v9 = vpop.f32.mrb[220].mxu0  ;;  %v18314_v0 = vpop.f32.mrb[222].mxu1 }
 0x8cd   : > { %v16163_v33 = vpack.c.bf16 %v13492_v12, %v13492_v12  ;;  %v13493_v16 = vmax.f32 %v13297_v4, 0.0  ;;  %v19414_v23 = vadd.f32 %v19217_v9, %v18313_v42  ;;  %v12685_v34 = vpop.f32.mrb[221].mxu0  ;;  %v8149_v36 = vpop.f32.mrb[223].mxu1 }
 0x8ce   : > { %v16161_v20 = vpack.c.bf16 %v13490_v26, %v13490_v26  ;;  %v13491_v50 = vmax.f32 %v13295_v30, 0.0  ;;  %v19415_v46 = vadd.f32 %v12685_v34, %v8146_v49  ;;  %v19218_v10 = vpop.f32.mrb[222].mxu0 }
 0x8cf   : > { %14501 = vst.msk [vmem:[%s25071_s12 + $0x2fc] sm:$0xf] %vm14309_vm4, %v16163_v33  ;;  %v16164_v44 = vpack.c.bf16 %v13493_v16, %v13493_v16  ;;  %v13097_v45 = vmul.f32 %v26149_v15, %v19414_v23  ;;  %v12688_v57 = vpop.f32.mrb[223].mxu0 }
 0x8d0   : > { %14499 = vst.msk [vmem:[%s25071_s12 + $0x2f4] sm:$0xf] %vm14309_vm4, %v16161_v20  ;;  %v16162_v61 = vpack.c.bf16 %v13491_v50, %v13491_v50  ;;  %v13095_v1 = vmul.f32 %v26149_v15, %v19415_v46  ;;  %v19416_v52 = vadd.f32 %v12688_v57, %v8149_v36 }
 0x8d1   : > { %14502 = vst.msk [vmem:[%s25071_s12 + $0x300] sm:$0xf] %vm14309_vm4, %v16164_v44  ;;  %v13300_v43 = vadd.f32 %v26160_v11, %v13097_v45 }
 0x8d2   : > { %14500 = vst.msk [vmem:[%s25071_s12 + $0x2f8] sm:$0xf] %vm14309_vm4, %v16162_v61  ;;  %v13298_v62 = vadd.f32 %v26160_v11, %v13095_v1  ;;  %v13096_v25 = vmul.f32 %v26149_v15, %v19416_v52 }
 0x8d3   : > { %v13496_v55 = vmax.f32 %v13300_v43, 0.0 }
 0x8d4   : > { %v13494_v41 = vmax.f32 %v13298_v62, 0.0  ;;  %v13299_v51 = vadd.f32 %v26160_v11, %v13096_v25 }
 0x8d5   : > { %v16167_v38 = vpack.c.bf16 %v13496_v55, %v13496_v55 }
 0x8d6   : > { %v16165_v39 = vpack.c.bf16 %v13494_v41, %v13494_v41  ;;  %v13495_v32 = vmax.f32 %v13299_v51, 0.0 }
 0x8d7   : > { %14505 = vst.msk [vmem:[%s25071_s12 + $0x30c] sm:$0xf] %vm14309_vm4, %v16167_v38 }
 0x8d8   : > { %14503 = vst.msk [vmem:[%s25071_s12 + $0x304] sm:$0xf] %vm14309_vm4, %v16165_v39  ;;  %v16166_v60 = vpack.c.bf16 %v13495_v32, %v13495_v32 }
 0x8da   : > { %14504 = vst.msk [vmem:[%s25071_s12 + $0x308] sm:$0xf] %vm14309_vm4, %v16166_v60 }
 0x8db PF: > { %s15_s20 = sadd.s32 1, %s21400_s20   ;;  %s27553_s18 = smov %s21396_s19 }
 0x8dc   : > { %p12_p7 = scmp.ge.s32.totalorder %s15_s20, 4   ;;  %s27554_s19 = smov %s27556_s21 }
 0x8de   :  { %14 = sbr.rel (!%p12_p7) target bundleno = 2 (0x2), region = 81 }

</bundles_post_ra>
